<compile_context>
chip_gen: v5e
topology: v5e:2x2
jax: 0.10.0
libtpu: 0.0.40
codegen_flags: <defaults>
</compile_context>

<pallas_src>
import functools

import jax
import jax.numpy as jnp
from jax import lax
from jax.experimental import pallas as pl
from jax.experimental.pallas import tpu as pltpu


def _bottleneck_kernel(x_ref, w1_ref, b1_ref, w2_ref, b2_ref, w3_ref, b3_ref,
                       o_ref, pad_ref, *col_scratch,
                       Bt, H, W, Cmid, use_im2col):
    """Fused bottleneck block for a tile of Bt images (Mt = Bt*H*W rows).

    x_ref  : (Mt, Cin)       bf16  flattened NHWC rows (also the residual)
    w1_ref : (Cin, Cmid)     bf16  1x1 conv, BN scale folded into columns
    w2_ref : (9*Cmid, Cmid)  bf16  3x3 conv as im2col matrix, BN folded
    w3_ref : (Cmid, Cout)    bf16  1x1 conv, BN folded
    b*_ref : (1, C)          f32   folded BN biases
    o_ref  : (Mt, Cout)      bf16
    pad_ref: (Bt, H+2, W+2, Cmid) f32   zero-padded conv2 input scratch
    col_scratch: optionally ((Mt, 9*Cmid) bf16,) im2col patch matrix
    """
    Mt = Bt * H * W

    # ---- conv1: 1x1 conv (channel matmul) + folded BN bias + ReLU ----------
    # NOTE: x_ref is re-read at the residual add instead of being kept live in
    # vregs across the whole body (short live ranges, no spill churn).
    h1 = jnp.dot(x_ref[...], w1_ref[...], preferred_element_type=jnp.float32)
    h1 = jnp.maximum(h1 + b1_ref[...], 0.0)                     # (Mt, Cmid) f32
    h1b = h1.astype(jnp.bfloat16)                               # bf16 once

    # ---- conv2: 3x3, stride=1, padding=1 ------------------------------------
    # Write the interior of the padded scratch, zero only the 1-px halo
    # (interior is fully overwritten every step; no cross-iteration state).
    pad_ref[:, 1:H + 1, 1:W + 1, :] = h1.reshape(Bt, H, W, Cmid)
    zrow = jnp.zeros((Bt, 1, W + 2, Cmid), jnp.float32)
    zcol = jnp.zeros((Bt, H, 1, Cmid), jnp.float32)
    pad_ref[:, 0:1, :, :] = zrow
    pad_ref[:, H + 1:H + 2, :, :] = zrow
    # TODO(synk): the two column-halo writes below are sublane-strided masked
    # stores; replace with an in-register W-pad (sublane concat) once that
    # lowering is verified on the target toolchain.
    pad_ref[:, 1:H + 1, 0:1, :] = zcol
    pad_ref[:, 1:H + 1, W + 1:W + 2, :] = zcol

    def tap_bf16(t):
        dy, dx = divmod(t, 3)
        if t == 4:                  # centre tap: straight from h1, no pad trip
            return h1b
        return (pad_ref[:, dy:dy + H, dx:dx + W, :]
                .reshape(Mt, Cmid).astype(jnp.bfloat16))

    if use_im2col:
        # One deep (Mt, 9*Cmid) x (9*Cmid, Cmid) MXU matmul from bf16 scratch.
        col_ref = col_scratch[0]
        for t in range(9):
            col_ref[:, t * Cmid:(t + 1) * Cmid] = tap_bf16(t)
        h2 = jnp.dot(col_ref[...], w2_ref[...],
                     preferred_element_type=jnp.float32)        # (Mt, Cmid)
    else:
        # Nine accumulating dots straight from the padded windows: no col
        # scratch and no (Mt, 9*Cmid) write+read round-trip.
        h2 = jnp.dot(tap_bf16(0), w2_ref[0:Cmid, :],
                     preferred_element_type=jnp.float32)
        for t in range(1, 9):
            h2 = h2 + jnp.dot(tap_bf16(t), w2_ref[t * Cmid:(t + 1) * Cmid, :],
                              preferred_element_type=jnp.float32)
    h2 = jnp.maximum(h2 + b2_ref[...], 0.0)

    # ---- conv3: 1x1 conv + folded BN (no ReLU yet) --------------------------
    h3 = jnp.dot(h2.astype(jnp.bfloat16), w3_ref[...],
                 preferred_element_type=jnp.float32)            # (Mt, Cout)

    # ---- residual add + final ReLU (f32 math, bf16 store) -------------------
    res = x_ref[...].astype(jnp.float32)                        # re-read residual
    o_ref[...] = jnp.maximum(h3 + b3_ref[...] + res, 0.0).astype(o_ref.dtype)


def _fold_bn(gamma, beta, mean, var, eps=1e-5):
    scale = gamma / jnp.sqrt(var + eps)
    bias = beta - mean * scale
    return scale.reshape(1, -1), bias.reshape(1, -1)


def _vmem_capacity_bytes():
    """Per-core VMEM capacity; conservative 64 MiB (v7x) fallback."""
    try:
        cap = int(pltpu.get_tpu_info().vmem_capacity_bytes)
        if cap > 0:
            return cap
    except Exception:
        pass
    return 64 * 1024 * 1024


def _tile_footprint_bytes(bt, H, W, Cin, Cmid, Cout, use_im2col):
    mt = bt * H * W
    io = 2 * mt * Cin * 2 + 2 * mt * Cout * 2       # double-buffered bf16 in/out
    pad = bt * (H + 2) * (W + 2) * Cmid * 4         # f32 halo scratch
    col = mt * 9 * Cmid * 2 if use_im2col else 0    # bf16 im2col scratch
    wts = 2 * 2 * (Cin * Cmid + 9 * Cmid * Cmid + Cmid * Cout)  # dbl-buf bf16
    bias = 2 * 4 * (Cmid + Cmid + Cout)             # dbl-buf f32 biases
    return io + pad + col + wts + bias


def _pick_batch_tile(N, H, W, Cin, Cmid, Cout, use_im2col, budget_bytes,
                     min_rows=512):
    """Largest divisor of N whose per-step VMEM footprint fits the budget.

    Prefers keeping >= 2 grid steps (pipelining; lets a v7x megacore split the
    grid) unless that would starve the MXU of rows (Mt < min_rows).  Also
    enforces the (8,128) sublane rule on the M tile.
    """
    ok = [d for d in range(1, N + 1)
          if N % d == 0
          and ((d * H * W) % 8 == 0 or d == N)
          and _tile_footprint_bytes(d, H, W, Cin, Cmid, Cout,
                                    use_im2col) <= budget_bytes]
    if not ok:
        return 1
    multi = [d for d in ok if N // d >= 2]
    if multi and multi[-1] * H * W >= min_rows:
        return multi[-1]
    return ok[-1]


def res_block_nhwc(x_nhwc, params, *, batch_tile=None, conv2_mode="auto"):
    """Fused ResNet50 bottleneck on NHWC activations (bf16 I/O, no transposes).

    conv2_mode: "im2col" (one deep matmul via bf16 patch scratch),
                "acc" (nine accumulating dots, no col scratch), or "auto".
    """
    N, H, W, Cin = x_nhwc.shape
    Cmid = params["w1"].shape[0]          # out_channels
    Cout = params["w3"].shape[0]          # out_channels * 4
    assert Cin == Cout, "downsample=None requires in_channels == out_channels*4"

    if conv2_mode == "auto":
        conv2_mode = "im2col" if Cmid < 128 else "acc"
    use_im2col = conv2_mode == "im2col"

    vmem_cap = _vmem_capacity_bytes()
    if batch_tile is None:
        batch_tile = _pick_batch_tile(N, H, W, Cin, Cmid, Cout, use_im2col,
                                      budget_bytes=int(0.70 * vmem_cap))
    assert N % batch_tile == 0
    Mt = batch_tile * H * W
    assert Mt % 8 == 0 or batch_tile == N, (
        "sublane rule: Bt*H*W must be a multiple of 8 (or a single grid step)")

    # bf16 activation I/O: the block is HBM-bound at real shapes.
    x2d = x_nhwc.reshape(N * H * W, Cin).astype(jnp.bfloat16)

    # Fold inference BN: scale into the conv weight columns (exact), bias as a
    # per-channel f32 add inside the kernel.  Weights cast to bf16 once.
    s1, b1 = _fold_bn(params["g1"], params["be1"], params["m1"], params["v1"])
    s2, b2 = _fold_bn(params["g2"], params["be2"], params["m2"], params["v2"])
    s3, b3 = _fold_bn(params["g3"], params["be3"], params["m3"], params["v3"])
    w1 = (jnp.transpose(params["w1"][:, :, 0, 0], (1, 0)) * s1
          ).astype(jnp.bfloat16)                                 # (Cin, Cmid)
    w2 = (jnp.transpose(params["w2"], (2, 3, 1, 0)).reshape(9 * Cmid, Cmid)
          * s2).astype(jnp.bfloat16)                             # (9*Cmid, Cmid)
    w3 = (jnp.transpose(params["w3"][:, :, 0, 0], (1, 0)) * s3
          ).astype(jnp.bfloat16)                                 # (Cmid, Cout)

    kernel = functools.partial(_bottleneck_kernel, Bt=batch_tile, H=H, W=W,
                               Cmid=Cmid, use_im2col=use_im2col)

    def full(a):
        # Grid-invariant block: fetched once (constant index_map).
        # TODO(synk): single-buffer via pipeline_mode=pl.Buffered(1) to reclaim
        # the unused second buffer at large Cmid.
        return pl.BlockSpec(a.shape, lambda n, nd=a.ndim: (0,) * nd)

    scratch = [pltpu.VMEM((batch_tile, H + 2, W + 2, Cmid), jnp.float32)]
    if use_im2col:
        scratch.append(pltpu.VMEM((Mt, 9 * Cmid), jnp.bfloat16))

    out2d = pl.pallas_call(
        kernel,
        out_shape=jax.ShapeDtypeStruct((N * H * W, Cout), jnp.bfloat16),
        grid_spec=pltpu.PrefetchScalarGridSpec(
            num_scalar_prefetch=0,
            grid=(N // batch_tile,),
            in_specs=[
                pl.BlockSpec((Mt, Cin), lambda n: (n, 0)),
                full(w1), full(b1), full(w2), full(b2), full(w3), full(b3),
            ],
            out_specs=pl.BlockSpec((Mt, Cout), lambda n: (n, 0)),
            scratch_shapes=scratch,
        ),
        compiler_params=pltpu.CompilerParams(
            dimension_semantics=("parallel",),
            vmem_limit_bytes=min(int(0.90 * vmem_cap), 128 * 1024 * 1024),
        ),
    )(x2d, w1, b1, w2, b2, w3, b3)

    return out2d.reshape(N, H, W, Cout)


def res_block_forward(x_nchw, params, **kwargs):
    """NCHW adapter matching the PyTorch module's layout.

    The two transposes cost an extra HBM round-trip of the activations; in a
    real network keep activations NHWC end-to-end and call res_block_nhwc.
    """
    x_nhwc = jnp.transpose(x_nchw, (0, 2, 3, 1))
    out = res_block_nhwc(x_nhwc, params, **kwargs)
    return jnp.transpose(out, (0, 3, 1, 2))


def _reference_forward(x_nchw, params):
    """Pure-JAX reference (XLA convs, f32) for correctness checking."""
    x = jnp.transpose(x_nchw, (0, 2, 3, 1)).astype(jnp.float32)
    w1 = jnp.transpose(params["w1"][:, :, 0, 0], (1, 0))
    w2 = jnp.transpose(params["w2"], (2, 3, 1, 0))
    w3 = jnp.transpose(params["w3"][:, :, 0, 0], (1, 0))
    s1, b1 = _fold_bn(params["g1"], params["be1"], params["m1"], params["v1"])
    s2, b2 = _fold_bn(params["g2"], params["be2"], params["m2"], params["v2"])
    s3, b3 = _fold_bn(params["g3"], params["be3"], params["m3"], params["v3"])

    h1 = jnp.maximum(jnp.einsum("nhwc,cd->nhwd", x, w1,
                                precision=lax.Precision.HIGHEST) * s1 + b1, 0.0)
    h2 = lax.conv_general_dilated(
        h1, w2, window_strides=(1, 1), padding=((1, 1), (1, 1)),
        dimension_numbers=("NHWC", "HWIO", "NHWC"),
        precision=lax.Precision.HIGHEST)
    h2 = jnp.maximum(h2 * s2 + b2, 0.0)
    h3 = jnp.einsum("nhwc,cd->nhwd", h2, w3,
                    precision=lax.Precision.HIGHEST) * s3 + b3
    out = jnp.maximum(h3 + x, 0.0)
    return jnp.transpose(out, (0, 3, 1, 2))


def _make_params(key, in_channels, out_channels):
    exp = 4
    ks = jax.random.split(key, 12)
    f32 = jnp.float32
    return {
        "w1": 0.1 * jax.random.normal(ks[0], (out_channels, in_channels, 1, 1), f32),
        "w2": 0.1 * jax.random.normal(ks[1], (out_channels, out_channels, 3, 3), f32),
        "w3": 0.1 * jax.random.normal(ks[2], (out_channels * exp, out_channels, 1, 1), f32),
        "g1": 1.0 + 0.1 * jax.random.normal(ks[3], (out_channels,), f32),
        "be1": 0.1 * jax.random.normal(ks[4], (out_channels,), f32),
        "m1": 0.1 * jax.random.normal(ks[5], (out_channels,), f32),
        "v1": jnp.abs(1.0 + 0.1 * jax.random.normal(ks[6], (out_channels,), f32)),
        "g2": 1.0 + 0.1 * jax.random.normal(ks[7], (out_channels,), f32),
        "be2": 0.1 * jax.random.normal(ks[8], (out_channels,), f32),
        "m2": 0.1 * jax.random.normal(ks[9], (out_channels,), f32),
        "v2": jnp.abs(1.0 + 0.1 * jax.random.normal(ks[10], (out_channels,), f32)),
        "g3": 1.0 + 0.1 * jax.random.normal(ks[11], (out_channels * exp,), f32),
        "be3": jnp.zeros((out_channels * exp,), f32),
        "m3": jnp.zeros((out_channels * exp,), f32),
        "v3": jnp.ones((out_channels * exp,), f32),
    }


if __name__ == "__main__":
    key = jax.random.PRNGKey(0)
    k_x, k_p = jax.random.split(key)

    # ResBlock(in_channels=128, out_channels=32) with stride=1, downsample=None:
    # Cout = 128 keeps the output lane-dense while staying small.
    N, out_channels = 8, 32
    in_channels = out_channels * 4          # required for identity residual add
    H = W = 8

    x = jax.random.normal(k_x, (N, in_channels, H, W), jnp.float32)   # NCHW
    # Quantize the input once to bf16 so the f32 reference sees exactly the
    # same activations as the bf16-I/O kernel (isolates kernel numerics from
    # the intentional inference-precision choice on the input).
    x = x.astype(jnp.bfloat16).astype(jnp.float32)
    params = _make_params(k_p, in_channels, out_channels)

    ref = jax.block_until_ready(_reference_forward(x, params))

    for mode in ("im2col", "acc"):          # exercise both conv2 variants
        out = jax.block_until_ready(
            res_block_forward(x, params, conv2_mode=mode)).astype(jnp.float32)
        assert out.shape == (N, in_channels, H, W)
        max_diff = float(jnp.max(jnp.abs(out - ref)))
        assert jnp.allclose(out, ref, rtol=3e-2, atol=3e-2), (
            f"conv2_mode={mode}: max abs diff {max_diff}")
    print("KERNEL_OK")
</pallas_src>

<mosaic_0001>
module attributes {stable_mosaic.version = 11 : i64} {
  func.func @_bottleneck_kernel(%arg0: i32, %arg1: memref<512x128xbf16, #tpu.memory_space<vmem>>, %arg2: memref<128x32xbf16, #tpu.memory_space<vmem>>, %arg3: memref<1x32xf32, #tpu.memory_space<vmem>>, %arg4: memref<288x32xbf16, #tpu.memory_space<vmem>>, %arg5: memref<1x32xf32, #tpu.memory_space<vmem>>, %arg6: memref<32x128xbf16, #tpu.memory_space<vmem>>, %arg7: memref<1x128xf32, #tpu.memory_space<vmem>>, %arg8: memref<512x128xbf16, #tpu.memory_space<vmem>>, %arg9: memref<8x10x10x32xf32, #tpu.memory_space<vmem>>, %arg10: memref<512x288xbf16, #tpu.memory_space<vmem>>) attributes {dimension_semantics = [#tpu.dimension_semantics<parallel>], iteration_bounds = array<i64: 1>, scalar_prefetch = 0 : i64, scratch_operands = 2 : i64, tpu.core_type = #tpu.core_type<tc>, window_params = [{transform_indices = @transform_0, window_bounds = array<i64: 512, 128>}, {pipeline_mode = #tpu.pipeline_mode<synchronous>, transform_indices = @transform_1, window_bounds = array<i64: 128, 32>}, {pipeline_mode = #tpu.pipeline_mode<synchronous>, transform_indices = @transform_2, window_bounds = array<i64: 1, 32>}, {pipeline_mode = #tpu.pipeline_mode<synchronous>, transform_indices = @transform_3, window_bounds = array<i64: 288, 32>}, {pipeline_mode = #tpu.pipeline_mode<synchronous>, transform_indices = @transform_4, window_bounds = array<i64: 1, 32>}, {pipeline_mode = #tpu.pipeline_mode<synchronous>, transform_indices = @transform_5, window_bounds = array<i64: 32, 128>}, {pipeline_mode = #tpu.pipeline_mode<synchronous>, transform_indices = @transform_6, window_bounds = array<i64: 1, 128>}, {transform_indices = @transform_7, window_bounds = array<i64: 512, 128>}]} {
    %c0 = arith.constant 0 : index
    %c0_0 = arith.constant 0 : index
    %0 = vector.load %arg1[%c0, %c0_0] : memref<512x128xbf16, #tpu.memory_space<vmem>>, vector<512x128xbf16>
    %c0_1 = arith.constant 0 : index
    %c0_2 = arith.constant 0 : index
    %1 = vector.load %arg2[%c0_1, %c0_2] : memref<128x32xbf16, #tpu.memory_space<vmem>>, vector<128x32xbf16>
    %cst = arith.constant dense<0.000000e+00> : vector<512x32xf32>
    %2 = tpu.matmul %0, %1, %cst {dimension_numbers = #tpu.dot_dimension_numbers<[1], [0], [0], [1], [0, 0, 1, 1], [], []>} : vector<512x128xbf16>, vector<128x32xbf16>, vector<512x32xf32> -> vector<512x32xf32>
    %c0_3 = arith.constant 0 : index
    %c0_4 = arith.constant 0 : index
    %3 = vector.load %arg3[%c0_3, %c0_4] : memref<1x32xf32, #tpu.memory_space<vmem>>, vector<1x32xf32>
    %4 = vector.broadcast %3 : vector<1x32xf32> to vector<512x32xf32>
    %5 = arith.addf %2, %4 : vector<512x32xf32>
    %cst_5 = arith.constant 0.000000e+00 : f32
    %6 = vector.broadcast %cst_5 : f32 to vector<512x32xf32>
    %7 = arith.maximumf %5, %6 : vector<512x32xf32>
    %8 = arith.truncf %7 : vector<512x32xf32> to vector<512x32xbf16>
    %9 = vector.shape_cast %7 : vector<512x32xf32> to vector<8x8x8x32xf32>
    %c0_6 = arith.constant 0 : index
    %c1 = arith.constant 1 : index
    %c1_7 = arith.constant 1 : index
    %c0_8 = arith.constant 0 : index
    %10 = vector.load %arg9[%c0_6, %c1, %c1_7, %c0_8] : memref<8x10x10x32xf32, #tpu.memory_space<vmem>>, vector<8x8x8x32xf32>
    tpu.vector_store %arg9[%c0_6, %c1, %c1_7, %c0_8], %9 {strides = array<i32>} : memref<8x10x10x32xf32, #tpu.memory_space<vmem>>, vector<8x8x8x32xf32>,
    %cst_9 = arith.constant 0.000000e+00 : f32
    %11 = vector.broadcast %cst_9 : f32 to vector<8x1x10x32xf32>
    %cst_10 = arith.constant 0.000000e+00 : f32
    %12 = vector.broadcast %cst_10 : f32 to vector<8x8x1x32xf32>
    %c0_11 = arith.constant 0 : index
    %c0_12 = arith.constant 0 : index
    %c0_13 = arith.constant 0 : index
    %c0_14 = arith.constant 0 : index
    %13 = vector.load %arg9[%c0_11, %c0_12, %c0_13, %c0_14] : memref<8x10x10x32xf32, #tpu.memory_space<vmem>>, vector<8x1x10x32xf32>
    tpu.vector_store %arg9[%c0_11, %c0_12, %c0_13, %c0_14], %11 {strides = array<i32>} : memref<8x10x10x32xf32, #tpu.memory_space<vmem>>, vector<8x1x10x32xf32>,
    %c0_15 = arith.constant 0 : index
    %c9 = arith.constant 9 : index
    %c0_16 = arith.constant 0 : index
    %c0_17 = arith.constant 0 : index
    %14 = vector.load %arg9[%c0_15, %c9, %c0_16, %c0_17] : memref<8x10x10x32xf32, #tpu.memory_space<vmem>>, vector<8x1x10x32xf32>
    tpu.vector_store %arg9[%c0_15, %c9, %c0_16, %c0_17], %11 {strides = array<i32>} : memref<8x10x10x32xf32, #tpu.memory_space<vmem>>, vector<8x1x10x32xf32>,
    %c0_18 = arith.constant 0 : index
    %c1_19 = arith.constant 1 : index
    %c0_20 = arith.constant 0 : index
    %c0_21 = arith.constant 0 : index
    %15 = vector.load %arg9[%c0_18, %c1_19, %c0_20, %c0_21] : memref<8x10x10x32xf32, #tpu.memory_space<vmem>>, vector<8x8x1x32xf32>
    tpu.vector_store %arg9[%c0_18, %c1_19, %c0_20, %c0_21], %12 {strides = array<i32>} : memref<8x10x10x32xf32, #tpu.memory_space<vmem>>, vector<8x8x1x32xf32>,
    %c0_22 = arith.constant 0 : index
    %c1_23 = arith.constant 1 : index
    %c9_24 = arith.constant 9 : index
    %c0_25 = arith.constant 0 : index
    %16 = vector.load %arg9[%c0_22, %c1_23, %c9_24, %c0_25] : memref<8x10x10x32xf32, #tpu.memory_space<vmem>>, vector<8x8x1x32xf32>
    tpu.vector_store %arg9[%c0_22, %c1_23, %c9_24, %c0_25], %12 {strides = array<i32>} : memref<8x10x10x32xf32, #tpu.memory_space<vmem>>, vector<8x8x1x32xf32>,
    %c0_26 = arith.constant 0 : index
    %c0_27 = arith.constant 0 : index
    %c0_28 = arith.constant 0 : index
    %c0_29 = arith.constant 0 : index
    %17 = vector.load %arg9[%c0_26, %c0_27, %c0_28, %c0_29] : memref<8x10x10x32xf32, #tpu.memory_space<vmem>>, vector<8x8x8x32xf32>
    %18 = vector.shape_cast %17 : vector<8x8x8x32xf32> to vector<512x32xf32>
    %19 = arith.truncf %18 : vector<512x32xf32> to vector<512x32xbf16>
    %c0_30 = arith.constant 0 : index
    %c0_31 = arith.constant 0 : index
    %20 = vector.load %arg10[%c0_30, %c0_31] : memref<512x288xbf16, #tpu.memory_space<vmem>>, vector<512x32xbf16>
    tpu.vector_store %arg10[%c0_30, %c0_31], %19 {strides = array<i32>} : memref<512x288xbf16, #tpu.memory_space<vmem>>, vector<512x32xbf16>,
    %c0_32 = arith.constant 0 : index
    %c0_33 = arith.constant 0 : index
    %c1_34 = arith.constant 1 : index
    %c0_35 = arith.constant 0 : index
    %21 = vector.load %arg9[%c0_32, %c0_33, %c1_34, %c0_35] : memref<8x10x10x32xf32, #tpu.memory_space<vmem>>, vector<8x8x8x32xf32>
    %22 = vector.shape_cast %21 : vector<8x8x8x32xf32> to vector<512x32xf32>
    %23 = arith.truncf %22 : vector<512x32xf32> to vector<512x32xbf16>
    %c0_36 = arith.constant 0 : index
    %c32 = arith.constant 32 : index
    %24 = vector.load %arg10[%c0_36, %c32] : memref<512x288xbf16, #tpu.memory_space<vmem>>, vector<512x32xbf16>
    tpu.vector_store %arg10[%c0_36, %c32], %23 {strides = array<i32>} : memref<512x288xbf16, #tpu.memory_space<vmem>>, vector<512x32xbf16>,
    %c0_37 = arith.constant 0 : index
    %c0_38 = arith.constant 0 : index
    %c2 = arith.constant 2 : index
    %c0_39 = arith.constant 0 : index
    %25 = vector.load %arg9[%c0_37, %c0_38, %c2, %c0_39] : memref<8x10x10x32xf32, #tpu.memory_space<vmem>>, vector<8x8x8x32xf32>
    %26 = vector.shape_cast %25 : vector<8x8x8x32xf32> to vector<512x32xf32>
    %27 = arith.truncf %26 : vector<512x32xf32> to vector<512x32xbf16>
    %c0_40 = arith.constant 0 : index
    %c64 = arith.constant 64 : index
    %28 = vector.load %arg10[%c0_40, %c64] : memref<512x288xbf16, #tpu.memory_space<vmem>>, vector<512x32xbf16>
    tpu.vector_store %arg10[%c0_40, %c64], %27 {strides = array<i32>} : memref<512x288xbf16, #tpu.memory_space<vmem>>, vector<512x32xbf16>,
    %c0_41 = arith.constant 0 : index
    %c1_42 = arith.constant 1 : index
    %c0_43 = arith.constant 0 : index
    %c0_44 = arith.constant 0 : index
    %29 = vector.load %arg9[%c0_41, %c1_42, %c0_43, %c0_44] : memref<8x10x10x32xf32, #tpu.memory_space<vmem>>, vector<8x8x8x32xf32>
    %30 = vector.shape_cast %29 : vector<8x8x8x32xf32> to vector<512x32xf32>
    %31 = arith.truncf %30 : vector<512x32xf32> to vector<512x32xbf16>
    %c0_45 = arith.constant 0 : index
    %c96 = arith.constant 96 : index
    %32 = vector.load %arg10[%c0_45, %c96] : memref<512x288xbf16, #tpu.memory_space<vmem>>, vector<512x32xbf16>
    tpu.vector_store %arg10[%c0_45, %c96], %31 {strides = array<i32>} : memref<512x288xbf16, #tpu.memory_space<vmem>>, vector<512x32xbf16>,
    %c0_46 = arith.constant 0 : index
    %c128 = arith.constant 128 : index
    %33 = vector.load %arg10[%c0_46, %c128] : memref<512x288xbf16, #tpu.memory_space<vmem>>, vector<512x32xbf16>
    tpu.vector_store %arg10[%c0_46, %c128], %8 {strides = array<i32>} : memref<512x288xbf16, #tpu.memory_space<vmem>>, vector<512x32xbf16>,
    %c0_47 = arith.constant 0 : index
    %c1_48 = arith.constant 1 : index
    %c2_49 = arith.constant 2 : index
    %c0_50 = arith.constant 0 : index
    %34 = vector.load %arg9[%c0_47, %c1_48, %c2_49, %c0_50] : memref<8x10x10x32xf32, #tpu.memory_space<vmem>>, vector<8x8x8x32xf32>
    %35 = vector.shape_cast %34 : vector<8x8x8x32xf32> to vector<512x32xf32>
    %36 = arith.truncf %35 : vector<512x32xf32> to vector<512x32xbf16>
    %c0_51 = arith.constant 0 : index
    %c160 = arith.constant 160 : index
    %37 = vector.load %arg10[%c0_51, %c160] : memref<512x288xbf16, #tpu.memory_space<vmem>>, vector<512x32xbf16>
    tpu.vector_store %arg10[%c0_51, %c160], %36 {strides = array<i32>} : memref<512x288xbf16, #tpu.memory_space<vmem>>, vector<512x32xbf16>,
    %c0_52 = arith.constant 0 : index
    %c2_53 = arith.constant 2 : index
    %c0_54 = arith.constant 0 : index
    %c0_55 = arith.constant 0 : index
    %38 = vector.load %arg9[%c0_52, %c2_53, %c0_54, %c0_55] : memref<8x10x10x32xf32, #tpu.memory_space<vmem>>, vector<8x8x8x32xf32>
    %39 = vector.shape_cast %38 : vector<8x8x8x32xf32> to vector<512x32xf32>
    %40 = arith.truncf %39 : vector<512x32xf32> to vector<512x32xbf16>
    %c0_56 = arith.constant 0 : index
    %c192 = arith.constant 192 : index
    %41 = vector.load %arg10[%c0_56, %c192] : memref<512x288xbf16, #tpu.memory_space<vmem>>, vector<512x32xbf16>
    tpu.vector_store %arg10[%c0_56, %c192], %40 {strides = array<i32>} : memref<512x288xbf16, #tpu.memory_space<vmem>>, vector<512x32xbf16>,
    %c0_57 = arith.constant 0 : index
    %c2_58 = arith.constant 2 : index
    %c1_59 = arith.constant 1 : index
    %c0_60 = arith.constant 0 : index
    %42 = vector.load %arg9[%c0_57, %c2_58, %c1_59, %c0_60] : memref<8x10x10x32xf32, #tpu.memory_space<vmem>>, vector<8x8x8x32xf32>
    %43 = vector.shape_cast %42 : vector<8x8x8x32xf32> to vector<512x32xf32>
    %44 = arith.truncf %43 : vector<512x32xf32> to vector<512x32xbf16>
    %c0_61 = arith.constant 0 : index
    %c224 = arith.constant 224 : index
    %45 = vector.load %arg10[%c0_61, %c224] : memref<512x288xbf16, #tpu.memory_space<vmem>>, vector<512x32xbf16>
    tpu.vector_store %arg10[%c0_61, %c224], %44 {strides = array<i32>} : memref<512x288xbf16, #tpu.memory_space<vmem>>, vector<512x32xbf16>,
    %c0_62 = arith.constant 0 : index
    %c2_63 = arith.constant 2 : index
    %c2_64 = arith.constant 2 : index
    %c0_65 = arith.constant 0 : index
    %46 = vector.load %arg9[%c0_62, %c2_63, %c2_64, %c0_65] : memref<8x10x10x32xf32, #tpu.memory_space<vmem>>, vector<8x8x8x32xf32>
    %47 = vector.shape_cast %46 : vector<8x8x8x32xf32> to vector<512x32xf32>
    %48 = arith.truncf %47 : vector<512x32xf32> to vector<512x32xbf16>
    %c0_66 = arith.constant 0 : index
    %c256 = arith.constant 256 : index
    %49 = vector.load %arg10[%c0_66, %c256] : memref<512x288xbf16, #tpu.memory_space<vmem>>, vector<512x32xbf16>
    tpu.vector_store %arg10[%c0_66, %c256], %48 {strides = array<i32>} : memref<512x288xbf16, #tpu.memory_space<vmem>>, vector<512x32xbf16>,
    %c0_67 = arith.constant 0 : index
    %c0_68 = arith.constant 0 : index
    %50 = vector.load %arg10[%c0_67, %c0_68] : memref<512x288xbf16, #tpu.memory_space<vmem>>, vector<512x288xbf16>
    %c0_69 = arith.constant 0 : index
    %c0_70 = arith.constant 0 : index
    %51 = vector.load %arg4[%c0_69, %c0_70] : memref<288x32xbf16, #tpu.memory_space<vmem>>, vector<288x32xbf16>
    %cst_71 = arith.constant dense<0.000000e+00> : vector<512x32xf32>
    %52 = tpu.matmul %50, %51, %cst_71 {dimension_numbers = #tpu.dot_dimension_numbers<[1], [0], [0], [1], [0, 0, 1, 1], [], []>} : vector<512x288xbf16>, vector<288x32xbf16>, vector<512x32xf32> -> vector<512x32xf32>
    %c0_72 = arith.constant 0 : index
    %c0_73 = arith.constant 0 : index
    %53 = vector.load %arg5[%c0_72, %c0_73] : memref<1x32xf32, #tpu.memory_space<vmem>>, vector<1x32xf32>
    %54 = vector.broadcast %53 : vector<1x32xf32> to vector<512x32xf32>
    %55 = arith.addf %52, %54 : vector<512x32xf32>
    %cst_74 = arith.constant 0.000000e+00 : f32
    %56 = vector.broadcast %cst_74 : f32 to vector<512x32xf32>
    %57 = arith.maximumf %55, %56 : vector<512x32xf32>
    %58 = arith.truncf %57 : vector<512x32xf32> to vector<512x32xbf16>
    %c0_75 = arith.constant 0 : index
    %c0_76 = arith.constant 0 : index
    %59 = vector.load %arg6[%c0_75, %c0_76] : memref<32x128xbf16, #tpu.memory_space<vmem>>, vector<32x128xbf16>
    %cst_77 = arith.constant dense<0.000000e+00> : vector<512x128xf32>
    %60 = tpu.matmul %58, %59, %cst_77 {dimension_numbers = #tpu.dot_dimension_numbers<[1], [0], [0], [1], [0, 0, 1, 1], [], []>} : vector<512x32xbf16>, vector<32x128xbf16>, vector<512x128xf32> -> vector<512x128xf32>
    %c0_78 = arith.constant 0 : index
    %c0_79 = arith.constant 0 : index
    %61 = vector.load %arg1[%c0_78, %c0_79] : memref<512x128xbf16, #tpu.memory_space<vmem>>, vector<512x128xbf16>
    %62 = arith.extf %61 : vector<512x128xbf16> to vector<512x128xf32>
    %c0_80 = arith.constant 0 : index
    %c0_81 = arith.constant 0 : index
    %63 = vector.load %arg7[%c0_80, %c0_81] : memref<1x128xf32, #tpu.memory_space<vmem>>, vector<1x128xf32>
    %64 = vector.broadcast %63 : vector<1x128xf32> to vector<512x128xf32>
    %65 = arith.addf %60, %64 : vector<512x128xf32>
    %66 = arith.addf %65, %62 : vector<512x128xf32>
    %cst_82 = arith.constant 0.000000e+00 : f32
    %67 = vector.broadcast %cst_82 : f32 to vector<512x128xf32>
    %68 = arith.maximumf %66, %67 : vector<512x128xf32>
    %69 = arith.truncf %68 : vector<512x128xf32> to vector<512x128xbf16>
    %c0_83 = arith.constant 0 : index
    %c0_84 = arith.constant 0 : index
    %70 = vector.load %arg8[%c0_83, %c0_84] : memref<512x128xbf16, #tpu.memory_space<vmem>>, vector<512x128xbf16>
    tpu.vector_store %arg8[%c0_83, %c0_84], %69 {strides = array<i32>} : memref<512x128xbf16, #tpu.memory_space<vmem>>, vector<512x128xbf16>,
    return
  }
  func.func @transform_0(%arg0: i32) -> (i32, i32) {
    %c0_i32 = arith.constant 0 : i32
    %c0_i32_0 = arith.constant 0 : i32
    return %arg0, %c0_i32 : i32, i32
  }
  func.func @transform_1(%arg0: i32) -> (i32, i32) {
    %c0_i32 = arith.constant 0 : i32
    %c0_i32_0 = arith.constant 0 : i32
    %c0_i32_1 = arith.constant 0 : i32
    return %c0_i32, %c0_i32_0 : i32, i32
  }
  func.func @transform_2(%arg0: i32) -> (i32, i32) {
    %c0_i32 = arith.constant 0 : i32
    %c0_i32_0 = arith.constant 0 : i32
    %c0_i32_1 = arith.constant 0 : i32
    return %c0_i32, %c0_i32_0 : i32, i32
  }
  func.func @transform_3(%arg0: i32) -> (i32, i32) {
    %c0_i32 = arith.constant 0 : i32
    %c0_i32_0 = arith.constant 0 : i32
    %c0_i32_1 = arith.constant 0 : i32
    return %c0_i32, %c0_i32_0 : i32, i32
  }
  func.func @transform_4(%arg0: i32) -> (i32, i32) {
    %c0_i32 = arith.constant 0 : i32
    %c0_i32_0 = arith.constant 0 : i32
    %c0_i32_1 = arith.constant 0 : i32
    return %c0_i32, %c0_i32_0 : i32, i32
  }
  func.func @transform_5(%arg0: i32) -> (i32, i32) {
    %c0_i32 = arith.constant 0 : i32
    %c0_i32_0 = arith.constant 0 : i32
    %c0_i32_1 = arith.constant 0 : i32
    return %c0_i32, %c0_i32_0 : i32, i32
  }
  func.func @transform_6(%arg0: i32) -> (i32, i32) {
    %c0_i32 = arith.constant 0 : i32
    %c0_i32_0 = arith.constant 0 : i32
    %c0_i32_1 = arith.constant 0 : i32
    return %c0_i32, %c0_i32_0 : i32, i32
  }
  func.func @transform_7(%arg0: i32) -> (i32, i32) {
    %c0_i32 = arith.constant 0 : i32
    %c0_i32_0 = arith.constant 0 : i32
    return %arg0, %c0_i32 : i32, i32
  }
}

</mosaic_0001>

<bundles_post_ra>
// kernel: tpu_custom_call.1
= control target key start
LH: loop header
LB: loop body
LE: loop exit
PB: predicated region body
PF: predicated region fallthrough
CT: control target
= control target key end

     0   :  { %12 = vsyncpa [#allocation5], 0  ;;  %s10174_s0 = inlined_call_operand.hbm [shape: bf16[512,128], index: 0, kind: input, shape index: {}]   ;;  %s10175_s1 = inlined_call_operand.vmem [shape: bf16[128,32], index: 1, kind: input, shape index: {}]   ;;  %s10176_s2 = inlined_call_operand.vmem [shape: f32[1,32], index: 2, kind: input, shape index: {}]   ;;  %s10177_s3 = inlined_call_operand.vmem [shape: bf16[288,32], index: 3, kind: input, shape index: {}]   ;;  %s10178_s4 = inlined_call_operand.vmem [shape: f32[1,32], index: 4, kind: input, shape index: {}]   ;;  %s10179_s5 = inlined_call_operand.vmem [shape: bf16[32,128], index: 5, kind: input, shape index: {}]   ;;  %s10180_s6 = inlined_call_operand.vmem [shape: f32[1,128], index: 6, kind: input, shape index: {}]   ;;  %s10181_s7 = inlined_call_operand.hbm [shape: bf16[512,128], index: 7, kind: output, shape index: {}]  }
   0x1   :  { %13 = vsyncpa [#allocation6], 0  ;;  %s18_s26 = sshll.u32 %s10174_s0, 4  ;;  %s7462_s27 = smov [#allocation4]   ;;  %s19_s26 = int_to_ptr.hbm [resolvable:$true] %s18_s26 }
   0x2   :  { %s20_s28 = sshll.u32 %s7462_s27, 4  ;;  %s7463_s29 = smov 64   ;;  %s21_s28 = int_to_ptr.vmem [resolvable:$true] %s20_s28 }
   0x3   :  { %s7464_s30 = smov 4  }
   0x4   :  { %26 = dma.hbm_to_vmem [thread:$0]  %s19_s26, 4096, %s21_s28, [#allocation5], %s7463_s29, %s7463_s29, %s7464_s30  }
   0x5   :  { %7458 = dma.done.wait [#allocation5], 4096  }
   0x6   :  { %7459 = vsyncadd [#allocation5], 4294963200  ;;  %v6905_v0 = vld [vmem:[%s10175_s1 + $0x38] sm:$0xff]  ;;  %v6904_v1 = vld [vmem:[%s10175_s1 + $0x30] sm:$0xff]  ;;  %vm666_vm0 = vcmask 261120   ;;  %vm732_vm1 = vcmask 254976  }
   0x7   :  { %368 = vmatpush.bf16.msra.mxu0 %v6905_v0  ;;  %7372 = vmatpush.bf16.msra.mxu1 %v6905_v0  ;;  %v6903_v2 = vld [vmem:[%s10175_s1 + $0x28] sm:$0xff]  ;;  %v6902_v3 = vld [vmem:[%s10175_s1 + $0x20] sm:$0xff]  ;;  %v6901_v4 = vld [vmem:[%s10175_s1 + $0x18] sm:$0xff]  ;;  %v7465_v20 = vmov 0.0   ;;  %vm765_vm2 = vcmask 253952   ;;  %s7467_s23 = smov 96  }
   0x8   :  { %7373 = vmatpush.bf16.msra.mxu2 %v6905_v0  ;;  %v6900_v5 = vld [vmem:[%s10175_s1 + $0x10] sm:$0xff]  ;;  %v6899_v6 = vld [vmem:[%s10175_s1 + $0x8] sm:$0xff]  ;;  %v6898_v7 = vld [vmem:[%s10175_s1] sm:$0xff]  ;;  %731 = vst.msk [vmem:[#allocation2] sm:$0xff] %vm666_vm0, %v7465_v20  ;;  %s7466_s1 = smov 32   ;;  %vm1471_vm3 = vcmask 519424  }
   0x9   :  { %v6866_v8 = vld [vmem:[#allocation4] sm:$0xff]  ;;  %v6884_v9 = vld [vmem:[#allocation4 + $0x90] sm:$0xff]  ;;  %v6867_v11 = vld [vmem:[#allocation4 + $0x8] sm:$0xff]  ;;  %733 = vst.msk [vmem:[#allocation2 + $0x8] sm:$0x3] %vm732_vm1, %v7465_v20  ;;  %vm1022_vm4 = vcmask 257024  }
   0xa   :  { %v6892_v10 = vld [vmem:[#allocation4 + $0xd0] sm:$0xff]  ;;  %v6885_v12 = vld [vmem:[#allocation4 + $0x98] sm:$0xff]  ;;  %v6886_v15 = vld [vmem:[#allocation4 + $0xa0] sm:$0xff]  ;;  %734 = vst.msk [vmem:[#allocation2 + $0xa0] sm:$0xff] %vm666_vm0, %v7465_v20  ;;  %vm1920_vm5 = vcmask 781824   ;;  %vm2369_vm6 = vcmask 1044224  }
   0xb   :  { %369 = vmatpush.bf16.msra.mxu0 %v6904_v1  ;;  %7374 = vmatpush.bf16.msra.mxu1 %v6904_v1  ;;  %v6893_v13 = vld [vmem:[#allocation4 + $0xd8] sm:$0xff]  ;;  %v6868_v14 = vld [vmem:[#allocation4 + $0x10] sm:$0xff]  ;;  %v6894_v16 = vld [vmem:[#allocation4 + $0xe0] sm:$0xff]  ;;  %735 = vst.msk [vmem:[#allocation2 + $0xa8] sm:$0x3] %vm732_vm1, %v7465_v20 }
   0xc   :  { %7375 = vmatpush.bf16.msra.mxu2 %v6904_v1  ;;  %v6869_v17 = vld [vmem:[#allocation4 + $0x18] sm:$0xff]  ;;  %v6887_v18 = vld [vmem:[#allocation4 + $0xa8] sm:$0xff]  ;;  %736 = vst.msk [vmem:[#allocation2 + $0x140] sm:$0xff] %vm666_vm0, %v7465_v20  ;;  %v6870_v23 = vld [vmem:[#allocation4 + $0x20] sm:$0xff] }
   0xd   :  { %v6895_v19 = vld [vmem:[#allocation4 + $0xe8] sm:$0xff]  ;;  %737 = vst.msk [vmem:[#allocation2 + $0x148] sm:$0x3] %vm732_vm1, %v7465_v20  ;;  %v6888_v24 = vld [vmem:[#allocation4 + $0xb0] sm:$0xff]  ;;  %v6889_v36 = vld [vmem:[#allocation4 + $0xb8] sm:$0xff] }
   0xe   :  { %738 = vst.msk [vmem:[#allocation2 + $0x1e0] sm:$0xff] %vm666_vm0, %v7465_v20  ;;  %v6871_v35 = vld [vmem:[#allocation4 + $0x28] sm:$0xff]  ;;  %v6872_v49 = vld [vmem:[#allocation4 + $0x30] sm:$0xff]  ;;  %v6890_v50 = vld [vmem:[#allocation4 + $0xc0] sm:$0xff] }
   0xf   :  { %370 = vmatpush.bf16.msra.mxu0 %v6903_v2  ;;  %7376 = vmatpush.bf16.msra.mxu1 %v6903_v2  ;;  %739 = vst.msk [vmem:[#allocation2 + $0x1e8] sm:$0x3] %vm732_vm1, %v7465_v20  ;;  %v6896_v57 = vld [vmem:[#allocation4 + $0xf0] sm:$0xff]  ;;  %v6873_v58 = vld [vmem:[#allocation4 + $0x38] sm:$0xff]  ;;  %v6891_v59 = vld [vmem:[#allocation4 + $0xc8] sm:$0xff] }
  0x10   :  { %7377 = vmatpush.bf16.msra.mxu2 %v6903_v2  ;;  %v1087_v21 = vld [vmem:[#allocation2 + $0x1] sm:$0xff]  ;;  %740 = vst.msk [vmem:[#allocation2 + $0x280] sm:$0xff] %vm666_vm0, %v7465_v20  ;;  %v7667_v60 = vld [vmem:[%s10176_s2] ss:$0 sm:$0xff] }
  0x11   :  { %v1151_v22 = vpack.c.bf16 %v1087_v21, %v1087_v21  ;;  %741 = vst.msk [vmem:[#allocation2 + $0x288] sm:$0x3] %vm732_vm1, %v7465_v20  ;;  %v1536_v38 = vld [vmem:[#allocation2 + $0x2] sm:$0xff] }
  0x12   :  { %742 = vst.msk [vmem:[#allocation2 + $0x320] sm:$0xff] %vm666_vm0, %v7465_v20  ;;  %v1095_v27 = vld [vmem:[#allocation2 + $0xa1] sm:$0xff]  ;;  %v1600_v41 = vpack.c.bf16 %v1536_v38, %v1536_v38 }
  0x13   :  { %371 = vmatpush.bf16.msra.mxu0 %v6902_v3  ;;  %7378 = vmatpush.bf16.msra.mxu1 %v6902_v3  ;;  %743 = vst.msk [vmem:[#allocation2 + $0x328] sm:$0x3] %vm732_vm1, %v7465_v20  ;;  %v1159_v30 = vpack.c.bf16 %v1095_v27, %v1095_v27  ;;  %v1544_v39 = vld [vmem:[#allocation2 + $0xa2] sm:$0xff] }
  0x14   :  { %7379 = vmatpush.bf16.msra.mxu2 %v6902_v3  ;;  %1279 = vrot.lane.b32.xlu0 %v1151_v22, %s7466_s1  ;;  %744 = vst.msk [vmem:[#allocation2 + $0x3c0] sm:$0xff] %vm666_vm0, %v7465_v20  ;;  %v1103_v25 = vld [vmem:[#allocation2 + $0x141] sm:$0xff]  ;;  %v1608_v42 = vpack.c.bf16 %v1544_v39, %v1544_v39 }
  0x15   :  { %745 = vst.msk [vmem:[#allocation2 + $0x3c8] sm:$0x3] %vm732_vm1, %v7465_v20  ;;  %v1167_v28 = vpack.c.bf16 %v1103_v25, %v1103_v25  ;;  %1295 = vrot.lane.b32.xlu2 %v1159_v30, %s7466_s1  ;;  %v1552_v51 = vld [vmem:[#allocation2 + $0x142] sm:$0xff]  ;;  %v6897_v30 = vld [vmem:[#allocation4 + $0xf8] sm:$0xff] }
  0x16   :  { %746 = vst.msk [vmem:[#allocation2 + $0x460] sm:$0xff] %vm666_vm0, %v7465_v20  ;;  %v1111_v26 = vld [vmem:[#allocation2 + $0x1e1] sm:$0xff]  ;;  %v1616_v54 = vpack.c.bf16 %v1552_v51, %v1552_v51 }
  0x17   :  { %372 = vmatpush.bf16.msra.mxu0 %v6901_v4  ;;  %7380 = vmatpush.bf16.msra.mxu1 %v6901_v4  ;;  %747 = vst.msk [vmem:[#allocation2 + $0x468] sm:$0x3] %vm732_vm1, %v7465_v20  ;;  %v1175_v29 = vpack.c.bf16 %v1111_v26, %v1111_v26  ;;  %v1560_v44 = vld [vmem:[#allocation2 + $0x1e2] sm:$0xff] }
  0x18   :  { %7381 = vmatpush.bf16.msra.mxu2 %v6901_v4  ;;  %749 = vst.msk [vmem:[#allocation2 + $0x90] sm:$0xff] %vm666_vm0, %v7465_v20  ;;  %1311 = vrot.lane.b32.xlu1 %v1167_v28, %s7466_s1  ;;  %v1119_v37 = vld [vmem:[#allocation2 + $0x281] sm:$0xff]  ;;  %v1624_v47 = vpack.c.bf16 %v1560_v44, %v1560_v44 }
  0x19   :  { %750 = vst.msk [vmem:[#allocation2 + $0x98] sm:$0x3] %vm732_vm1, %v7465_v20  ;;  %v1183_v40 = vpack.c.bf16 %v1119_v37, %v1119_v37  ;;  %v1568_v45 = vld [vmem:[#allocation2 + $0x282] sm:$0xff]  ;;  %v6876_v37 = vld [vmem:[#allocation4 + $0x50] sm:$0xff] }
  0x1a   :  { %751 = vst.msk [vmem:[#allocation2 + $0x130] sm:$0xff] %vm666_vm0, %v7465_v20  ;;  %v1127_v31 = vld [vmem:[#allocation2 + $0x321] sm:$0xff]  ;;  %v1632_v48 = vpack.c.bf16 %v1568_v45, %v1568_v45 }
  0x1b   :  { %373 = vmatpush.bf16.msra.mxu0 %v6900_v5  ;;  %7382 = vmatpush.bf16.msra.mxu1 %v6900_v5  ;;  %752 = vst.msk [vmem:[#allocation2 + $0x138] sm:$0x3] %vm732_vm1, %v7465_v20  ;;  %v1191_v33 = vpack.c.bf16 %v1127_v31, %v1127_v31  ;;  %v6874_v61 = vld [vmem:[#allocation4 + $0x40] sm:$0xff]  ;;  %v6875_v22 = vld [vmem:[#allocation4 + $0x48] sm:$0xff] }
  0x1c   :  { %7383 = vmatpush.bf16.msra.mxu2 %v6900_v5  ;;  %1327 = vrot.lane.b32.xlu0 %v1175_v29, %s7466_s1  ;;  %753 = vst.msk [vmem:[#allocation2 + $0x1d0] sm:$0xff] %vm666_vm0, %v7465_v20  ;;  %v1135_v32 = vld [vmem:[#allocation2 + $0x3c1] sm:$0xff] }
  0x1d   :  { %754 = vst.msk [vmem:[#allocation2 + $0x1d8] sm:$0x3] %vm732_vm1, %v7465_v20  ;;  %v1199_v34 = vpack.c.bf16 %v1135_v32, %v1135_v32  ;;  %1343 = vrot.lane.b32.xlu2 %v1183_v40, %s7466_s1 }
  0x1e   :  { %755 = vst.msk [vmem:[#allocation2 + $0x270] sm:$0xff] %vm666_vm0, %v7465_v20  ;;  %v1143_v43 = vld [vmem:[#allocation2 + $0x461] sm:$0xff] }
  0x1f   :  { %374 = vmatpush.bf16.msra.mxu0 %v6899_v6  ;;  %7384 = vmatpush.bf16.msra.mxu1 %v6899_v6  ;;  %756 = vst.msk [vmem:[#allocation2 + $0x278] sm:$0x3] %vm732_vm1, %v7465_v20  ;;  %v1207_v46 = vpack.c.bf16 %v1143_v43, %v1143_v43  ;;  %v2954_v52 = vld [vmem:[#allocation2 + $0x90] sm:$0xff] }
  0x20   :  { %7385 = vmatpush.bf16.msra.mxu2 %v6899_v6  ;;  %757 = vst.msk [vmem:[#allocation2 + $0x310] sm:$0xff] %vm666_vm0, %v7465_v20  ;;  %1359 = vrot.lane.b32.xlu1 %v1191_v33, %s7466_s1  ;;  %v3402_v53 = vld [vmem:[#allocation2 + $0x91] sm:$0xff]  ;;  %v3018_v55 = vpack.c.bf16 %v2954_v52, %v2954_v52 }
  0x21   :  { %758 = vst.msk [vmem:[#allocation2 + $0x318] sm:$0x3] %vm732_vm1, %v7465_v20  ;;  %v3466_v56 = vpack.c.bf16 %v3402_v53, %v3402_v53  ;;  %v6877_v52 = vld [vmem:[#allocation4 + $0x58] sm:$0xff] }
  0x22   :  { %759 = vst.msk [vmem:[#allocation2 + $0x3b0] sm:$0xff] %vm666_vm0, %v7465_v20 }
  0x23   :  { %375 = vmatpush.bf16.msra.mxu0 %v6898_v7  ;;  %7386 = vmatpush.bf16.msra.mxu1 %v6898_v7  ;;  %760 = vst.msk [vmem:[#allocation2 + $0x3b8] sm:$0x3] %vm732_vm1, %v7465_v20 }
  0x24   :  { %7387 = vmatpush.bf16.msra.mxu2 %v6898_v7  ;;  %1375 = vrot.lane.b32.xlu0 %v1199_v34, %s7466_s1  ;;  %761 = vst.msk [vmem:[#allocation2 + $0x450] sm:$0xff] %vm666_vm0, %v7465_v20 }
  0x25   :  { %762 = vst.msk [vmem:[#allocation2 + $0x458] sm:$0x3] %vm732_vm1, %v7465_v20  ;;  %1391 = vrot.lane.b32.xlu2 %v1207_v46, %s7466_s1 }
  0x26   :  { %376 = vmatmul.bf16.vlgmr.msra.gmra.mxu0 %v6866_v8  ;;  %466 = vmatmul.bf16.vlgmr.msra.gmra.mxu1 %v6884_v9  ;;  %763 = vst.msk [vmem:[#allocation2 + $0x4f0] sm:$0xff] %vm666_vm0, %v7465_v20 }
  0x27   :  { %506 = vmatmul.bf16.vlgmr.msra.gmra.mxu2 %v6892_v10  ;;  %764 = vst.msk [vmem:[#allocation2 + $0x4f8] sm:$0x3] %vm732_vm1, %v7465_v20 }
  0x28   :  { %1728 = vrot.lane.b32.xlu1 %v1600_v41, %s7463_s29  ;;  %882 = vst.msk [vmem:[#allocation2 + $0x419] sm:$0x1] %vm765_vm2, %v7465_v20 }
  0x29   :  { %766 = vst.msk [vmem:[#allocation2 + $0x10] sm:$0x1] %vm765_vm2, %v7465_v20 }
  0x2a   :  { %767 = vst.msk [vmem:[#allocation2 + $0x20] sm:$0x1] %vm765_vm2, %v7465_v20 }
  0x2b   :  { %768 = vst.msk [vmem:[#allocation2 + $0x30] sm:$0x1] %vm765_vm2, %v7465_v20 }
  0x2c   :  { %1744 = vrot.lane.b32.xlu0 %v1608_v42, %s7463_s29  ;;  %769 = vst.msk [vmem:[#allocation2 + $0x40] sm:$0x1] %vm765_vm2, %v7465_v20 }
  0x2d   :  { %1760 = vrot.lane.b32.xlu2 %v1616_v54, %s7463_s29  ;;  %770 = vst.msk [vmem:[#allocation2 + $0x50] sm:$0x1] %vm765_vm2, %v7465_v20 }
  0x2e   :  { %771 = vst.msk [vmem:[#allocation2 + $0x60] sm:$0x1] %vm765_vm2, %v7465_v20 }
  0x2f   :  { %772 = vst.msk [vmem:[#allocation2 + $0x70] sm:$0x1] %vm765_vm2, %v7465_v20 }
  0x30   :  { %1776 = vrot.lane.b32.xlu1 %v1624_v47, %s7463_s29  ;;  %773 = vst.msk [vmem:[#allocation2 + $0x80] sm:$0x1] %vm765_vm2, %v7465_v20 }
  0x31   :  { %774 = vst.msk [vmem:[#allocation2 + $0xb0] sm:$0x1] %vm765_vm2, %v7465_v20 }
  0x32   :  { %775 = vst.msk [vmem:[#allocation2 + $0xc0] sm:$0x1] %vm765_vm2, %v7465_v20 }
  0x33   :  { %776 = vst.msk [vmem:[#allocation2 + $0xd0] sm:$0x1] %vm765_vm2, %v7465_v20 }
  0x34   :  { %1792 = vrot.lane.b32.xlu0 %v1632_v48, %s7463_s29  ;;  %777 = vst.msk [vmem:[#allocation2 + $0xe0] sm:$0x1] %vm765_vm2, %v7465_v20 }
  0x35   :  { %778 = vst.msk [vmem:[#allocation2 + $0xf0] sm:$0x1] %vm765_vm2, %v7465_v20 }
  0x36   :  { %381 = vmatmul.bf16.gmra.mxu0 %v6867_v11  ;;  %471 = vmatmul.bf16.gmra.mxu1 %v6885_v12  ;;  %779 = vst.msk [vmem:[#allocation2 + $0x100] sm:$0x1] %vm765_vm2, %v7465_v20 }
  0x37   :  { %511 = vmatmul.bf16.gmra.mxu2 %v6893_v13  ;;  %780 = vst.msk [vmem:[#allocation2 + $0x110] sm:$0x1] %vm765_vm2, %v7465_v20 }
  0x38   :  { %3153 = vrot.lane.b32.xlu1 %v3018_v55, %s7463_s29  ;;  %781 = vst.msk [vmem:[#allocation2 + $0x120] sm:$0x1] %vm765_vm2, %v7465_v20 }
  0x39   :  { %782 = vst.msk [vmem:[#allocation2 + $0x150] sm:$0x1] %vm765_vm2, %v7465_v20 }
  0x3a   :  { %783 = vst.msk [vmem:[#allocation2 + $0x160] sm:$0x1] %vm765_vm2, %v7465_v20 }
  0x3b   :  { %784 = vst.msk [vmem:[#allocation2 + $0x170] sm:$0x1] %vm765_vm2, %v7465_v20 }
  0x3c   :  { %3601 = vrot.lane.b32.xlu0 %v3466_v56, %s7467_s23  ;;  %785 = vst.msk [vmem:[#allocation2 + $0x180] sm:$0x1] %vm765_vm2, %v7465_v20 }
  0x3d   :  { %786 = vst.msk [vmem:[#allocation2 + $0x190] sm:$0x1] %vm765_vm2, %v7465_v20 }
  0x3e   :  { %787 = vst.msk [vmem:[#allocation2 + $0x1a0] sm:$0x1] %vm765_vm2, %v7465_v20 }
  0x3f   :  { %788 = vst.msk [vmem:[#allocation2 + $0x1b0] sm:$0x1] %vm765_vm2, %v7465_v20 }
  0x40   :  { %789 = vst.msk [vmem:[#allocation2 + $0x1c0] sm:$0x1] %vm765_vm2, %v7465_v20 }
  0x41   :  { %790 = vst.msk [vmem:[#allocation2 + $0x1f0] sm:$0x1] %vm765_vm2, %v7465_v20 }
  0x42   :  { %791 = vst.msk [vmem:[#allocation2 + $0x200] sm:$0x1] %vm765_vm2, %v7465_v20 }
  0x43   :  { %792 = vst.msk [vmem:[#allocation2 + $0x210] sm:$0x1] %vm765_vm2, %v7465_v20 }
  0x44   :  { %793 = vst.msk [vmem:[#allocation2 + $0x220] sm:$0x1] %vm765_vm2, %v7465_v20 }
  0x45   :  { %794 = vst.msk [vmem:[#allocation2 + $0x230] sm:$0x1] %vm765_vm2, %v7465_v20 }
  0x46   :  { %386 = vmatmul.bf16.gmra.mxu0 %v6868_v14  ;;  %476 = vmatmul.bf16.gmra.mxu1 %v6886_v15  ;;  %795 = vst.msk [vmem:[#allocation2 + $0x240] sm:$0x1] %vm765_vm2, %v7465_v20 }
  0x47   :  { %516 = vmatmul.bf16.gmra.mxu2 %v6894_v16  ;;  %796 = vst.msk [vmem:[#allocation2 + $0x250] sm:$0x1] %vm765_vm2, %v7465_v20 }
  0x48   :  { %797 = vst.msk [vmem:[#allocation2 + $0x260] sm:$0x1] %vm765_vm2, %v7465_v20 }
  0x49   :  { %798 = vst.msk [vmem:[#allocation2 + $0x290] sm:$0x1] %vm765_vm2, %v7465_v20 }
  0x4a   :  { %799 = vst.msk [vmem:[#allocation2 + $0x2a0] sm:$0x1] %vm765_vm2, %v7465_v20 }
  0x4b   :  { %800 = vst.msk [vmem:[#allocation2 + $0x2b0] sm:$0x1] %vm765_vm2, %v7465_v20 }
  0x4c   :  { %801 = vst.msk [vmem:[#allocation2 + $0x2c0] sm:$0x1] %vm765_vm2, %v7465_v20 }
  0x4d   :  { %802 = vst.msk [vmem:[#allocation2 + $0x2d0] sm:$0x1] %vm765_vm2, %v7465_v20 }
  0x4e   :  { %803 = vst.msk [vmem:[#allocation2 + $0x2e0] sm:$0x1] %vm765_vm2, %v7465_v20 }
  0x4f   :  { %804 = vst.msk [vmem:[#allocation2 + $0x2f0] sm:$0x1] %vm765_vm2, %v7465_v20 }
  0x50   :  { %805 = vst.msk [vmem:[#allocation2 + $0x300] sm:$0x1] %vm765_vm2, %v7465_v20 }
  0x51   :  { %806 = vst.msk [vmem:[#allocation2 + $0x330] sm:$0x1] %vm765_vm2, %v7465_v20 }
  0x52   :  { %807 = vst.msk [vmem:[#allocation2 + $0x340] sm:$0x1] %vm765_vm2, %v7465_v20 }
  0x53   :  { %808 = vst.msk [vmem:[#allocation2 + $0x350] sm:$0x1] %vm765_vm2, %v7465_v20 }
  0x54   :  { %809 = vst.msk [vmem:[#allocation2 + $0x360] sm:$0x1] %vm765_vm2, %v7465_v20 }
  0x55   :  { %810 = vst.msk [vmem:[#allocation2 + $0x370] sm:$0x1] %vm765_vm2, %v7465_v20 }
  0x56   :  { %391 = vmatmul.bf16.gmra.mxu0 %v6869_v17  ;;  %481 = vmatmul.bf16.gmra.mxu1 %v6887_v18  ;;  %811 = vst.msk [vmem:[#allocation2 + $0x380] sm:$0x1] %vm765_vm2, %v7465_v20 }
  0x57   :  { %521 = vmatmul.bf16.gmra.mxu2 %v6895_v19  ;;  %812 = vst.msk [vmem:[#allocation2 + $0x390] sm:$0x1] %vm765_vm2, %v7465_v20 }
  0x58   :  { %813 = vst.msk [vmem:[#allocation2 + $0x3a0] sm:$0x1] %vm765_vm2, %v7465_v20 }
  0x59   :  { %814 = vst.msk [vmem:[#allocation2 + $0x3d0] sm:$0x1] %vm765_vm2, %v7465_v20 }
  0x5a   :  { %815 = vst.msk [vmem:[#allocation2 + $0x3e0] sm:$0x1] %vm765_vm2, %v7465_v20 }
  0x5b   :  { %816 = vst.msk [vmem:[#allocation2 + $0x3f0] sm:$0x1] %vm765_vm2, %v7465_v20 }
  0x5c   :  { %817 = vst.msk [vmem:[#allocation2 + $0x400] sm:$0x1] %vm765_vm2, %v7465_v20 }
  0x5d   :  { %818 = vst.msk [vmem:[#allocation2 + $0x410] sm:$0x1] %vm765_vm2, %v7465_v20 }
  0x5e   :  { %819 = vst.msk [vmem:[#allocation2 + $0x420] sm:$0x1] %vm765_vm2, %v7465_v20 }
  0x5f   :  { %820 = vst.msk [vmem:[#allocation2 + $0x430] sm:$0x1] %vm765_vm2, %v7465_v20 }
  0x60   :  { %821 = vst.msk [vmem:[#allocation2 + $0x440] sm:$0x1] %vm765_vm2, %v7465_v20 }
  0x61   :  { %822 = vst.msk [vmem:[#allocation2 + $0x470] sm:$0x1] %vm765_vm2, %v7465_v20 }
  0x62   :  { %823 = vst.msk [vmem:[#allocation2 + $0x480] sm:$0x1] %vm765_vm2, %v7465_v20 }
  0x63   :  { %824 = vst.msk [vmem:[#allocation2 + $0x490] sm:$0x1] %vm765_vm2, %v7465_v20 }
  0x64   :  { %825 = vst.msk [vmem:[#allocation2 + $0x4a0] sm:$0x1] %vm765_vm2, %v7465_v20 }
  0x65   :  { %826 = vst.msk [vmem:[#allocation2 + $0x4b0] sm:$0x1] %vm765_vm2, %v7465_v20 }
  0x66   :  { %396 = vmatmul.bf16.gmra.mxu0 %v6870_v23  ;;  %486 = vmatmul.bf16.gmra.mxu1 %v6888_v24  ;;  %827 = vst.msk [vmem:[#allocation2 + $0x4c0] sm:$0x1] %vm765_vm2, %v7465_v20 }
  0x67   :  { %526 = vmatmul.bf16.gmra.mxu2 %v6896_v57  ;;  %828 = vst.msk [vmem:[#allocation2 + $0x4d0] sm:$0x1] %vm765_vm2, %v7465_v20 }
  0x68   :  { %829 = vst.msk [vmem:[#allocation2 + $0x4e0] sm:$0x1] %vm765_vm2, %v7465_v20 }
  0x69   :  { %830 = vst.msk [vmem:[#allocation2 + $0x19] sm:$0x1] %vm765_vm2, %v7465_v20 }
  0x6a   :  { %831 = vst.msk [vmem:[#allocation2 + $0x29] sm:$0x1] %vm765_vm2, %v7465_v20 }
  0x6b   :  { %832 = vst.msk [vmem:[#allocation2 + $0x39] sm:$0x1] %vm765_vm2, %v7465_v20 }
  0x6c   :  { %833 = vst.msk [vmem:[#allocation2 + $0x49] sm:$0x1] %vm765_vm2, %v7465_v20 }
  0x6d   :  { %834 = vst.msk [vmem:[#allocation2 + $0x59] sm:$0x1] %vm765_vm2, %v7465_v20 }
  0x6e   :  { %835 = vst.msk [vmem:[#allocation2 + $0x69] sm:$0x1] %vm765_vm2, %v7465_v20 }
  0x6f   :  { %836 = vst.msk [vmem:[#allocation2 + $0x79] sm:$0x1] %vm765_vm2, %v7465_v20 }
  0x70   :  { %837 = vst.msk [vmem:[#allocation2 + $0x89] sm:$0x1] %vm765_vm2, %v7465_v20 }
  0x71   :  { %838 = vst.msk [vmem:[#allocation2 + $0xb9] sm:$0x1] %vm765_vm2, %v7465_v20 }
  0x72   :  { %839 = vst.msk [vmem:[#allocation2 + $0xc9] sm:$0x1] %vm765_vm2, %v7465_v20 }
  0x73   :  { %840 = vst.msk [vmem:[#allocation2 + $0xd9] sm:$0x1] %vm765_vm2, %v7465_v20 }
  0x74   :  { %841 = vst.msk [vmem:[#allocation2 + $0xe9] sm:$0x1] %vm765_vm2, %v7465_v20 }
  0x75   :  { %842 = vst.msk [vmem:[#allocation2 + $0xf9] sm:$0x1] %vm765_vm2, %v7465_v20 }
  0x76   :  { %401 = vmatmul.bf16.gmra.mxu0 %v6871_v35  ;;  %491 = vmatmul.bf16.gmra.mxu1 %v6889_v36  ;;  %843 = vst.msk [vmem:[#allocation2 + $0x109] sm:$0x1] %vm765_vm2, %v7465_v20 }
  0x77   :  { %844 = vst.msk [vmem:[#allocation2 + $0x119] sm:$0x1] %vm765_vm2, %v7465_v20  ;;  %531 = vmatmul.bf16.gmra.mxu2 %v6897_v30 }
  0x78   :  { %845 = vst.msk [vmem:[#allocation2 + $0x129] sm:$0x1] %vm765_vm2, %v7465_v20 }
  0x79   :  { %846 = vst.msk [vmem:[#allocation2 + $0x159] sm:$0x1] %vm765_vm2, %v7465_v20 }
  0x7a   :  { %847 = vst.msk [vmem:[#allocation2 + $0x169] sm:$0x1] %vm765_vm2, %v7465_v20 }
  0x7b   :  { %848 = vst.msk [vmem:[#allocation2 + $0x179] sm:$0x1] %vm765_vm2, %v7465_v20 }
  0x7c   :  { %849 = vst.msk [vmem:[#allocation2 + $0x189] sm:$0x1] %vm765_vm2, %v7465_v20 }
  0x7d   :  { %850 = vst.msk [vmem:[#allocation2 + $0x199] sm:$0x1] %vm765_vm2, %v7465_v20 }
  0x7e   :  { %851 = vst.msk [vmem:[#allocation2 + $0x1a9] sm:$0x1] %vm765_vm2, %v7465_v20 }
  0x7f   :  { %852 = vst.msk [vmem:[#allocation2 + $0x1b9] sm:$0x1] %vm765_vm2, %v7465_v20 }
  0x80   :  { %853 = vst.msk [vmem:[#allocation2 + $0x1c9] sm:$0x1] %vm765_vm2, %v7465_v20 }
  0x81   :  { %854 = vst.msk [vmem:[#allocation2 + $0x1f9] sm:$0x1] %vm765_vm2, %v7465_v20 }
  0x82   :  { %855 = vst.msk [vmem:[#allocation2 + $0x209] sm:$0x1] %vm765_vm2, %v7465_v20 }
  0x83   :  { %856 = vst.msk [vmem:[#allocation2 + $0x219] sm:$0x1] %vm765_vm2, %v7465_v20 }
  0x84   :  { %857 = vst.msk [vmem:[#allocation2 + $0x229] sm:$0x1] %vm765_vm2, %v7465_v20 }
  0x85   :  { %858 = vst.msk [vmem:[#allocation2 + $0x239] sm:$0x1] %vm765_vm2, %v7465_v20 }
  0x86   :  { %406 = vmatmul.bf16.gmra.mxu0 %v6872_v49  ;;  %496 = vmatmul.bf16.gmra.mxu1 %v6890_v50  ;;  %859 = vst.msk [vmem:[#allocation2 + $0x249] sm:$0x1] %vm765_vm2, %v7465_v20 }
  0x87   :  { %860 = vst.msk [vmem:[#allocation2 + $0x259] sm:$0x1] %vm765_vm2, %v7465_v20 }
  0x88   :  { %861 = vst.msk [vmem:[#allocation2 + $0x269] sm:$0x1] %vm765_vm2, %v7465_v20 }
  0x89   :  { %862 = vst.msk [vmem:[#allocation2 + $0x299] sm:$0x1] %vm765_vm2, %v7465_v20 }
  0x8a   :  { %863 = vst.msk [vmem:[#allocation2 + $0x2a9] sm:$0x1] %vm765_vm2, %v7465_v20 }
  0x8b   :  { %864 = vst.msk [vmem:[#allocation2 + $0x2b9] sm:$0x1] %vm765_vm2, %v7465_v20 }
  0x8c   :  { %865 = vst.msk [vmem:[#allocation2 + $0x2c9] sm:$0x1] %vm765_vm2, %v7465_v20 }
  0x8d   :  { %866 = vst.msk [vmem:[#allocation2 + $0x2d9] sm:$0x1] %vm765_vm2, %v7465_v20 }
  0x8e   :  { %867 = vst.msk [vmem:[#allocation2 + $0x2e9] sm:$0x1] %vm765_vm2, %v7465_v20 }
  0x8f   :  { %868 = vst.msk [vmem:[#allocation2 + $0x2f9] sm:$0x1] %vm765_vm2, %v7465_v20 }
  0x90   :  { %869 = vst.msk [vmem:[#allocation2 + $0x309] sm:$0x1] %vm765_vm2, %v7465_v20 }
  0x91   :  { %870 = vst.msk [vmem:[#allocation2 + $0x339] sm:$0x1] %vm765_vm2, %v7465_v20 }
  0x92   :  { %871 = vst.msk [vmem:[#allocation2 + $0x349] sm:$0x1] %vm765_vm2, %v7465_v20 }
  0x93   :  { %872 = vst.msk [vmem:[#allocation2 + $0x359] sm:$0x1] %vm765_vm2, %v7465_v20 }
  0x94   :  { %873 = vst.msk [vmem:[#allocation2 + $0x369] sm:$0x1] %vm765_vm2, %v7465_v20 }
  0x95   :  { %874 = vst.msk [vmem:[#allocation2 + $0x379] sm:$0x1] %vm765_vm2, %v7465_v20 }
  0x96   :  { %411 = vmatmul.bf16.gmra.mxu0 %v6873_v58  ;;  %501 = vmatmul.bf16.gmra.mxu1 %v6891_v59  ;;  %875 = vst.msk [vmem:[#allocation2 + $0x389] sm:$0x1] %vm765_vm2, %v7465_v20 }
  0x97   :  { %876 = vst.msk [vmem:[#allocation2 + $0x399] sm:$0x1] %vm765_vm2, %v7465_v20 }
  0x98   :  { %877 = vst.msk [vmem:[#allocation2 + $0x3a9] sm:$0x1] %vm765_vm2, %v7465_v20 }
  0x99   :  { %878 = vst.msk [vmem:[#allocation2 + $0x3d9] sm:$0x1] %vm765_vm2, %v7465_v20 }
  0x9a   :  { %879 = vst.msk [vmem:[#allocation2 + $0x3e9] sm:$0x1] %vm765_vm2, %v7465_v20 }
  0x9b   :  { %880 = vst.msk [vmem:[#allocation2 + $0x3f9] sm:$0x1] %vm765_vm2, %v7465_v20 }
  0x9c   :  { %881 = vst.msk [vmem:[#allocation2 + $0x409] sm:$0x1] %vm765_vm2, %v7465_v20 }
  0x9d   :  { %883 = vst.msk [vmem:[#allocation2 + $0x429] sm:$0x1] %vm765_vm2, %v7465_v20 }
  0x9e   :  { %884 = vst.msk [vmem:[#allocation2 + $0x439] sm:$0x1] %vm765_vm2, %v7465_v20 }
  0x9f   :  { %885 = vst.msk [vmem:[#allocation2 + $0x449] sm:$0x1] %vm765_vm2, %v7465_v20 }
  0xa0   :  { %886 = vst.msk [vmem:[#allocation2 + $0x479] sm:$0x1] %vm765_vm2, %v7465_v20 }
  0xa1   :  { %887 = vst.msk [vmem:[#allocation2 + $0x489] sm:$0x1] %vm765_vm2, %v7465_v20 }
  0xa2   :  { %888 = vst.msk [vmem:[#allocation2 + $0x499] sm:$0x1] %vm765_vm2, %v7465_v20 }
  0xa3   :  { %v377_v62 = vpop.f32.mrf.mxu0  ;;  %v467_v63 = vpop.f32.mrf.mxu1  ;;  %889 = vst.msk [vmem:[#allocation2 + $0x4a9] sm:$0x1] %vm765_vm2, %v7465_v20 }
  0xa4   :  { %v378_v0 = vadd.f32 %v7667_v60, %v377_v62  ;;  %v468_v1 = vadd.f32 %v7667_v60, %v467_v63  ;;  %890 = vst.msk [vmem:[#allocation2 + $0x4b9] sm:$0x1] %vm765_vm2, %v7465_v20 }
  0xa5   :  { %891 = vst.msk [vmem:[#allocation2 + $0x4c9] sm:$0x1] %vm765_vm2, %v7465_v20 }
  0xa6   :  { %v7683_v2 = vmax.f32 %v378_v0, 0.0  ;;  %v7685_v3 = vmax.f32 %v468_v1, 0.0  ;;  %416 = vmatmul.bf16.gmra.mxu0 %v6874_v61  ;;  %892 = vst.msk [vmem:[#allocation2 + $0x4d9] sm:$0x1] %vm765_vm2, %v7465_v20 }
  0xa7   :  { %893 = vst.msk [vmem:[#allocation2 + $0x4e9] sm:$0x1] %vm765_vm2, %v7465_v20 }
  0xa8   :  { %667 = vst.msk [vmem:[#allocation2 + $0x11] sm:$0xff] %vm666_vm0, %v7683_v2 }
  0xa9   :  { %703 = vst.msk [vmem:[#allocation2 + $0x2d1] sm:$0xff] %vm666_vm0, %v7685_v3 }
  0xaa   :  { %v507_v4 = vpop.f32.mrf.mxu2 }
  0xab   :  { %v379_v5 = vpop.f32.mrf.mxu0  ;;  %v469_v6 = vpop.f32.mrf.mxu1  ;;  %v508_v7 = vadd.f32 %v7667_v60, %v507_v4 }
  0xac   :  { %v380_v8 = vadd.f32 %v7667_v60, %v379_v5  ;;  %v470_v9 = vadd.f32 %v7667_v60, %v469_v6 }
  0xad   :  { %v7704_v10 = vmax.f32 %v508_v7, 0.0 }
  0xae   :  { %v7708_v11 = vmax.f32 %v380_v8, 0.0  ;;  %v7710_v12 = vmax.f32 %v470_v9, 0.0 }
  0xaf   :  { %719 = vst.msk [vmem:[#allocation2 + $0x411] sm:$0xff] %vm666_vm0, %v7704_v10  ;;  %v1537_v14 = vld [vmem:[#allocation2 + $0x12] sm:$0xff] }
  0xb0   :  { %668 = vst.msk [vmem:[#allocation2 + $0x21] sm:$0xff] %vm666_vm0, %v7708_v11  ;;  %v1124_v13 = vld [vmem:[#allocation2 + $0x2d1] sm:$0xff]  ;;  %v1601_v17 = vpack.c.bf16 %v1537_v14, %v1537_v14 }
  0xb1   :  { %704 = vst.msk [vmem:[#allocation2 + $0x2e1] sm:$0xff] %vm666_vm0, %v7710_v12  ;;  %v1088_v15 = vld [vmem:[#allocation2 + $0x11] sm:$0xff]  ;;  %v1188_v16 = vpack.c.bf16 %v1124_v13, %v1124_v13 }
  0xb2   :  { %v1152_v18 = vpack.c.bf16 %v1088_v15, %v1088_v15  ;;  %1730 = vrot.lane.b32.xlu2 %v1601_v17, %s7463_s29  ;;  %v1985_v23 = vld [vmem:[#allocation2 + $0x10] sm:$0xff]  ;;  %v509_v39 = vpop.f32.mrf.mxu2 }
  0xb3   :  { %1353 = vrot.lane.b32.xlu1 %v1188_v16, %s7466_s1  ;;  %v7834_v19 = vpop.f32.mrf.mxu0  ;;  %v7838_v21 = vpop.f32.mrf.mxu1  ;;  %v7850_v25 = vpack.c.bf16 %v1985_v23, %v1985_v23  ;;  %v1573_v32 = vld [vmem:[#allocation2 + $0x2d2] sm:$0xff]  ;;  %v510_v48 = vadd.f32 %v7667_v60, %v509_v39 }
  0xb4   :  { %1281 = vrot.lane.b32.xlu0 %v1152_v18, %s7466_s1  ;;  %v1637_v35 = vpack.c.bf16 %v1573_v32, %v1573_v32  ;;  %v383_v46 = vadd.f32 %v7667_v60, %v7834_v19  ;;  %v473_v47 = vadd.f32 %v7667_v60, %v7838_v21 }
  0xb5   :  { %v7941_v61 = vmax.f32 %v510_v48, 0.0  ;;  %1024 = vst.msk [vmem:[#allocation3 + $0xc] sm:$0xf] %vm1022_vm4, %v7850_v25 }
  0xb6   :  { %421 = vmatmul.bf16.gmra.mxu0 %v6875_v22  ;;  %v1140_v40 = vld [vmem:[#allocation2 + $0x411] sm:$0xff]  ;;  %v7931_v53 = vmax.f32 %v383_v46, 0.0  ;;  %v7936_v57 = vmax.f32 %v473_v47, 0.0  ;;  %v1296_v46 = vpop.permute.xlu2 %1295  ;;  %v602_v47 = vpack.c.bf16 %v7708_v11, %v7708_v11 }
  0xb7   :  { %v1538_v24 = vld [vmem:[#allocation2 + $0x22] sm:$0xff]  ;;  %v1204_v41 = vpack.c.bf16 %v1140_v40, %v1140_v40  ;;  %720 = vst.msk [vmem:[#allocation2 + $0x421] sm:$0xff] %vm666_vm0, %v7941_v61 }
  0xb8   :  { %v7854_v26 = vpack.c.bf16 %v1538_v24, %v1538_v24  ;;  %v1089_v29 = vld [vmem:[#allocation2 + $0x21] sm:$0xff]  ;;  %669 = vst.msk [vmem:[#allocation2 + $0x31] sm:$0xff] %vm666_vm0, %v7931_v53 }
  0xb9   :  { %v7874_v31 = vpack.c.bf16 %v1089_v29, %v1089_v29  ;;  %v1574_v36 = vld [vmem:[#allocation2 + $0x2e2] sm:$0xff]  ;;  %705 = vst.msk [vmem:[#allocation2 + $0x2f1] sm:$0xff] %vm666_vm0, %v7936_v57 }
  0xba   :  { %v1638_v38 = vpack.c.bf16 %v1574_v36, %v1574_v36  ;;  %1802 = vrot.lane.b32.xlu2 %v1637_v35, %s7463_s29  ;;  %v2947_v42 = vld [vmem:[#allocation2 + $0x20] sm:$0xff]  ;;  %v512_v49 = vpop.f32.mrf.mxu2  ;;  %2435 = vst.msk [vmem:[#allocation3 + $0x10] sm:$0xf] %vm1022_vm4, %v602_v47 }
  0xbb   :  { %2690 = vrot.lane.b32.xlu1 %v1601_v17, %s7466_s1  ;;  %v384_v27 = vpop.f32.mrf.mxu0  ;;  %v474_v28 = vpop.f32.mrf.mxu1  ;;  %v7908_v45 = vpack.c.bf16 %v2947_v42, %v2947_v42  ;;  %v1125_v50 = vld [vmem:[#allocation2 + $0x2e1] sm:$0xff]  ;;  %v513_v58 = vadd.f32 %v7667_v60, %v512_v49  ;;  %v601_v42 = vpack.c.bf16 %v7683_v2, %v7683_v2  ;;  %v603_v2 = vpack.c.bf16 %v7931_v53, %v7931_v53 }
  0xbc   :  { %1732 = vrot.lane.b32.xlu0 %v7854_v26, %s7463_s29  ;;  %v385_v51 = vadd.f32 %v7667_v60, %v384_v27  ;;  %v475_v54 = vadd.f32 %v7667_v60, %v474_v28  ;;  %v1189_v59 = vpack.c.bf16 %v1125_v50, %v1125_v50  ;;  %v902_v29 = vld [vmem:[#allocation2 + $0xa0] sm:$0xff] }
  0xbd   :  { %v7957_v5 = vmax.f32 %v513_v58, 0.0  ;;  %v966_v35 = vpack.c.bf16 %v902_v29, %v902_v29  ;;  %2434 = vst.msk [vmem:[#allocation3 + $0x4] sm:$0xf] %vm1022_vm4, %v601_v42 }
  0xbe   :  { %v7946_v63 = vmax.f32 %v385_v51, 0.0  ;;  %v7952_v1 = vmax.f32 %v475_v54, 0.0  ;;  %v1141_v30 = vld [vmem:[#allocation2 + $0x421] sm:$0xff]  ;;  %2436 = vst.msk [vmem:[#allocation3 + $0x1c] sm:$0xf] %vm1022_vm4, %v603_v2 }
  0xbf   :  { %721 = vst.msk [vmem:[#allocation2 + $0x431] sm:$0xff] %vm666_vm0, %v7957_v5  ;;  %v1090_v23 = vld [vmem:[#allocation2 + $0x31] sm:$0xff] }
  0xc0   :  { %670 = vst.msk [vmem:[#allocation2 + $0x41] sm:$0xff] %vm666_vm0, %v7946_v63  ;;  %v7993_v27 = vpack.c.bf16 %v1090_v23, %v1090_v23  ;;  %v1126_v39 = vld [vmem:[#allocation2 + $0x2f1] sm:$0xff] }
  0xc1   :  { %706 = vst.msk [vmem:[#allocation2 + $0x301] sm:$0xff] %vm666_vm0, %v7952_v1  ;;  %v1190_v49 = vpack.c.bf16 %v1126_v39, %v1126_v39  ;;  %v2948_v53 = vld [vmem:[#allocation2 + $0x30] sm:$0xff] }
  0xc2   :  { %1385 = vrot.lane.b32.xlu2 %v1204_v41, %s7466_s1  ;;  %v514_v13 = vpop.f32.mrf.mxu2  ;;  %1031 = vst.msk [vmem:[#allocation3 + $0x60] sm:$0xf] %vm1022_vm4, %v966_v35  ;;  %v3894_v39 = vld [vmem:[#allocation2 + $0x412] sm:$0xff] }
  0xc3   :  { %2177 = vrot.lane.b32.xlu1 %v7850_v25, %s7467_s23  ;;  %v387_v33 = vpop.f32.mrf.mxu0  ;;  %v477_v34 = vpop.f32.mrf.mxu1  ;;  %v515_v22 = vadd.f32 %v7667_v60, %v514_v13  ;;  %1480 = vst.msk [vmem:[#allocation3 + $0x60] sm:$0xf] %vm1471_vm3, %v1296_v46 }
  0xc4   :  { %1804 = vrot.lane.b32.xlu0 %v1638_v38, %s7463_s29  ;;  %v388_v62 = vadd.f32 %v7667_v60, %v387_v33  ;;  %v478_v0 = vadd.f32 %v7667_v60, %v477_v34  ;;  %v6878_v34 = vld [vmem:[#allocation4 + $0x60] sm:$0xff]  ;;  %v1539_v38 = vld [vmem:[#allocation2 + $0x32] sm:$0xff] }
  0xc5   :  { %v8005_v33 = vmax.f32 %v515_v22, 0.0  ;;  %v1603_v48 = vpack.c.bf16 %v1539_v38, %v1539_v38  ;;  %v654_v22 = vpack.c.bf16 %v7941_v61, %v7941_v61  ;;  %v8117_v38 = vpop.permute.xlu0 %1279 }
  0xc6   :  { %426 = vmatmul.bf16.gmra.mxu0 %v6876_v37  ;;  %v7962_v6 = vmax.f32 %v388_v62, 0.0  ;;  %v7967_v8 = vmax.f32 %v478_v0, 0.0  ;;  %v3896_v46 = vld [vmem:[#allocation2 + $0x432] sm:$0xff] }
  0xc7   :  { %722 = vst.msk [vmem:[#allocation2 + $0x441] sm:$0xff] %vm666_vm0, %v8005_v33  ;;  %v656_v29 = vpack.c.bf16 %v8005_v33, %v8005_v33 }
  0xc8   :  { %671 = vst.msk [vmem:[#allocation2 + $0x51] sm:$0xff] %vm666_vm0, %v7962_v6  ;;  %v605_v11 = vpack.c.bf16 %v7962_v6, %v7962_v6  ;;  %v1142_v6 = vld [vmem:[#allocation2 + $0x431] sm:$0xff] }
  0xc9   :  { %707 = vst.msk [vmem:[#allocation2 + $0x331] sm:$0xff] %vm666_vm0, %v7967_v8 }
  0xca   :  { %1355 = vrot.lane.b32.xlu2 %v1189_v59, %s7466_s1  ;;  %2438 = vst.msk [vmem:[#allocation3 + $0x34] sm:$0xf] %vm1022_vm4, %v605_v11 }
  0xcb   :  { %1283 = vrot.lane.b32.xlu1 %v7874_v31, %s7466_s1  ;;  %v389_v43 = vpop.f32.mrf.mxu0  ;;  %v479_v44 = vpop.f32.mrf.mxu1  ;;  %2487 = vst.msk [vmem:[#allocation3 + $0x280] sm:$0xf] %vm1022_vm4, %v654_v22 }
  0xcc   :  { %3139 = vrot.lane.b32.xlu0 %v7908_v45, %s7463_s29  ;;  %v390_v4 = vadd.f32 %v7667_v60, %v389_v43  ;;  %v480_v20 = vadd.f32 %v7667_v60, %v479_v44  ;;  %2489 = vst.msk [vmem:[#allocation3 + $0x298] sm:$0xf] %vm1022_vm4, %v656_v29 }
  0xce   :  { %v7972_v14 = vmax.f32 %v390_v4, 0.0  ;;  %v7976_v17 = vmax.f32 %v480_v20, 0.0  ;;  %v1091_v4 = vld [vmem:[#allocation2 + $0x41] sm:$0xff] }
  0xcf   :  { %v8071_v13 = vpack.c.bf16 %v1091_v4, %v1091_v4  ;;  %v1541_v2 = vld [vmem:[#allocation2 + $0x52] sm:$0xff]  ;;  %v3897_v11 = vld [vmem:[#allocation2 + $0x442] sm:$0xff]  ;;  %v8146_v4 = vpop.permute.xlu0 %1327 }
  0xd0   :  { %672 = vst.msk [vmem:[#allocation2 + $0x61] sm:$0xff] %vm666_vm0, %v7972_v14  ;;  %v606_v50 = vpack.c.bf16 %v7972_v14, %v7972_v14  ;;  %v1206_v14 = vpack.c.bf16 %v1142_v6, %v1142_v6  ;;  %v926_v6 = vld [vmem:[#allocation2 + $0x280] sm:$0xff] }
  0xd1   :  { %708 = vst.msk [vmem:[#allocation2 + $0x341] sm:$0xff] %vm666_vm0, %v7976_v17 }
  0xd2   :  { %2692 = vrot.lane.b32.xlu2 %v7854_v26, %s7466_s1  ;;  %v1205_v26 = vpack.c.bf16 %v1141_v30, %v1141_v30  ;;  %2439 = vst.msk [vmem:[#allocation3 + $0x40] sm:$0xf] %vm1022_vm4, %v606_v50  ;;  %v8130_v50 = vpack.c.bf16 %v1541_v2, %v1541_v2 }
  0xd3   :  { %v392_v55 = vpop.f32.mrf.mxu0  ;;  %v482_v56 = vpop.f32.mrf.mxu1  ;;  %1285 = vrot.lane.b32.xlu1 %v7993_v27, %s7466_s1 }
  0xd4   :  { %v393_v7 = vadd.f32 %v7667_v60, %v392_v55  ;;  %v483_v9 = vadd.f32 %v7667_v60, %v482_v56  ;;  %1387 = vrot.lane.b32.xlu0 %v1205_v26, %s7466_s1 }
  0xd6   :  { %431 = vmatmul.bf16.gmra.mxu0 %v6877_v52  ;;  %v7982_v21 = vmax.f32 %v393_v7, 0.0  ;;  %v7989_v24 = vmax.f32 %v483_v9, 0.0  ;;  %v638_v7 = vpack.c.bf16 %v7710_v12, %v7710_v12  ;;  %v639_v9 = vpack.c.bf16 %v7936_v57, %v7936_v57 }
  0xd7   :  { %v641_v12 = vpack.c.bf16 %v7967_v8, %v7967_v8  ;;  %v642_v57 = vpack.c.bf16 %v7976_v17, %v7976_v17  ;;  %v2501_v8 = vld [vmem:[#allocation2 + $0x42] sm:$0xff] }
  0xd8   :  { %673 = vst.msk [vmem:[#allocation2 + $0x71] sm:$0xff] %vm666_vm0, %v7982_v21  ;;  %v607_v56 = vpack.c.bf16 %v7982_v21, %v7982_v21  ;;  %v3880_v21 = vld [vmem:[#allocation2 + $0x2f2] sm:$0xff] }
  0xd9   :  { %709 = vst.msk [vmem:[#allocation2 + $0x351] sm:$0xff] %vm666_vm0, %v7989_v24  ;;  %v3944_v61 = vpack.c.bf16 %v3880_v21, %v3880_v21 }
  0xda   :  { %3587 = vrot.lane.b32.xlu2 %v7874_v31, %s7467_s23  ;;  %v604_v31 = vpack.c.bf16 %v7946_v63, %v7946_v63  ;;  %v8054_v63 = vpack.c.bf16 %v2948_v53, %v2948_v53  ;;  %2440 = vst.msk [vmem:[#allocation3 + $0x4c] sm:$0xf] %vm1022_vm4, %v607_v56 }
  0xdb   :  { %v394_v15 = vpop.f32.mrf.mxu0  ;;  %v484_v16 = vpop.f32.mrf.mxu1  ;;  %1734 = vrot.lane.b32.xlu1 %v1603_v48, %s7463_s29  ;;  %2471 = vst.msk [vmem:[#allocation3 + $0x1c0] sm:$0xf] %vm1022_vm4, %v638_v7 }
  0xdc   :  { %v395_v18 = vadd.f32 %v7667_v60, %v394_v15  ;;  %v485_v19 = vadd.f32 %v7667_v60, %v484_v16  ;;  %1357 = vrot.lane.b32.xlu0 %v1190_v49, %s7466_s1  ;;  %2437 = vst.msk [vmem:[#allocation3 + $0x28] sm:$0xf] %vm1022_vm4, %v604_v31  ;;  %v643_v15 = vpack.c.bf16 %v7989_v24, %v7989_v24  ;;  %v6879_v24 = vld [vmem:[#allocation4 + $0x68] sm:$0xff] }
  0xdd   :  { %2472 = vst.msk [vmem:[#allocation3 + $0x1cc] sm:$0xf] %vm1022_vm4, %v639_v9  ;;  %v3958_v31 = vpack.c.bf16 %v3894_v39, %v3894_v39 }
  0xde   :  { %v7995_v28 = vmax.f32 %v395_v18, 0.0  ;;  %v7999_v32 = vmax.f32 %v485_v19, 0.0  ;;  %2474 = vst.msk [vmem:[#allocation3 + $0x1e4] sm:$0xf] %vm1022_vm4, %v641_v12  ;;  %v653_v18 = vpack.c.bf16 %v7704_v10, %v7704_v10  ;;  %v2565_v19 = vpack.c.bf16 %v2501_v8, %v2501_v8  ;;  %v3883_v10 = vld [vmem:[#allocation2 + $0x342] sm:$0xff] }
  0xdf   :  { %2475 = vst.msk [vmem:[#allocation3 + $0x1f0] sm:$0xf] %vm1022_vm4, %v642_v57  ;;  %v990_v57 = vpack.c.bf16 %v926_v6, %v926_v6 }
  0xe0   :  { %674 = vst.msk [vmem:[#allocation2 + $0x81] sm:$0xff] %vm666_vm0, %v7995_v28  ;;  %v608_v62 = vpack.c.bf16 %v7995_v28, %v7995_v28  ;;  %v655_v28 = vpack.c.bf16 %v7957_v5, %v7957_v5  ;;  %v3884_v30 = vld [vmem:[#allocation2 + $0x352] sm:$0xff]  ;;  %v2949_v5 = vld [vmem:[#allocation2 + $0x40] sm:$0xff] }
  0xe1   :  { %710 = vst.msk [vmem:[#allocation2 + $0x361] sm:$0xff] %vm666_vm0, %v7999_v32  ;;  %v3948_v33 = vpack.c.bf16 %v3884_v30, %v3884_v30  ;;  %v8122_v42 = vpack.c.bf16 %v2949_v5, %v2949_v5  ;;  %v8181_v30 = vpop.permute.xlu0 %1375 }
  0xe2   :  { %2179 = vrot.lane.b32.xlu2 %v7908_v45, %s7467_s23  ;;  %v637_v45 = vpack.c.bf16 %v7685_v3, %v7685_v3  ;;  %2441 = vst.msk [vmem:[#allocation3 + $0x58] sm:$0xf] %vm1022_vm4, %v608_v62  ;;  %v640_v3 = vpack.c.bf16 %v7952_v1, %v7952_v1  ;;  %v644_v1 = vpack.c.bf16 %v7999_v32, %v7999_v32 }
  0xe3   :  { %v397_v36 = vpop.f32.mrf.mxu0  ;;  %v487_v37 = vpop.f32.mrf.mxu1  ;;  %3141 = vrot.lane.b32.xlu1 %v8054_v63, %s7463_s29  ;;  %2476 = vst.msk [vmem:[#allocation3 + $0x1fc] sm:$0xf] %vm1022_vm4, %v643_v15  ;;  %v1092_v15 = vld [vmem:[#allocation2 + $0x51] sm:$0xff] }
  0xe4   :  { %v398_v40 = vadd.f32 %v7667_v60, %v397_v36  ;;  %v488_v41 = vadd.f32 %v7667_v60, %v487_v37  ;;  %3589 = vrot.lane.b32.xlu0 %v7993_v27, %s7467_s23  ;;  %2470 = vst.msk [vmem:[#allocation3 + $0x1b4] sm:$0xf] %vm1022_vm4, %v637_v45  ;;  %v3881_v27 = vld [vmem:[#allocation2 + $0x302] sm:$0xff]  ;;  %v517_v36 = vpop.f32.mrf.mxu2 }
  0xe5   :  { %2473 = vst.msk [vmem:[#allocation3 + $0x1d8] sm:$0xf] %vm1022_vm4, %v640_v3  ;;  %v3945_v32 = vpack.c.bf16 %v3881_v27, %v3881_v27  ;;  %v894_v3 = vld [vmem:[#allocation2] sm:$0xff] }
  0xe6   :  { %v545_v43 = vmax.f32 %v398_v40, 0.0  ;;  %v8022_v44 = vmax.f32 %v488_v41, 0.0  ;;  %436 = vmatmul.bf16.gmra.mxu0 %v6878_v34  ;;  %2477 = vst.msk [vmem:[#allocation3 + $0x208] sm:$0xf] %vm1022_vm4, %v644_v1  ;;  %v3947_v34 = vpack.c.bf16 %v3883_v10, %v3883_v10  ;;  %v8120_v41 = vpop.permute.xlu2 %1343  ;;  %v2950_v1 = vld [vmem:[#allocation2 + $0x50] sm:$0xff] }
  0xe7   :  { %2486 = vst.msk [vmem:[#allocation3 + $0x274] sm:$0xf] %vm1022_vm4, %v653_v18  ;;  %v8163_v18 = vpack.c.bf16 %v2950_v1, %v2950_v1  ;;  %v1128_v10 = vld [vmem:[#allocation2 + $0x331] sm:$0xff] }
  0xe8   :  { %675 = vst.msk [vmem:[#allocation2 + $0xb1] sm:$0xff] %vm666_vm0, %v545_v43  ;;  %v609_v0 = vpack.c.bf16 %v545_v43, %v545_v43  ;;  %v645_v16 = vpack.c.bf16 %v8022_v44, %v8022_v44  ;;  %v3885_v26 = vld [vmem:[#allocation2 + $0x362] sm:$0xff]  ;;  %v6881_v1 = vld [vmem:[#allocation4 + $0x78] sm:$0xff] }
  0xe9   :  { %711 = vst.msk [vmem:[#allocation2 + $0x371] sm:$0xff] %vm666_vm0, %v8022_v44  ;;  %v3949_v40 = vpack.c.bf16 %v3885_v26, %v3885_v26  ;;  %v3895_v43 = vld [vmem:[#allocation2 + $0x422] sm:$0xff] }
  0xea   :  { %2442 = vst.msk [vmem:[#allocation3 + $0x64] sm:$0xf] %vm1022_vm4, %v609_v0  ;;  %1287 = vrot.lane.b32.xlu2 %v8071_v13, %s7466_s1  ;;  %v8144_v0 = vpop.permute.xlu1 %1311 }
  0xeb   :  { %v399_v51 = vpop.f32.mrf.mxu0  ;;  %v489_v52 = vpop.f32.mrf.mxu1  ;;  %1389 = vrot.lane.b32.xlu1 %v1206_v14, %s7466_s1  ;;  %2478 = vst.msk [vmem:[#allocation3 + $0x214] sm:$0xf] %vm1022_vm4, %v645_v16 }
  0xec   :  { %v400_v54 = vadd.f32 %v7667_v60, %v399_v51  ;;  %v490_v55 = vadd.f32 %v7667_v60, %v489_v52  ;;  %2694 = vrot.lane.b32.xlu0 %v1603_v48, %s7466_s1  ;;  %2488 = vst.msk [vmem:[#allocation3 + $0x28c] sm:$0xf] %vm1022_vm4, %v655_v28  ;;  %v518_v48 = vadd.f32 %v7667_v60, %v517_v36  ;;  %v1542_v28 = vld [vmem:[#allocation2 + $0x62] sm:$0xff] }
  0xed   :  { %4008 = vst.msk [vmem:[#allocation3 + $0x1c4] sm:$0xf] %vm1022_vm4, %v3944_v61  ;;  %v3959_v52 = vpack.c.bf16 %v3895_v43, %v3895_v43  ;;  %v8186_v26 = vpack.c.bf16 %v1542_v28, %v1542_v28 }
  0xee   :  { %v546_v58 = vmax.f32 %v400_v54, 0.0  ;;  %v582_v59 = vmax.f32 %v490_v55, 0.0  ;;  %4009 = vst.msk [vmem:[#allocation3 + $0x1d0] sm:$0xf] %vm1022_vm4, %v3945_v32  ;;  %v3960_v54 = vpack.c.bf16 %v3896_v46, %v3896_v46  ;;  %v3961_v55 = vpack.c.bf16 %v3897_v11, %v3897_v11  ;;  %v8150_v9 = vpop.permute.xlu2 %1391  ;;  %v7018_v32 = vld [vmem:[%s10177_s3 + $0x80] sm:$0xff] }
  0xef   :  { %4011 = vst.msk [vmem:[#allocation3 + $0x1e8] sm:$0xf] %vm1022_vm4, %v3947_v34  ;;  %v593_v56 = vmax.f32 %v518_v48, 0.0 }
  0xf0   :  { %676 = vst.msk [vmem:[#allocation2 + $0xc1] sm:$0xff] %vm666_vm0, %v546_v58  ;;  %v610_v20 = vpack.c.bf16 %v546_v58, %v546_v58  ;;  %v646_v17 = vpack.c.bf16 %v582_v59, %v582_v59  ;;  %v3886_v35 = vld [vmem:[#allocation2 + $0x372] sm:$0xff] }
  0xf1   :  { %712 = vst.msk [vmem:[#allocation2 + $0x381] sm:$0xff] %vm666_vm0, %v582_v59  ;;  %v3950_v44 = vpack.c.bf16 %v3886_v35, %v3886_v35  ;;  %v657_v59 = vpack.c.bf16 %v593_v56, %v593_v56  ;;  %v1192_v35 = vpack.c.bf16 %v1128_v10, %v1128_v10  ;;  %v942_v10 = vld [vmem:[#allocation2 + $0x3c0] sm:$0xff] }
  0xf2   :  { %2443 = vst.msk [vmem:[#allocation3 + $0x70] sm:$0xf] %vm1022_vm4, %v610_v20  ;;  %1736 = vrot.lane.b32.xlu2 %v2565_v19, %s7463_s29  ;;  %v8179_v61 = vpop.permute.xlu1 %1359 }
  0xf3   :  { %v402_v23 = vpop.f32.mrf.mxu0  ;;  %2479 = vst.msk [vmem:[#allocation3 + $0x220] sm:$0xf] %vm1022_vm4, %v646_v17  ;;  %2696 = vrot.lane.b32.xlu1 %v2565_v19, %s7466_s1  ;;  %v492_v49 = vpop.f32.mrf.mxu1  ;;  %v8161_v17 = vpack.c.bf16 %v1092_v15, %v1092_v15  ;;  %v958_v19 = vpack.c.bf16 %v894_v3, %v894_v3 }
  0xf4   :  { %2181 = vrot.lane.b32.xlu0 %v8054_v63, %s7467_s23  ;;  %4012 = vst.msk [vmem:[#allocation3 + $0x1f4] sm:$0xf] %vm1022_vm4, %v3948_v33  ;;  %v403_v53 = vadd.f32 %v7667_v60, %v402_v23  ;;  %v493_v58 = vadd.f32 %v7667_v60, %v492_v49  ;;  %v519_v63 = vpop.f32.mrf.mxu2  ;;  %v7019_v23 = vld [vmem:[%s10177_s3 + $0x88] sm:$0xff]  ;;  %v918_v49 = vld [vmem:[#allocation2 + $0x1e0] sm:$0xff] }
  0xf5   :  { %4013 = vst.msk [vmem:[#allocation3 + $0x200] sm:$0xf] %vm1022_vm4, %v3949_v40  ;;  %v520_v7 = vadd.f32 %v7667_v60, %v519_v63  ;;  %7388 = vmatpush.bf16.msra.mxu3 %v7019_v23  ;;  %5231 = vmatpush.bf16.msrb.mxu0 %v7019_v23  ;;  %v8247_v23 = vld [vmem:[%s10176_s2] ss:$0 sm:$0xff] }
  0xf6   :  { %441 = vmatmul.bf16.gmra.mxu0 %v6879_v24  ;;  %4014 = vst.msk [vmem:[#allocation3 + $0x20c] sm:$0xf] %vm1022_vm4, %v3950_v44  ;;  %v547_v62 = vmax.f32 %v403_v53, 0.0  ;;  %v583_v45 = vmax.f32 %v493_v58, 0.0  ;;  %v6880_v24 = vld [vmem:[#allocation4 + $0x70] sm:$0xff]  ;;  %v8190_v34 = vpop.permute.xlu2 %1760  ;;  %v950_v44 = vld [vmem:[#allocation2 + $0x460] sm:$0xff] }
  0xf7   :  { %4022 = vst.msk [vmem:[#allocation3 + $0x26c] sm:$0xf] %vm1022_vm4, %v3958_v31  ;;  %v594_v16 = vmax.f32 %v520_v7, 0.0  ;;  %v1014_v48 = vpack.c.bf16 %v950_v44, %v950_v44  ;;  %v1093_v58 = vld [vmem:[#allocation2 + $0x61] sm:$0xff] }
  0xf8   :  { %v3887_v37 = vld [vmem:[#allocation2 + $0x382] sm:$0xff]  ;;  %4023 = vst.msk [vmem:[#allocation3 + $0x278] sm:$0xf] %vm1022_vm4, %v3959_v52  ;;  %v611_v20 = vpack.c.bf16 %v547_v62, %v547_v62 }
  0xf9   :  { %v3951_v47 = vpack.c.bf16 %v3887_v37, %v3887_v37  ;;  %4024 = vst.msk [vmem:[#allocation3 + $0x284] sm:$0xf] %vm1022_vm4, %v3960_v54  ;;  %v658_v27 = vpack.c.bf16 %v594_v16, %v594_v16  ;;  %v910_v37 = vld [vmem:[#allocation2 + $0x140] sm:$0xff]  ;;  %7389 = vmatpush.bf16.msra.mxu3 %v7018_v32  ;;  %5232 = vmatpush.bf16.msrb.mxu0 %v7018_v32 }
  0xfa   :  { %3143 = vrot.lane.b32.xlu2 %v8122_v42, %s7463_s29  ;;  %4025 = vst.msk [vmem:[#allocation3 + $0x290] sm:$0xf] %vm1022_vm4, %v3961_v55  ;;  %v974_v46 = vpack.c.bf16 %v910_v37, %v910_v37  ;;  %v8212_v54 = vpop.permute.xlu1 %1728  ;;  %v8214_v55 = vpop.permute.xlu0 %1744 }
  0xfb   :  { %v404_v51 = vpop.f32.mrf.mxu0  ;;  %3591 = vrot.lane.b32.xlu1 %v8071_v13, %s7467_s23  ;;  %4015 = vst.msk [vmem:[#allocation3 + $0x218] sm:$0xf] %vm1022_vm4, %v3951_v47  ;;  %v647_v13 = vpack.c.bf16 %v583_v45, %v583_v45  ;;  %v494_v12 = vpop.f32.mrf.mxu1 }
  0xfc   :  { %1738 = vrot.lane.b32.xlu0 %v8130_v50, %s7463_s29  ;;  %723 = vst.msk [vmem:[#allocation2 + $0x471] sm:$0xff] %vm666_vm0, %v593_v56  ;;  %v405_v14 = vadd.f32 %v7667_v60, %v404_v51  ;;  %v495_v22 = vadd.f32 %v7667_v60, %v494_v12  ;;  %v522_v47 = vpop.f32.mrf.mxu2  ;;  %v982_v51 = vpack.c.bf16 %v918_v49, %v918_v49  ;;  %v2951_v56 = vld [vmem:[#allocation2 + $0x60] sm:$0xff] }
  0xfd   :  { %2490 = vst.msk [vmem:[#allocation3 + $0x2a4] sm:$0xf] %vm1022_vm4, %v657_v59  ;;  %v523_v2 = vadd.f32 %v7667_v60, %v522_v47  ;;  %v8219_v63 = vpack.c.bf16 %v2951_v56, %v2951_v56  ;;  %v6882_v49 = vld [vmem:[#allocation4 + $0x80] sm:$0xff] }
  0xfe   :  { %677 = vst.msk [vmem:[#allocation2 + $0xd1] sm:$0xff] %vm666_vm0, %v547_v62  ;;  %v548_v21 = vmax.f32 %v405_v14, 0.0  ;;  %v584_v33 = vmax.f32 %v495_v22, 0.0 }
  0xff   :  { %2444 = vst.msk [vmem:[#allocation3 + $0x7c] sm:$0xf] %vm1022_vm4, %v611_v20  ;;  %v8222_v20 = vpack.c.bf16 %v1093_v58, %v1093_v58 }
 0x100   :  { %713 = vst.msk [vmem:[#allocation2 + $0x391] sm:$0xff] %vm666_vm0, %v583_v45  ;;  %v612_v5 = vpack.c.bf16 %v548_v21, %v548_v21  ;;  %v648_v43 = vpack.c.bf16 %v584_v33, %v584_v33 }
 0x101   :  { %2480 = vst.msk [vmem:[#allocation3 + $0x22c] sm:$0xf] %vm1022_vm4, %v647_v13 }
 0x102   :  { %1289 = vrot.lane.b32.xlu2 %v8161_v17, %s7466_s1  ;;  %1055 = vst.msk [vmem:[#allocation3 + $0x180] sm:$0xf] %vm1022_vm4, %v990_v57  ;;  %v6612_v59 = vld [vmem:[#allocation3 + $0x218] sm:$0xf] }
 0x103   :  { %2183 = vrot.lane.b32.xlu1 %v8122_v42, %s7467_s23  ;;  %v8158_v8 = vpop.f32.mrf.mxu0  ;;  %1504 = vst.msk [vmem:[#allocation3 + $0x180] sm:$0xf] %vm1471_vm3, %v8120_v41  ;;  %v1144_v29 = vld [vmem:[#allocation2 + $0x471] sm:$0xff]  ;;  %v497_v41 = vpop.f32.mrf.mxu1 }
 0x104   :  { %3145 = vrot.lane.b32.xlu0 %v8163_v18, %s7463_s29  ;;  %1023 = vst.msk [vmem:[#allocation3] sm:$0xf] %vm1022_vm4, %v958_v19  ;;  %v1208_v36 = vpack.c.bf16 %v1144_v29, %v1144_v29  ;;  %v408_v52 = vadd.f32 %v7667_v60, %v8158_v8  ;;  %v498_v53 = vadd.f32 %v7667_v60, %v497_v41  ;;  %v8239_v19 = vpop.permute.xlu1 %1776 }
 0x105   :  { %1472 = vst.msk [vmem:[#allocation3] sm:$0xf] %vm1471_vm3, %v8117_v38 }
 0x106   :  { %446 = vmatmul.bf16.gmra.mxu0 %v6880_v24  ;;  %724 = vst.msk [vmem:[#allocation2 + $0x481] sm:$0xff] %vm666_vm0, %v594_v16  ;;  %v549_v3 = vmax.f32 %v408_v52, 0.0  ;;  %v585_v14 = vmax.f32 %v498_v53, 0.0  ;;  %v1129_v16 = vld [vmem:[#allocation2 + $0x341] sm:$0xff] }
 0x107   :  { %v3888_v40 = vld [vmem:[#allocation2 + $0x392] sm:$0xff]  ;;  %2491 = vst.msk [vmem:[#allocation3 + $0x2b0] sm:$0xf] %vm1022_vm4, %v658_v27 }
 0x108   :  { %v3952_v38 = vpack.c.bf16 %v3888_v40, %v3888_v40  ;;  %678 = vst.msk [vmem:[#allocation2 + $0xe1] sm:$0xff] %vm666_vm0, %v548_v21  ;;  %v613_v15 = vpack.c.bf16 %v549_v3, %v549_v3  ;;  %v8241_v21 = vpop.permute.xlu0 %1792 }
 0x109   :  { %2445 = vst.msk [vmem:[#allocation3 + $0x88] sm:$0xf] %vm1022_vm4, %v612_v5  ;;  %v1006_v5 = vpack.c.bf16 %v942_v10, %v942_v10 }
 0x10a   :  { %1361 = vrot.lane.b32.xlu2 %v1192_v35, %s7466_s1  ;;  %4016 = vst.msk [vmem:[#allocation3 + $0x224] sm:$0xf] %vm1022_vm4, %v3952_v38 }
 0x10b   :  { %1740 = vrot.lane.b32.xlu1 %v8186_v26, %s7463_s29  ;;  %v8195_v39 = vpop.f32.mrf.mxu0  ;;  %714 = vst.msk [vmem:[#allocation2 + $0x3a1] sm:$0xff] %vm666_vm0, %v584_v33  ;;  %v499_v60 = vpop.f32.mrf.mxu1 }
 0x10c   :  { %1393 = vrot.lane.b32.xlu0 %v1208_v36, %s7466_s1  ;;  %2481 = vst.msk [vmem:[#allocation3 + $0x238] sm:$0xf] %vm1022_vm4, %v648_v43  ;;  %v8217_v62 = vpop.permute.xlu2 %1730  ;;  %v410_v24 = vadd.f32 %v8247_v23, %v8195_v39  ;;  %v500_v36 = vadd.f32 %v8247_v23, %v499_v60  ;;  %v8267_v39 = vpop.permute.xlu1 %3153 }
 0x10d   :  { %v3899_v31 = vld [vmem:[#allocation2 + $0x482] sm:$0xff]  ;;  %1039 = vst.msk [vmem:[#allocation3 + $0xc0] sm:$0xf] %vm1022_vm4, %v974_v46 }
 0x10e   :  { %v3963_v11 = vpack.c.bf16 %v3899_v31, %v3899_v31  ;;  %1488 = vst.msk [vmem:[#allocation3 + $0xc0] sm:$0xf] %vm1471_vm3, %v8144_v0  ;;  %v595_v0 = vmax.f32 %v523_v2, 0.0  ;;  %v1145_v8 = vld [vmem:[#allocation2 + $0x481] sm:$0xff]  ;;  %v550_v35 = vmax.f32 %v410_v24, 0.0  ;;  %v586_v43 = vmax.f32 %v500_v36, 0.0 }
 0x10f   :  { %1079 = vst.msk [vmem:[#allocation3 + $0x2a0] sm:$0xf] %vm1022_vm4, %v1014_v48  ;;  %v1209_v28 = vpack.c.bf16 %v1145_v8, %v1145_v8  ;;  %v7009_v2 = vld [vmem:[%s10177_s3 + $0x38] sm:$0xff]  ;;  %v931_v36 = vld [vmem:[#allocation2 + $0x2d0] sm:$0xff] }
 0x110   :  { %4027 = vst.msk [vmem:[#allocation3 + $0x2a8] sm:$0xf] %vm1022_vm4, %v3963_v11  ;;  %v659_v13 = vpack.c.bf16 %v595_v0, %v595_v0  ;;  %v8269_v40 = vpop.permute.xlu0 %3601  ;;  %v614_v38 = vpack.c.bf16 %v550_v35, %v550_v35  ;;  %v650_v47 = vpack.c.bf16 %v586_v43, %v586_v43  ;;  %4887 = vmatpush.bf16.msrb.mxu1 %v7009_v2  ;;  %v7005_v2 = vld [vmem:[%s10177_s3 + $0x18] sm:$0xff] }
 0x111   :  { %1528 = vst.msk [vmem:[#allocation3 + $0x2a0] sm:$0xf] %vm1471_vm3, %v8150_v9  ;;  %v6974_v6 = vld [vmem:[#allocation3 + $0x220] sm:$0xf0] }
 0x112   :  { %3593 = vrot.lane.b32.xlu2 %v8161_v17, %s7467_s23  ;;  %v3889_v7 = vld [vmem:[#allocation2 + $0x3a2] sm:$0xff]  ;;  %1047 = vst.msk [vmem:[#allocation3 + $0x120] sm:$0xf] %vm1022_vm4, %v982_v51  ;;  %v6613_v12 = vor.u32 %v6974_v6, %v6612_v59  ;;  %v649_v17 = vpack.c.bf16 %v585_v14, %v585_v14 }
 0x113   :  { %v412_v45 = vpop.f32.mrf.mxu0  ;;  %3147 = vrot.lane.b32.xlu1 %v8219_v63, %s7463_s29  ;;  %v3953_v57 = vpack.c.bf16 %v3889_v7, %v3889_v7  ;;  %1496 = vst.msk [vmem:[#allocation3 + $0x120] sm:$0xf] %vm1471_vm3, %v8146_v4  ;;  %v934_v9 = vld [vmem:[#allocation2 + $0x320] sm:$0xff]  ;;  %v1193_v4 = vpack.c.bf16 %v1129_v16, %v1129_v16  ;;  %v502_v33 = vpop.f32.mrf.mxu1 }
 0x114   :  { %1291 = vrot.lane.b32.xlu0 %v8222_v20, %s7466_s1  ;;  %725 = vst.msk [vmem:[#allocation2 + $0x491] sm:$0xff] %vm666_vm0, %v595_v0  ;;  %6816 = vmatmul.msk.bf16.vlgmr.msra.gmra.mxu3 %vm666_vm0, %v6613_v12  ;;  %v998_v22 = vpack.c.bf16 %v934_v9, %v934_v9  ;;  %v8251_v27 = vpop.permute.xlu2 %1802  ;;  %v413_v44 = vadd.f32 %v8247_v23, %v412_v45 }
 0x115   :  { %4017 = vst.msk [vmem:[#allocation3 + $0x230] sm:$0xf] %vm1022_vm4, %v3953_v57  ;;  %v503_v48 = vadd.f32 %v8247_v23, %v502_v33 }
 0x116   :  { %2492 = vst.msk [vmem:[#allocation3 + $0x2bc] sm:$0xf] %vm1022_vm4, %v659_v13  ;;  %451 = vmatmul.bf16.gmra.mxu0 %v6881_v1  ;;  %v3890_v13 = vld [vmem:[#allocation2 + $0x3b2] sm:$0xff] }
 0x117   :  { %679 = vst.msk [vmem:[#allocation2 + $0xf1] sm:$0xff] %vm666_vm0, %v549_v3  ;;  %v587_v52 = vmax.f32 %v503_v48, 0.0  ;;  %v1130_v3 = vld [vmem:[#allocation2 + $0x351] sm:$0xff]  ;;  %v932_v48 = vld [vmem:[#allocation2 + $0x2e0] sm:$0xff] }
 0x118   :  { %2446 = vst.msk [vmem:[#allocation3 + $0x94] sm:$0xf] %vm1022_vm4, %v613_v15  ;;  %v947_v15 = vld [vmem:[#allocation2 + $0x410] sm:$0xff]  ;;  %v1194_v1 = vpack.c.bf16 %v1130_v3, %v1130_v3  ;;  %v7017_v3 = vld [vmem:[%s10177_s3 + $0x78] sm:$0xff] }
 0x119   :  { %715 = vst.msk [vmem:[#allocation2 + $0x3d1] sm:$0xff] %vm666_vm0, %v585_v14  ;;  %v651_v59 = vpack.c.bf16 %v587_v52, %v587_v52  ;;  %v1543_v14 = vld [vmem:[#allocation2 + $0x72] sm:$0xff]  ;;  %5056 = vmatpush.bf16.msrb.mxu2 %v7017_v3 }
 0x11a   :  { %2698 = vrot.lane.b32.xlu2 %v8130_v50, %s7466_s1  ;;  %2482 = vst.msk [vmem:[#allocation3 + $0x244] sm:$0xf] %vm1022_vm4, %v649_v17  ;;  %v8323_v8 = vpack.c.bf16 %v1543_v14, %v1543_v14 }
 0x11b   :  { %1395 = vrot.lane.b32.xlu1 %v1209_v28, %s7466_s1  ;;  %v414_v29 = vpop.f32.mrf.mxu0  ;;  %v3900_v32 = vld [vmem:[#allocation2 + $0x492] sm:$0xff]  ;;  %1063 = vst.msk [vmem:[#allocation3 + $0x1e0] sm:$0xf] %vm1022_vm4, %v998_v22  ;;  %v504_v53 = vpop.f32.mrf.mxu1  ;;  %v7007_v22 = vld [vmem:[%s10177_s3 + $0x28] sm:$0xff]  ;;  %v3954_v28 = vpack.c.bf16 %v3890_v13, %v3890_v13 }
 0x11c   :  { %1363 = vrot.lane.b32.xlu0 %v1193_v4, %s7466_s1  ;;  %v3964_v37 = vpack.c.bf16 %v3900_v32, %v3900_v32  ;;  %1512 = vst.msk [vmem:[#allocation3 + $0x1e0] sm:$0xf] %vm1471_vm3, %v8179_v61  ;;  %v8273_v46 = vpop.permute.xlu2 %1385  ;;  %v1094_v61 = vld [vmem:[#allocation2 + $0x71] sm:$0xff]  ;;  %v415_v31 = vadd.f32 %v8247_v23, %v414_v29  ;;  %v505_v60 = vadd.f32 %v8247_v23, %v504_v53 }
 0x11d   :  { %1937 = vst.msk [vmem:[#allocation3 + $0xc0] sm:$0xf] %vm1920_vm5, %v8190_v34  ;;  %v8277_v34 = vpack.c.bf16 %v1094_v61, %v1094_v61  ;;  %v1011_v29 = vpack.c.bf16 %v947_v15, %v947_v15  ;;  %v1146_v53 = vld [vmem:[#allocation2 + $0x491] sm:$0xff]  ;;  %v1131_v15 = vld [vmem:[#allocation2 + $0x361] sm:$0xff] }
 0x11e   :  { %4028 = vst.msk [vmem:[#allocation3 + $0x2b4] sm:$0xf] %vm1022_vm4, %v3964_v37  ;;  %v3854_v50 = vld [vmem:[#allocation2 + $0xf2] sm:$0xff]  ;;  %v552_v45 = vmax.f32 %v415_v31, 0.0  ;;  %v588_v7 = vmax.f32 %v505_v60, 0.0 }
 0x11f   :  { %v3918_v41 = vpack.c.bf16 %v3854_v50, %v3854_v50  ;;  %1071 = vst.msk [vmem:[#allocation3 + $0x240] sm:$0xf] %vm1022_vm4, %v1006_v5  ;;  %v524_v5 = vpop.f32.mrf.mxu2  ;;  %v7006_v50 = vld [vmem:[%s10177_s3 + $0x20] sm:$0xff] }
 0x120   :  { %1520 = vst.msk [vmem:[#allocation3 + $0x240] sm:$0xf] %vm1471_vm3, %v8181_v30  ;;  %v551_v30 = vmax.f32 %v413_v44, 0.0  ;;  %v652_v9 = vpack.c.bf16 %v588_v7, %v588_v7  ;;  %v2953_v44 = vld [vmem:[#allocation2 + $0x80] sm:$0xff] }
 0x121   :  { %3982 = vst.msk [vmem:[#allocation3 + $0x8c] sm:$0xf] %vm1022_vm4, %v3918_v41 }
 0x122   :  { %2185 = vrot.lane.b32.xlu2 %v8163_v18, %s7467_s23  ;;  %680 = vst.msk [vmem:[#allocation2 + $0x101] sm:$0xff] %vm666_vm0, %v550_v35  ;;  %v615_v51 = vpack.c.bf16 %v551_v30, %v551_v30  ;;  %v2952_v35 = vld [vmem:[#allocation2 + $0x70] sm:$0xff] }
 0x123   :  { %1293 = vrot.lane.b32.xlu1 %v8277_v34, %s7466_s1  ;;  %2447 = vst.msk [vmem:[#allocation3 + $0xa0] sm:$0xf] %vm1022_vm4, %v614_v38  ;;  %v417_v11 = vpop.f32.mrf.mxu0  ;;  %v8352_v38 = vpack.c.bf16 %v2952_v35, %v2952_v35 }
 0x124   :  { %2700 = vrot.lane.b32.xlu0 %v8186_v26, %s7466_s1  ;;  %716 = vst.msk [vmem:[#allocation2 + $0x3e1] sm:$0xff] %vm666_vm0, %v586_v43  ;;  %v8303_v0 = vpop.permute.xlu2 %1355 }
 0x125   :  { %2483 = vst.msk [vmem:[#allocation3 + $0x250] sm:$0xf] %vm1022_vm4, %v650_v47  ;;  %v8297_v56 = vpop.permute.xlu1 %1353  ;;  %v995_v47 = vpack.c.bf16 %v931_v36, %v931_v36 }
 0x126   :  { %1921 = vst.msk [vmem:[#allocation3] sm:$0xf] %vm1920_vm5, %v8212_v54  ;;  %v8299_v58 = vpop.permute.xlu0 %1281  ;;  %456 = vmatmul.bf16.gmra.mxu0 %v6882_v49 }
 0x127   :  { %1929 = vst.msk [vmem:[#allocation3 + $0x60] sm:$0xf] %vm1920_vm5, %v8214_v55  ;;  %v616_v55 = vpack.c.bf16 %v552_v45, %v552_v45 }
 0x128   :  { %681 = vst.msk [vmem:[#allocation2 + $0x111] sm:$0xff] %vm666_vm0, %v551_v30 }
 0x129   :  { %2448 = vst.msk [vmem:[#allocation3 + $0xac] sm:$0xf] %vm1022_vm4, %v615_v51 }
 0x12a   :  { %717 = vst.msk [vmem:[#allocation2 + $0x3f1] sm:$0xff] %vm666_vm0, %v587_v52  ;;  %1742 = vrot.lane.b32.xlu2 %v8323_v8, %s7463_s29  ;;  %v6624_v52 = vld [vmem:[#allocation3 + $0x230] sm:$0xf] }
 0x12b   :  { %v3891_v54 = vld [vmem:[#allocation2 + $0x3e2] sm:$0xff]  ;;  %2484 = vst.msk [vmem:[#allocation3 + $0x25c] sm:$0xf] %vm1022_vm4, %v651_v59  ;;  %v8317_v12 = vpop.f32.mrf.mxu0  ;;  %1365 = vrot.lane.b32.xlu1 %v1194_v1, %s7466_s1  ;;  %v996_v59 = vpack.c.bf16 %v932_v48, %v932_v48 }
 0x12c   :  { %3595 = vrot.lane.b32.xlu0 %v8222_v20, %s7467_s23  ;;  %v3955_v6 = vpack.c.bf16 %v3891_v54, %v3891_v54  ;;  %1945 = vst.msk [vmem:[#allocation3 + $0x120] sm:$0xf] %vm1920_vm5, %v8239_v19  ;;  %v7008_v20 = vld [vmem:[%s10177_s3 + $0x30] sm:$0xff]  ;;  %v8327_v17 = vpop.permute.xlu2 %2692 }
 0x12d   :  { %1953 = vst.msk [vmem:[#allocation3 + $0x180] sm:$0xf] %vm1920_vm5, %v8241_v21  ;;  %v8325_v16 = vpop.permute.xlu1 %2690  ;;  %v418_v21 = vadd.f32 %v8247_v23, %v417_v11  ;;  %4888 = vmatpush.bf16.msrb.mxu1 %v7008_v20  ;;  %v525_v11 = vadd.f32 %v8247_v23, %v524_v5  ;;  %v7002_v5 = vld [vmem:[%s10177_s3] sm:$0xff] }
 0x12e   :  { %4019 = vst.msk [vmem:[#allocation3 + $0x248] sm:$0xf] %vm1022_vm4, %v3955_v6  ;;  %v8331_v4 = vpop.permute.xlu0 %1732  ;;  %v1210_v6 = vpack.c.bf16 %v1146_v53, %v1146_v53 }
 0x12f   :  { %v3856_v57 = vld [vmem:[#allocation2 + $0x112] sm:$0xff]  ;;  %682 = vst.msk [vmem:[#allocation2 + $0x121] sm:$0xff] %vm666_vm0, %v552_v45  ;;  %v553_v32 = vmax.f32 %v418_v21, 0.0  ;;  %v420_v45 = vadd.f32 %v8247_v23, %v8317_v12  ;;  %v596_v54 = vmax.f32 %v525_v11, 0.0  ;;  %v1195_v21 = vpack.c.bf16 %v1131_v15, %v1131_v15 }
 0x130   :  { %v3920_v19 = vpack.c.bf16 %v3856_v57, %v3856_v57  ;;  %2449 = vst.msk [vmem:[#allocation3 + $0xb8] sm:$0xf] %vm1022_vm4, %v616_v55  ;;  %v7004_v55 = vld [vmem:[%s10177_s3 + $0x10] sm:$0xff] }
 0x131   :  { %v3892_v24 = vld [vmem:[#allocation2 + $0x3f2] sm:$0xff]  ;;  %718 = vst.msk [vmem:[#allocation2 + $0x401] sm:$0xff] %vm666_vm0, %v588_v7  ;;  %4889 = vmatpush.bf16.msrb.mxu1 %v7007_v22  ;;  %v617_v37 = vpack.c.bf16 %v553_v32, %v553_v32  ;;  %v527_v7 = vpop.f32.mrf.mxu2  ;;  %v554_v13 = vmax.f32 %v420_v45, 0.0 }
 0x132   :  { %3984 = vst.msk [vmem:[#allocation3 + $0xa4] sm:$0xf] %vm1022_vm4, %v3920_v19  ;;  %v3956_v10 = vpack.c.bf16 %v3892_v24, %v3892_v24  ;;  %3149 = vrot.lane.b32.xlu2 %v8352_v38, %s7463_s29  ;;  %v528_v14 = vadd.f32 %v8247_v23, %v527_v7  ;;  %v1545_v45 = vld [vmem:[#allocation2 + $0xb2] sm:$0xff] }
 0x133   :  { %2485 = vst.msk [vmem:[#allocation3 + $0x268] sm:$0xf] %vm1022_vm4, %v652_v9  ;;  %v422_v43 = vpop.f32.mrf.mxu0  ;;  %3597 = vrot.lane.b32.xlu1 %v8277_v34, %s7467_s23  ;;  %v618_v25 = vpack.c.bf16 %v554_v13, %v554_v13 }
 0x134   :  { %2187 = vrot.lane.b32.xlu0 %v8219_v63, %s7467_s23  ;;  %4020 = vst.msk [vmem:[#allocation3 + $0x254] sm:$0xf] %vm1022_vm4, %v3956_v10  ;;  %v6883_v63 = vld [vmem:[#allocation4 + $0x88] sm:$0xff]  ;;  %v8357_v49 = vpop.permute.xlu2 %3587  ;;  %v423_v57 = vadd.f32 %v8247_v23, %v422_v43 }
 0x135   :  { %4018 = vst.msk [vmem:[#allocation3 + $0x23c] sm:$0xf] %vm1022_vm4, %v3954_v28  ;;  %4890 = vmatpush.bf16.msrb.mxu1 %v7006_v50  ;;  %v8355_v30 = vpop.permute.xlu1 %2177  ;;  %v6636_v22 = vld [vmem:[#allocation3 + $0x248] sm:$0xf] }
 0x136   :  { %v3857_v33 = vld [vmem:[#allocation2 + $0x122] sm:$0xff]  ;;  %1076 = vst.msk [vmem:[#allocation3 + $0x27c] sm:$0xf] %vm1022_vm4, %v1011_v29  ;;  %461 = vmatmul.bf16.gmra.mxu0 %v6883_v63  ;;  %v8370_v51 = vpop.permute.xlu0 %1804 }
 0x137   :  { %v3921_v41 = vpack.c.bf16 %v3857_v33, %v3857_v33  ;;  %1525 = vst.msk [vmem:[#allocation3 + $0x27c] sm:$0xf] %vm1471_vm3, %v8273_v46  ;;  %v8362_v46 = vpack.c.bf16 %v2953_v44, %v2953_v44  ;;  %v7016_v33 = vld [vmem:[%s10177_s3 + $0x70] sm:$0xff] }
 0x138   :  { %v3893_v61 = vld [vmem:[#allocation2 + $0x402] sm:$0xff]  ;;  %683 = vst.msk [vmem:[#allocation2 + $0x151] sm:$0xff] %vm666_vm0, %v553_v32  ;;  %5057 = vmatpush.bf16.msrb.mxu2 %v7016_v33 }
 0x139   :  { %3985 = vst.msk [vmem:[#allocation3 + $0xb0] sm:$0xf] %vm1022_vm4, %v3921_v41  ;;  %v3957_v31 = vpack.c.bf16 %v3893_v61, %v3893_v61  ;;  %4891 = vmatpush.bf16.msrb.mxu1 %v7005_v2  ;;  %v529_v28 = vpop.f32.mrf.mxu2 }
 0x13a   :  { %2450 = vst.msk [vmem:[#allocation3 + $0xc4] sm:$0xf] %vm1022_vm4, %v617_v37  ;;  %1397 = vrot.lane.b32.xlu2 %v1210_v6, %s7466_s1  ;;  %v530_v29 = vadd.f32 %v8247_v23, %v529_v28 }
 0x13b   :  { %4021 = vst.msk [vmem:[#allocation3 + $0x260] sm:$0xf] %vm1022_vm4, %v3957_v31  ;;  %2702 = vrot.lane.b32.xlu1 %v8323_v8, %s7466_s1  ;;  %v424_v12 = vpop.f32.mrf.mxu0  ;;  %v6980_v24 = vld [vmem:[#allocation3 + $0x250] sm:$0xf0] }
 0x13c   :  { %3151 = vrot.lane.b32.xlu0 %v8362_v46, %s7463_s29  ;;  %v6977_v60 = vld [vmem:[#allocation3 + $0x238] sm:$0xf0]  ;;  %1060 = vst.msk [vmem:[#allocation3 + $0x1bc] sm:$0xf] %vm1022_vm4, %v995_v47  ;;  %v8406_v20 = vpop.permute.xlu2 %2179  ;;  %v425_v1 = vadd.f32 %v8247_v23, %v424_v12  ;;  %v6637_v35 = vor.u32 %v6980_v24, %v6636_v22  ;;  %v598_v43 = vmax.f32 %v530_v29, 0.0  ;;  %v896_v47 = vld [vmem:[#allocation2 + $0x20] sm:$0xff] }
 0x13d   :  { %v6625_v34 = vor.u32 %v6977_v60, %v6624_v52  ;;  %1509 = vst.msk [vmem:[#allocation3 + $0x1bc] sm:$0xf] %vm1471_vm3, %v8297_v56  ;;  %4892 = vmatpush.bf16.msrb.mxu1 %v7004_v55  ;;  %v7003_v56 = vld [vmem:[%s10177_s3 + $0x8] sm:$0xff]  ;;  %v960_v52 = vpack.c.bf16 %v896_v47, %v896_v47  ;;  %v1096_v55 = vld [vmem:[#allocation2 + $0xb1] sm:$0xff] }
 0x13e   :  { %1958 = vst.msk [vmem:[#allocation3 + $0x1bc] sm:$0xf] %vm1920_vm5, %v8251_v27  ;;  %v660_v27 = vpack.c.bf16 %v596_v54, %v596_v54  ;;  %v8411_v9 = vpop.permute.xlu0 %3139  ;;  %v556_v32 = vmax.f32 %v425_v1, 0.0  ;;  %v662_v2 = vpack.c.bf16 %v598_v43, %v598_v43  ;;  %v2505_v60 = vld [vmem:[#allocation2 + $0x82] sm:$0xff]  ;;  %v6983_v22 = vld [vmem:[#allocation3 + $0x268] sm:$0xf0] }
 0x13f   :  { %6817 = vmatmul.msk.bf16.gmra.mxu3 %vm666_vm0, %v6625_v34  ;;  %1061 = vst.msk [vmem:[#allocation3 + $0x1c8] sm:$0xf] %vm1022_vm4, %v996_v59  ;;  %v8461_v6 = vpack.c.bf16 %v2505_v60, %v2505_v60  ;;  %v3844_v47 = vld [vmem:[#allocation2 + $0x32] sm:$0xff]  ;;  %v7010_v60 = vld [vmem:[%s10177_s3 + $0x40] sm:$0xff] }
 0x140   :  { %1510 = vst.msk [vmem:[#allocation3 + $0x1c8] sm:$0xf] %vm1471_vm3, %v8303_v0  ;;  %v8404_v0 = vpop.permute.xlu1 %1283  ;;  %v620_v61 = vpack.c.bf16 %v556_v32, %v556_v32 }
 0x141   :  { %1473 = vst.msk [vmem:[#allocation3 + $0xc] sm:$0xf] %vm1471_vm3, %v8299_v58  ;;  %4893 = vmatpush.bf16.msrb.mxu1 %v7003_v56  ;;  %v597_v58 = vmax.f32 %v528_v14, 0.0  ;;  %v532_v59 = vpop.f32.mrf.mxu2  ;;  %v1160_v56 = vpack.c.bf16 %v1096_v55, %v1096_v55  ;;  %v7014_v14 = vld [vmem:[%s10177_s3 + $0x60] sm:$0xff]  ;;  %v933_v55 = vld [vmem:[#allocation2 + $0x2f0] sm:$0xff] }
 0x142   :  { %1922 = vst.msk [vmem:[#allocation3 + $0xc] sm:$0xf] %vm1920_vm5, %v8217_v62  ;;  %v555_v62 = vmax.f32 %v423_v57, 0.0  ;;  %1367 = vrot.lane.b32.xlu2 %v1195_v21, %s7466_s1  ;;  %v533_v3 = vadd.f32 %v8247_v23, %v532_v59  ;;  %v6648_v15 = vld [vmem:[#allocation3 + $0x260] sm:$0xf] }
 0x143   :  { %726 = vst.msk [vmem:[#allocation2 + $0x4a1] sm:$0xff] %vm666_vm0, %v596_v54  ;;  %v661_v19 = vpack.c.bf16 %v597_v58, %v597_v58  ;;  %2189 = vrot.lane.b32.xlu1 %v8352_v38, %s7467_s23  ;;  %v427_v36 = vpop.f32.mrf.mxu0  ;;  %v8459_v54 = vpack.c.bf16 %v1545_v45, %v1545_v45  ;;  %v3401_v21 = vld [vmem:[#allocation2 + $0x81] sm:$0xff] }
 0x144   :  { %2493 = vst.msk [vmem:[#allocation3 + $0x2c8] sm:$0xf] %vm1022_vm4, %v660_v27  ;;  %v619_v10 = vpack.c.bf16 %v555_v62, %v555_v62  ;;  %v8437_v41 = vpop.permute.xlu2 %1287 }
 0x145   :  { %684 = vst.msk [vmem:[#allocation2 + $0x161] sm:$0xff] %vm666_vm0, %v554_v13  ;;  %4894 = vmatpush.bf16.msrb.mxu1 %v7002_v5 }
 0x146   :  { %2451 = vst.msk [vmem:[#allocation3 + $0xd0] sm:$0xf] %vm1022_vm4, %v618_v25  ;;  %v8440_v44 = vpop.permute.xlu0 %1387 }
 0x147   :  { %2882 = vst.msk [vmem:[#allocation3 + $0x4] sm:$0xf] %vm1471_vm3, %v8325_v16 }
 0x148   :  { %2883 = vst.msk [vmem:[#allocation3 + $0x10] sm:$0xf] %vm1471_vm3, %v8327_v17  ;;  %v8435_v63 = vpop.permute.xlu1 %1285 }
 0x149   :  { %727 = vst.msk [vmem:[#allocation2 + $0x4b1] sm:$0xff] %vm666_vm0, %v597_v58 }
 0x14a   :  { %v3901_v16 = vld [vmem:[#allocation2 + $0x4a2] sm:$0xff]  ;;  %2494 = vst.msk [vmem:[#allocation3 + $0x2d4] sm:$0xf] %vm1022_vm4, %v661_v19  ;;  %2704 = vrot.lane.b32.xlu2 %v8461_v6, %s7466_s1  ;;  %v599_v19 = vmax.f32 %v533_v3, 0.0 }
 0x14b   :  { %v1147_v17 = vld [vmem:[#allocation2 + $0x4a1] sm:$0xff]  ;;  %v3965_v37 = vpack.c.bf16 %v3901_v16, %v3901_v16  ;;  %685 = vst.msk [vmem:[#allocation2 + $0x171] sm:$0xff] %vm666_vm0, %v555_v62  ;;  %v429_v34 = vpop.f32.mrf.mxu0  ;;  %1746 = vrot.lane.b32.xlu1 %v8459_v54, %s7463_s29  ;;  %v897_v62 = vld [vmem:[#allocation2 + $0x30] sm:$0xff] }
 0x14c   :  { %v1211_v50 = vpack.c.bf16 %v1147_v17, %v1147_v17  ;;  %2452 = vst.msk [vmem:[#allocation3 + $0xdc] sm:$0xf] %vm1022_vm4, %v619_v10  ;;  %v8465_v13 = vpop.permute.xlu2 %1736  ;;  %v663_v28 = vpack.c.bf16 %v599_v19, %v599_v19  ;;  %v961_v29 = vpack.c.bf16 %v897_v62, %v897_v62  ;;  %v7012_v17 = vld [vmem:[%s10177_s3 + $0x50] sm:$0xff] }
 0x14d   :  { %4029 = vst.msk [vmem:[#allocation3 + $0x2c0] sm:$0xf] %vm1022_vm4, %v3965_v37  ;;  %v430_v37 = vadd.f32 %v8247_v23, %v429_v34 }
 0x14e   :  { %1399 = vrot.lane.b32.xlu0 %v1211_v50, %s7466_s1  ;;  %2370 = vst.msk [vmem:[#allocation3] sm:$0xf] %vm2369_vm6, %v8355_v30  ;;  %v428_v30 = vadd.f32 %v8247_v23, %v427_v36  ;;  %v8469_v27 = vpop.permute.xlu0 %1357 }
 0x14f   :  { %6818 = vmatmul.msk.bf16.gmra.mxu3 %vm666_vm0, %v6637_v35  ;;  %1959 = vst.msk [vmem:[#allocation3 + $0x1c8] sm:$0xf] %vm1920_vm5, %v8370_v51  ;;  %v7015_v51 = vld [vmem:[%s10177_s3 + $0x68] sm:$0xff] }
 0x150   :  { %v3902_v48 = vld [vmem:[#allocation2 + $0x4b2] sm:$0xff]  ;;  %686 = vst.msk [vmem:[#allocation2 + $0x181] sm:$0xff] %vm666_vm0, %v556_v32  ;;  %v8463_v7 = vpop.permute.xlu1 %1734  ;;  %5058 = vmatpush.bf16.msrb.mxu2 %v7015_v51  ;;  %v557_v12 = vmax.f32 %v428_v30, 0.0  ;;  %v3465_v32 = vpack.c.bf16 %v3401_v21, %v3401_v21 }
 0x151   :  { %v3966_v31 = vpack.c.bf16 %v3902_v48, %v3902_v48  ;;  %2453 = vst.msk [vmem:[#allocation3 + $0xe8] sm:$0xf] %vm1022_vm4, %v620_v61  ;;  %v1148_v25 = vld [vmem:[#allocation2 + $0x4b1] sm:$0xff] }
 0x152   :  { %v3860_v11 = vld [vmem:[#allocation2 + $0x172] sm:$0xff]  ;;  %728 = vst.msk [vmem:[#allocation2 + $0x4c1] sm:$0xff] %vm666_vm0, %v598_v43  ;;  %v621_v1 = vpack.c.bf16 %v557_v12, %v557_v12  ;;  %v1212_v24 = vpack.c.bf16 %v1148_v25, %v1148_v25  ;;  %3599 = vrot.lane.b32.xlu2 %v3465_v32, %s7467_s23  ;;  %v3843_v43 = vld [vmem:[#allocation2 + $0x22] sm:$0xff] }
 0x153   :  { %4030 = vst.msk [vmem:[#allocation3 + $0x2cc] sm:$0xf] %vm1022_vm4, %v3966_v31  ;;  %v3924_v53 = vpack.c.bf16 %v3860_v11, %v3860_v11  ;;  %v558_v31 = vmax.f32 %v430_v37, 0.0  ;;  %v7011_v11 = vld [vmem:[%s10177_s3 + $0x48] sm:$0xff]  ;;  %v1547_v37 = vld [vmem:[#allocation2 + $0xd2] sm:$0xff] }
 0x154   :  { %2495 = vst.msk [vmem:[#allocation3 + $0x2e0] sm:$0xf] %vm1022_vm4, %v662_v2  ;;  %5059 = vmatpush.bf16.msrb.mxu2 %v7014_v14  ;;  %v8496_v16 = vpop.permute.xlu2 %3143  ;;  %1401 = vrot.lane.b32.xlu1 %v1212_v24, %s7466_s1  ;;  %v3907_v2 = vpack.c.bf16 %v3843_v43, %v3843_v43  ;;  %v6986_v14 = vld [vmem:[#allocation3 + $0x280] sm:$0xf0] }
 0x155   :  { %3988 = vst.msk [vmem:[#allocation3 + $0xd4] sm:$0xf] %vm1022_vm4, %v3924_v53  ;;  %v6340_v36 = vld [vmem:[#allocation3] sm:$0xf] }
 0x156   :  { %1025 = vst.msk [vmem:[#allocation3 + $0x18] sm:$0xf] %vm1022_vm4, %v960_v52  ;;  %1297 = vrot.lane.b32.xlu0 %v1160_v56, %s7466_s1  ;;  %v8500_v35 = vpop.permute.xlu0 %3589  ;;  %v1097_v52 = vld [vmem:[#allocation2 + $0xc1] sm:$0xff]  ;;  %v6660_v56 = vld [vmem:[#allocation3 + $0x278] sm:$0xf] }
 0x157   :  { %1474 = vst.msk [vmem:[#allocation3 + $0x18] sm:$0xf] %vm1471_vm3, %v8404_v0  ;;  %v1132_v0 = vld [vmem:[#allocation2 + $0x371] sm:$0xff]  ;;  %v1546_v25 = vld [vmem:[#allocation2 + $0xc2] sm:$0xff] }
 0x158   :  { %1923 = vst.msk [vmem:[#allocation3 + $0x18] sm:$0xf] %vm1920_vm5, %v8331_v4  ;;  %v7013_v4 = vld [vmem:[%s10177_s3 + $0x58] sm:$0xff]  ;;  %v1196_v10 = vpack.c.bf16 %v1132_v0, %v1132_v0  ;;  %v8494_v5 = vpop.permute.xlu1 %3141  ;;  %s6165_s3 = sshll.u32 %s10181_s7, 4  ;;  %s6166_s3 = int_to_ptr.hbm [resolvable:$true] %s6165_s3 }
 0x159   :  { %v3903_v57 = vld [vmem:[#allocation2 + $0x4c2] sm:$0xff]  ;;  %2371 = vst.msk [vmem:[#allocation3 + $0xc] sm:$0xf] %vm2369_vm6, %v8406_v20  ;;  %v6649_v20 = vor.u32 %v6983_v22, %v6648_v15  ;;  %5060 = vmatpush.bf16.msrb.mxu2 %v7013_v4  ;;  %v6661_v15 = vor.u32 %v6986_v14, %v6660_v56 }
 0x15a   :  { %v3967_v58 = vpack.c.bf16 %v3903_v57, %v3903_v57  ;;  %3331 = vst.msk [vmem:[#allocation3 + $0x4] sm:$0xf] %vm1920_vm5, %v8411_v9  ;;  %v432_v9 = vpop.f32.mrf.mxu0  ;;  %2191 = vrot.lane.b32.xlu2 %v8362_v46, %s7467_s23  ;;  %v997_v46 = vpack.c.bf16 %v933_v55, %v933_v55  ;;  %v1993_v57 = vld [vmem:[#allocation2 + $0xb0] sm:$0xff] }
 0x15b   :  { %3779 = vst.msk [vmem:[#allocation3 + $0x4] sm:$0xf] %vm2369_vm6, %v8357_v49  ;;  %v948_v49 = vld [vmem:[#allocation2 + $0x420] sm:$0xff]  ;;  %v433_v3 = vadd.f32 %v8247_v23, %v432_v9  ;;  %v8560_v22 = vpack.c.bf16 %v1993_v57, %v1993_v57  ;;  %v6672_v55 = vld [vmem:[#allocation3 + $0x290] sm:$0xf] }
 0x15c   :  { %4031 = vst.msk [vmem:[#allocation3 + $0x2d8] sm:$0xf] %vm1022_vm4, %v3967_v58  ;;  %v1012_v50 = vpack.c.bf16 %v948_v49, %v948_v49  ;;  %v8526_v30 = vpop.permute.xlu2 %1289  ;;  %v7401_v49 = vld [vmem:[#allocation2 + $0x52] sm:$0xff] }
 0x15d   :  { %687 = vst.msk [vmem:[#allocation2 + $0x191] sm:$0xff] %vm666_vm0, %v557_v12  ;;  %5061 = vmatpush.bf16.msrb.mxu2 %v7012_v17  ;;  %v1133_v12 = vld [vmem:[#allocation2 + $0x381] sm:$0xff]  ;;  %v559_v0 = vmax.f32 %v433_v3, 0.0  ;;  %v3910_v17 = vpack.c.bf16 %v7401_v49, %v7401_v49 }
 0x15e   :  { %2454 = vst.msk [vmem:[#allocation3 + $0xf4] sm:$0xf] %vm1022_vm4, %v621_v1  ;;  %1369 = vrot.lane.b32.xlu0 %v1196_v10, %s7466_s1  ;;  %v8530_v45 = vpop.permute.xlu0 %2694  ;;  %v1197_v1 = vpack.c.bf16 %v1133_v12, %v1133_v12 }
 0x15f   :  { %6819 = vmatmul.msk.bf16.gmra.mxu3 %vm666_vm0, %v6649_v20  ;;  %729 = vst.msk [vmem:[#allocation2 + $0x4d1] sm:$0xff] %vm666_vm0, %v599_v19  ;;  %v8551_v19 = vpack.c.bf16 %v1546_v25, %v1546_v25  ;;  %v623_v21 = vpack.c.bf16 %v559_v0, %v559_v0  ;;  %v935_v25 = vld [vmem:[#allocation2 + $0x330] sm:$0xff] }
 0x160   :  { %2496 = vst.msk [vmem:[#allocation3 + $0x2ec] sm:$0xf] %vm1022_vm4, %v663_v28  ;;  %v6907_v33 = vld [vmem:[#allocation3 + $0x8] sm:$0xf0] }
 0x161   :  { %1026 = vst.msk [vmem:[#allocation3 + $0x24] sm:$0xf] %vm1022_vm4, %v961_v29  ;;  %v6341_v61 = vor.u32 %v6907_v33, %v6340_v36  ;;  %5062 = vmatpush.bf16.msrb.mxu2 %v7011_v11  ;;  %v949_v36 = vld [vmem:[#allocation2 + $0x430] sm:$0xff]  ;;  %v2955_v33 = vld [vmem:[#allocation2 + $0xc0] sm:$0xff] }
 0x162   :  { %1475 = vst.msk [vmem:[#allocation3 + $0x24] sm:$0xf] %vm1471_vm3, %v8435_v63  ;;  %v434_v53 = vpop.f32.mrf.mxu0  ;;  %v8522_v63 = vpack.c.bf16 %v1097_v52, %v1097_v52  ;;  %1748 = vrot.lane.b32.xlu2 %v8551_v19, %s7463_s29  ;;  %v2956_v52 = vld [vmem:[#allocation2 + $0xd0] sm:$0xff] }
 0x163   :  { %1027 = vst.msk [vmem:[#allocation3 + $0x30] sm:$0xf] %vm1022_vm4, %v8122_v42  ;;  %4895 = vmatmul.bf16.vlgmr.msrb.gmra.mxu1 %v6341_v61  ;;  %v8524_v42 = vpop.permute.xlu1 %1389  ;;  %v8580_v61 = vpack.c.bf16 %v2955_v33, %v2955_v33  ;;  %v1099_v33 = vld [vmem:[#allocation2 + $0xe1] sm:$0xff] }
 0x164   :  { %v3862_v48 = vld [vmem:[#allocation2 + $0x192] sm:$0xff]  ;;  %1476 = vst.msk [vmem:[#allocation3 + $0x30] sm:$0xf] %vm1471_vm3, %v8437_v41  ;;  %v3908_v41 = vpack.c.bf16 %v3844_v47, %v3844_v47  ;;  %1299 = vrot.lane.b32.xlu1 %v8522_v63, %s7466_s1  ;;  %v8555_v4 = vpop.permute.xlu2 %1361 }
 0x165   :  { %v3926_v59 = vpack.c.bf16 %v3862_v48, %v3862_v48  ;;  %1077 = vst.msk [vmem:[#allocation3 + $0x288] sm:$0xf] %vm1022_vm4, %v1012_v50  ;;  %5063 = vmatpush.bf16.msrb.mxu2 %v7010_v60 }
 0x166   :  { %v3904_v51 = vld [vmem:[#allocation2 + $0x4d2] sm:$0xff]  ;;  %1526 = vst.msk [vmem:[#allocation3 + $0x288] sm:$0xf] %vm1471_vm3, %v8440_v44  ;;  %v622_v44 = vpack.c.bf16 %v558_v31, %v558_v31  ;;  %2706 = vrot.lane.b32.xlu0 %v8459_v54, %s7466_s1  ;;  %v435_v54 = vadd.f32 %v8247_v23, %v434_v53  ;;  %v8562_v24 = vpop.permute.xlu0 %2181  ;;  %v6906_v53 = vld [vmem:[#allocation3 + $0x4] sm:$0xf] }
 0x167   :  { %3990 = vst.msk [vmem:[#allocation3 + $0xec] sm:$0xf] %vm1022_vm4, %v3926_v59  ;;  %v3968_v34 = vpack.c.bf16 %v3904_v51, %v3904_v51  ;;  %v1149_v59 = vld [vmem:[#allocation2 + $0x4c1] sm:$0xff] }
 0x168   :  { %3971 = vst.msk [vmem:[#allocation3 + $0x8] sm:$0xf] %vm1022_vm4, %v3907_v2  ;;  %v560_v28 = vmax.f32 %v435_v54, 0.0  ;;  %v8587_v2 = vpack.c.bf16 %v1547_v37, %v1547_v37  ;;  %v1213_v3 = vpack.c.bf16 %v1149_v59, %v1149_v59  ;;  %v3850_v59 = vld [vmem:[#allocation2 + $0x92] sm:$0xff] }
 0x169   :  { %4032 = vst.msk [vmem:[#allocation3 + $0x2e4] sm:$0xf] %vm1022_vm4, %v3968_v34  ;;  %v8605_v34 = vpack.c.bf16 %v2956_v52, %v2956_v52 }
 0x16a   :  { %3972 = vst.msk [vmem:[#allocation3 + $0x14] sm:$0xf] %vm1022_vm4, %v3908_v41  ;;  %v437_v58 = vpop.f32.mrf.mxu0  ;;  %v624_v43 = vpack.c.bf16 %v560_v28, %v560_v28  ;;  %3155 = vrot.lane.b32.xlu2 %v8580_v61, %s7463_s29 }
 0x16b   :  { %688 = vst.msk [vmem:[#allocation2 + $0x1a1] sm:$0xff] %vm666_vm0, %v558_v31  ;;  %v8553_v62 = vpop.permute.xlu1 %2696  ;;  %v438_v11 = vadd.f32 %v8247_v23, %v437_v58 }
 0x16c   :  { %2455 = vst.msk [vmem:[#allocation3 + $0x100] sm:$0xf] %vm1022_vm4, %v622_v44  ;;  %1371 = vrot.lane.b32.xlu1 %v1197_v1, %s7466_s1 }
 0x16d   :  { %1924 = vst.msk [vmem:[#allocation3 + $0x24] sm:$0xf] %vm1920_vm5, %v8463_v7  ;;  %v3845_v7 = vld [vmem:[#allocation2 + $0x42] sm:$0xff]  ;;  %v561_v41 = vmax.f32 %v438_v11, 0.0 }
 0x16e   :  { %1925 = vst.msk [vmem:[#allocation3 + $0x30] sm:$0xf] %vm1920_vm5, %v8465_v13  ;;  %2193 = vrot.lane.b32.xlu0 %v8560_v22, %s7467_s23  ;;  %v3909_v29 = vpack.c.bf16 %v3845_v7, %v3845_v7  ;;  %v8589_v31 = vpop.permute.xlu0 %1738  ;;  %v1150_v7 = vld [vmem:[#allocation2 + $0x4d1] sm:$0xff] }
 0x16f   :  { %6820 = vmatmul.msk.bf16.gmra.mxu3 %vm666_vm0, %v6661_v15  ;;  %1062 = vst.msk [vmem:[#allocation3 + $0x1d4] sm:$0xf] %vm1022_vm4, %v997_v46  ;;  %v6348_v13 = vld [vmem:[#allocation3 + $0x8] sm:$0xf]  ;;  %v625_v15 = vpack.c.bf16 %v561_v41, %v561_v41 }
 0x170   :  { %1511 = vst.msk [vmem:[#allocation3 + $0x1d4] sm:$0xf] %vm1471_vm3, %v8469_v27  ;;  %v3898_v27 = vld [vmem:[#allocation2 + $0x452] sm:$0xff] }
 0x171   :  { %v6908_v20 = vld [vmem:[#allocation3 + $0x10] sm:$0xf0]  ;;  %689 = vst.msk [vmem:[#allocation2 + $0x1b1] sm:$0xff] %vm666_vm0, %v559_v0  ;;  %v3962_v48 = vpack.c.bf16 %v3898_v27, %v3898_v27 }
 0x172   :  { %v6349_v10 = vor.u32 %v6908_v20, %v6348_v13  ;;  %v3863_v9 = vld [vmem:[#allocation2 + $0x1a2] sm:$0xff]  ;;  %2456 = vst.msk [vmem:[#allocation3 + $0x10c] sm:$0xf] %vm1022_vm4, %v623_v21  ;;  %v439_v50 = vpop.f32.mrf.mxu0  ;;  %1403 = vrot.lane.b32.xlu2 %v1213_v3, %s7466_s1 }
 0x173   :  { %v3927_v32 = vpack.c.bf16 %v3863_v9, %v3863_v9  ;;  %3332 = vst.msk [vmem:[#allocation3 + $0x10] sm:$0xf] %vm1920_vm5, %v8494_v5  ;;  %v8582_v47 = vpop.permute.xlu1 %3591  ;;  %v8584_v5 = vpop.permute.xlu2 %3593 }
 0x174   :  { %6794 = vmatmul.msk.bf16.vlgmr.msrb.gmra.mxu0 %vm666_vm0, %v6349_v10  ;;  %3780 = vst.msk [vmem:[#allocation3 + $0x10] sm:$0xf] %vm2369_vm6, %v8500_v35  ;;  %v1013_v35 = vpack.c.bf16 %v949_v36, %v949_v36  ;;  %2708 = vrot.lane.b32.xlu1 %v8551_v19, %s7466_s1 }
 0x175   :  { %3991 = vst.msk [vmem:[#allocation3 + $0xf8] sm:$0xf] %vm1022_vm4, %v3927_v32 }
 0x176   :  { %3973 = vst.msk [vmem:[#allocation3 + $0x20] sm:$0xf] %vm1022_vm4, %v3909_v29  ;;  %1750 = vrot.lane.b32.xlu0 %v8587_v2, %s7463_s29 }
 0x177   :  { %3974 = vst.msk [vmem:[#allocation3 + $0x2c] sm:$0xf] %vm1022_vm4, %v3910_v17 }
 0x178   :  { %690 = vst.msk [vmem:[#allocation2 + $0x1c1] sm:$0xff] %vm666_vm0, %v560_v28  ;;  %v1214_v28 = vpack.c.bf16 %v1150_v7, %v1150_v7 }
 0x179   :  { %2457 = vst.msk [vmem:[#allocation3 + $0x118] sm:$0xf] %vm1022_vm4, %v624_v43 }
 0x17a   :  { %4026 = vst.msk [vmem:[#allocation3 + $0x29c] sm:$0xf] %vm1022_vm4, %v3962_v48  ;;  %v442_v44 = vpop.f32.mrf.mxu0  ;;  %v6684_v48 = vld [vmem:[#allocation3 + $0x2a8] sm:$0xf] }
 0x17b   :  { %1078 = vst.msk [vmem:[#allocation3 + $0x294] sm:$0xf] %vm1022_vm4, %v1013_v35  ;;  %v6342_v51 = vld [vmem:[#allocation3 + $0xc] sm:$0xf0]  ;;  %v8609_v56 = vpop.permute.xlu1 %2183  ;;  %v8611_v14 = vpop.permute.xlu2 %2698  ;;  %v443_v49 = vadd.f32 %v8247_v23, %v442_v44  ;;  %v8671_v35 = vpack.c.bf16 %v1099_v33, %v1099_v33 }
 0x17c   :  { %1527 = vst.msk [vmem:[#allocation3 + $0x294] sm:$0xf] %vm1471_vm3, %v8524_v42  ;;  %v6345_v60 = vor.u32 %v6906_v53, %v6342_v51  ;;  %v8615_v42 = vpop.permute.xlu0 %3145  ;;  %3603 = vrot.lane.b32.xlu1 %v8522_v63, %s7467_s23 }
 0x17d   :  { %1028 = vst.msk [vmem:[#allocation3 + $0x3c] sm:$0xf] %vm1022_vm4, %v8163_v18  ;;  %v6360_v12 = vld [vmem:[#allocation3 + $0x20] sm:$0xf]  ;;  %v440_v18 = vadd.f32 %v8247_v23, %v439_v50  ;;  %v563_v27 = vmax.f32 %v443_v49, 0.0 }
 0x17e   :  { %1477 = vst.msk [vmem:[#allocation3 + $0x3c] sm:$0xf] %vm1471_vm3, %v8526_v30  ;;  %5064 = vmatmul.bf16.vlgmr.msrb.gmra.mxu2 %v6345_v60  ;;  %v6911_v46 = vld [vmem:[#allocation3 + $0x28] sm:$0xf0]  ;;  %v534_v30 = vpop.f32.mrf.mxu2  ;;  %3157 = vrot.lane.b32.xlu0 %v8605_v34, %s7463_s29  ;;  %v3914_v60 = vpack.c.bf16 %v3850_v59, %v3850_v59  ;;  %v1549_v59 = vld [vmem:[#allocation2 + $0xf2] sm:$0xff] }
 0x17f   :  { %v3865_v57 = vld [vmem:[#allocation2 + $0x1c2] sm:$0xff]  ;;  %2884 = vst.msk [vmem:[#allocation3 + $0x1c] sm:$0xf] %vm1471_vm3, %v8530_v45  ;;  %v999_v45 = vpack.c.bf16 %v935_v25, %v935_v25  ;;  %v6361_v54 = vor.u32 %v6911_v46, %v6360_v12  ;;  %v562_v63 = vmax.f32 %v440_v18, 0.0  ;;  %v535_v21 = vadd.f32 %v8247_v23, %v534_v30 }
 0x180   :  { %v3929_v0 = vpack.c.bf16 %v3865_v57, %v3865_v57  ;;  %3333 = vst.msk [vmem:[#allocation3 + $0x1c] sm:$0xf] %vm1920_vm5, %v8496_v16  ;;  %v1098_v16 = vld [vmem:[#allocation2 + $0xd1] sm:$0xff] }
 0x181   :  { %v6989_v58 = vld [vmem:[#allocation3 + $0x298] sm:$0xf0]  ;;  %691 = vst.msk [vmem:[#allocation2 + $0x1f1] sm:$0xff] %vm666_vm0, %v561_v41  ;;  %v8636_v20 = vpack.c.bf16 %v1098_v16, %v1098_v16  ;;  %v600_v32 = vmax.f32 %v535_v21, 0.0  ;;  %v951_v57 = vld [vmem:[#allocation2 + $0x470] sm:$0xff] }
 0x182   :  { %3993 = vst.msk [vmem:[#allocation3 + $0x110] sm:$0xf] %vm1022_vm4, %v3929_v0  ;;  %v6673_v1 = vor.u32 %v6989_v58, %v6672_v55  ;;  %v444_v13 = vpop.f32.mrf.mxu0  ;;  %v2957_v55 = vld [vmem:[#allocation2 + $0xe0] sm:$0xff] }
 0x183   :  { %2458 = vst.msk [vmem:[#allocation3 + $0x124] sm:$0xf] %vm1022_vm4, %v625_v15  ;;  %v8638_v10 = vpop.permute.xlu1 %1740  ;;  %v8640_v9 = vpop.permute.xlu2 %2185  ;;  %1301 = vrot.lane.b32.xlu2 %v8636_v20, %s7466_s1  ;;  %v664_v17 = vpack.c.bf16 %v600_v32, %v600_v32  ;;  %v8694_v25 = vpack.c.bf16 %v2957_v55, %v2957_v55 }
 0x184   :  { %6795 = vmatmul.msk.bf16.gmra.mxu0 %vm666_vm0, %v6361_v54  ;;  %6821 = vmatmul.msk.bf16.gmra.mxu3 %vm666_vm0, %v6673_v1  ;;  %2885 = vst.msk [vmem:[#allocation3 + $0x28] sm:$0xf] %vm1471_vm3, %v8553_v62  ;;  %v8644_v29 = vpop.permute.xlu0 %1393  ;;  %v626_v62 = vpack.c.bf16 %v562_v63, %v562_v63 }
 0x185   :  { %1064 = vst.msk [vmem:[#allocation3 + $0x1ec] sm:$0xf] %vm1022_vm4, %v999_v45  ;;  %2195 = vrot.lane.b32.xlu1 %v8580_v61, %s7467_s23  ;;  %v1550_v45 = vld [vmem:[#allocation2 + $0x102] sm:$0xff] }
 0x186   :  { %1513 = vst.msk [vmem:[#allocation3 + $0x1ec] sm:$0xf] %vm1471_vm3, %v8555_v4  ;;  %1405 = vrot.lane.b32.xlu0 %v1214_v28, %s7466_s1  ;;  %v1134_v4 = vld [vmem:[#allocation2 + $0x391] sm:$0xff] }
 0x187   :  { %2372 = vst.msk [vmem:[#allocation3 + $0x18] sm:$0xf] %vm2369_vm6, %v8562_v24  ;;  %v1548_v24 = vld [vmem:[#allocation2 + $0xe2] sm:$0xff]  ;;  %v1198_v36 = vpack.c.bf16 %v1134_v4, %v1134_v4 }
 0x188   :  { %3975 = vst.msk [vmem:[#allocation3 + $0x38] sm:$0xf] %vm1022_vm4, %v8186_v26  ;;  %v627_v26 = vpack.c.bf16 %v563_v27, %v563_v27  ;;  %v8664_v50 = vpack.c.bf16 %v1548_v24, %v1548_v24  ;;  %v6696_v24 = vld [vmem:[#allocation3 + $0x2c0] sm:$0xf] }
 0x189   :  { %3976 = vst.msk [vmem:[#allocation3 + $0x44] sm:$0xf] %vm1022_vm4, %v8323_v8 }
 0x18a   :  { %692 = vst.msk [vmem:[#allocation2 + $0x201] sm:$0xff] %vm666_vm0, %v562_v63  ;;  %v447_v37 = vpop.f32.mrf.mxu0  ;;  %v900_v63 = vld [vmem:[#allocation2 + $0x60] sm:$0xff] }
 0x18b   :  { %2459 = vst.msk [vmem:[#allocation3 + $0x130] sm:$0xf] %vm1022_vm4, %v626_v62  ;;  %v8666_v8 = vpop.permute.xlu1 %3147  ;;  %v8668_v43 = vpop.permute.xlu2 %1742  ;;  %1373 = vrot.lane.b32.xlu2 %v1198_v36, %s7466_s1  ;;  %v448_v15 = vadd.f32 %v8247_v23, %v447_v37 }
 0x18c   :  { %3781 = vst.msk [vmem:[#allocation3 + $0x1c] sm:$0xf] %vm2369_vm6, %v8582_v47  ;;  %v8673_v11 = vpop.permute.xlu0 %1291  ;;  %v6992_v47 = vld [vmem:[#allocation3 + $0x2b0] sm:$0xf0] }
 0x18d   :  { %1926 = vst.msk [vmem:[#allocation3 + $0x3c] sm:$0xf] %vm1920_vm5, %v8589_v31  ;;  %v445_v31 = vadd.f32 %v8247_v23, %v444_v13  ;;  %1752 = vrot.lane.b32.xlu1 %v8664_v50, %s7463_s29  ;;  %v6685_v41 = vor.u32 %v6992_v47, %v6684_v48  ;;  %v1015_v23 = vpack.c.bf16 %v951_v57, %v951_v57  ;;  %v565_v1 = vmax.f32 %v448_v15, 0.0 }
 0x18e   :  { %730 = vst.msk [vmem:[#allocation2 + $0x4e1] sm:$0xff] %vm666_vm0, %v600_v32  ;;  %1303 = vrot.lane.b32.xlu0 %v8671_v35, %s7466_s1  ;;  %v6352_v30 = vld [vmem:[#allocation3 + $0x18] sm:$0xf]  ;;  %v8726_v32 = vld [vmem:[%s10176_s2] ss:$0 sm:$0xff] }
 0x18f   :  { %v6372_v52 = vld [vmem:[#allocation3 + $0x38] sm:$0xf]  ;;  %2497 = vst.msk [vmem:[#allocation3 + $0x2f8] sm:$0xf] %vm1022_vm4, %v664_v17  ;;  %v564_v44 = vmax.f32 %v445_v31, 0.0  ;;  %v629_v13 = vpack.c.bf16 %v565_v1, %v565_v1  ;;  %v952_v31 = vld [vmem:[#allocation2 + $0x480] sm:$0xff] }
 0x190   :  { %v6914_v53 = vld [vmem:[#allocation3 + $0x40] sm:$0xf0]  ;;  %693 = vst.msk [vmem:[#allocation2 + $0x211] sm:$0xff] %vm666_vm0, %v563_v27  ;;  %v6995_v17 = vld [vmem:[#allocation3 + $0x2c8] sm:$0xf0]  ;;  %v964_v27 = vpack.c.bf16 %v900_v63, %v900_v63 }
 0x191   :  { %2460 = vst.msk [vmem:[#allocation3 + $0x13c] sm:$0xf] %vm1022_vm4, %v627_v26  ;;  %v6373_v51 = vor.u32 %v6914_v53, %v6372_v52  ;;  %v628_v0 = vpack.c.bf16 %v564_v44, %v564_v44  ;;  %v6697_v47 = vor.u32 %v6995_v17, %v6696_v24  ;;  %v1136_v53 = vld [vmem:[#allocation2 + $0x3d1] sm:$0xff] }
 0x192   :  { %2373 = vst.msk [vmem:[#allocation3 + $0x24] sm:$0xf] %vm2369_vm6, %v8609_v56  ;;  %v449_v3 = vpop.f32.mrf.mxu0  ;;  %v1200_v55 = vpack.c.bf16 %v1136_v53, %v1136_v53  ;;  %v937_v24 = vld [vmem:[#allocation2 + $0x350] sm:$0xff] }
 0x193   :  { %2886 = vst.msk [vmem:[#allocation3 + $0x34] sm:$0xf] %vm1471_vm3, %v8611_v14  ;;  %v8696_v56 = vpop.permute.xlu1 %1395  ;;  %v8698_v14 = vpop.permute.xlu2 %3149  ;;  %3605 = vrot.lane.b32.xlu2 %v8636_v20, %s7467_s23  ;;  %v6909_v16 = vld [vmem:[#allocation3 + $0x1c] sm:$0xf]  ;;  %v8720_v20 = vpack.c.bf16 %v1550_v45, %v1550_v45  ;;  %v450_v49 = vadd.f32 %v8726_v32, %v449_v3  ;;  %v6998_v45 = vld [vmem:[#allocation3 + $0x2e0] sm:$0xf0] }
 0x194   :  { %6796 = vmatmul.msk.bf16.gmra.mxu0 %vm666_vm0, %v6373_v51  ;;  %6822 = vmatmul.msk.bf16.gmra.mxu3 %vm666_vm0, %v6685_v41  ;;  %3334 = vst.msk [vmem:[#allocation3 + $0x28] sm:$0xf] %vm1920_vm5, %v8615_v42  ;;  %v8703_v42 = vpop.permute.xlu0 %1363  ;;  %v1102_v51 = vld [vmem:[#allocation2 + $0x111] sm:$0xff] }
 0x195   :  { %v3905_v12 = vld [vmem:[#allocation2 + $0x4e2] sm:$0xff]  ;;  %3782 = vst.msk [vmem:[#allocation3 + $0x28] sm:$0xf] %vm2369_vm6, %v8584_v5  ;;  %3159 = vrot.lane.b32.xlu1 %v8694_v25, %s7463_s29  ;;  %v566_v48 = vmax.f32 %v450_v49, 0.0  ;;  %v8756_v3 = vpack.c.bf16 %v1102_v51, %v1102_v51  ;;  %v2958_v53 = vld [vmem:[#allocation2 + $0xf0] sm:$0xff] }
 0x196   :  { %v3969_v46 = vpack.c.bf16 %v3905_v12, %v3905_v12  ;;  %3977 = vst.msk [vmem:[#allocation3 + $0x50] sm:$0xf] %vm1022_vm4, %v8461_v6  ;;  %2712 = vrot.lane.b32.xlu0 %v8664_v50, %s7466_s1  ;;  %v1100_v6 = vld [vmem:[#allocation2 + $0xf1] sm:$0xff]  ;;  %v1137_v49 = vld [vmem:[#allocation2 + $0x3e1] sm:$0xff] }
 0x197   :  { %v3868_v18 = vld [vmem:[#allocation2 + $0x212] sm:$0xff]  ;;  %3978 = vst.msk [vmem:[#allocation3 + $0x5c] sm:$0xf] %vm1022_vm4, %v3914_v60  ;;  %v8716_v21 = vpack.c.bf16 %v1100_v6, %v1100_v6  ;;  %v936_v60 = vld [vmem:[#allocation2 + $0x340] sm:$0xff] }
 0x198   :  { %4033 = vst.msk [vmem:[#allocation3 + $0x2f0] sm:$0xf] %vm1022_vm4, %v3969_v46  ;;  %v3932_v5 = vpack.c.bf16 %v3868_v18, %v3868_v18  ;;  %v8762_v46 = vpack.c.bf16 %v1549_v59, %v1549_v59  ;;  %v1000_v15 = vpack.c.bf16 %v936_v60, %v936_v60  ;;  %v1138_v18 = vld [vmem:[#allocation2 + $0x3f1] sm:$0xff] }
 0x199   :  { %694 = vst.msk [vmem:[#allocation2 + $0x221] sm:$0xff] %vm666_vm0, %v564_v44  ;;  %v6910_v58 = vld [vmem:[#allocation3 + $0x20] sm:$0xf0]  ;;  %v1202_v6 = vpack.c.bf16 %v1138_v18, %v1138_v18 }
 0x19a   :  { %3996 = vst.msk [vmem:[#allocation3 + $0x134] sm:$0xf] %vm1022_vm4, %v3932_v5  ;;  %v6353_v54 = vor.u32 %v6910_v58, %v6352_v30  ;;  %v452_v28 = vpop.f32.mrf.mxu0  ;;  %v953_v5 = vld [vmem:[#allocation2 + $0x490] sm:$0xff]  ;;  %v6708_v58 = vld [vmem:[#allocation3 + $0x2d8] sm:$0xf] }
 0x19b   :  { %2461 = vst.msk [vmem:[#allocation3 + $0x148] sm:$0xf] %vm1022_vm4, %v628_v0  ;;  %v8729_v4 = vpop.permute.xlu1 %1293  ;;  %2710 = vrot.lane.b32.xlu2 %v8587_v2, %s7466_s1  ;;  %v453_v44 = vadd.f32 %v8726_v32, %v452_v28  ;;  %v1101_v0 = vld [vmem:[#allocation2 + $0x101] sm:$0xff]  ;;  %v6709_v28 = vor.u32 %v6998_v45, %v6708_v58 }
 0x19c   :  { %2374 = vst.msk [vmem:[#allocation3 + $0x30] sm:$0xf] %vm2369_vm6, %v8640_v9  ;;  %4900 = vmatmul.bf16.gmra.mxu1 %v6353_v54  ;;  %v6354_v7 = vld [vmem:[#allocation3 + $0x24] sm:$0xf0]  ;;  %v8731_v9 = vpop.permute.xlu2 %1397  ;;  %v8735_v36 = vpop.permute.xlu0 %2700 }
 0x19d   :  { %1080 = vst.msk [vmem:[#allocation3 + $0x2ac] sm:$0xf] %vm1022_vm4, %v1015_v23  ;;  %v6357_v62 = vor.u32 %v6909_v16, %v6354_v7  ;;  %v6384_v33 = vld [vmem:[#allocation3 + $0x50] sm:$0xf]  ;;  %1305 = vrot.lane.b32.xlu1 %v8716_v21, %s7466_s1  ;;  %v1017_v7 = vpack.c.bf16 %v953_v5, %v953_v5 }
 0x19e   :  { %1529 = vst.msk [vmem:[#allocation3 + $0x2ac] sm:$0xf] %vm1471_vm3, %v8644_v29  ;;  %v6917_v37 = vld [vmem:[#allocation3 + $0x58] sm:$0xf0]  ;;  %1756 = vrot.lane.b32.xlu0 %v8720_v20, %s7463_s29 }
 0x19f   :  { %5069 = vmatmul.bf16.gmra.mxu2 %v6357_v62  ;;  %695 = vst.msk [vmem:[#allocation2 + $0x231] sm:$0xff] %vm666_vm0, %v565_v1  ;;  %v6385_v52 = vor.u32 %v6917_v37, %v6384_v33  ;;  %v8787_v1 = vpack.c.bf16 %v1101_v0, %v1101_v0  ;;  %v1201_v37 = vpack.c.bf16 %v1137_v49, %v1137_v49  ;;  %v6926_v49 = vld [vmem:[#allocation3 + $0xa0] sm:$0xf0] }
 0x1a0   :  { %v3869_v26 = vld [vmem:[#allocation2 + $0x222] sm:$0xff]  ;;  %2462 = vst.msk [vmem:[#allocation3 + $0x154] sm:$0xf] %vm1022_vm4, %v629_v13 }
 0x1a1   :  { %v3933_v29 = vpack.c.bf16 %v3869_v26, %v3869_v26  ;;  %3335 = vst.msk [vmem:[#allocation3 + $0x34] sm:$0xf] %vm1920_vm5, %v8666_v8  ;;  %v630_v8 = vpack.c.bf16 %v566_v48, %v566_v48 }
 0x1a2   :  { %1029 = vst.msk [vmem:[#allocation3 + $0x48] sm:$0xf] %vm1022_vm4, %v964_v27  ;;  %v454_v41 = vpop.f32.mrf.mxu0 }
 0x1a3   :  { %3997 = vst.msk [vmem:[#allocation3 + $0x140] sm:$0xf] %vm1022_vm4, %v3933_v29  ;;  %v8758_v12 = vpop.permute.xlu1 %1365  ;;  %1754 = vrot.lane.b32.xlu2 %v8762_v46, %s7463_s29  ;;  %v455_v54 = vadd.f32 %v8726_v32, %v454_v41  ;;  %v938_v29 = vld [vmem:[#allocation2 + $0x360] sm:$0xff] }
 0x1a4   :  { %6797 = vmatmul.msk.bf16.gmra.mxu0 %vm666_vm0, %v6385_v52  ;;  %6823 = vmatmul.msk.bf16.gmra.mxu3 %vm666_vm0, %v6697_v47  ;;  %1478 = vst.msk [vmem:[#allocation3 + $0x48] sm:$0xf] %vm1471_vm3, %v8673_v11  ;;  %v1016_v11 = vpack.c.bf16 %v952_v31, %v952_v31  ;;  %v8764_v57 = vpop.permute.xlu0 %3595  ;;  %v1002_v47 = vpack.c.bf16 %v938_v29, %v938_v29  ;;  %v1139_v31 = vld [vmem:[#allocation2 + $0x401] sm:$0xff] }
 0x1a5   :  { %1927 = vst.msk [vmem:[#allocation3 + $0x48] sm:$0xf] %vm1920_vm5, %v8638_v10  ;;  %1377 = vrot.lane.b32.xlu1 %v1200_v55, %s7466_s1  ;;  %v8769_v10 = vpop.permute.xlu2 %1367  ;;  %v568_v62 = vmax.f32 %v455_v54, 0.0 }
 0x1a6   :  { %3979 = vst.msk [vmem:[#allocation3 + $0x68] sm:$0xf] %vm1022_vm4, %v8551_v19  ;;  %1309 = vrot.lane.b32.xlu0 %v8756_v3, %s7466_s1  ;;  %v567_v19 = vmax.f32 %v453_v44, 0.0  ;;  %v6923_v44 = vld [vmem:[#allocation3 + $0x88] sm:$0xf0] }
 0x1a7   :  { %3980 = vst.msk [vmem:[#allocation3 + $0x74] sm:$0xf] %vm1022_vm4, %v8587_v2  ;;  %v632_v33 = vpack.c.bf16 %v568_v62, %v568_v62 }
 0x1a8   :  { %696 = vst.msk [vmem:[#allocation2 + $0x241] sm:$0xff] %vm666_vm0, %v566_v48  ;;  %v631_v2 = vpack.c.bf16 %v567_v19, %v567_v19  ;;  %v1001_v48 = vpack.c.bf16 %v937_v24, %v937_v24 }
 0x1a9   :  { %2463 = vst.msk [vmem:[#allocation3 + $0x160] sm:$0xf] %vm1022_vm4, %v630_v8  ;;  %v8840_v8 = vpack.c.bf16 %v2958_v53, %v2958_v53  ;;  %v1106_v53 = vld [vmem:[#allocation2 + $0x171] sm:$0xff] }
 0x1aa   :  { %1081 = vst.msk [vmem:[#allocation3 + $0x2b8] sm:$0xf] %vm1022_vm4, %v1016_v11  ;;  %v457_v23 = vpop.f32.mrf.mxu0 }
 0x1ab   :  { %1530 = vst.msk [vmem:[#allocation3 + $0x2b8] sm:$0xf] %vm1471_vm3, %v8696_v56  ;;  %v8783_v30 = vpop.permute.xlu1 %3597  ;;  %1307 = vrot.lane.b32.xlu2 %v8787_v1, %s7466_s1  ;;  %v458_v52 = vadd.f32 %v8726_v32, %v457_v23  ;;  %v1105_v23 = vld [vmem:[#allocation2 + $0x161] sm:$0xff] }
 0x1ac   :  { %1065 = vst.msk [vmem:[#allocation3 + $0x1f8] sm:$0xf] %vm1022_vm4, %v1000_v15  ;;  %v8789_v56 = vpop.permute.xlu0 %2187  ;;  %v8865_v58 = vpack.c.bf16 %v1105_v23, %v1105_v23 }
 0x1ad   :  { %1514 = vst.msk [vmem:[#allocation3 + $0x1f8] sm:$0xf] %vm1471_vm3, %v8703_v42  ;;  %v6396_v63 = vld [vmem:[#allocation3 + $0x68] sm:$0xf]  ;;  %3609 = vrot.lane.b32.xlu1 %v8716_v21, %s7467_s23  ;;  %v8801_v42 = vpop.permute.xlu2 %2704  ;;  %v1551_v21 = vld [vmem:[#allocation2 + $0x112] sm:$0xff]  ;;  %v569_v59 = vmax.f32 %v458_v52, 0.0 }
 0x1ae   :  { %697 = vst.msk [vmem:[#allocation2 + $0x251] sm:$0xff] %vm666_vm0, %v567_v19  ;;  %v6920_v16 = vld [vmem:[#allocation3 + $0x70] sm:$0xf0]  ;;  %1381 = vrot.lane.b32.xlu0 %v1202_v6, %s7466_s1  ;;  %v8812_v17 = vpack.c.bf16 %v1551_v21, %v1551_v21  ;;  %v6720_v19 = vld [vmem:[#allocation3 + $0x2f0] sm:$0xf] }
 0x1af   :  { %2464 = vst.msk [vmem:[#allocation3 + $0x16c] sm:$0xf] %vm1022_vm4, %v631_v2  ;;  %v6397_v13 = vor.u32 %v6920_v16, %v6396_v63  ;;  %v633_v41 = vpack.c.bf16 %v569_v59, %v569_v59  ;;  %v1554_v63 = vld [vmem:[#allocation2 + $0x162] sm:$0xff] }
 0x1b0   :  { %1030 = vst.msk [vmem:[#allocation3 + $0x54] sm:$0xf] %vm1022_vm4, %v8352_v38  ;;  %v3906_v38 = vld [vmem:[#allocation2 + $0x4f2] sm:$0xff]  ;;  %v8896_v21 = vpack.c.bf16 %v1554_v63, %v1554_v63 }
 0x1b1   :  { %1479 = vst.msk [vmem:[#allocation3 + $0x54] sm:$0xf] %vm1471_vm3, %v8729_v4  ;;  %v6432_v63 = vld [vmem:[#allocation3 + $0xb0] sm:$0xf] }
 0x1b2   :  { %1928 = vst.msk [vmem:[#allocation3 + $0x54] sm:$0xf] %vm1920_vm5, %v8668_v43 }
 0x1b3   :  { %1082 = vst.msk [vmem:[#allocation3 + $0x2c4] sm:$0xf] %vm1022_vm4, %v1017_v7  ;;  %v8814_v43 = vpop.permute.xlu1 %2702  ;;  %1379 = vrot.lane.b32.xlu2 %v1201_v37, %s7466_s1  ;;  %v3858_v37 = vld [vmem:[#allocation2 + $0x132] sm:$0xff] }
 0x1b4   :  { %6798 = vmatmul.msk.bf16.gmra.mxu0 %vm666_vm0, %v6397_v13  ;;  %6824 = vmatmul.msk.bf16.gmra.mxu3 %vm666_vm0, %v6709_v28  ;;  %1531 = vst.msk [vmem:[#allocation3 + $0x2c4] sm:$0xf] %vm1471_vm3, %v8731_v9  ;;  %v8818_v26 = vpop.permute.xlu0 %3151  ;;  %v3970_v9 = vpack.c.bf16 %v3906_v38, %v3906_v38  ;;  %v8892_v38 = vpop.f32.mrf.mxu3  ;;  %v3922_v52 = vpack.c.bf16 %v3858_v37, %v3858_v37  ;;  %v941_v37 = vld [vmem:[#allocation2 + $0x390] sm:$0xff] }
 0x1b5   :  { %v3872_v4 = vld [vmem:[#allocation2 + $0x252] sm:$0xff]  ;;  %2887 = vst.msk [vmem:[#allocation3 + $0x40] sm:$0xf] %vm1471_vm3, %v8735_v36  ;;  %1758 = vrot.lane.b32.xlu1 %v8812_v17, %s7463_s29  ;;  %v459_v36 = vpop.f32.mrf.mxu0 }
 0x1b6   :  { %v3936_v27 = vpack.c.bf16 %v3872_v4, %v3872_v4  ;;  %3336 = vst.msk [vmem:[#allocation3 + $0x40] sm:$0xf] %vm1920_vm5, %v8698_v14  ;;  %3607 = vrot.lane.b32.xlu0 %v8671_v35, %s7467_s23  ;;  %v8830_v14 = vpop.permute.xlu2 %3599  ;;  %v1203_v35 = vpack.c.bf16 %v1139_v31, %v1139_v31  ;;  %v460_v55 = vadd.f32 %v8726_v32, %v459_v36 }
 0x1b7   :  { %3981 = vst.msk [vmem:[#allocation3 + $0x80] sm:$0xf] %vm1022_vm4, %v8664_v50  ;;  %v1553_v50 = vld [vmem:[#allocation2 + $0x152] sm:$0xff] }
 0x1b8   :  { %4000 = vst.msk [vmem:[#allocation3 + $0x164] sm:$0xf] %vm1022_vm4, %v3936_v27  ;;  %v8835_v51 = vpack.c.bf16 %v1553_v50, %v1553_v50  ;;  %v570_v6 = vmax.f32 %v460_v55, 0.0  ;;  %v6364_v27 = vld [vmem:[#allocation3 + $0x30] sm:$0xf] }
 0x1b9   :  { %698 = vst.msk [vmem:[#allocation2 + $0x261] sm:$0xff] %vm666_vm0, %v568_v62  ;;  %v954_v62 = vld [vmem:[#allocation2 + $0x4a0] sm:$0xff]  ;;  %v939_v55 = vld [vmem:[#allocation2 + $0x370] sm:$0xff] }
 0x1ba   :  { %2465 = vst.msk [vmem:[#allocation3 + $0x178] sm:$0xf] %vm1022_vm4, %v632_v33  ;;  %v634_v54 = vpack.c.bf16 %v570_v6, %v570_v6  ;;  %v1018_v33 = vpack.c.bf16 %v954_v62, %v954_v62 }
 0x1bb   :  { %4034 = vst.msk [vmem:[#allocation3 + $0x2fc] sm:$0xf] %vm1022_vm4, %v3970_v9  ;;  %v8846_v11 = vpop.permute.xlu1 %2189  ;;  %3161 = vrot.lane.b32.xlu2 %v8840_v8, %s7463_s29 }
 0x1bc   :  { %1066 = vst.msk [vmem:[#allocation3 + $0x204] sm:$0xf] %vm1022_vm4, %v1001_v48 }
 0x1bd   :  { %1515 = vst.msk [vmem:[#allocation3 + $0x204] sm:$0xf] %vm1471_vm3, %v8758_v12  ;;  %1383 = vrot.lane.b32.xlu1 %v1203_v35, %s7466_s1  ;;  %v462_v18 = vpop.f32.mrf.mxu0  ;;  %v955_v35 = vld [vmem:[#allocation2 + $0x4b0] sm:$0xff] }
 0x1be   :  { %1067 = vst.msk [vmem:[#allocation3 + $0x210] sm:$0xf] %vm1022_vm4, %v1002_v47  ;;  %v6408_v60 = vld [vmem:[#allocation3 + $0x80] sm:$0xf]  ;;  %1762 = vrot.lane.b32.xlu0 %v8835_v51, %s7463_s29  ;;  %v2192_v2 = vpop.permute.xlu2 %2191  ;;  %v463_v45 = vadd.f32 %v8726_v32, %v462_v18  ;;  %v1003_v18 = vpack.c.bf16 %v939_v55, %v939_v55 }
 0x1bf   :  { %1516 = vst.msk [vmem:[#allocation3 + $0x210] sm:$0xf] %vm1471_vm3, %v8769_v10  ;;  %v6409_v0 = vor.u32 %v6923_v44, %v6408_v60  ;;  %v8923_v44 = vpop.f32.mrf.mxu3 }
 0x1c0   :  { %v3873_v15 = vld [vmem:[#allocation2 + $0x262] sm:$0xff]  ;;  %3783 = vst.msk [vmem:[#allocation3 + $0x34] sm:$0xf] %vm2369_vm6, %v8764_v57  ;;  %v8854_v12 = vpop.permute.xlu0 %1399 }
 0x1c1   :  { %v3937_v10 = vpack.c.bf16 %v3873_v15, %v3873_v15  ;;  %699 = vst.msk [vmem:[#allocation2 + $0x291] sm:$0xff] %vm666_vm0, %v569_v59  ;;  %v1556_v59 = vld [vmem:[#allocation2 + $0x182] sm:$0xff] }
 0x1c2   :  { %v7001_v5 = vld [vmem:[#allocation3 + $0x2f8] sm:$0xf0]  ;;  %2466 = vst.msk [vmem:[#allocation3 + $0x184] sm:$0xf] %vm1022_vm4, %v633_v41  ;;  %v8918_v41 = vpack.c.bf16 %v1106_v53, %v1106_v53  ;;  %v8920_v60 = vpack.c.bf16 %v1556_v59, %v1556_v59 }
 0x1c3   :  { %4001 = vst.msk [vmem:[#allocation3 + $0x170] sm:$0xf] %vm1022_vm4, %v3937_v10  ;;  %v6721_v57 = vor.u32 %v7001_v5, %v6720_v19  ;;  %2197 = vrot.lane.b32.xlu2 %v8605_v34, %s7467_s23  ;;  %v2960_v5 = vld [vmem:[#allocation2 + $0x110] sm:$0xff] }
 0x1c4   :  { %6799 = vmatmul.msk.bf16.gmra.mxu0 %vm666_vm0, %v6409_v0  ;;  %3784 = vst.msk [vmem:[#allocation3 + $0x40] sm:$0xf] %vm2369_vm6, %v8783_v30 }
 0x1c5   :  { %6825 = vmatmul.msk.bf16.gmra.mxu3 %vm666_vm0, %v6721_v57  ;;  %2889 = vst.msk [vmem:[#allocation3 + $0x58] sm:$0xf] %vm1471_vm3, %v8801_v42  ;;  %2714 = vrot.lane.b32.xlu1 %v8762_v46, %s7466_s1  ;;  %v464_v42 = vpop.f32.mrf.mxu0  ;;  %v1108_v57 = vld [vmem:[#allocation2 + $0x191] sm:$0xff] }
 0x1c6   :  { %3338 = vst.msk [vmem:[#allocation3 + $0x58] sm:$0xf] %vm1920_vm5, %v8267_v39  ;;  %1315 = vrot.lane.b32.xlu0 %v8865_v58, %s7466_s1  ;;  %v8882_v39 = vpop.permute.xlu1 %1746  ;;  %v8885_v30 = vpop.permute.xlu2 %1748  ;;  %v465_v4 = vadd.f32 %v8726_v32, %v464_v42 }
 0x1c7   :  { %3786 = vst.msk [vmem:[#allocation3 + $0x58] sm:$0xf] %vm2369_vm6, %v8269_v40  ;;  %v571_v40 = vmax.f32 %v463_v45, 0.0  ;;  %v6912_v16 = vld [vmem:[#allocation3 + $0x34] sm:$0xf]  ;;  %v956_v45 = vld [vmem:[#allocation2 + $0x4c0] sm:$0xff] }
 0x1c8   :  { %2375 = vst.msk [vmem:[#allocation3 + $0x3c] sm:$0xf] %vm2369_vm6, %v8789_v56  ;;  %v8887_v46 = vpop.permute.xlu0 %1297  ;;  %v1104_v56 = vld [vmem:[#allocation2 + $0x151] sm:$0xff] }
 0x1c9   :  { %3983 = vst.msk [vmem:[#allocation3 + $0x98] sm:$0xf] %vm1022_vm4, %v8720_v20  ;;  %v635_v28 = vpack.c.bf16 %v571_v40, %v571_v40  ;;  %v1168_v24 = vpack.c.bf16 %v1104_v56, %v1104_v56  ;;  %v1020_v56 = vpack.c.bf16 %v956_v45, %v956_v45 }
 0x1ca   :  { %700 = vst.msk [vmem:[#allocation2 + $0x2a1] sm:$0xff] %vm666_vm0, %v570_v6  ;;  %v1555_v6 = vld [vmem:[#allocation2 + $0x172] sm:$0xff] }
 0x1cb   :  { %2467 = vst.msk [vmem:[#allocation3 + $0x190] sm:$0xf] %vm1022_vm4, %v634_v54  ;;  %v6366_v7 = vld [vmem:[#allocation3 + $0x3c] sm:$0xf0]  ;;  %1313 = vrot.lane.b32.xlu2 %v1168_v24, %s7466_s1  ;;  %v8943_v54 = vpack.c.bf16 %v2960_v5, %v2960_v5 }
 0x1cc   :  { %2888 = vst.msk [vmem:[#allocation3 + $0x4c] sm:$0xf] %vm1471_vm3, %v8814_v43  ;;  %v6369_v13 = vor.u32 %v6912_v16, %v6366_v7  ;;  %v8957_v16 = vpop.f32.mrf.mxu3  ;;  %v940_v7 = vld [vmem:[#allocation2 + $0x380] sm:$0xff] }
 0x1cd   :  { %3337 = vst.msk [vmem:[#allocation3 + $0x4c] sm:$0xf] %vm1920_vm5, %v8818_v26  ;;  %1764 = vrot.lane.b32.xlu1 %v8896_v21, %s7463_s29  ;;  %v1107_v24 = vld [vmem:[#allocation2 + $0x181] sm:$0xff] }
 0x1ce   :  { %3785 = vst.msk [vmem:[#allocation3 + $0x4c] sm:$0xf] %vm2369_vm6, %v8830_v14  ;;  %5074 = vmatmul.bf16.gmra.mxu2 %v6369_v13  ;;  %2199 = vrot.lane.b32.xlu0 %v8694_v25, %s7467_s23  ;;  %v1402_v29 = vpop.permute.xlu1 %1401  ;;  %v572_v14 = vmax.f32 %v465_v4, 0.0  ;;  %v8911_v50 = vpop.permute.xlu2 %3155  ;;  %v6378_v19 = vld [vmem:[#allocation3 + $0x54] sm:$0xf0]  ;;  %v2513_v5 = vld [vmem:[#allocation2 + $0x122] sm:$0xff] }
 0x1cf   :  { %v6913_v43 = vld [vmem:[#allocation3 + $0x38] sm:$0xf0]  ;;  %701 = vst.msk [vmem:[#allocation2 + $0x2b1] sm:$0xff] %vm666_vm0, %v571_v40  ;;  %v1557_v4 = vld [vmem:[#allocation2 + $0x192] sm:$0xff]  ;;  %v2577_v45 = vpack.c.bf16 %v2513_v5, %v2513_v5 }
 0x1d0   :  { %v6420_v26 = vld [vmem:[#allocation3 + $0x98] sm:$0xf]  ;;  %v6365_v9 = vor.u32 %v6913_v43, %v6364_v27  ;;  %2468 = vst.msk [vmem:[#allocation3 + $0x19c] sm:$0xf] %vm1022_vm4, %v635_v28  ;;  %v1370_v47 = vpop.permute.xlu0 %1369  ;;  %v636_v31 = vpack.c.bf16 %v572_v14, %v572_v14  ;;  %v2959_v27 = vld [vmem:[#allocation2 + $0x100] sm:$0xff]  ;;  %v8970_v43 = vpack.c.bf16 %v1107_v24, %v1107_v24 }
 0x1d1   :  { %v3875_v32 = vld [vmem:[#allocation2 + $0x2a2] sm:$0xff]  ;;  %2376 = vst.msk [vmem:[#allocation3 + $0x48] sm:$0xf] %vm2369_vm6, %v8846_v11  ;;  %v6421_v36 = vor.u32 %v6926_v49, %v6420_v26  ;;  %v1019_v11 = vpack.c.bf16 %v955_v35, %v955_v35  ;;  %v1004_v49 = vpack.c.bf16 %v940_v7, %v940_v7  ;;  %v3878_v35 = vld [vmem:[#allocation2 + $0x2d2] sm:$0xff]  ;;  %v9042_v7 = vld [vmem:[%s10178_s4] ss:$0 sm:$0xff] }
 0x1d2   :  { %v3939_v48 = vpack.c.bf16 %v3875_v32, %v3875_v32  ;;  %4905 = vmatmul.bf16.gmra.mxu1 %v6365_v9  ;;  %2377 = vst.msk [vmem:[#allocation3 + $0x54] sm:$0xf] %vm2369_vm6, %v2192_v2  ;;  %v1109_v32 = vld [vmem:[#allocation2 + $0x1a1] sm:$0xff]  ;;  %v6468_v5 = vld [vmem:[#allocation3 + $0xf8] sm:$0xf] }
 0x1d3   :  { %1083 = vst.msk [vmem:[#allocation3 + $0x2d0] sm:$0xf] %vm1022_vm4, %v1018_v33  ;;  %2716 = vrot.lane.b32.xlu2 %v8720_v20, %s7466_s1  ;;  %v8972_v33 = vpack.c.bf16 %v2959_v27, %v2959_v27 }
 0x1d4   :  { %6800 = vmatmul.msk.bf16.gmra.mxu0 %vm666_vm0, %v6421_v36  ;;  %4003 = vst.msk [vmem:[#allocation3 + $0x188] sm:$0xf] %vm1022_vm4, %v3939_v48  ;;  %v1005_v36 = vpack.c.bf16 %v941_v37, %v941_v37  ;;  %v1559_v48 = vld [vmem:[#allocation2 + $0x1b2] sm:$0xff] }
 0x1d5   :  { %1532 = vst.msk [vmem:[#allocation3 + $0x2d0] sm:$0xf] %vm1471_vm3, %v8854_v12  ;;  %1317 = vrot.lane.b32.xlu1 %v8918_v41, %s7466_s1  ;;  %v6915_v15 = vld [vmem:[#allocation3 + $0x4c] sm:$0xf] }
 0x1d6   :  { %3986 = vst.msk [vmem:[#allocation3 + $0xbc] sm:$0xf] %vm1022_vm4, %v3922_v52  ;;  %1768 = vrot.lane.b32.xlu0 %v8920_v60, %s7463_s29  ;;  %v1300_v12 = vpop.permute.xlu1 %1299  ;;  %v1404_v2 = vpop.permute.xlu2 %1403  ;;  %v6381_v23 = vor.u32 %v6915_v15, %v6378_v19  ;;  %v1173_v52 = vpack.c.bf16 %v1109_v32, %v1109_v32  ;;  %v3879_v15 = vld [vmem:[#allocation2 + $0x2e2] sm:$0xff]  ;;  %v957_v19 = vld [vmem:[#allocation2 + $0x4d0] sm:$0xff] }
 0x1d7   :  { %702 = vst.msk [vmem:[#allocation2 + $0x2c1] sm:$0xff] %vm666_vm0, %v572_v14  ;;  %v1623_v14 = vpack.c.bf16 %v1559_v48, %v1559_v48 }
 0x1d8   :  { %2469 = vst.msk [vmem:[#allocation3 + $0x1a8] sm:$0xf] %vm1022_vm4, %v636_v31  ;;  %v6376_v10 = vld [vmem:[#allocation3 + $0x48] sm:$0xf]  ;;  %v2707_v0 = vpop.permute.xlu0 %2706 }
 0x1d9   :  { %1032 = vst.msk [vmem:[#allocation3 + $0x6c] sm:$0xf] %vm1022_vm4, %v8560_v22  ;;  %v6916_v20 = vld [vmem:[#allocation3 + $0x50] sm:$0xf0]  ;;  %v8940_v22 = vpack.c.bf16 %v1108_v57, %v1108_v57 }
 0x1da   :  { %1481 = vst.msk [vmem:[#allocation3 + $0x6c] sm:$0xf] %vm1471_vm3, %v8887_v46  ;;  %v6377_v40 = vor.u32 %v6916_v20, %v6376_v10  ;;  %v8946_v46 = vpack.c.bf16 %v1555_v6, %v1555_v6  ;;  %v1110_v57 = vld [vmem:[#allocation2 + $0x1b1] sm:$0xff]  ;;  %v3943_v20 = vpack.c.bf16 %v3879_v15, %v3879_v15 }
 0x1db   :  { %1930 = vst.msk [vmem:[#allocation3 + $0x6c] sm:$0xf] %vm1920_vm5, %v8882_v39  ;;  %v1114_v15 = vld [vmem:[#allocation2 + $0x211] sm:$0xff] }
 0x1dc   :  { %1084 = vst.msk [vmem:[#allocation3 + $0x2dc] sm:$0xf] %vm1022_vm4, %v1019_v11  ;;  %1766 = vrot.lane.b32.xlu2 %v8946_v46, %s7463_s29  ;;  %v3942_v11 = vpack.c.bf16 %v3878_v35, %v3878_v35 }
 0x1dd   :  { %1533 = vst.msk [vmem:[#allocation3 + $0x2dc] sm:$0xf] %vm1471_vm3, %v1402_v29  ;;  %v6929_v39 = vld [vmem:[#allocation3 + $0xb8] sm:$0xf0]  ;;  %3165 = vrot.lane.b32.xlu1 %v8943_v54, %s7463_s29  ;;  %v8986_v29 = vpop.f32.mrf.mxu3 }
 0x1de   :  { %5079 = vmatmul.bf16.gmra.mxu2 %v6381_v23  ;;  %1068 = vst.msk [vmem:[#allocation3 + $0x21c] sm:$0xf] %vm1022_vm4, %v1003_v18  ;;  %1321 = vrot.lane.b32.xlu0 %v8940_v22, %s7466_s1  ;;  %v1372_v42 = vpop.permute.xlu1 %1371  ;;  %v6433_v13 = vor.u32 %v6929_v39, %v6432_v63  ;;  %v1302_v28 = vpop.permute.xlu2 %1301  ;;  %v1021_v18 = vpack.c.bf16 %v957_v19, %v957_v19 }
 0x1df   :  { %1517 = vst.msk [vmem:[#allocation3 + $0x21c] sm:$0xf] %vm1471_vm3, %v1370_v47 }
 0x1e0   :  { %3987 = vst.msk [vmem:[#allocation3 + $0xc8] sm:$0xf] %vm1022_vm4, %v8896_v21  ;;  %v2194_v62 = vpop.permute.xlu0 %2193 }
 0x1e1   :  { %1033 = vst.msk [vmem:[#allocation3 + $0x78] sm:$0xf] %vm1022_vm4, %v8580_v61  ;;  %v8967_v61 = vpack.c.bf16 %v1557_v4, %v1557_v4 }
 0x1e2   :  { %4910 = vmatmul.bf16.gmra.mxu1 %v6377_v40  ;;  %1482 = vst.msk [vmem:[#allocation3 + $0x78] sm:$0xf] %vm1471_vm3, %v1300_v12  ;;  %v9034_v40 = vpack.c.bf16 %v1110_v57, %v1110_v57 }
 0x1e3   :  { %1931 = vst.msk [vmem:[#allocation3 + $0x78] sm:$0xf] %vm1920_vm5, %v8885_v30 }
 0x1e4   :  { %6801 = vmatmul.msk.bf16.gmra.mxu0 %vm666_vm0, %v6433_v13  ;;  %1085 = vst.msk [vmem:[#allocation3 + $0x2e8] sm:$0xf] %vm1022_vm4, %v1020_v56  ;;  %1319 = vrot.lane.b32.xlu2 %v8970_v43, %s7466_s1  ;;  %v6935_v56 = vld [vmem:[#allocation3 + $0xe8] sm:$0xf0] }
 0x1e5   :  { %1534 = vst.msk [vmem:[#allocation3 + $0x2e8] sm:$0xf] %vm1471_vm3, %v1404_v2  ;;  %1770 = vrot.lane.b32.xlu1 %v8967_v61, %s7463_s29  ;;  %v9004_v55 = vpop.f32.mrf.mxu3 }
 0x1e6   :  { %2890 = vst.msk [vmem:[#allocation3 + $0x64] sm:$0xf] %vm1471_vm3, %v2707_v0  ;;  %3163 = vrot.lane.b32.xlu0 %v8972_v33, %s7463_s29  ;;  %v2709_v30 = vpop.permute.xlu1 %2708  ;;  %v1374_v26 = vpop.permute.xlu2 %1373 }
 0x1e7   :  { %3339 = vst.msk [vmem:[#allocation3 + $0x64] sm:$0xf] %vm1920_vm5, %v8911_v50  ;;  %v6444_v50 = vld [vmem:[#allocation3 + $0xc8] sm:$0xf]  ;;  %v4896_v0 = vpop.f32.mrf.mxu1 }
 0x1e8   :  { %1069 = vst.msk [vmem:[#allocation3 + $0x228] sm:$0xf] %vm1022_vm4, %v1004_v49  ;;  %v1751_v9 = vpop.permute.xlu0 %1750 }
 0x1e9   :  { %1518 = vst.msk [vmem:[#allocation3 + $0x228] sm:$0xf] %vm1471_vm3, %v1372_v42 }
 0x1ea   :  { %1034 = vst.msk [vmem:[#allocation3 + $0x84] sm:$0xf] %vm1022_vm4, %v8605_v34  ;;  %v6932_v34 = vld [vmem:[#allocation3 + $0xd0] sm:$0xf0] }
 0x1eb   :  { %1483 = vst.msk [vmem:[#allocation3 + $0x84] sm:$0xf] %vm1471_vm3, %v1302_v28  ;;  %v6445_v47 = vor.u32 %v6932_v34, %v6444_v50  ;;  %v3866_v28 = vld [vmem:[#allocation2 + $0x1d2] sm:$0xff] }
 0x1ec   :  { %2378 = vst.msk [vmem:[#allocation3 + $0x60] sm:$0xf] %vm2369_vm6, %v2194_v62  ;;  %3611 = vrot.lane.b32.xlu2 %v8787_v1, %s7467_s23  ;;  %v3930_v24 = vpack.c.bf16 %v3866_v28, %v3866_v28  ;;  %v3882_v50 = vld [vmem:[#allocation2 + $0x312] sm:$0xff] }
 0x1ed   :  { %3989 = vst.msk [vmem:[#allocation3 + $0xe0] sm:$0xf] %vm1022_vm4, %v8920_v60  ;;  %1323 = vrot.lane.b32.xlu1 %v1173_v52, %s7466_s1  ;;  %v1558_v60 = vld [vmem:[#allocation2 + $0x1a2] sm:$0xff]  ;;  %v9036_v63 = vpop.f32.mrf.mxu3  ;;  %v3946_v34 = vpack.c.bf16 %v3882_v50, %v3882_v50  ;;  %v1563_v28 = vld [vmem:[#allocation2 + $0x212] sm:$0xff] }
 0x1ee   :  { %2891 = vst.msk [vmem:[#allocation3 + $0x70] sm:$0xf] %vm1471_vm3, %v2709_v30  ;;  %1774 = vrot.lane.b32.xlu0 %v1623_v14, %s7463_s29  ;;  %v3604_v31 = vpop.permute.xlu1 %3603  ;;  %v3606_v53 = vpop.permute.xlu2 %3605  ;;  %v9007_v1 = vpack.c.bf16 %v1558_v60, %v1558_v60  ;;  %v4897_v30 = vadd.f32 %v9042_v7, %v4896_v0 }
 0x1ef   :  { %1070 = vst.msk [vmem:[#allocation3 + $0x234] sm:$0xf] %vm1022_vm4, %v1005_v36  ;;  %v1112_v36 = vld [vmem:[#allocation2 + $0x1f1] sm:$0xff] }
 0x1f0   :  { %1519 = vst.msk [vmem:[#allocation3 + $0x234] sm:$0xf] %vm1471_vm3, %v1374_v26  ;;  %v3158_v59 = vpop.permute.xlu0 %3157  ;;  %v1176_v52 = vpack.c.bf16 %v1112_v36, %v1112_v36  ;;  %v1565_v36 = vld [vmem:[#allocation2 + $0x232] sm:$0xff] }
 0x1f1   :  { %1932 = vst.msk [vmem:[#allocation3 + $0x84] sm:$0xf] %vm1920_vm5, %v1751_v9  ;;  %v5234_v42 = vpop.f32.mrf.mxu0  ;;  %v4898_v9 = vpop.f32.mrf.mxu1 }
 0x1f2   :  { %3992 = vst.msk [vmem:[#allocation3 + $0x104] sm:$0xf] %vm1022_vm4, %v1623_v14 }
 0x1f3   :  { %3787 = vst.msk [vmem:[#allocation3 + $0x64] sm:$0xf] %vm2369_vm6, %v3604_v31  ;;  %v6388_v37 = vld [vmem:[#allocation3 + $0x60] sm:$0xf] }
 0x1f4   :  { %6802 = vmatmul.msk.bf16.gmra.mxu0 %vm666_vm0, %v6445_v47  ;;  %3340 = vst.msk [vmem:[#allocation3 + $0x70] sm:$0xf] %vm1920_vm5, %v3158_v59  ;;  %1772 = vrot.lane.b32.xlu2 %v9007_v1, %s7463_s29  ;;  %v6456_v39 = vld [vmem:[#allocation3 + $0xe0] sm:$0xf]  ;;  %v4899_v47 = vadd.f32 %v9042_v7, %v4898_v9 }
 0x1f5   :  { %3788 = vst.msk [vmem:[#allocation3 + $0x70] sm:$0xf] %vm2369_vm6, %v3606_v53  ;;  %2201 = vrot.lane.b32.xlu1 %v8840_v8, %s7467_s23  ;;  %v6457_v62 = vor.u32 %v6935_v56, %v6456_v39  ;;  %v9059_v31 = vpop.f32.mrf.mxu3 }
 0x1f6   :  { %1035 = vst.msk [vmem:[#allocation3 + $0x90] sm:$0xf] %vm1022_vm4, %v8694_v25  ;;  %3613 = vrot.lane.b32.xlu0 %v8756_v3, %s7467_s23  ;;  %v7021_v25 = vld [vmem:[%s10179_s5 + $0x8] sm:$0xff]  ;;  %v2711_v10 = vpop.permute.xlu2 %2710 }
 0x1f7   :  { %1037 = vst.msk [vmem:[#allocation3 + $0xa8] sm:$0xf] %vm1022_vm4, %v8972_v33  ;;  %v2196_v12 = vpop.permute.xlu1 %2195  ;;  %5740 = vmatpush.bf16.msrb.mxu3 %v7021_v25 }
 0x1f8   :  { %1036 = vst.msk [vmem:[#allocation3 + $0x9c] sm:$0xf] %vm1022_vm4, %v8840_v8  ;;  %v1406_v3 = vpop.permute.xlu0 %1405  ;;  %v7020_v8 = vld [vmem:[%s10179_s5] sm:$0xff] }
 0x1f9   :  { %1038 = vst.msk [vmem:[#allocation3 + $0xb4] sm:$0xf] %vm1022_vm4, %v8943_v54  ;;  %v5236_v19 = vpop.f32.mrf.mxu0  ;;  %v6938_v57 = vld [vmem:[#allocation3 + $0x100] sm:$0xf0] }
 0x1fa   :  { %v6918_v2 = vld [vmem:[#allocation3 + $0x64] sm:$0xf]  ;;  %4006 = vst.msk [vmem:[#allocation3 + $0x1ac] sm:$0xf] %vm1022_vm4, %v3942_v11 }
 0x1fb   :  { %2379 = vst.msk [vmem:[#allocation3 + $0x6c] sm:$0xf] %vm2369_vm6, %v2196_v12  ;;  %5741 = vmatpush.bf16.msrb.mxu3 %v7020_v8  ;;  %v3409_v12 = vld [vmem:[#allocation2 + $0x121] sm:$0xff] }
 0x1fc   :  { %2892 = vst.msk [vmem:[#allocation3 + $0x7c] sm:$0xf] %vm1471_vm3, %v2711_v10  ;;  %v6390_v6 = vld [vmem:[#allocation3 + $0x6c] sm:$0xf0]  ;;  %1325 = vrot.lane.b32.xlu2 %v9034_v40, %s7466_s1 }
 0x1fd   :  { %1086 = vst.msk [vmem:[#allocation3 + $0x2f4] sm:$0xf] %vm1022_vm4, %v1021_v18  ;;  %v6393_v23 = vor.u32 %v6918_v2, %v6390_v6  ;;  %2720 = vrot.lane.b32.xlu1 %v2577_v45, %s7466_s1  ;;  %v1178_v18 = vpack.c.bf16 %v1114_v15, %v1114_v15  ;;  %v944_v6 = vld [vmem:[#allocation2 + $0x3e0] sm:$0xff] }
 0x1fe   :  { %1535 = vst.msk [vmem:[#allocation3 + $0x2f4] sm:$0xf] %vm1471_vm3, %v1406_v3  ;;  %2718 = vrot.lane.b32.xlu0 %v8812_v17, %s7466_s1  ;;  %v1755_v4 = vpop.permute.xlu2 %1754  ;;  %v1562_v17 = vld [vmem:[#allocation2 + $0x202] sm:$0xff]  ;;  %v3473_v3 = vpack.c.bf16 %v3409_v12, %v3409_v12  ;;  %v1008_v39 = vpack.c.bf16 %v944_v6, %v944_v6 }
 0x1ff   :  { %5084 = vmatmul.bf16.gmra.mxu2 %v6393_v23  ;;  %4007 = vst.msk [vmem:[#allocation3 + $0x1b8] sm:$0xf] %vm1022_vm4, %v3943_v20  ;;  %v1753_v49 = vpop.permute.xlu1 %1752  ;;  %v1626_v14 = vpack.c.bf16 %v1562_v17, %v1562_v17  ;;  %v6469_v23 = vor.u32 %v6938_v57, %v6468_v5 }
 0x200   :  { %v1304_v27 = vpop.permute.xlu0 %1303  ;;  %3994 = vst.msk [vmem:[#allocation3 + $0x11c] sm:$0xf] %vm1022_vm4, %v3930_v24  ;;  %v1627_v24 = vpack.c.bf16 %v1563_v28, %v1563_v28 }
 0x201   :  { %v5065_v13 = vpop.f32.mrf.mxu2  ;;  %1484 = vst.msk [vmem:[#allocation3 + $0x90] sm:$0xf] %vm1471_vm3, %v1304_v27 }
 0x202   :  { %v6919_v26 = vld [vmem:[#allocation3 + $0x68] sm:$0xf0]  ;;  %1933 = vst.msk [vmem:[#allocation3 + $0x90] sm:$0xf] %vm1920_vm5, %v1753_v49  ;;  %v5066_v48 = vadd.f32 %v5065_v13, %v4897_v30  ;;  %v9071_v13 = vpop.f32.mrf.mxu3  ;;  %v2962_v49 = vld [vmem:[#allocation2 + $0x130] sm:$0xff] }
 0x203   :  { %v6389_v32 = vor.u32 %v6919_v26, %v6388_v37  ;;  %3995 = vst.msk [vmem:[#allocation3 + $0x128] sm:$0xf] %vm1022_vm4, %v1626_v14  ;;  %v3026_v27 = vpack.c.bf16 %v2962_v49, %v2962_v49  ;;  %v5239_v37 = vpop.f32.mrf.mxu0 }
 0x204   :  { %6803 = vmatmul.msk.bf16.gmra.mxu0 %vm666_vm0, %v6457_v62  ;;  %2203 = vrot.lane.b32.xlu2 %v8972_v33, %s7467_s23  ;;  %4010 = vst.msk [vmem:[#allocation3 + $0x1dc] sm:$0xf] %vm1022_vm4, %v3946_v34  ;;  %v5235_v59 = vadd.f32 %v5234_v42, %v5066_v48  ;;  %v1561_v33 = vld [vmem:[#allocation2 + $0x1f2] sm:$0xff]  ;;  %v1113_v62 = vld [vmem:[#allocation2 + $0x201] sm:$0xff] }
 0x205   :  { %4915 = vmatmul.bf16.gmra.mxu1 %v6389_v32  ;;  %1329 = vrot.lane.b32.xlu1 %v1176_v52, %s7466_s1  ;;  %v1625_v8 = vpack.c.bf16 %v1561_v33, %v1561_v33  ;;  %1073 = vst.msk [vmem:[#allocation3 + $0x258] sm:$0xf] %vm1022_vm4, %v1008_v39  ;;  %v1177_v30 = vpack.c.bf16 %v1113_v62, %v1113_v62  ;;  %v1115_v48 = vld [vmem:[#allocation2 + $0x221] sm:$0xff] }
 0x206   :  { %1780 = vrot.lane.b32.xlu0 %v1626_v14, %s7463_s29  ;;  %v1308_v11 = vpop.permute.xlu2 %1307  ;;  %v5394_v2 = vmax.f32 %v5235_v59, 0.0  ;;  %v2961_v52 = vld [vmem:[#allocation2 + $0x120] sm:$0xff]  ;;  %v1629_v14 = vpack.c.bf16 %v1565_v36, %v1565_v36  ;;  %v6480_v59 = vld [vmem:[#allocation3 + $0x110] sm:$0xf]  ;;  %v6944_v36 = vld [vmem:[#allocation3 + $0x130] sm:$0xf0] }
 0x207   :  { %v3160_v60 = vpop.permute.xlu1 %3159  ;;  %1486 = vst.msk [vmem:[#allocation3 + $0xa8] sm:$0xf] %vm1471_vm3, %v1308_v11 }
 0x208   :  { %3341 = vst.msk [vmem:[#allocation3 + $0x7c] sm:$0xf] %vm1920_vm5, %v3160_v60  ;;  %v2713_v25 = vpop.permute.xlu0 %2712  ;;  %v945_v60 = vld [vmem:[#allocation2 + $0x3f0] sm:$0xff] }
 0x209   :  { %v5067_v53 = vpop.f32.mrf.mxu2  ;;  %2893 = vst.msk [vmem:[#allocation3 + $0x88] sm:$0xf] %vm1471_vm3, %v2713_v25  ;;  %v1009_v25 = vpack.c.bf16 %v945_v60, %v945_v60  ;;  %v1118_v60 = vld [vmem:[#allocation2 + $0x251] sm:$0xff] }
 0x20a   :  { %v5068_v35 = vadd.f32 %v5067_v53, %v4899_v47  ;;  %v9084_v34 = vpop.f32.mrf.mxu3  ;;  %v1179_v47 = vpack.c.bf16 %v1115_v48, %v1115_v48  ;;  %v3025_v53 = vpack.c.bf16 %v2961_v52, %v2961_v52  ;;  %3998 = vst.msk [vmem:[#allocation3 + $0x14c] sm:$0xf] %vm1022_vm4, %v1629_v14  ;;  %v946_v52 = vld [vmem:[#allocation2 + $0x400] sm:$0xff] }
 0x20b   :  { %1074 = vst.msk [vmem:[#allocation3 + $0x264] sm:$0xf] %vm1022_vm4, %v1009_v25 }
 0x20c   :  { %v5237_v10 = vadd.f32 %v5236_v19, %v5068_v35  ;;  %1778 = vrot.lane.b32.xlu2 %v1625_v8, %s7463_s29  ;;  %v6941_v35 = vld [vmem:[#allocation3 + $0x118] sm:$0xf0] }
 0x20d   :  { %3615 = vrot.lane.b32.xlu1 %v3473_v3, %s7467_s23  ;;  %v6481_v11 = vor.u32 %v6941_v35, %v6480_v59 }
 0x20e   :  { %v5395_v0 = vmax.f32 %v5237_v10, 0.0  ;;  %1333 = vrot.lane.b32.xlu0 %v1178_v18, %s7466_s1  ;;  %v1380_v56 = vpop.permute.xlu2 %1379  ;;  %v5241_v10 = vpop.f32.mrf.mxu0  ;;  %v1564_v18 = vld [vmem:[#allocation2 + $0x222] sm:$0xff] }
 0x20f   :  { %v1306_v45 = vpop.permute.xlu1 %1305  ;;  %1522 = vst.msk [vmem:[#allocation3 + $0x258] sm:$0xf] %vm1471_vm3, %v1380_v56  ;;  %v9097_v5 = vpack.c.bf16 %v1564_v18, %v1564_v18 }
 0x210   :  { %v5458_v20 = vpack.c.bf16 %v5395_v0, %v5394_v2  ;;  %1485 = vst.msk [vmem:[#allocation3 + $0x9c] sm:$0xf] %vm1471_vm3, %v1306_v45  ;;  %v1757_v42 = vpop.permute.xlu0 %1756  ;;  %v1117_v2 = vld [vmem:[#allocation2 + $0x241] sm:$0xff] }
 0x211   :  { %1934 = vst.msk [vmem:[#allocation3 + $0x9c] sm:$0xf] %vm1920_vm5, %v1755_v4  ;;  %v943_v4 = vld [vmem:[#allocation2 + $0x3d0] sm:$0xff]  ;;  %v1181_v3 = vpack.c.bf16 %v1117_v2, %v1117_v2  ;;  %v1566_v45 = vld [vmem:[#allocation2 + $0x242] sm:$0xff] }
 0x212   :  { %6834 = vmatmul.msk.bf16.vlgmr.msrb.gmra.mxu3 %vm666_vm0, %v5458_v20  ;;  %1935 = vst.msk [vmem:[#allocation3 + $0xa8] sm:$0xf] %vm1920_vm5, %v1757_v42  ;;  %v1007_v26 = vpack.c.bf16 %v943_v4, %v943_v4  ;;  %v9099_v20 = vpop.f32.mrf.mxu3 }
 0x214   :  { %6804 = vmatmul.msk.bf16.gmra.mxu0 %vm666_vm0, %v6469_v23  ;;  %1331 = vrot.lane.b32.xlu2 %v1177_v30, %s7466_s1  ;;  %1072 = vst.msk [vmem:[#allocation3 + $0x24c] sm:$0xf] %vm1022_vm4, %v1007_v26  ;;  %v911_v23 = vld [vmem:[#allocation2 + $0x150] sm:$0xff] }
 0x215   :  { %1782 = vrot.lane.b32.xlu1 %v1627_v24, %s7463_s29  ;;  %v9106_v42 = vpack.c.bf16 %v911_v23, %v911_v23  ;;  %v1116_v30 = vld [vmem:[#allocation2 + $0x231] sm:$0xff] }
 0x216   :  { %3169 = vrot.lane.b32.xlu0 %v3026_v27, %s7463_s29  ;;  %v3162_v32 = vpop.permute.xlu2 %3161  ;;  %v1630_v27 = vpack.c.bf16 %v1566_v45, %v1566_v45  ;;  %v9112_v26 = vpop.f32.mrf.mxu0  ;;  %v6504_v45 = vld [vmem:[#allocation3 + $0x140] sm:$0xf] }
 0x217   :  { %v1378_v9 = vpop.permute.xlu1 %1377  ;;  %3342 = vst.msk [vmem:[#allocation3 + $0x88] sm:$0xf] %vm1920_vm5, %v3162_v32  ;;  %v1180_v32 = vpack.c.bf16 %v1116_v30, %v1116_v30 }
 0x218   :  { %v1310_v17 = vpop.permute.xlu0 %1309  ;;  %1521 = vst.msk [vmem:[#allocation3 + $0x24c] sm:$0xf] %vm1471_vm3, %v1378_v9  ;;  %v6492_v9 = vld [vmem:[#allocation3 + $0x128] sm:$0xf] }
 0x219   :  { %v4901_v50 = vpop.f32.mrf.mxu1  ;;  %1487 = vst.msk [vmem:[#allocation3 + $0xb4] sm:$0xf] %vm1471_vm3, %v1310_v17 }
 0x21a   :  { %v4902_v0 = vadd.f32 %v9042_v7, %v4901_v50  ;;  %1040 = vst.msk [vmem:[#allocation3 + $0xcc] sm:$0xf] %vm1022_vm4, %v9106_v42  ;;  %v6493_v50 = vor.u32 %v6944_v36, %v6492_v9 }
 0x21b   :  { %3999 = vst.msk [vmem:[#allocation3 + $0x158] sm:$0xf] %vm1022_vm4, %v1630_v27 }
 0x21c   :  { %3167 = vrot.lane.b32.xlu2 %v3025_v53, %s7463_s29 }
 0x21d   :  { %1335 = vrot.lane.b32.xlu1 %v1179_v47, %s7466_s1  ;;  %v1010_v47 = vpack.c.bf16 %v946_v52, %v946_v52 }
 0x21e   :  { %1786 = vrot.lane.b32.xlu0 %v1629_v14, %s7463_s29  ;;  %v2198_v12 = vpop.permute.xlu2 %2197  ;;  %v9120_v14 = vpop.f32.mrf.mxu3 }
 0x21f   :  { %v3610_v19 = vpop.permute.xlu1 %3609  ;;  %2380 = vst.msk [vmem:[#allocation3 + $0x78] sm:$0xf] %vm2369_vm6, %v2198_v12 }
 0x220   :  { %3790 = vst.msk [vmem:[#allocation3 + $0x88] sm:$0xf] %vm2369_vm6, %v3610_v19  ;;  %v1382_v33 = vpop.permute.xlu0 %1381  ;;  %v1182_v19 = vpack.c.bf16 %v1118_v60, %v1118_v60 }
 0x221   :  { %v4903_v8 = vpop.f32.mrf.mxu1  ;;  %1523 = vst.msk [vmem:[#allocation3 + $0x264] sm:$0xf] %vm1471_vm3, %v1382_v33  ;;  %v9128_v33 = vpop.f32.mrf.mxu0 }
 0x222   :  { %v5070_v15 = vpop.f32.mrf.mxu2  ;;  %v4904_v6 = vadd.f32 %v9042_v7, %v4903_v8  ;;  %1075 = vst.msk [vmem:[#allocation3 + $0x270] sm:$0xf] %vm1022_vm4, %v1010_v47 }
 0x223   :  { %v5071_v57 = vadd.f32 %v5070_v15, %v4902_v0  ;;  %v1120_v0 = vld [vmem:[#allocation2 + $0x291] sm:$0xff] }
 0x224   :  { %6805 = vmatmul.msk.bf16.gmra.mxu0 %vm666_vm0, %v6481_v11  ;;  %1784 = vrot.lane.b32.xlu2 %v9097_v5, %s7463_s29  ;;  %v3410_v11 = vld [vmem:[#allocation2 + $0x131] sm:$0xff]  ;;  %v1184_v23 = vpack.c.bf16 %v1120_v0, %v1120_v0 }
 0x225   :  { %2207 = vrot.lane.b32.xlu1 %v3025_v53, %s7467_s23  ;;  %v5240_v28 = vadd.f32 %v5239_v37, %v5071_v57  ;;  %v3474_v25 = vpack.c.bf16 %v3410_v11, %v3410_v11 }
 0x226   :  { %1339 = vrot.lane.b32.xlu0 %v1181_v3, %s7466_s1  ;;  %v1314_v49 = vpop.permute.xlu2 %1313  ;;  %v9137_v57 = vpop.f32.mrf.mxu3 }
 0x227   :  { %v1759_v56 = vpop.permute.xlu1 %1758  ;;  %1489 = vst.msk [vmem:[#allocation3 + $0xcc] sm:$0xf] %vm1471_vm3, %v1314_v49  ;;  %v5396_v37 = vmax.f32 %v5240_v28, 0.0  ;;  %v3874_v28 = vld [vmem:[#allocation2 + $0x272] sm:$0xff] }
 0x228   :  { %1936 = vst.msk [vmem:[#allocation3 + $0xb4] sm:$0xf] %vm1920_vm5, %v1759_v56  ;;  %v3608_v24 = vpop.permute.xlu0 %3607  ;;  %v914_v56 = vld [vmem:[#allocation2 + $0x180] sm:$0xff]  ;;  %v3938_v9 = vpack.c.bf16 %v3874_v28, %v3874_v28 }
 0x229   :  { %3789 = vst.msk [vmem:[#allocation3 + $0x7c] sm:$0xf] %vm2369_vm6, %v3608_v24  ;;  %v1572_v28 = vld [vmem:[#allocation2 + $0x2c2] sm:$0xff] }
 0x22a   :  { %v5072_v39 = vpop.f32.mrf.mxu2  ;;  %4002 = vst.msk [vmem:[#allocation3 + $0x17c] sm:$0xf] %vm1022_vm4, %v3938_v9 }
 0x22b   :  { %v5073_v62 = vadd.f32 %v5072_v39, %v4904_v6  ;;  %v1567_v6 = vld [vmem:[#allocation2 + $0x252] sm:$0xff] }
 0x22c   :  { %1337 = vrot.lane.b32.xlu2 %v1180_v32, %s7466_s1  ;;  %v1631_v39 = vpack.c.bf16 %v1567_v6, %v1567_v6  ;;  %v1569_v32 = vld [vmem:[#allocation2 + $0x292] sm:$0xff] }
 0x22d   :  { %v5242_v4 = vadd.f32 %v5241_v10, %v5073_v62  ;;  %1788 = vrot.lane.b32.xlu1 %v1630_v27, %s7463_s29  ;;  %v912_v10 = vld [vmem:[#allocation2 + $0x160] sm:$0xff]  ;;  %v9146_v62 = vpop.f32.mrf.mxu0  ;;  %v9148_v27 = vpack.c.bf16 %v914_v56, %v914_v56 }
 0x22e   :  { %2205 = vrot.lane.b32.xlu0 %v8943_v54, %s7467_s23  ;;  %v2717_v59 = vpop.permute.xlu2 %2716  ;;  %v6402_v54 = vld [vmem:[#allocation3 + $0x84] sm:$0xf0]  ;;  %v9134_v2 = vpack.c.bf16 %v912_v10, %v912_v10  ;;  %v9155_v36 = vpop.f32.mrf.mxu3 }
 0x22f   :  { %v5397_v17 = vmax.f32 %v5242_v4, 0.0  ;;  %v1384_v53 = vpop.permute.xlu1 %1383  ;;  %2895 = vst.msk [vmem:[#allocation3 + $0xa0] sm:$0xf] %vm1471_vm3, %v2717_v59  ;;  %v1121_v59 = vld [vmem:[#allocation2 + $0x2a1] sm:$0xff] }
 0x230   :  { %v1763_v35 = vpop.permute.xlu0 %1762  ;;  %1524 = vst.msk [vmem:[#allocation3 + $0x270] sm:$0xf] %vm1471_vm3, %v1384_v53  ;;  %v6921_v15 = vld [vmem:[#allocation3 + $0x7c] sm:$0xf] }
 0x231   :  { %v5459_v48 = vpack.c.bf16 %v5397_v17, %v5396_v37  ;;  %v6405_v12 = vor.u32 %v6921_v15, %v6402_v54  ;;  %1938 = vst.msk [vmem:[#allocation3 + $0xcc] sm:$0xf] %vm1920_vm5, %v1763_v35  ;;  %v1633_v37 = vpack.c.bf16 %v1569_v32, %v1569_v32  ;;  %v913_v17 = vld [vmem:[#allocation2 + $0x170] sm:$0xff]  ;;  %v1185_v15 = vpack.c.bf16 %v1121_v59, %v1121_v59  ;;  %v6516_v54 = vld [vmem:[#allocation3 + $0x158] sm:$0xf] }
 0x232   :  { %1041 = vst.msk [vmem:[#allocation3 + $0xd8] sm:$0xf] %vm1022_vm4, %v9134_v2 }
 0x233   :  { %6835 = vmatmul.msk.bf16.gmra.mxu3 %vm666_vm0, %v5459_v48  ;;  %5089 = vmatmul.bf16.gmra.mxu2 %v6405_v12  ;;  %1043 = vst.msk [vmem:[#allocation3 + $0xf0] sm:$0xf] %vm1022_vm4, %v9148_v27  ;;  %v9164_v48 = vpack.c.bf16 %v913_v17, %v913_v17  ;;  %v917_v17 = vld [vmem:[#allocation2 + $0x1b0] sm:$0xff] }
 0x234   :  { %6806 = vmatmul.msk.bf16.gmra.mxu0 %vm666_vm0, %v6493_v50  ;;  %3617 = vrot.lane.b32.xlu2 %v3474_v25, %s7467_s23  ;;  %v1571_v50 = vld [vmem:[#allocation2 + $0x2b2] sm:$0xff] }
 0x235   :  { %1341 = vrot.lane.b32.xlu1 %v1182_v19, %s7466_s1  ;;  %v9168_v35 = vpop.f32.mrf.mxu0  ;;  %1042 = vst.msk [vmem:[#allocation3 + $0xe4] sm:$0xf] %vm1022_vm4, %v9164_v48  ;;  %v1635_v60 = vpack.c.bf16 %v1571_v50, %v1571_v50  ;;  %v6950_v19 = vld [vmem:[#allocation3 + $0x160] sm:$0xf0] }
 0x236   :  { %2724 = vrot.lane.b32.xlu0 %v8896_v21, %s7466_s1  ;;  %v1767_v3 = vpop.permute.xlu2 %1766  ;;  %v6947_v21 = vld [vmem:[#allocation3 + $0x148] sm:$0xf0]  ;;  %v9175_v12 = vpop.f32.mrf.mxu3  ;;  %v6517_v0 = vor.u32 %v6950_v19, %v6516_v54  ;;  %v6953_v19 = vld [vmem:[#allocation3 + $0x178] sm:$0xf0] }
 0x237   :  { %v2715_v18 = vpop.permute.xlu1 %2714  ;;  %v6505_v49 = vor.u32 %v6947_v21, %v6504_v45  ;;  %4004 = vst.msk [vmem:[#allocation3 + $0x194] sm:$0xf] %vm1022_vm4, %v1635_v60  ;;  %v1570_v21 = vld [vmem:[#allocation2 + $0x2a2] sm:$0xff] }
 0x238   :  { %2894 = vst.msk [vmem:[#allocation3 + $0x94] sm:$0xf] %vm1471_vm3, %v2715_v18  ;;  %v1316_v8 = vpop.permute.xlu0 %1315  ;;  %v915_v18 = vld [vmem:[#allocation2 + $0x190] sm:$0xff]  ;;  %v1634_v9 = vpack.c.bf16 %v1570_v21, %v1570_v21 }
 0x239   :  { %1490 = vst.msk [vmem:[#allocation3 + $0xd8] sm:$0xf] %vm1471_vm3, %v1316_v8  ;;  %v9182_v8 = vpack.c.bf16 %v915_v18, %v915_v18 }
 0x23b   :  { %1044 = vst.msk [vmem:[#allocation3 + $0xfc] sm:$0xf] %vm1022_vm4, %v9182_v8 }
 0x23c   :  { %1790 = vrot.lane.b32.xlu2 %v1631_v39, %s7463_s29  ;;  %v1123_v39 = vld [vmem:[#allocation2 + $0x2c1] sm:$0xff] }
 0x23d   :  { %3171 = vrot.lane.b32.xlu1 %v9134_v2, %s7463_s29  ;;  %v1187_v56 = vpack.c.bf16 %v1123_v39, %v1123_v39 }
 0x23e   :  { %1345 = vrot.lane.b32.xlu0 %v1184_v23, %s7466_s1  ;;  %v1320_v30 = vpop.permute.xlu2 %1319 }
 0x23f   :  { %v1765_v24 = vpop.permute.xlu1 %1764  ;;  %1492 = vst.msk [vmem:[#allocation3 + $0xf0] sm:$0xf] %vm1471_vm3, %v1320_v30  ;;  %v1636_v30 = vpack.c.bf16 %v1572_v28, %v1572_v28 }
 0x240   :  { %1939 = vst.msk [vmem:[#allocation3 + $0xd8] sm:$0xf] %vm1920_vm5, %v1765_v24  ;;  %v2200_v4 = vpop.permute.xlu0 %2199 }
 0x241   :  { %2381 = vst.msk [vmem:[#allocation3 + $0x84] sm:$0xf] %vm2369_vm6, %v2200_v4 }
 0x242   :  { %4005 = vst.msk [vmem:[#allocation3 + $0x1a0] sm:$0xf] %vm1022_vm4, %v1636_v30 }
 0x244   :  { %6807 = vmatmul.msk.bf16.gmra.mxu0 %vm666_vm0, %v6505_v49  ;;  %2722 = vrot.lane.b32.xlu2 %v8835_v51, %s7466_s1  ;;  %v6400_v51 = vld [vmem:[#allocation3 + $0x78] sm:$0xf]  ;;  %v9190_v49 = vpop.f32.mrf.mxu0 }
 0x245   :  { %1794 = vrot.lane.b32.xlu1 %v1633_v37, %s7463_s29 }
 0x246   :  { %3619 = vrot.lane.b32.xlu0 %v8865_v58, %s7467_s23  ;;  %v9166_v47 = vpop.permute.xlu2 %3611 }
 0x247   :  { %v1318_v52 = vpop.permute.xlu1 %1317 }
 0x248   :  { %v1769_v53 = vpop.permute.xlu0 %1768  ;;  %1491 = vst.msk [vmem:[#allocation3 + $0xe4] sm:$0xf] %vm1471_vm3, %v1318_v52  ;;  %v6922_v11 = vld [vmem:[#allocation3 + $0x80] sm:$0xf0]  ;;  %v9198_v52 = vpop.f32.mrf.mxu3 }
 0x249   :  { %1940 = vst.msk [vmem:[#allocation3 + $0xe4] sm:$0xf] %vm1920_vm5, %v1767_v3  ;;  %v6401_v58 = vor.u32 %v6922_v11, %v6400_v51 }
 0x24a   :  { %1941 = vst.msk [vmem:[#allocation3 + $0xf0] sm:$0xf] %vm1920_vm5, %v1769_v53 }
 0x24b   :  { %4920 = vmatmul.bf16.gmra.mxu1 %v6401_v58  ;;  %v1122_v58 = vld [vmem:[#allocation2 + $0x2b1] sm:$0xff] }
 0x24c   :  { %3173 = vrot.lane.b32.xlu2 %v9164_v48, %s7463_s29  ;;  %v9211_v18 = vpop.f32.mrf.mxu0 }
 0x24d   :  { %1347 = vrot.lane.b32.xlu1 %v1185_v15, %s7466_s1 }
 0x24e   :  { %1798 = vrot.lane.b32.xlu0 %v1635_v60, %s7463_s29  ;;  %v1773_v6 = vpop.permute.xlu2 %1772  ;;  %v9201_v60 = vpack.c.bf16 %v917_v17, %v917_v17 }
 0x24f   :  { %v4906_v25 = vpop.f32.mrf.mxu1  ;;  %v3166_v3 = vpop.permute.xlu1 %3165 }
 0x250   :  { %3344 = vst.msk [vmem:[#allocation3 + $0xa0] sm:$0xf] %vm1920_vm5, %v3166_v3  ;;  %v1322_v23 = vpop.permute.xlu0 %1321  ;;  %v4907_v45 = vadd.f32 %v9042_v7, %v4906_v25  ;;  %v916_v3 = vld [vmem:[#allocation2 + $0x1a0] sm:$0xff] }
 0x251   :  { %v5075_v10 = vpop.f32.mrf.mxu2  ;;  %1493 = vst.msk [vmem:[#allocation3 + $0xfc] sm:$0xf] %vm1471_vm3, %v1322_v23 }
 0x252   :  { %v5076_v24 = vadd.f32 %v5075_v10, %v4907_v45  ;;  %1046 = vst.msk [vmem:[#allocation3 + $0x114] sm:$0xf] %vm1022_vm4, %v9201_v60  ;;  %v1186_v10 = vpack.c.bf16 %v1122_v58, %v1122_v58  ;;  %v9218_v45 = vpack.c.bf16 %v916_v3, %v916_v3 }
 0x254   :  { %6808 = vmatmul.msk.bf16.gmra.mxu0 %vm666_vm0, %v6517_v0  ;;  %1796 = vrot.lane.b32.xlu2 %v1634_v9, %s7463_s29  ;;  %v5245_v50 = vadd.f32 %v9112_v26, %v5076_v24  ;;  %v6528_v26 = vld [vmem:[#allocation3 + $0x170] sm:$0xf]  ;;  %1045 = vst.msk [vmem:[#allocation3 + $0x108] sm:$0xf] %vm1022_vm4, %v9218_v45  ;;  %v9237_v9 = vpop.f32.mrf.mxu0 }
 0x255   :  { %3621 = vrot.lane.b32.xlu1 %v8918_v41, %s7467_s23  ;;  %v6529_v23 = vor.u32 %v6953_v19, %v6528_v26 }
 0x256   :  { %1351 = vrot.lane.b32.xlu0 %v1187_v56, %s7466_s1  ;;  %v1326_v51 = vpop.permute.xlu2 %1325  ;;  %v5398_v15 = vmax.f32 %v5245_v50, 0.0  ;;  %v9220_v56 = vpop.f32.mrf.mxu3 }
 0x257   :  { %v4908_v4 = vpop.f32.mrf.mxu1  ;;  %v1771_v59 = vpop.permute.xlu1 %1770  ;;  %1495 = vst.msk [vmem:[#allocation3 + $0x114] sm:$0xf] %vm1471_vm3, %v1326_v51 }
 0x258   :  { %v4909_v32 = vadd.f32 %v9042_v7, %v4908_v4  ;;  %1942 = vst.msk [vmem:[#allocation3 + $0xfc] sm:$0xf] %vm1920_vm5, %v1771_v59  ;;  %v3164_v41 = vpop.permute.xlu0 %3163 }
 0x259   :  { %v5077_v37 = vpop.f32.mrf.mxu2  ;;  %3343 = vst.msk [vmem:[#allocation3 + $0x94] sm:$0xf] %vm1920_vm5, %v3164_v41  ;;  %v6540_v41 = vld [vmem:[#allocation3 + $0x188] sm:$0xf] }
 0x25a   :  { %v5078_v53 = vadd.f32 %v5077_v37, %v4909_v32  ;;  %3791 = vst.msk [vmem:[#allocation3 + $0x94] sm:$0xf] %vm2369_vm6, %v9166_v47 }
 0x25c   :  { %v5247_v11 = vadd.f32 %v9128_v33, %v5078_v53  ;;  %1349 = vrot.lane.b32.xlu2 %v1186_v10, %s7466_s1  ;;  %v9254_v10 = vpop.f32.mrf.mxu0 }
 0x25d   :  { %1800 = vrot.lane.b32.xlu1 %v1636_v30, %s7463_s29 }
 0x25e   :  { %v5399_v54 = vmax.f32 %v5247_v11, 0.0  ;;  %2211 = vrot.lane.b32.xlu0 %v9134_v2, %s7467_s23  ;;  %v2204_v47 = vpop.permute.xlu2 %2203  ;;  %v9243_v59 = vpop.f32.mrf.mxu3  ;;  %v6956_v11 = vld [vmem:[#allocation3 + $0x190] sm:$0xf0] }
 0x25f   :  { %v4911_v25 = vpop.f32.mrf.mxu1  ;;  %v1324_v21 = vpop.permute.xlu1 %1323  ;;  %2383 = vst.msk [vmem:[#allocation3 + $0x9c] sm:$0xf] %vm2369_vm6, %v2204_v47 }
 0x260   :  { %v5460_v33 = vpack.c.bf16 %v5399_v54, %v5398_v15  ;;  %v1775_v39 = vpop.permute.xlu0 %1774  ;;  %v4912_v28 = vadd.f32 %v9042_v7, %v4911_v25  ;;  %1494 = vst.msk [vmem:[#allocation3 + $0x108] sm:$0xf] %vm1471_vm3, %v1324_v21 }
 0x261   :  { %v5080_v0 = vpop.f32.mrf.mxu2  ;;  %1943 = vst.msk [vmem:[#allocation3 + $0x108] sm:$0xf] %vm1920_vm5, %v1773_v6  ;;  %v6924_v3 = vld [vmem:[#allocation3 + $0x94] sm:$0xf] }
 0x262   :  { %6836 = vmatmul.msk.bf16.gmra.mxu3 %vm666_vm0, %v5460_v33  ;;  %v5081_v2 = vadd.f32 %v5080_v0, %v4912_v28  ;;  %1944 = vst.msk [vmem:[#allocation3 + $0x114] sm:$0xf] %vm1920_vm5, %v1775_v39  ;;  %v919_v39 = vld [vmem:[#allocation2 + $0x1f0] sm:$0xff] }
 0x263   :  { %v9269_v28 = vpack.c.bf16 %v919_v39, %v919_v39  ;;  %v6564_v39 = vld [vmem:[#allocation3 + $0x1b8] sm:$0xf] }
 0x264   :  { %6809 = vmatmul.msk.bf16.gmra.mxu0 %vm666_vm0, %v6529_v23  ;;  %2209 = vrot.lane.b32.xlu2 %v9106_v42, %s7467_s23  ;;  %v5250_v6 = vadd.f32 %v9146_v62, %v5081_v2  ;;  %v920_v62 = vld [vmem:[#allocation2 + $0x200] sm:$0xff] }
 0x265   :  { %2726 = vrot.lane.b32.xlu1 %v8946_v46, %s7466_s1  ;;  %v2517_v46 = vld [vmem:[#allocation2 + $0x182] sm:$0xff]  ;;  %v9251_v26 = vpack.c.bf16 %v920_v62, %v920_v62  ;;  %1048 = vst.msk [vmem:[#allocation3 + $0x12c] sm:$0xf] %vm1022_vm4, %v9269_v28 }
 0x266   :  { %3175 = vrot.lane.b32.xlu0 %v9148_v27, %s7463_s29  ;;  %v1779_v17 = vpop.permute.xlu2 %1778  ;;  %v5400_v42 = vmax.f32 %v5250_v6, 0.0  ;;  %v2581_v58 = vpack.c.bf16 %v2517_v46, %v2517_v46  ;;  %v9261_v47 = vpop.f32.mrf.mxu3  ;;  %v3415_v46 = vld [vmem:[#allocation2 + $0x1a1] sm:$0xff] }
 0x267   :  { %v4913_v24 = vpop.f32.mrf.mxu1  ;;  %v2202_v37 = vpop.permute.xlu1 %2201  ;;  %1049 = vst.msk [vmem:[#allocation3 + $0x138] sm:$0xf] %vm1022_vm4, %v9251_v26 }
 0x268   :  { %v4914_v30 = vadd.f32 %v9042_v7, %v4913_v24  ;;  %2382 = vst.msk [vmem:[#allocation3 + $0x90] sm:$0xf] %vm2369_vm6, %v2202_v37  ;;  %v3614_v50 = vpop.permute.xlu0 %3613 }
 0x269   :  { %v5082_v4 = vpop.f32.mrf.mxu2  ;;  %3792 = vst.msk [vmem:[#allocation3 + $0xa0] sm:$0xf] %vm2369_vm6, %v3614_v50 }
 0x26a   :  { %v5083_v32 = vadd.f32 %v5082_v4, %v4914_v30  ;;  %v9274_v4 = vpop.f32.mrf.mxu0 }
 0x26c   :  { %v5252_v53 = vadd.f32 %v9168_v35, %v5083_v32  ;;  %2728 = vrot.lane.b32.xlu2 %v2581_v58, %s7466_s1  ;;  %v6541_v35 = vor.u32 %v6956_v11, %v6540_v41  ;;  %v923_v11 = vld [vmem:[#allocation2 + $0x230] sm:$0xff] }
 0x26d   :  { %3177 = vrot.lane.b32.xlu1 %v9182_v8, %s7463_s29 }
 0x26e   :  { %v5401_v51 = vmax.f32 %v5252_v53, 0.0  ;;  %3625 = vrot.lane.b32.xlu0 %v8940_v22, %s7467_s23  ;;  %v1332_v19 = vpop.permute.xlu2 %1331  ;;  %v6925_v22 = vld [vmem:[#allocation3 + $0x98] sm:$0xf0]  ;;  %v9285_v6 = vpop.f32.mrf.mxu3 }
 0x26f   :  { %v2721_v54 = vpop.permute.xlu1 %2720  ;;  %v6412_v33 = vld [vmem:[#allocation3 + $0x90] sm:$0xf]  ;;  %1498 = vst.msk [vmem:[#allocation3 + $0x138] sm:$0xf] %vm1471_vm3, %v1332_v19 }
 0x270   :  { %v5461_v15 = vpack.c.bf16 %v5401_v51, %v5400_v42  ;;  %2897 = vst.msk [vmem:[#allocation3 + $0xb8] sm:$0xf] %vm1471_vm3, %v2721_v54  ;;  %v2719_v25 = vpop.permute.xlu0 %2718  ;;  %v6413_v0 = vor.u32 %v6925_v22, %v6412_v33  ;;  %v6414_v23 = vld [vmem:[#allocation3 + $0x9c] sm:$0xf0]  ;;  %v3479_v42 = vpack.c.bf16 %v3415_v46, %v3415_v46 }
 0x271   :  { %2896 = vst.msk [vmem:[#allocation3 + $0xac] sm:$0xf] %vm1471_vm3, %v2719_v25  ;;  %v6417_v21 = vor.u32 %v6924_v3, %v6414_v23  ;;  %v2521_v25 = vld [vmem:[#allocation2 + $0x1c2] sm:$0xff] }
 0x272   :  { %6837 = vmatmul.msk.bf16.gmra.mxu3 %vm666_vm0, %v5461_v15  ;;  %4925 = vmatmul.bf16.gmra.mxu1 %v6413_v0  ;;  %v9295_v41 = vpop.f32.mrf.mxu0  ;;  %v9302_v15 = vpack.c.bf16 %v923_v11, %v923_v11  ;;  %v6962_v0 = vld [vmem:[#allocation3 + $0x1c0] sm:$0xf0] }
 0x273   :  { %5094 = vmatmul.bf16.gmra.mxu2 %v6417_v21  ;;  %v2585_v21 = vpack.c.bf16 %v2521_v25, %v2521_v25  ;;  %v2970_v25 = vld [vmem:[#allocation2 + $0x1d0] sm:$0xff] }
 0x274   :  { %6810 = vmatmul.msk.bf16.gmra.mxu0 %vm666_vm0, %v6541_v35  ;;  %3623 = vrot.lane.b32.xlu2 %v8970_v43, %s7467_s23  ;;  %v921_v43 = vld [vmem:[#allocation2 + $0x210] sm:$0xff]  ;;  %1052 = vst.msk [vmem:[#allocation3 + $0x15c] sm:$0xf] %vm1022_vm4, %v9302_v15 }
 0x275   :  { %2213 = vrot.lane.b32.xlu1 %v9164_v48, %s7467_s23  ;;  %v6552_v48 = vld [vmem:[#allocation3 + $0x1a0] sm:$0xf] }
 0x276   :  { %2730 = vrot.lane.b32.xlu0 %v8967_v61, %s7466_s1  ;;  %v3168_v24 = vpop.permute.xlu2 %3167  ;;  %v6959_v61 = vld [vmem:[#allocation3 + $0x1a8] sm:$0xf0]  ;;  %v9307_v33 = vpop.f32.mrf.mxu3 }
 0x277   :  { %v1330_v2 = vpop.permute.xlu1 %1329  ;;  %3345 = vst.msk [vmem:[#allocation3 + $0xac] sm:$0xf] %vm1920_vm5, %v3168_v24  ;;  %v6553_v32 = vor.u32 %v6959_v61, %v6552_v48 }
 0x278   :  { %v1781_v30 = vpop.permute.xlu0 %1780  ;;  %1497 = vst.msk [vmem:[#allocation3 + $0x12c] sm:$0xf] %vm1471_vm3, %v1330_v2 }
 0x279   :  { %1946 = vst.msk [vmem:[#allocation3 + $0x12c] sm:$0xf] %vm1920_vm5, %v1779_v17  ;;  %v9287_v17 = vpack.c.bf16 %v921_v43, %v921_v43 }
 0x27a   :  { %1947 = vst.msk [vmem:[#allocation3 + $0x138] sm:$0xf] %vm1920_vm5, %v1781_v30  ;;  %v9319_v24 = vpop.f32.mrf.mxu0  ;;  %v6565_v30 = vor.u32 %v6962_v0, %v6564_v39  ;;  %v3034_v39 = vpack.c.bf16 %v2970_v25, %v2970_v25 }
 0x27b   :  { %1050 = vst.msk [vmem:[#allocation3 + $0x144] sm:$0xf] %vm1022_vm4, %v9287_v17 }
 0x27c   :  { %2215 = vrot.lane.b32.xlu2 %v9148_v27, %s7467_s23 }
 0x27d   :  { %2732 = vrot.lane.b32.xlu1 %v9007_v1, %s7466_s1 }
 0x27e   :  { %3181 = vrot.lane.b32.xlu0 %v9201_v60, %s7463_s29  ;;  %v1785_v50 = vpop.permute.xlu2 %1784 }
 0x27f   :  { %v3616_v37 = vpop.permute.xlu1 %3615 }
 0x280   :  { %3793 = vst.msk [vmem:[#allocation3 + $0xac] sm:$0xf] %vm2369_vm6, %v3616_v37  ;;  %v1334_v53 = vpop.permute.xlu0 %1333 }
 0x281   :  { %1499 = vst.msk [vmem:[#allocation3 + $0x144] sm:$0xf] %vm1471_vm3, %v1334_v53 }
 0x282   :  { %v5085_v1 = vpop.f32.mrf.mxu2  ;;  %v4916_v27 = vpop.f32.mrf.mxu1 }
 0x283   :  { %v4917_v51 = vadd.f32 %v9042_v7, %v4916_v27  ;;  %v9330_v27 = vld [vmem:[%s10180_s6] ss:$0 sm:$0xff]  ;;  %v9343_v0 = vpop.f32.mrf.mxu0 }
 0x284   :  { %6811 = vmatmul.msk.bf16.gmra.mxu0 %vm666_vm0, %v6553_v32  ;;  %3179 = vrot.lane.b32.xlu2 %v9218_v45, %s7463_s29 }
 0x285   :  { %3627 = vrot.lane.b32.xlu1 %v3479_v42, %s7467_s23  ;;  %v5086_v62 = vadd.f32 %v5085_v1, %v4917_v51  ;;  %v7023_v42 = vld [vmem:[#allocation4] sm:$0xff]  }
 0x286   :  { %2217 = vrot.lane.b32.xlu0 %v9182_v8, %s7467_s23  ;;  %v1338_v35 = vpop.permute.xlu2 %1337 }
 0x287   :  { %v1783_v58 = vpop.permute.xlu1 %1782  ;;  %1501 = vst.msk [vmem:[#allocation3 + $0x15c] sm:$0xf] %vm1471_vm3, %v1338_v35  ;;  %v5255_v3 = vadd.f32 %v9190_v49, %v5086_v62  ;;  %v3418_v62 = vld [vmem:[#allocation2 + $0x1d1] sm:$0xff]  ;;  %v7024_v35 = vunpack.c.l.bf16 %v7023_v42 }
 0x288   :  { %1948 = vst.msk [vmem:[#allocation3 + $0x144] sm:$0xf] %vm1920_vm5, %v1783_v58  ;;  %v3170_v54 = vpop.permute.xlu0 %3169  ;;  %v924_v58 = vld [vmem:[#allocation2 + $0x240] sm:$0xff] }
 0x289   :  { %3346 = vst.msk [vmem:[#allocation3 + $0xb8] sm:$0xf] %vm1920_vm5, %v3170_v54  ;;  %v5402_v61 = vmax.f32 %v5255_v3, 0.0  ;;  %v7025_v3 = vunpack.c.h.bf16 %v7023_v42 }
 0x28a   :  { %v4918_v19 = vpop.f32.mrf.mxu1  ;;  %v5087_v22 = vpop.f32.mrf.mxu2 }
 0x28b   :  { %v4919_v8 = vadd.f32 %v9042_v7, %v4918_v19  ;;  %v922_v7 = vld [vmem:[#allocation2 + $0x220] sm:$0xff]  ;;  %v9340_v19 = vpack.c.bf16 %v924_v58, %v924_v58  ;;  %v9356_v58 = vpop.f32.mrf.mxu0 }
 0x28c   :  { %3629 = vrot.lane.b32.xlu2 %v9034_v40, %s7467_s23  ;;  %v9321_v48 = vpack.c.bf16 %v922_v7, %v922_v7  ;;  %v2520_v40 = vld [vmem:[#allocation2 + $0x1b2] sm:$0xff] }
 0x28d   :  { %v5088_v23 = vadd.f32 %v5087_v22, %v4919_v8  ;;  %2219 = vrot.lane.b32.xlu1 %v9218_v45, %s7467_s23  ;;  %v3417_v45 = vld [vmem:[#allocation2 + $0x1c1] sm:$0xff]  ;;  %v2584_v51 = vpack.c.bf16 %v2520_v40, %v2520_v40  ;;  %1053 = vst.msk [vmem:[#allocation3 + $0x168] sm:$0xf] %vm1022_vm4, %v9340_v19 }
 0x28e   :  { %2736 = vrot.lane.b32.xlu0 %v2585_v21, %s7466_s1  ;;  %v3618_v32 = vpop.permute.xlu2 %3617  ;;  %1051 = vst.msk [vmem:[#allocation3 + $0x150] sm:$0xf] %vm1022_vm4, %v9321_v48  ;;  %v3481_v11 = vpack.c.bf16 %v3417_v45, %v3417_v45 }
 0x28f   :  { %v5257_v2 = vadd.f32 %v9211_v18, %v5088_v23  ;;  %v1336_v49 = vpop.permute.xlu1 %1335  ;;  %v2969_v18 = vld [vmem:[#allocation2 + $0x1c0] sm:$0xff]  ;;  %3794 = vst.msk [vmem:[#allocation3 + $0xb8] sm:$0xf] %vm2369_vm6, %v3618_v32  ;;  %v3482_v23 = vpack.c.bf16 %v3418_v62, %v3418_v62 }
 0x290   :  { %v1787_v37 = vpop.permute.xlu0 %1786  ;;  %1500 = vst.msk [vmem:[#allocation3 + $0x150] sm:$0xf] %vm1471_vm3, %v1336_v49  ;;  %v3033_v46 = vpack.c.bf16 %v2969_v18, %v2969_v18 }
 0x291   :  { %v5403_v43 = vmax.f32 %v5257_v2, 0.0  ;;  %1949 = vst.msk [vmem:[#allocation3 + $0x150] sm:$0xf] %vm1920_vm5, %v1785_v50 }
 0x292   :  { %1950 = vst.msk [vmem:[#allocation3 + $0x15c] sm:$0xf] %vm1920_vm5, %v1787_v37 }
 0x293   :  { %v5462_v1 = vpack.c.bf16 %v5403_v43, %v5402_v61  ;;  %v6576_v61 = vld [vmem:[#allocation3 + $0x1d0] sm:$0xf]  ;;  %v6965_v43 = vld [vmem:[#allocation3 + $0x1d8] sm:$0xf0] }
 0x294   :  { %6812 = vmatmul.msk.bf16.gmra.mxu0 %vm666_vm0, %v6565_v30  ;;  %2734 = vrot.lane.b32.xlu2 %v2584_v51, %s7466_s1  ;;  %v6927_v30 = vld [vmem:[#allocation3 + $0xac] sm:$0xf]  ;;  %v6577_v18 = vor.u32 %v6965_v43, %v6576_v61  ;;  %v927_v61 = vld [vmem:[#allocation2 + $0x290] sm:$0xff] }
 0x295   :  { %v5743_v53 = vpop.f32.mrf.mxu3  ;;  %6838 = vmatmul.msk.bf16.gmra.mxu3 %vm666_vm0, %v5462_v1  ;;  %3183 = vrot.lane.b32.xlu1 %v3033_v46, %s7463_s29 }
 0x296   :  { %3631 = vrot.lane.b32.xlu0 %v3481_v11, %s7467_s23  ;;  %v5744_v50 = vadd.f32 %v9330_v27, %v5743_v53  ;;  %v1791_v8 = vpop.permute.xlu2 %1790  ;;  %v6426_v49 = vld [vmem:[#allocation3 + $0xb4] sm:$0xf0] }
 0x297   :  { %v2208_v54 = vpop.permute.xlu1 %2207  ;;  %v6429_v32 = vor.u32 %v6927_v30, %v6426_v49  ;;  %v2522_v11 = vld [vmem:[#allocation2 + $0x1f2] sm:$0xff]  ;;  %v9370_v30 = vpop.f32.mrf.mxu0 }
 0x298   :  { %2385 = vst.msk [vmem:[#allocation3 + $0xb4] sm:$0xf] %vm2369_vm6, %v2208_v54  ;;  %v1340_v22 = vpop.permute.xlu0 %1339  ;;  %v5903_v2 = vadd.f32 %v7024_v35, %v5744_v50  ;;  %v2586_v62 = vpack.c.bf16 %v2522_v11, %v2522_v11  ;;  %v929_v11 = vld [vmem:[#allocation2 + $0x2b0] sm:$0xff] }
 0x299   :  { %1502 = vst.msk [vmem:[#allocation3 + $0x168] sm:$0xf] %vm1471_vm3, %v1340_v22  ;;  %5099 = vmatmul.bf16.gmra.mxu2 %v6429_v32  ;;  %v9377_v32 = vpack.c.bf16 %v927_v61, %v927_v61 }
 0x29a   :  { %v5967_v40 = vmax.f32 %v5903_v2, 0.0  ;;  %v6968_v2 = vld [vmem:[#allocation3 + $0x1f0] sm:$0xf0] }
 0x29b   :  { %1056 = vst.msk [vmem:[#allocation3 + $0x18c] sm:$0xf] %vm1022_vm4, %v9377_v32 }
 0x29c   :  { %3185 = vrot.lane.b32.xlu2 %v3034_v39, %s7463_s29  ;;  %v3420_v39 = vld [vmem:[#allocation2 + $0x211] sm:$0xff] }
 0x29d   :  { %v5745_v21 = vpop.f32.mrf.mxu3  ;;  %3633 = vrot.lane.b32.xlu1 %v3482_v23, %s7467_s23  ;;  %v2523_v23 = vld [vmem:[#allocation2 + $0x202] sm:$0xff]  ;;  %v3484_v49 = vpack.c.bf16 %v3420_v39, %v3420_v39  ;;  %v6971_v39 = vld [vmem:[#allocation3 + $0x208] sm:$0xf0] }
 0x29e   :  { %v5746_v7 = vadd.f32 %v9330_v27, %v5745_v21  ;;  %2223 = vrot.lane.b32.xlu0 %v3033_v46, %s7467_s23  ;;  %v2723_v1 = vpop.permute.xlu2 %2722  ;;  %v925_v46 = vld [vmem:[#allocation2 + $0x250] sm:$0xff] }
 0x29f   :  { %v1789_v53 = vpop.permute.xlu1 %1788  ;;  %2898 = vst.msk [vmem:[#allocation3 + $0xc4] sm:$0xf] %vm1471_vm3, %v2723_v1  ;;  %v9363_v35 = vpack.c.bf16 %v925_v46, %v925_v46  ;;  %v6928_v22 = vld [vmem:[#allocation3 + $0xb0] sm:$0xf0] }
 0x2a0   :  { %v5904_v37 = vadd.f32 %v7025_v3, %v5746_v7  ;;  %1951 = vst.msk [vmem:[#allocation3 + $0x168] sm:$0xf] %vm1920_vm5, %v1789_v53  ;;  %v2206_v42 = vpop.permute.xlu0 %2205  ;;  %v2587_v7 = vpack.c.bf16 %v2523_v23, %v2523_v23 }
 0x2a1   :  { %2384 = vst.msk [vmem:[#allocation3 + $0xa8] sm:$0xf] %vm2369_vm6, %v2206_v42  ;;  %v7310_v42 = vld [vmem:[#allocation4 + $0x8] sm:$0xff]  }
 0x2a2   :  { %v5968_v45 = vmax.f32 %v5904_v37, 0.0  ;;  %1054 = vst.msk [vmem:[#allocation3 + $0x174] sm:$0xf] %vm1022_vm4, %v9363_v35 }
 0x2a4   :  { %6813 = vmatmul.msk.bf16.gmra.mxu0 %vm666_vm0, %v6577_v18  ;;  %v7153_v51 = vpack.c.bf16 %v5968_v45, %v5967_v40  ;;  %2221 = vrot.lane.b32.xlu2 %v9201_v60, %s7467_s23  ;;  %v6588_v60 = vld [vmem:[#allocation3 + $0x1e8] sm:$0xf]  ;;  %v2524_v45 = vld [vmem:[#allocation2 + $0x212] sm:$0xff] }
 0x2a5   :  { %2738 = vrot.lane.b32.xlu1 %v2586_v62, %s7466_s1  ;;  %v6589_v43 = vor.u32 %v6968_v2, %v6588_v60  ;;  %v3419_v40 = vld [vmem:[#allocation2 + $0x201] sm:$0xff]  ;;  %v9387_v62 = vpop.f32.mrf.mxu0 }
 0x2a6   :  { %7154 = vst [vmem:[#allocation7] sm:$0xff] %v7153_v51   ;;  %3187 = vrot.lane.b32.xlu0 %v9251_v26, %s7463_s29  ;;  %v3174_v54 = vpop.permute.xlu2 %3173  ;;  %v3483_v1 = vpack.c.bf16 %v3419_v40, %v3419_v40  ;;  %v2588_v51 = vpack.c.bf16 %v2524_v45, %v2524_v45 }
 0x2a7   :  { %v1342_v50 = vpop.permute.xlu1 %1341 }
 0x2a8   :  { %v2725_v25 = vpop.permute.xlu0 %2724  ;;  %v6424_v3 = vld [vmem:[#allocation3 + $0xa8] sm:$0xf]  ;;  %1503 = vst.msk [vmem:[#allocation3 + $0x174] sm:$0xf] %vm1471_vm3, %v1342_v50  ;;  %v9390_v50 = vpack.c.bf16 %v929_v11, %v929_v11 }
 0x2a9   :  { %v6425_v21 = vor.u32 %v6928_v22, %v6424_v3  ;;  %1952 = vst.msk [vmem:[#allocation3 + $0x174] sm:$0xf] %vm1920_vm5, %v1791_v8  ;;  %v7029_v3 = vunpack.c.h.bf16 %v7310_v42 }
 0x2aa   :  { %2899 = vst.msk [vmem:[#allocation3 + $0xd0] sm:$0xf] %vm1471_vm3, %v2725_v25 }
 0x2ab   :  { %4930 = vmatmul.bf16.gmra.mxu1 %v6425_v21  ;;  %3348 = vst.msk [vmem:[#allocation3 + $0xd0] sm:$0xf] %vm1920_vm5, %v3174_v54  ;;  %v7028_v54 = vunpack.c.l.bf16 %v7310_v42  ;;  %v6600_v21 = vld [vmem:[#allocation3 + $0x200] sm:$0xf] }
 0x2ac   :  { %2740 = vrot.lane.b32.xlu2 %v2587_v7, %s7466_s1  ;;  %1058 = vst.msk [vmem:[#allocation3 + $0x1a4] sm:$0xf] %vm1022_vm4, %v9390_v50  ;;  %v6601_v61 = vor.u32 %v6971_v39, %v6600_v21 }
 0x2ad   :  { %3189 = vrot.lane.b32.xlu1 %v9287_v17, %s7463_s29 }
 0x2ae   :  { %3637 = vrot.lane.b32.xlu0 %v3484_v49, %s7467_s23  ;;  %v1797_v37 = vpop.permute.xlu2 %1796  ;;  %v928_v49 = vld [vmem:[#allocation2 + $0x2a0] sm:$0xff] }
 0x2af   :  { %v3172_v8 = vpop.permute.xlu1 %3171 }
 0x2b0   :  { %3347 = vst.msk [vmem:[#allocation3 + $0xc4] sm:$0xf] %vm1920_vm5, %v3172_v8  ;;  %v1346_v18 = vpop.permute.xlu0 %1345 }
 0x2b1   :  { %1505 = vst.msk [vmem:[#allocation3 + $0x18c] sm:$0xf] %vm1471_vm3, %v1346_v18 }
 0x2b4   :  { %6814 = vmatmul.msk.bf16.gmra.mxu0 %vm666_vm0, %v6589_v43  ;;  %3635 = vrot.lane.b32.xlu2 %v3483_v1, %s7467_s23  ;;  %v9405_v43 = vpack.c.bf16 %v928_v49, %v928_v49  ;;  %v9407_v1 = vpop.f32.mrf.mxu0 }
 0x2b5   :  { %2225 = vrot.lane.b32.xlu1 %v9269_v28, %s7467_s23 }
 0x2b6   :  { %v5748_v53 = vpop.f32.mrf.mxu3  ;;  %2742 = vrot.lane.b32.xlu0 %v2588_v51, %s7466_s1  ;;  %v1350_v22 = vpop.permute.xlu2 %1349  ;;  %1057 = vst.msk [vmem:[#allocation3 + $0x198] sm:$0xf] %vm1022_vm4, %v9405_v43  ;;  %v930_v51 = vld [vmem:[#allocation2 + $0x2c0] sm:$0xff] }
 0x2b7   :  { %v1795_v46 = vpop.permute.xlu1 %1794  ;;  %v5749_v25 = vadd.f32 %v9330_v27, %v5748_v53  ;;  %1507 = vst.msk [vmem:[#allocation3 + $0x1a4] sm:$0xf] %vm1471_vm3, %v1350_v22  ;;  %v3421_v53 = vld [vmem:[#allocation2 + $0x221] sm:$0xff]  ;;  %v5090_v22 = vpop.f32.mrf.mxu2 }
 0x2b8   :  { %1954 = vst.msk [vmem:[#allocation3 + $0x18c] sm:$0xf] %vm1920_vm5, %v1795_v46  ;;  %v3620_v28 = vpop.permute.xlu0 %3619  ;;  %v3485_v42 = vpack.c.bf16 %v3421_v53, %v3421_v53  ;;  %v9421_v46 = vpack.c.bf16 %v930_v51, %v930_v51 }
 0x2b9   :  { %3795 = vst.msk [vmem:[#allocation3 + $0xc4] sm:$0xf] %vm2369_vm6, %v3620_v28  ;;  %v5905_v60 = vadd.f32 %v7028_v54, %v5749_v25  ;;  %v3422_v25 = vld [vmem:[#allocation2 + $0x231] sm:$0xff] }
 0x2ba   :  { %1059 = vst.msk [vmem:[#allocation3 + $0x1b0] sm:$0xf] %vm1022_vm4, %v9421_v46 }
 0x2bb   :  { %v5969_v18 = vmax.f32 %v5905_v60, 0.0 }
 0x2bc   :  { %2227 = vrot.lane.b32.xlu2 %v9251_v26, %s7467_s23 }
 0x2bd   :  { %2744 = vrot.lane.b32.xlu1 %v9097_v5, %s7466_s1 }
 0x2be   :  { %v5750_v23 = vpop.f32.mrf.mxu3  ;;  %3193 = vrot.lane.b32.xlu0 %v9302_v15, %s7463_s29  ;;  %v2210_v45 = vpop.permute.xlu2 %2209 }
 0x2bf   :  { %v5751_v2 = vadd.f32 %v9330_v27, %v5750_v23  ;;  %v1348_v8 = vpop.permute.xlu1 %1347  ;;  %2386 = vst.msk [vmem:[#allocation3 + $0xc0] sm:$0xf] %vm2369_vm6, %v2210_v45  ;;  %v3486_v23 = vpack.c.bf16 %v3422_v25, %v3422_v25 }
 0x2c0   :  { %v1799_v5 = vpop.permute.xlu0 %1798  ;;  %1506 = vst.msk [vmem:[#allocation3 + $0x198] sm:$0xf] %vm1471_vm3, %v1348_v8 }
 0x2c1   :  { %v5906_v7 = vadd.f32 %v7029_v3, %v5751_v2  ;;  %1955 = vst.msk [vmem:[#allocation3 + $0x198] sm:$0xf] %vm1920_vm5, %v1797_v37  ;;  %v2527_v3 = vld [vmem:[#allocation2 + $0x242] sm:$0xff] }
 0x2c2   :  { %1956 = vst.msk [vmem:[#allocation3 + $0x1a4] sm:$0xf] %vm1920_vm5, %v1799_v5  ;;  %v2591_v39 = vpack.c.bf16 %v2527_v3, %v2527_v3  ;;  %v6930_v2 = vld [vmem:[#allocation3 + $0xc4] sm:$0xf]  ;;  %v5092_v5 = vpop.f32.mrf.mxu2 }
 0x2c3   :  { %v5970_v40 = vmax.f32 %v5906_v7, 0.0 }
 0x2c4   :  { %6815 = vmatmul.msk.bf16.gmra.mxu0 %vm666_vm0, %v6601_v61  ;;  %3191 = vrot.lane.b32.xlu2 %v9321_v48, %s7463_s29 }
 0x2c5   :  { %v7158_v26 = vpack.c.bf16 %v5970_v40, %v5969_v18  ;;  %3639 = vrot.lane.b32.xlu1 %v3485_v42, %s7467_s23  ;;  %v2526_v40 = vld [vmem:[#allocation2 + $0x232] sm:$0xff] }
 0x2c6   :  { %2229 = vrot.lane.b32.xlu0 %v9287_v17, %s7467_s23  ;;  %v2729_v37 = vpop.permute.xlu2 %2728  ;;  %v9431_v17 = vld [vmem:[%s10178_s4] ss:$0 sm:$0xff] }
 0x2c7   :  { %7341 = vst [vmem:[#allocation7 + $0x8] sm:$0xff] %v7158_v26   ;;  %v3622_v11 = vpop.permute.xlu1 %3621  ;;  %v2590_v26 = vpack.c.bf16 %v2526_v40, %v2526_v40 }
 0x2c8   :  { %3796 = vst.msk [vmem:[#allocation3 + $0xd0] sm:$0xf] %vm2369_vm6, %v3622_v11  ;;  %v1352_v54 = vpop.permute.xlu0 %1351  ;;  %v4921_v28 = vpop.f32.mrf.mxu1 }
 0x2c9   :  { %2901 = vst.msk [vmem:[#allocation3 + $0xe8] sm:$0xf] %vm1471_vm3, %v2729_v37  ;;  %v4922_v21 = vadd.f32 %v9431_v17, %v4921_v28  ;;  %v3424_v28 = vld [vmem:[#allocation2 + $0x251] sm:$0xff] }
 0x2ca   :  { %1508 = vst.msk [vmem:[#allocation3 + $0x1b0] sm:$0xf] %vm1471_vm3, %v1352_v54 }
 0x2cb   :  { %v5091_v8 = vadd.f32 %v5090_v22, %v4922_v21  ;;  %v6436_v22 = vld [vmem:[#allocation3 + $0xc0] sm:$0xf] }
 0x2cc   :  { %3641 = vrot.lane.b32.xlu2 %v3486_v23, %s7467_s23 }
 0x2cd   :  { %2231 = vrot.lane.b32.xlu1 %v9321_v48, %s7467_s23  ;;  %v3423_v48 = vld [vmem:[#allocation2 + $0x241] sm:$0xff]  ;;  %v5260_v42 = vadd.f32 %v9237_v9, %v5091_v8 }
 0x2ce   :  { %2748 = vrot.lane.b32.xlu0 %v2591_v39, %s7466_s1  ;;  %v3624_v49 = vpop.permute.xlu2 %3623  ;;  %v3487_v11 = vpack.c.bf16 %v3423_v48, %v3423_v48 }
 0x2cf   :  { %v1801_v60 = vpop.permute.xlu1 %1800  ;;  %v6438_v7 = vld [vmem:[#allocation3 + $0xcc] sm:$0xf0]  ;;  %v5404_v3 = vmax.f32 %v5260_v42, 0.0 }
 0x2d0   :  { %1957 = vst.msk [vmem:[#allocation3 + $0x1b0] sm:$0xf] %vm1920_vm5, %v1801_v60  ;;  %v6441_v61 = vor.u32 %v6930_v2, %v6438_v7  ;;  %v2212_v18 = vpop.permute.xlu0 %2211  ;;  %v4923_v45 = vpop.f32.mrf.mxu1  ;;  %v3488_v60 = vpack.c.bf16 %v3424_v28, %v3424_v28  ;;  %v2529_v28 = vld [vmem:[#allocation2 + $0x262] sm:$0xff] }
 0x2d1   :  { %2387 = vst.msk [vmem:[#allocation3 + $0xcc] sm:$0xf] %vm2369_vm6, %v2212_v18  ;;  %v4924_v53 = vadd.f32 %v9431_v17, %v4923_v45  ;;  %v2977_v18 = vld [vmem:[#allocation2 + $0x260] sm:$0xff]  ;;  %v7311_v45 = vld [vmem:[#allocation4 + $0x10] sm:$0xff]  }
 0x2d2   :  { %5104 = vmatmul.bf16.gmra.mxu2 %v6441_v61  ;;  %v2528_v61 = vld [vmem:[#allocation2 + $0x252] sm:$0xff]  ;;  %v9460_v48 = vpack.c.bf16 %v2977_v18, %v2977_v18 }
 0x2d3   :  { %v5093_v51 = vadd.f32 %v5092_v5, %v4924_v53  ;;  %v2592_v40 = vpack.c.bf16 %v2528_v61, %v2528_v61  ;;  %v7032_v53 = vunpack.c.l.bf16 %v7311_v45 }
 0x2d4   :  { %2746 = vrot.lane.b32.xlu2 %v2590_v26, %s7466_s1 }
 0x2d5   :  { %3195 = vrot.lane.b32.xlu1 %v9340_v19, %s7463_s29  ;;  %v5262_v37 = vadd.f32 %v9254_v10, %v5093_v51  ;;  %v3426_v51 = vld [vmem:[#allocation2 + $0x271] sm:$0xff] }
 0x2d6   :  { %3643 = vrot.lane.b32.xlu0 %v3487_v11, %s7467_s23  ;;  %v2216_v25 = vpop.permute.xlu2 %2215  ;;  %v7033_v11 = vunpack.c.h.bf16 %v7311_v45 }
 0x2d7   :  { %v2727_v54 = vpop.permute.xlu1 %2726  ;;  %v5405_v23 = vmax.f32 %v5262_v37, 0.0  ;;  %2389 = vst.msk [vmem:[#allocation3 + $0xe4] sm:$0xf] %vm2369_vm6, %v2216_v25 }
 0x2d8   :  { %2900 = vst.msk [vmem:[#allocation3 + $0xdc] sm:$0xf] %vm1471_vm3, %v2727_v54  ;;  %v3176_v9 = vpop.permute.xlu0 %3175  ;;  %v6931_v21 = vld [vmem:[#allocation3 + $0xc8] sm:$0xf0] }
 0x2d9   :  { %3349 = vst.msk [vmem:[#allocation3 + $0xdc] sm:$0xf] %vm1920_vm5, %v3176_v9  ;;  %v6437_v39 = vor.u32 %v6931_v21, %v6436_v22  ;;  %v5463_v10 = vpack.c.bf16 %v5405_v23, %v5404_v3  ;;  %v3490_v21 = vpack.c.bf16 %v3426_v51, %v3426_v51  ;;  %v7312_v51 = vld [vmem:[#allocation4 + $0x18] sm:$0xff]  }
 0x2da   :  { %3797 = vst.msk [vmem:[#allocation3 + $0xdc] sm:$0xf] %vm2369_vm6, %v3624_v49 }
 0x2db   :  { %4935 = vmatmul.bf16.gmra.mxu1 %v6437_v39  ;;  %6839 = vmatmul.msk.bf16.gmra.mxu3 %vm666_vm0, %v5463_v10  ;;  %v2593_v39 = vpack.c.bf16 %v2529_v28, %v2529_v28 }
 0x2dc   :  { %3197 = vrot.lane.b32.xlu2 %v9363_v35, %s7463_s29 }
 0x2dd   :  { %3645 = vrot.lane.b32.xlu1 %v3488_v60, %s7467_s23 }
 0x2de   :  { %2235 = vrot.lane.b32.xlu0 %v9340_v19, %s7467_s23  ;;  %v3180_v7 = vpop.permute.xlu2 %3179  ;;  %v2978_v19 = vld [vmem:[#allocation2 + $0x270] sm:$0xff] }
 0x2df   :  { %v3178_v2 = vpop.permute.xlu1 %3177  ;;  %v3042_v22 = vpack.c.bf16 %v2978_v19, %v2978_v19  ;;  %v3425_v19 = vld [vmem:[#allocation2 + $0x261] sm:$0xff] }
 0x2e0   :  { %3350 = vst.msk [vmem:[#allocation3 + $0xe8] sm:$0xf] %vm1920_vm5, %v3178_v2  ;;  %v3626_v8 = vpop.permute.xlu0 %3625 }
 0x2e1   :  { %3798 = vst.msk [vmem:[#allocation3 + $0xe8] sm:$0xf] %vm2369_vm6, %v3626_v8  ;;  %v6933_v54 = vld [vmem:[#allocation3 + $0xdc] sm:$0xf] }
 0x2e4   :  { %2233 = vrot.lane.b32.xlu2 %v9302_v15, %s7467_s23 }
 0x2e5   :  { %v5753_v49 = vpop.f32.mrf.mxu3  ;;  %2750 = vrot.lane.b32.xlu1 %v2592_v40, %s7466_s1 }
 0x2e6   :  { %v5754_v5 = vadd.f32 %v9330_v27, %v5753_v49  ;;  %3199 = vrot.lane.b32.xlu0 %v9460_v48, %s7463_s29  ;;  %v3630_v42 = vpop.permute.xlu2 %3629  ;;  %v6934_v49 = vld [vmem:[#allocation3 + $0xe0] sm:$0xf0] }
 0x2e7   :  { %v2214_v26 = vpop.permute.xlu1 %2213 }
 0x2e8   :  { %2388 = vst.msk [vmem:[#allocation3 + $0xd8] sm:$0xf] %vm2369_vm6, %v2214_v26  ;;  %v2731_v37 = vpop.permute.xlu0 %2730  ;;  %v6450_v25 = vld [vmem:[#allocation3 + $0xe4] sm:$0xf0]  ;;  %v5907_v23 = vadd.f32 %v7032_v53, %v5754_v5  ;;  %v2530_v26 = vld [vmem:[#allocation2 + $0x292] sm:$0xff] }
 0x2e9   :  { %2902 = vst.msk [vmem:[#allocation3 + $0xf4] sm:$0xf] %vm1471_vm3, %v2731_v37  ;;  %v6453_v15 = vor.u32 %v6933_v54, %v6450_v25  ;;  %v2594_v37 = vpack.c.bf16 %v2530_v26, %v2530_v26  ;;  %v7036_v54 = vunpack.c.l.bf16 %v7312_v51  ;;  %v3427_v26 = vld [vmem:[#allocation2 + $0x2a1] sm:$0xff] }
 0x2ea   :  { %3351 = vst.msk [vmem:[#allocation3 + $0xf4] sm:$0xf] %vm1920_vm5, %v3180_v7  ;;  %v5971_v60 = vmax.f32 %v5907_v23, 0.0  ;;  %v7037_v23 = vunpack.c.h.bf16 %v7312_v51 }
 0x2eb   :  { %5109 = vmatmul.bf16.gmra.mxu2 %v6453_v15  ;;  %v2531_v15 = vld [vmem:[#allocation2 + $0x2a2] sm:$0xff] }
 0x2ec   :  { %2752 = vrot.lane.b32.xlu2 %v2593_v39, %s7466_s1 }
 0x2ed   :  { %v5755_v3 = vpop.f32.mrf.mxu3  ;;  %3201 = vrot.lane.b32.xlu1 %v3042_v22, %s7463_s29 }
 0x2ee   :  { %v5756_v9 = vadd.f32 %v9330_v27, %v5755_v3  ;;  %3649 = vrot.lane.b32.xlu0 %v3490_v21, %s7467_s23  ;;  %v2735_v18 = vpop.permute.xlu2 %2734 }
 0x2ef   :  { %v2733_v61 = vpop.permute.xlu1 %2732  ;;  %v6448_v8 = vld [vmem:[#allocation3 + $0xd8] sm:$0xf]  ;;  %2904 = vst.msk [vmem:[#allocation3 + $0x10c] sm:$0xf] %vm1471_vm3, %v2735_v18  ;;  %v4926_v5 = vpop.f32.mrf.mxu1 }
 0x2f0   :  { %v5908_v10 = vadd.f32 %v7033_v11, %v5756_v9  ;;  %2903 = vst.msk [vmem:[#allocation3 + $0x100] sm:$0xf] %vm1471_vm3, %v2733_v61  ;;  %v6449_v40 = vor.u32 %v6934_v49, %v6448_v8  ;;  %v3182_v45 = vpop.permute.xlu0 %3181  ;;  %v3489_v11 = vpack.c.bf16 %v3425_v19, %v3425_v19  ;;  %v4927_v39 = vadd.f32 %v9431_v17, %v4926_v5 }
 0x2f1   :  { %3352 = vst.msk [vmem:[#allocation3 + $0x100] sm:$0xf] %vm1920_vm5, %v3182_v45 }
 0x2f2   :  { %v5972_v2 = vmax.f32 %v5908_v10, 0.0  ;;  %4940 = vmatmul.bf16.gmra.mxu1 %v6449_v40  ;;  %3800 = vst.msk [vmem:[#allocation3 + $0x100] sm:$0xf] %vm2369_vm6, %v3630_v42  ;;  %v2595_v10 = vpack.c.bf16 %v2531_v15, %v2531_v15 }
 0x2f4   :  { %v7163_v7 = vpack.c.bf16 %v5972_v2, %v5971_v60  ;;  %3647 = vrot.lane.b32.xlu2 %v3489_v11, %s7467_s23 }
 0x2f5   :  { %v5758_v53 = vpop.f32.mrf.mxu3  ;;  %2237 = vrot.lane.b32.xlu1 %v9363_v35, %s7467_s23 }
 0x2f6   :  { %7342 = vst [vmem:[#allocation7 + $0x10] sm:$0xff] %v7163_v7   ;;  %v5759_v25 = vadd.f32 %v9330_v27, %v5758_v53  ;;  %2754 = vrot.lane.b32.xlu0 %v2594_v37, %s7466_s1  ;;  %v5095_v28 = vpop.f32.mrf.mxu2  ;;  %v3186_v3 = vpop.permute.xlu2 %3185 }
 0x2f7   :  { %v3628_v22 = vpop.permute.xlu1 %3627  ;;  %v4928_v60 = vpop.f32.mrf.mxu1  ;;  %v5096_v61 = vadd.f32 %v5095_v28, %v4927_v39 }
 0x2f8   :  { %3799 = vst.msk [vmem:[#allocation3 + $0xf4] sm:$0xf] %vm2369_vm6, %v3628_v22  ;;  %v2218_v42 = vpop.permute.xlu0 %2217  ;;  %v5909_v35 = vadd.f32 %v7036_v54, %v5759_v25  ;;  %v4929_v18 = vadd.f32 %v9431_v17, %v4928_v60  ;;  %v3491_v25 = vpack.c.bf16 %v3427_v26, %v3427_v26  ;;  %v3430_v26 = vld [vmem:[#allocation2 + $0x2d1] sm:$0xff] }
 0x2f9   :  { %2390 = vst.msk [vmem:[#allocation3 + $0xf0] sm:$0xf] %vm2369_vm6, %v2218_v42  ;;  %v6462_v45 = vld [vmem:[#allocation3 + $0xfc] sm:$0xf0]  ;;  %v5265_v11 = vadd.f32 %v9274_v4, %v5096_v61  ;;  %v2532_v61 = vld [vmem:[#allocation2 + $0x2b2] sm:$0xff] }
 0x2fa   :  { %v5973_v8 = vmax.f32 %v5909_v35, 0.0  ;;  %v3428_v35 = vld [vmem:[#allocation2 + $0x2b1] sm:$0xff] }
 0x2fb   :  { %v5406_v22 = vmax.f32 %v5265_v11, 0.0  ;;  %v3492_v39 = vpack.c.bf16 %v3428_v35, %v3428_v35  ;;  %v2534_v35 = vld [vmem:[#allocation2 + $0x2d2] sm:$0xff] }
 0x2fc   :  { %2239 = vrot.lane.b32.xlu2 %v9460_v48, %s7467_s23 }
 0x2fd   :  { %v5760_v9 = vpop.f32.mrf.mxu3  ;;  %2756 = vrot.lane.b32.xlu1 %v2595_v10, %s7466_s1 }
 0x2fe   :  { %v5761_v21 = vadd.f32 %v9330_v27, %v5760_v9  ;;  %3205 = vrot.lane.b32.xlu0 %v9390_v50, %s7463_s29  ;;  %v5097_v19 = vpop.f32.mrf.mxu2  ;;  %v2222_v53 = vpop.permute.xlu2 %2221 }
 0x2ff   :  { %v2220_v40 = vpop.permute.xlu1 %2219  ;;  %v6936_v7 = vld [vmem:[#allocation3 + $0xf4] sm:$0xf]  ;;  %v5098_v48 = vadd.f32 %v5097_v19, %v4929_v18  ;;  %2392 = vst.msk [vmem:[#allocation3 + $0x108] sm:$0xf] %vm2369_vm6, %v2222_v53  ;;  %v7313_v19 = vld [vmem:[#allocation4 + $0x20] sm:$0xff]  }
 0x300   :  { %v5910_v2 = vadd.f32 %v7037_v23, %v5761_v21  ;;  %2391 = vst.msk [vmem:[#allocation3 + $0xfc] sm:$0xf] %vm2369_vm6, %v2220_v40  ;;  %v6465_v5 = vor.u32 %v6936_v7, %v6462_v45  ;;  %v2737_v37 = vpop.permute.xlu0 %2736  ;;  %v6460_v23 = vld [vmem:[#allocation3 + $0xf0] sm:$0xf]  ;;  %v2533_v21 = vld [vmem:[#allocation2 + $0x2c2] sm:$0xff] }
 0x301   :  { %2905 = vst.msk [vmem:[#allocation3 + $0x118] sm:$0xf] %vm1471_vm3, %v2737_v37  ;;  %v5267_v54 = vadd.f32 %v9295_v41, %v5098_v48 }
 0x302   :  { %v5974_v49 = vmax.f32 %v5910_v2, 0.0  ;;  %5114 = vmatmul.bf16.gmra.mxu2 %v6465_v5  ;;  %3354 = vst.msk [vmem:[#allocation3 + $0x118] sm:$0xf] %vm1920_vm5, %v3186_v3 }
 0x303   :  { %v5407_v28 = vmax.f32 %v5267_v54, 0.0 }
 0x304   :  { %v7168_v51 = vpack.c.bf16 %v5974_v49, %v5973_v8  ;;  %3203 = vrot.lane.b32.xlu2 %v9405_v43, %s7463_s29  ;;  %v3429_v8 = vld [vmem:[#allocation2 + $0x2c1] sm:$0xff]  ;;  %v2596_v49 = vpack.c.bf16 %v2532_v61, %v2532_v61 }
 0x305   :  { %3651 = vrot.lane.b32.xlu1 %v3491_v25, %s7467_s23  ;;  %v5464_v4 = vpack.c.bf16 %v5407_v28, %v5406_v22  ;;  %v3493_v18 = vpack.c.bf16 %v3429_v8, %v3429_v8  ;;  %v3494_v25 = vpack.c.bf16 %v3430_v26, %v3430_v26  ;;  %v7040_v22 = vunpack.c.l.bf16 %v7313_v19 }
 0x306   :  { %7343 = vst [vmem:[#allocation7 + $0x18] sm:$0xff] %v7168_v51   ;;  %2241 = vrot.lane.b32.xlu0 %v9377_v32, %s7467_s23  ;;  %v2741_v41 = vpop.permute.xlu2 %2740  ;;  %v2597_v32 = vpack.c.bf16 %v2533_v21, %v2533_v21  ;;  %v2982_v51 = vld [vmem:[#allocation2 + $0x2d0] sm:$0xff]  ;;  %v6472_v48 = vld [vmem:[#allocation3 + $0x108] sm:$0xf] }
 0x307   :  { %v3184_v15 = vpop.permute.xlu1 %3183  ;;  %v6937_v42 = vld [vmem:[#allocation3 + $0xf8] sm:$0xf0]  ;;  %6840 = vmatmul.msk.bf16.gmra.mxu3 %vm666_vm0, %v5464_v4  ;;  %2907 = vst.msk [vmem:[#allocation3 + $0x130] sm:$0xf] %vm1471_vm3, %v2741_v41  ;;  %v9523_v4 = vpack.c.bf16 %v2982_v51, %v2982_v51 }
 0x308   :  { %3353 = vst.msk [vmem:[#allocation3 + $0x10c] sm:$0xf] %vm1920_vm5, %v3184_v15  ;;  %v6461_v9 = vor.u32 %v6937_v42, %v6460_v23  ;;  %v3632_v3 = vpop.permute.xlu0 %3631  ;;  %v7041_v15 = vunpack.c.h.bf16 %v7313_v19 }
 0x309   :  { %3801 = vst.msk [vmem:[#allocation3 + $0x10c] sm:$0xf] %vm2369_vm6, %v3632_v3 }
 0x30a   :  { %4945 = vmatmul.bf16.gmra.mxu1 %v6461_v9 }
 0x30c   :  { %3653 = vrot.lane.b32.xlu2 %v3492_v39, %s7467_s23 }
 0x30d   :  { %2243 = vrot.lane.b32.xlu1 %v9405_v43, %s7467_s23 }
 0x30e   :  { %2760 = vrot.lane.b32.xlu0 %v2597_v32, %s7466_s1  ;;  %v3636_v60 = vpop.permute.xlu2 %3635  ;;  %v2983_v32 = vld [vmem:[#allocation2 + $0x2e0] sm:$0xff] }
 0x30f   :  { %v3634_v10 = vpop.permute.xlu1 %3633 }
 0x310   :  { %3802 = vst.msk [vmem:[#allocation3 + $0x118] sm:$0xf] %vm2369_vm6, %v3634_v10  ;;  %v2224_v2 = vpop.permute.xlu0 %2223  ;;  %v6939_v7 = vld [vmem:[#allocation3 + $0x10c] sm:$0xf]  ;;  %v2598_v10 = vpack.c.bf16 %v2534_v35, %v2534_v35 }
 0x311   :  { %2393 = vst.msk [vmem:[#allocation3 + $0x114] sm:$0xf] %vm2369_vm6, %v2224_v2 }
 0x314   :  { %2758 = vrot.lane.b32.xlu2 %v2596_v49, %s7466_s1  ;;  %v2984_v49 = vld [vmem:[#allocation2 + $0x2f0] sm:$0xff] }
 0x315   :  { %3207 = vrot.lane.b32.xlu1 %v9421_v46, %s7463_s29 }
 0x316   :  { %3655 = vrot.lane.b32.xlu0 %v3493_v18, %s7467_s23  ;;  %v2228_v53 = vpop.permute.xlu2 %2227  ;;  %v2535_v18 = vld [vmem:[#allocation2 + $0x2e2] sm:$0xff] }
 0x317   :  { %v2739_v40 = vpop.permute.xlu1 %2738  ;;  %v6474_v45 = vld [vmem:[#allocation3 + $0x114] sm:$0xf0]  ;;  %2395 = vst.msk [vmem:[#allocation3 + $0x12c] sm:$0xf] %vm2369_vm6, %v2228_v53  ;;  %v2599_v26 = vpack.c.bf16 %v2535_v18, %v2535_v18 }
 0x318   :  { %v5763_v43 = vpop.f32.mrf.mxu3  ;;  %2906 = vst.msk [vmem:[#allocation3 + $0x124] sm:$0xf] %vm1471_vm3, %v2739_v40  ;;  %v6477_v5 = vor.u32 %v6939_v7, %v6474_v45  ;;  %v3188_v11 = vpop.permute.xlu0 %3187  ;;  %v6940_v37 = vld [vmem:[#allocation3 + $0x110] sm:$0xf0] }
 0x319   :  { %3355 = vst.msk [vmem:[#allocation3 + $0x124] sm:$0xf] %vm1920_vm5, %v3188_v11  ;;  %v6473_v54 = vor.u32 %v6940_v37, %v6472_v48  ;;  %v5764_v28 = vadd.f32 %v9330_v27, %v5763_v43 }
 0x31a   :  { %5119 = vmatmul.bf16.gmra.mxu2 %v6477_v5  ;;  %3803 = vst.msk [vmem:[#allocation3 + $0x124] sm:$0xf] %vm2369_vm6, %v3636_v60  ;;  %v3432_v5 = vld [vmem:[#allocation2 + $0x2f1] sm:$0xff] }
 0x31b   :  { %4950 = vmatmul.bf16.gmra.mxu1 %v6473_v54  ;;  %v5911_v41 = vadd.f32 %v7040_v22, %v5764_v28  ;;  %v3496_v11 = vpack.c.bf16 %v3432_v5, %v3432_v5 }
 0x31c   :  { %3209 = vrot.lane.b32.xlu2 %v9523_v4, %s7463_s29  ;;  %v5100_v45 = vpop.f32.mrf.mxu2 }
 0x31d   :  { %3657 = vrot.lane.b32.xlu1 %v3494_v25, %s7467_s23  ;;  %v5975_v60 = vmax.f32 %v5911_v41, 0.0  ;;  %v2536_v41 = vld [vmem:[#allocation2 + $0x2f2] sm:$0xff] }
 0x31e   :  { %2247 = vrot.lane.b32.xlu0 %v9421_v46, %s7467_s23  ;;  %v3192_v3 = vpop.permute.xlu2 %3191  ;;  %v9534_v46 = vpack.c.bf16 %v2983_v32, %v2983_v32  ;;  %v6943_v25 = vld [vmem:[#allocation3 + $0x128] sm:$0xf0]  ;;  %v2600_v32 = vpack.c.bf16 %v2536_v41, %v2536_v41 }
 0x31f   :  { %v3190_v42 = vpop.permute.xlu1 %3189 }
 0x320   :  { %v5765_v23 = vpop.f32.mrf.mxu3  ;;  %3356 = vst.msk [vmem:[#allocation3 + $0x130] sm:$0xf] %vm1920_vm5, %v3190_v42  ;;  %v3638_v21 = vpop.permute.xlu0 %3637 }
 0x321   :  { %v5766_v9 = vadd.f32 %v9330_v27, %v5765_v23  ;;  %3804 = vst.msk [vmem:[#allocation3 + $0x130] sm:$0xf] %vm2369_vm6, %v3638_v21  ;;  %v6942_v40 = vld [vmem:[#allocation3 + $0x124] sm:$0xf] }
 0x322   :  { %v3431_v23 = vld [vmem:[#allocation2 + $0x2e1] sm:$0xff] }
 0x323   :  { %v5912_v39 = vadd.f32 %v7041_v15, %v5766_v9  ;;  %v3495_v35 = vpack.c.bf16 %v3431_v23, %v3431_v23  ;;  %v2538_v23 = vld [vmem:[#allocation2 + $0x332] sm:$0xff] }
 0x324   :  { %2245 = vrot.lane.b32.xlu2 %v9390_v50, %s7467_s23  ;;  %v9543_v50 = vpack.c.bf16 %v2984_v49, %v2984_v49 }
 0x325   :  { %v5976_v2 = vmax.f32 %v5912_v39, 0.0  ;;  %2762 = vrot.lane.b32.xlu1 %v2598_v10, %s7466_s1 }
 0x326   :  { %3211 = vrot.lane.b32.xlu0 %v9534_v46, %s7463_s29  ;;  %v3642_v8 = vpop.permute.xlu2 %3641 }
 0x327   :  { %v7173_v61 = vpack.c.bf16 %v5976_v2, %v5975_v60  ;;  %v2226_v27 = vpop.permute.xlu1 %2225 }
 0x328   :  { %2394 = vst.msk [vmem:[#allocation3 + $0x120] sm:$0xf] %vm2369_vm6, %v2226_v27  ;;  %v2743_v43 = vpop.permute.xlu0 %2742  ;;  %v6486_v7 = vld [vmem:[#allocation3 + $0x12c] sm:$0xf0]  ;;  %v4931_v19 = vpop.f32.mrf.mxu1 }
 0x329   :  { %7344 = vst [vmem:[#allocation7 + $0x20] sm:$0xff] %v7173_v61   ;;  %v6489_v53 = vor.u32 %v6942_v40, %v6486_v7  ;;  %v4932_v51 = vadd.f32 %v9431_v17, %v4931_v19  ;;  %v2537_v61 = vld [vmem:[#allocation2 + $0x302] sm:$0xff]  ;;  %v2986_v27 = vld [vmem:[#allocation2 + $0x310] sm:$0xff] }
 0x32a   :  { %2908 = vst.msk [vmem:[#allocation3 + $0x13c] sm:$0xf] %vm1471_vm3, %v2743_v43  ;;  %v3050_v43 = vpack.c.bf16 %v2986_v27, %v2986_v27 }
 0x32b   :  { %3357 = vst.msk [vmem:[#allocation3 + $0x13c] sm:$0xf] %vm1920_vm5, %v3192_v3  ;;  %5124 = vmatmul.bf16.gmra.mxu2 %v6489_v53  ;;  %v5101_v22 = vadd.f32 %v5100_v45, %v4932_v51  ;;  %v5102_v3 = vpop.f32.mrf.mxu2  ;;  %v3433_v53 = vld [vmem:[#allocation2 + $0x301] sm:$0xff] }
 0x32c   :  { %2764 = vrot.lane.b32.xlu2 %v2599_v26, %s7466_s1  ;;  %v2985_v26 = vld [vmem:[#allocation2 + $0x300] sm:$0xff] }
 0x32d   :  { %3213 = vrot.lane.b32.xlu1 %v9543_v50, %s7463_s29  ;;  %v5270_v21 = vadd.f32 %v9319_v24, %v5101_v22  ;;  %v3049_v51 = vpack.c.bf16 %v2985_v26, %v2985_v26 }
 0x32e   :  { %3661 = vrot.lane.b32.xlu0 %v3496_v11, %s7467_s23  ;;  %v2747_v37 = vpop.permute.xlu2 %2746 }
 0x32f   :  { %v2745_v48 = vpop.permute.xlu1 %2744  ;;  %v6484_v54 = vld [vmem:[#allocation3 + $0x120] sm:$0xf]  ;;  %2910 = vst.msk [vmem:[#allocation3 + $0x154] sm:$0xf] %vm1471_vm3, %v2747_v37 }
 0x330   :  { %2909 = vst.msk [vmem:[#allocation3 + $0x148] sm:$0xf] %vm1471_vm3, %v2745_v48  ;;  %v3194_v28 = vpop.permute.xlu0 %3193  ;;  %v6485_v15 = vor.u32 %v6943_v25, %v6484_v54  ;;  %v4933_v42 = vpop.f32.mrf.mxu1  ;;  %v3434_v54 = vld [vmem:[#allocation2 + $0x311] sm:$0xff] }
 0x331   :  { %3358 = vst.msk [vmem:[#allocation3 + $0x148] sm:$0xf] %vm1920_vm5, %v3194_v28  ;;  %v4934_v9 = vadd.f32 %v9431_v17, %v4933_v42  ;;  %v2602_v42 = vpack.c.bf16 %v2538_v23, %v2538_v23 }
 0x332   :  { %3806 = vst.msk [vmem:[#allocation3 + $0x148] sm:$0xf] %vm2369_vm6, %v3642_v8  ;;  %4955 = vmatmul.bf16.gmra.mxu1 %v6485_v15  ;;  %v5408_v8 = vmax.f32 %v5270_v21, 0.0  ;;  %v3498_v15 = vpack.c.bf16 %v3434_v54, %v3434_v54  ;;  %v2988_v21 = vld [vmem:[#allocation2 + $0x350] sm:$0xff]  ;;  %v7314_v54 = vld [vmem:[#allocation4 + $0x28] sm:$0xff]  }
 0x333   :  { %v5103_v39 = vadd.f32 %v5102_v3, %v4934_v9  ;;  %v2539_v3 = vld [vmem:[#allocation2 + $0x342] sm:$0xff] }
 0x334   :  { %3659 = vrot.lane.b32.xlu2 %v3495_v35, %s7467_s23 }
 0x335   :  { %2249 = vrot.lane.b32.xlu1 %v9523_v4, %s7467_s23  ;;  %v5272_v10 = vadd.f32 %v9343_v0, %v5103_v39  ;;  %v2601_v4 = vpack.c.bf16 %v2537_v61, %v2537_v61  ;;  %v9584_v39 = vpack.c.bf16 %v2539_v3, %v2539_v3 }
 0x336   :  { %2766 = vrot.lane.b32.xlu0 %v2600_v32, %s7466_s1  ;;  %v3198_v2 = vpop.permute.xlu2 %3197 }
 0x337   :  { %v3640_v60 = vpop.permute.xlu1 %3639  ;;  %v5409_v49 = vmax.f32 %v5272_v10, 0.0 }
 0x338   :  { %3805 = vst.msk [vmem:[#allocation3 + $0x13c] sm:$0xf] %vm2369_vm6, %v3640_v60  ;;  %v2230_v24 = vpop.permute.xlu0 %2229 }
 0x339   :  { %2396 = vst.msk [vmem:[#allocation3 + $0x138] sm:$0xf] %vm2369_vm6, %v2230_v24  ;;  %v5465_v18 = vpack.c.bf16 %v5409_v49, %v5408_v8  ;;  %v6498_v7 = vld [vmem:[#allocation3 + $0x144] sm:$0xf0]  ;;  %v2987_v49 = vld [vmem:[#allocation2 + $0x340] sm:$0xff] }
 0x33a   :  { %v3435_v8 = vld [vmem:[#allocation2 + $0x341] sm:$0xff] }
 0x33b   :  { %6841 = vmatmul.msk.bf16.gmra.mxu3 %vm666_vm0, %v5465_v18  ;;  %v1576_v24 = vld [vmem:[#allocation2 + $0x322] sm:$0xff] }
 0x33c   :  { %2251 = vrot.lane.b32.xlu2 %v9534_v46, %s7467_s23  ;;  %v3497_v46 = vpack.c.bf16 %v3433_v53, %v3433_v53  ;;  %v3051_v53 = vpack.c.bf16 %v2987_v49, %v2987_v49 }
 0x33d   :  { %2768 = vrot.lane.b32.xlu1 %v2601_v4, %s7466_s1 }
 0x33e   :  { %3217 = vrot.lane.b32.xlu0 %v3050_v43, %s7463_s29  ;;  %v2234_v45 = vpop.permute.xlu2 %2233 }
 0x33f   :  { %v2232_v0 = vpop.permute.xlu1 %2231  ;;  %v6945_v40 = vld [vmem:[#allocation3 + $0x13c] sm:$0xf]  ;;  %2398 = vst.msk [vmem:[#allocation3 + $0x150] sm:$0xf] %vm2369_vm6, %v2234_v45  ;;  %v1640_v45 = vpack.c.bf16 %v1576_v24, %v1576_v24 }
 0x340   :  { %2397 = vst.msk [vmem:[#allocation3 + $0x144] sm:$0xf] %vm2369_vm6, %v2232_v0  ;;  %v6501_v19 = vor.u32 %v6945_v40, %v6498_v7  ;;  %v2749_v5 = vpop.permute.xlu0 %2748  ;;  %v6496_v48 = vld [vmem:[#allocation3 + $0x138] sm:$0xf]  ;;  %v3499_v7 = vpack.c.bf16 %v3435_v8, %v3435_v8 }
 0x341   :  { %2911 = vst.msk [vmem:[#allocation3 + $0x160] sm:$0xf] %vm1471_vm3, %v2749_v5 }
 0x342   :  { %5129 = vmatmul.bf16.gmra.mxu2 %v6501_v19  ;;  %3360 = vst.msk [vmem:[#allocation3 + $0x160] sm:$0xf] %vm1920_vm5, %v3198_v2 }
 0x344   :  { %3215 = vrot.lane.b32.xlu2 %v3049_v51, %s7463_s29 }
 0x345   :  { %3663 = vrot.lane.b32.xlu1 %v3497_v46, %s7467_s23 }
 0x346   :  { %1806 = vrot.lane.b32.xlu0 %v2600_v32, %s7463_s29  ;;  %v2753_v25 = vpop.permute.xlu2 %2752  ;;  %v6508_v43 = vld [vmem:[#allocation3 + $0x150] sm:$0xf] }
 0x347   :  { %v3196_v11 = vpop.permute.xlu1 %3195  ;;  %v6946_v37 = vld [vmem:[#allocation3 + $0x140] sm:$0xf0]  ;;  %2913 = vst.msk [vmem:[#allocation3 + $0x178] sm:$0xf] %vm1471_vm3, %v2753_v25 }
 0x348   :  { %3359 = vst.msk [vmem:[#allocation3 + $0x154] sm:$0xf] %vm1920_vm5, %v3196_v11  ;;  %v6497_v22 = vor.u32 %v6946_v37, %v6496_v48  ;;  %v3644_v28 = vpop.permute.xlu0 %3643  ;;  %v3436_v37 = vld [vmem:[#allocation2 + $0x351] sm:$0xff] }
 0x349   :  { %3807 = vst.msk [vmem:[#allocation3 + $0x154] sm:$0xf] %vm2369_vm6, %v3644_v28  ;;  %v3500_v23 = vpack.c.bf16 %v3436_v37, %v3436_v37 }
 0x34a   :  { %4960 = vmatmul.bf16.gmra.mxu1 %v6497_v22 }
 0x34c   :  { %3665 = vrot.lane.b32.xlu2 %v3498_v15, %s7467_s23 }
 0x34d   :  { %2253 = vrot.lane.b32.xlu1 %v9543_v50, %s7467_s23  ;;  %v9588_v50 = vpack.c.bf16 %v2988_v21, %v2988_v21  ;;  %v7045_v21 = vunpack.c.h.bf16 %v7314_v54 }
 0x34e   :  { %2770 = vrot.lane.b32.xlu0 %v2602_v42, %s7466_s1  ;;  %v3648_v9 = vpop.permute.xlu2 %3647 }
 0x34f   :  { %v3646_v41 = vpop.permute.xlu1 %3645 }
 0x350   :  { %3808 = vst.msk [vmem:[#allocation3 + $0x160] sm:$0xf] %vm2369_vm6, %v3646_v41  ;;  %v2236_v35 = vpop.permute.xlu0 %2235  ;;  %v6948_v10 = vld [vmem:[#allocation3 + $0x154] sm:$0xf]  ;;  %v7044_v41 = vunpack.c.l.bf16 %v7314_v54 }
 0x351   :  { %2399 = vst.msk [vmem:[#allocation3 + $0x15c] sm:$0xf] %vm2369_vm6, %v2236_v35 }
 0x354   :  { %2255 = vrot.lane.b32.xlu2 %v3049_v51, %s7467_s23 }
 0x355   :  { %2772 = vrot.lane.b32.xlu1 %v9584_v39, %s7466_s1  ;;  %v5105_v2 = vpop.f32.mrf.mxu2 }
 0x356   :  { %3221 = vrot.lane.b32.xlu0 %v9588_v50, %s7463_s29  ;;  %v2240_v61 = vpop.permute.xlu2 %2239 }
 0x357   :  { %v2751_v32 = vpop.permute.xlu1 %2750  ;;  %v6510_v60 = vld [vmem:[#allocation3 + $0x15c] sm:$0xf0]  ;;  %2401 = vst.msk [vmem:[#allocation3 + $0x174] sm:$0xf] %vm2369_vm6, %v2240_v61  ;;  %v2540_v61 = vld [vmem:[#allocation2 + $0x352] sm:$0xff] }
 0x358   :  { %2912 = vst.msk [vmem:[#allocation3 + $0x16c] sm:$0xf] %vm1471_vm3, %v2751_v32  ;;  %v6513_v27 = vor.u32 %v6948_v10, %v6510_v60  ;;  %v3200_v18 = vpop.permute.xlu0 %3199  ;;  %v4936_v4 = vpop.f32.mrf.mxu1  ;;  %v6949_v0 = vld [vmem:[#allocation3 + $0x158] sm:$0xf0] }
 0x359   :  { %3361 = vst.msk [vmem:[#allocation3 + $0x16c] sm:$0xf] %vm1920_vm5, %v3200_v18  ;;  %v6509_v40 = vor.u32 %v6949_v0, %v6508_v43  ;;  %v4937_v19 = vadd.f32 %v9431_v17, %v4936_v4  ;;  %v2989_v43 = vld [vmem:[#allocation2 + $0x360] sm:$0xff] }
 0x35a   :  { %5134 = vmatmul.bf16.gmra.mxu2 %v6513_v27  ;;  %3809 = vst.msk [vmem:[#allocation3 + $0x16c] sm:$0xf] %vm2369_vm6, %v3648_v9  ;;  %v9608_v9 = vld [vmem:[%s10180_s6] ss:$0 sm:$0xff] }
 0x35b   :  { %4965 = vmatmul.bf16.gmra.mxu1 %v6509_v40  ;;  %v5106_v26 = vadd.f32 %v5105_v2, %v4937_v19  ;;  %v9619_v40 = vpack.c.bf16 %v2540_v61, %v2540_v61  ;;  %v3437_v61 = vld [vmem:[#allocation2 + $0x361] sm:$0xff] }
 0x35c   :  { %3219 = vrot.lane.b32.xlu2 %v3051_v53, %s7463_s29 }
 0x35d   :  { %3667 = vrot.lane.b32.xlu1 %v3499_v7, %s7467_s23  ;;  %v5107_v22 = vpop.f32.mrf.mxu2  ;;  %v5275_v28 = vadd.f32 %v9356_v58, %v5106_v26 }
 0x35e   :  { %1808 = vrot.lane.b32.xlu0 %v1640_v45, %s7463_s29  ;;  %v5768_v46 = vpop.f32.mrf.mxu3  ;;  %v3204_v51 = vpop.permute.xlu2 %3203 }
 0x35f   :  { %v3202_v5 = vpop.permute.xlu1 %3201  ;;  %v5769_v3 = vadd.f32 %v9608_v9, %v5768_v46  ;;  %v5410_v32 = vmax.f32 %v5275_v28, 0.0  ;;  %v2541_v28 = vld [vmem:[#allocation2 + $0x362] sm:$0xff] }
 0x360   :  { %3362 = vst.msk [vmem:[#allocation3 + $0x178] sm:$0xf] %vm1920_vm5, %v3202_v5  ;;  %v3650_v11 = vpop.permute.xlu0 %3649  ;;  %v4938_v48 = vpop.f32.mrf.mxu1 }
 0x361   :  { %3810 = vst.msk [vmem:[#allocation3 + $0x178] sm:$0xf] %vm2369_vm6, %v3650_v11  ;;  %v4939_v25 = vadd.f32 %v9431_v17, %v4938_v48  ;;  %v5913_v27 = vadd.f32 %v7044_v41, %v5769_v3  ;;  %v6952_v11 = vld [vmem:[#allocation3 + $0x170] sm:$0xf0]  ;;  %v9633_v3 = vpack.c.bf16 %v2541_v28, %v2541_v28 }
 0x363   :  { %v5108_v15 = vadd.f32 %v5107_v22, %v4939_v25  ;;  %v5977_v45 = vmax.f32 %v5913_v27, 0.0  ;;  %v2990_v25 = vld [vmem:[#allocation2 + $0x370] sm:$0xff] }
 0x364   :  { %3669 = vrot.lane.b32.xlu2 %v3500_v23, %s7467_s23  ;;  %v9630_v41 = vpack.c.bf16 %v2990_v25, %v2990_v25  ;;  %v2542_v25 = vld [vmem:[#allocation2 + $0x372] sm:$0xff] }
 0x365   :  { %1810 = vrot.lane.b32.xlu1 %v2602_v42, %s7463_s29  ;;  %v5277_v35 = vadd.f32 %v9370_v30, %v5108_v15  ;;  %v6951_v42 = vld [vmem:[#allocation3 + $0x16c] sm:$0xf]  ;;  %v2025_v30 = vld [vmem:[#allocation2 + $0x330] sm:$0xff] }
 0x366   :  { %2259 = vrot.lane.b32.xlu0 %v3051_v53, %s7467_s23  ;;  %v5770_v60 = vpop.f32.mrf.mxu3  ;;  %v3654_v2 = vpop.permute.xlu2 %3653  ;;  %v2089_v7 = vpack.c.bf16 %v2025_v30, %v2025_v30  ;;  %v3053_v53 = vpack.c.bf16 %v2989_v43, %v2989_v43  ;;  %v3438_v15 = vld [vmem:[#allocation2 + $0x371] sm:$0xff] }
 0x367   :  { %v2238_v58 = vpop.permute.xlu1 %2237  ;;  %v5411_v10 = vmax.f32 %v5277_v35, 0.0  ;;  %v5771_v8 = vadd.f32 %v9608_v9, %v5770_v60  ;;  %v3502_v35 = vpack.c.bf16 %v3438_v15, %v3438_v15 }
 0x368   :  { %2400 = vst.msk [vmem:[#allocation3 + $0x168] sm:$0xf] %vm2369_vm6, %v2238_v58  ;;  %v2755_v49 = vpop.permute.xlu0 %2754  ;;  %v6522_v24 = vld [vmem:[#allocation3 + $0x174] sm:$0xf0] }
 0x369   :  { %2914 = vst.msk [vmem:[#allocation3 + $0x184] sm:$0xf] %vm1471_vm3, %v2755_v49  ;;  %v5466_v18 = vpack.c.bf16 %v5411_v10, %v5410_v32  ;;  %v6525_v4 = vor.u32 %v6951_v42, %v6522_v24  ;;  %v5914_v0 = vadd.f32 %v7045_v21, %v5771_v8  ;;  %v3501_v42 = vpack.c.bf16 %v3437_v61, %v3437_v61  ;;  %v3440_v61 = vld [vmem:[#allocation2 + $0x391] sm:$0xff] }
 0x36a   :  { %3363 = vst.msk [vmem:[#allocation3 + $0x184] sm:$0xf] %vm1920_vm5, %v3204_v51 }
 0x36b   :  { %6842 = vmatmul.msk.bf16.gmra.mxu3 %vm666_vm0, %v5466_v18  ;;  %5139 = vmatmul.bf16.gmra.mxu2 %v6525_v4  ;;  %v5978_v19 = vmax.f32 %v5914_v0, 0.0 }
 0x36c   :  { %2257 = vrot.lane.b32.xlu2 %v2089_v7, %s7467_s23 }
 0x36d   :  { %2774 = vrot.lane.b32.xlu1 %v9619_v40, %s7466_s1  ;;  %v7178_v5 = vpack.c.bf16 %v5978_v19, %v5977_v45 }
 0x36e   :  { %3223 = vrot.lane.b32.xlu0 %v3053_v53, %s7463_s29  ;;  %v5110_v26 = vpop.f32.mrf.mxu2  ;;  %v2759_v48 = vpop.permute.xlu2 %2758 }
 0x36f   :  { %v2757_v46 = vpop.permute.xlu1 %2756  ;;  %v6520_v51 = vld [vmem:[#allocation3 + $0x168] sm:$0xf]  ;;  %v4941_v37 = vpop.f32.mrf.mxu1  ;;  %7345 = vst [vmem:[#allocation7 + $0x28] sm:$0xff] %v7178_v5  }
 0x370   :  { %2915 = vst.msk [vmem:[#allocation3 + $0x190] sm:$0xf] %vm1471_vm3, %v2757_v46  ;;  %v6521_v54 = vor.u32 %v6952_v11, %v6520_v51  ;;  %v3206_v22 = vpop.permute.xlu0 %3205  ;;  %v4942_v23 = vadd.f32 %v9431_v17, %v4941_v37  ;;  %v2991_v37 = vld [vmem:[#allocation2 + $0x380] sm:$0xff] }
 0x371   :  { %2916 = vst.msk [vmem:[#allocation3 + $0x19c] sm:$0xf] %vm1471_vm3, %v2759_v48  ;;  %v9666_v28 = vpack.c.bf16 %v2991_v37, %v2991_v37 }
 0x372   :  { %4970 = vmatmul.bf16.gmra.mxu1 %v6521_v54  ;;  %3364 = vst.msk [vmem:[#allocation3 + $0x190] sm:$0xf] %vm1920_vm5, %v3206_v22  ;;  %v5111_v21 = vadd.f32 %v5110_v26, %v4942_v23  ;;  %v5284_v54 = vpop.f32.mrf.mxu0  ;;  %v3439_v22 = vld [vmem:[#allocation2 + $0x381] sm:$0xff]  ;;  %v2606_v23 = vpack.c.bf16 %v2542_v25, %v2542_v25 }
 0x373   :  { %3812 = vst.msk [vmem:[#allocation3 + $0x190] sm:$0xf] %vm2369_vm6, %v3654_v2 }
 0x374   :  { %2776 = vrot.lane.b32.xlu2 %v9633_v3, %s7466_s1  ;;  %v5280_v8 = vadd.f32 %v9387_v62, %v5111_v21 }
 0x375   :  { %3225 = vrot.lane.b32.xlu1 %v9630_v41, %s7463_s29 }
 0x376   :  { %3673 = vrot.lane.b32.xlu0 %v3502_v35, %s7467_s23  ;;  %v3210_v32 = vpop.permute.xlu2 %3209  ;;  %v5112_v27 = vpop.f32.mrf.mxu2  ;;  %v5412_v30 = vmax.f32 %v5280_v8, 0.0  ;;  %v3503_v35 = vpack.c.bf16 %v3439_v22, %v3439_v22 }
 0x377   :  { %v3652_v58 = vpop.permute.xlu1 %3651  ;;  %v4943_v10 = vpop.f32.mrf.mxu1 }
 0x378   :  { %3811 = vst.msk [vmem:[#allocation3 + $0x184] sm:$0xf] %vm2369_vm6, %v3652_v58  ;;  %v2242_v60 = vpop.permute.xlu0 %2241  ;;  %v4944_v2 = vadd.f32 %v9431_v17, %v4943_v10  ;;  %v7315_v58 = vld [vmem:[#allocation4 + $0x30] sm:$0xff]  }
 0x379   :  { %2402 = vst.msk [vmem:[#allocation3 + $0x180] sm:$0xf] %vm2369_vm6, %v2242_v60  ;;  %v9676_v60 = vld [vmem:[%s10178_s4] ss:$0 sm:$0xff] }
 0x37a   :  { %v5113_v49 = vadd.f32 %v5112_v27, %v4944_v2  ;;  %v6534_v0 = vld [vmem:[#allocation3 + $0x18c] sm:$0xf0]  ;;  %v7048_v27 = vunpack.c.l.bf16 %v7315_v58 }
 0x37c   :  { %v5282_v24 = vadd.f32 %v9407_v1, %v5113_v49  ;;  %3671 = vrot.lane.b32.xlu2 %v3501_v42, %s7467_s23 }
 0x37d   :  { %1812 = vrot.lane.b32.xlu1 %v9584_v39, %s7463_s29  ;;  %v2543_v39 = vld [vmem:[#allocation2 + $0x382] sm:$0xff] }
 0x37e   :  { %v5413_v18 = vmax.f32 %v5282_v24, 0.0  ;;  %2261 = vrot.lane.b32.xlu0 %v9588_v50, %s7467_s23  ;;  %v2246_v62 = vpop.permute.xlu2 %2245  ;;  %v9656_v50 = vpack.c.bf16 %v2543_v39, %v2543_v39  ;;  %v2992_v24 = vld [vmem:[#allocation2 + $0x390] sm:$0xff] }
 0x37f   :  { %v2244_v4 = vpop.permute.xlu1 %2243  ;;  %v6954_v43 = vld [vmem:[#allocation3 + $0x184] sm:$0xf]  ;;  %2404 = vst.msk [vmem:[#allocation3 + $0x198] sm:$0xf] %vm2369_vm6, %v2246_v62 }
 0x380   :  { %2403 = vst.msk [vmem:[#allocation3 + $0x18c] sm:$0xf] %vm2369_vm6, %v2244_v4  ;;  %v6537_v7 = vor.u32 %v6954_v43, %v6534_v0  ;;  %v2761_v1 = vpop.permute.xlu0 %2760  ;;  %v5467_v45 = vpack.c.bf16 %v5413_v18, %v5412_v30  ;;  %v6532_v46 = vld [vmem:[#allocation3 + $0x180] sm:$0xf]  ;;  %v5286_v4 = vpop.f32.mrf.mxu0  ;;  %v7049_v43 = vunpack.c.h.bf16 %v7315_v58  ;;  %v3504_v0 = vpack.c.bf16 %v3440_v61, %v3440_v61 }
 0x381   :  { %2917 = vst.msk [vmem:[#allocation3 + $0x1a8] sm:$0xf] %vm1471_vm3, %v2761_v1  ;;  %v9681_v1 = vpack.c.bf16 %v2992_v24, %v2992_v24 }
 0x382   :  { %5144 = vmatmul.bf16.gmra.mxu2 %v6537_v7  ;;  %3366 = vst.msk [vmem:[#allocation3 + $0x1a8] sm:$0xf] %vm1920_vm5, %v3210_v32  ;;  %6843 = vmatmul.msk.bf16.gmra.mxu3 %vm666_vm0, %v5467_v45 }
 0x384   :  { %1814 = vrot.lane.b32.xlu2 %v9619_v40, %s7463_s29 }
 0x385   :  { %2263 = vrot.lane.b32.xlu1 %v3053_v53, %s7467_s23  ;;  %v5115_v19 = vpop.f32.mrf.mxu2 }
 0x386   :  { %2780 = vrot.lane.b32.xlu0 %v9656_v50, %s7466_s1  ;;  %v2765_v11 = vpop.permute.xlu2 %2764  ;;  %v6544_v37 = vld [vmem:[#allocation3 + $0x198] sm:$0xf] }
 0x387   :  { %v3208_v5 = vpop.permute.xlu1 %3207  ;;  %v4946_v26 = vpop.f32.mrf.mxu1  ;;  %v6955_v51 = vld [vmem:[#allocation3 + $0x188] sm:$0xf0]  ;;  %2919 = vst.msk [vmem:[#allocation3 + $0x1c0] sm:$0xf] %vm1471_vm3, %v2765_v11 }
 0x388   :  { %3365 = vst.msk [vmem:[#allocation3 + $0x19c] sm:$0xf] %vm1920_vm5, %v3208_v5  ;;  %v6533_v48 = vor.u32 %v6955_v51, %v6532_v46  ;;  %v3656_v53 = vpop.permute.xlu0 %3655  ;;  %v4947_v40 = vadd.f32 %v9431_v17, %v4946_v26 }
 0x389   :  { %3813 = vst.msk [vmem:[#allocation3 + $0x19c] sm:$0xf] %vm2369_vm6, %v3656_v53 }
 0x38a   :  { %4975 = vmatmul.bf16.gmra.mxu1 %v6533_v48  ;;  %v5773_v15 = vpop.f32.mrf.mxu3  ;;  %v5116_v21 = vadd.f32 %v5115_v19, %v4947_v40 }
 0x38b   :  { %v5774_v8 = vadd.f32 %v9608_v9, %v5773_v15 }
 0x38c   :  { %2778 = vrot.lane.b32.xlu2 %v2606_v23, %s7466_s1  ;;  %v5285_v30 = vadd.f32 %v5284_v54, %v5116_v21 }
 0x38d   :  { %3227 = vrot.lane.b32.xlu1 %v9666_v28, %s7463_s29  ;;  %v5117_v49 = vpop.f32.mrf.mxu2  ;;  %v5915_v45 = vadd.f32 %v7048_v27, %v5774_v8 }
 0x38e   :  { %3675 = vrot.lane.b32.xlu0 %v3503_v35, %s7467_s23  ;;  %v3660_v17 = vpop.permute.xlu2 %3659  ;;  %v5414_v19 = vmax.f32 %v5285_v30, 0.0 }
 0x38f   :  { %v3658_v32 = vpop.permute.xlu1 %3657  ;;  %v4948_v10 = vpop.f32.mrf.mxu1  ;;  %v5979_v25 = vmax.f32 %v5915_v45, 0.0 }
 0x390   :  { %3814 = vst.msk [vmem:[#allocation3 + $0x1a8] sm:$0xf] %vm2369_vm6, %v3658_v32  ;;  %v4949_v2 = vadd.f32 %v9676_v60, %v4948_v10  ;;  %v2248_v42 = vpop.permute.xlu0 %2247  ;;  %v6957_v51 = vld [vmem:[#allocation3 + $0x19c] sm:$0xf]  ;;  %v5289_v32 = vpop.f32.mrf.mxu0 }
 0x391   :  { %2405 = vst.msk [vmem:[#allocation3 + $0x1a4] sm:$0xf] %vm2369_vm6, %v2248_v42 }
 0x392   :  { %v5118_v18 = vadd.f32 %v5117_v49, %v4949_v2  ;;  %v5775_v7 = vpop.f32.mrf.mxu3  ;;  %v2994_v49 = vld [vmem:[#allocation2 + $0x3b0] sm:$0xff] }
 0x393   :  { %v5776_v39 = vadd.f32 %v9608_v9, %v5775_v7 }
 0x394   :  { %v5287_v62 = vadd.f32 %v5286_v4, %v5118_v18  ;;  %3229 = vrot.lane.b32.xlu2 %v9681_v1, %s7463_s29  ;;  %v3058_v18 = vpack.c.bf16 %v2994_v49, %v2994_v49 }
 0x395   :  { %3677 = vrot.lane.b32.xlu1 %v3504_v0, %s7467_s23  ;;  %v5916_v26 = vadd.f32 %v7049_v43, %v5776_v39 }
 0x396   :  { %v5415_v5 = vmax.f32 %v5287_v62, 0.0  ;;  %1818 = vrot.lane.b32.xlu0 %v2606_v23, %s7463_s29  ;;  %v2252_v48 = vpop.permute.xlu2 %2251  ;;  %v2544_v23 = vld [vmem:[#allocation2 + $0x392] sm:$0xff] }
 0x397   :  { %v2763_v46 = vpop.permute.xlu1 %2762  ;;  %v6546_v11 = vld [vmem:[#allocation3 + $0x1a4] sm:$0xf0]  ;;  %v5980_v40 = vmax.f32 %v5916_v26, 0.0  ;;  %2407 = vst.msk [vmem:[#allocation3 + $0x1bc] sm:$0xf] %vm2369_vm6, %v2252_v48  ;;  %v2608_v10 = vpack.c.bf16 %v2544_v23, %v2544_v23 }
 0x398   :  { %2918 = vst.msk [vmem:[#allocation3 + $0x1b4] sm:$0xf] %vm1471_vm3, %v2763_v46  ;;  %v6549_v54 = vor.u32 %v6957_v51, %v6546_v11  ;;  %v5468_v53 = vpack.c.bf16 %v5415_v5, %v5414_v19  ;;  %v3212_v22 = vpop.permute.xlu0 %3211  ;;  %v4951_v15 = vpop.f32.mrf.mxu1  ;;  %v6958_v35 = vld [vmem:[#allocation3 + $0x1a0] sm:$0xf0] }
 0x399   :  { %3367 = vst.msk [vmem:[#allocation3 + $0x1b4] sm:$0xf] %vm1920_vm5, %v3212_v22  ;;  %v6545_v21 = vor.u32 %v6958_v35, %v6544_v37  ;;  %v7183_v58 = vpack.c.bf16 %v5980_v40, %v5979_v25  ;;  %v4952_v27 = vadd.f32 %v9676_v60, %v4951_v15  ;;  %v5291_v62 = vpop.f32.mrf.mxu0  ;;  %v3441_v19 = vld [vmem:[#allocation2 + $0x3a1] sm:$0xff]  ;;  %v3442_v35 = vld [vmem:[#allocation2 + $0x3b1] sm:$0xff] }
 0x39a   :  { %5149 = vmatmul.bf16.gmra.mxu2 %v6549_v54  ;;  %6844 = vmatmul.msk.bf16.gmra.mxu3 %vm666_vm0, %v5468_v53  ;;  %3815 = vst.msk [vmem:[#allocation3 + $0x1b4] sm:$0xf] %vm2369_vm6, %v3660_v17  ;;  %v2545_v17 = vld [vmem:[#allocation2 + $0x3a2] sm:$0xff] }
 0x39b   :  { %4980 = vmatmul.bf16.gmra.mxu1 %v6545_v21  ;;  %7346 = vst [vmem:[#allocation7 + $0x30] sm:$0xff] %v7183_v58   ;;  %v2993_v51 = vld [vmem:[#allocation2 + $0x3a0] sm:$0xff] }
 0x39c   :  { %1816 = vrot.lane.b32.xlu2 %v9633_v3, %s7463_s29  ;;  %v3057_v53 = vpack.c.bf16 %v2993_v51, %v2993_v51 }
 0x39d   :  { %2265 = vrot.lane.b32.xlu1 %v9630_v41, %s7467_s23  ;;  %v5120_v2 = vpop.f32.mrf.mxu2  ;;  %v2609_v41 = vpack.c.bf16 %v2545_v17, %v2545_v17 }
 0x39e   :  { %2782 = vrot.lane.b32.xlu0 %v2608_v10, %s7466_s1  ;;  %v3216_v8 = vpop.permute.xlu2 %3215  ;;  %v5121_v30 = vadd.f32 %v5120_v2, %v4952_v27  ;;  %v6961_v15 = vld [vmem:[#allocation3 + $0x1b8] sm:$0xf0] }
 0x39f   :  { %v3214_v61 = vpop.permute.xlu1 %3213 }
 0x3a0   :  { %3368 = vst.msk [vmem:[#allocation3 + $0x1c0] sm:$0xf] %vm1920_vm5, %v3214_v61  ;;  %v3662_v42 = vpop.permute.xlu0 %3661  ;;  %v4953_v24 = vpop.f32.mrf.mxu1  ;;  %v5290_v43 = vadd.f32 %v5289_v32, %v5121_v30  ;;  %v3506_v61 = vpack.c.bf16 %v3442_v35, %v3442_v35 }
 0x3a1   :  { %3816 = vst.msk [vmem:[#allocation3 + $0x1c0] sm:$0xf] %vm2369_vm6, %v3662_v42  ;;  %v4954_v4 = vadd.f32 %v9676_v60, %v4953_v24  ;;  %v6960_v26 = vld [vmem:[#allocation3 + $0x1b4] sm:$0xf]  ;;  %v5294_v2 = vpop.f32.mrf.mxu0 }
 0x3a2   :  { %v5416_v11 = vmax.f32 %v5290_v43, 0.0  ;;  %v2546_v42 = vld [vmem:[#allocation2 + $0x3d2] sm:$0xff] }
 0x3a4   :  { %2267 = vrot.lane.b32.xlu2 %v9666_v28, %s7467_s23  ;;  %v3505_v28 = vpack.c.bf16 %v3441_v19, %v3441_v19 }
 0x3a5   :  { %2784 = vrot.lane.b32.xlu1 %v2609_v41, %s7466_s1  ;;  %v5122_v3 = vpop.f32.mrf.mxu2 }
 0x3a6   :  { %v5123_v0 = vadd.f32 %v5122_v3, %v4954_v4  ;;  %3233 = vrot.lane.b32.xlu0 %v3058_v18, %s7463_s29  ;;  %v3666_v39 = vpop.permute.xlu2 %3665  ;;  %v2995_v18 = vld [vmem:[#allocation2 + $0x3e0] sm:$0xff]  ;;  %v9725_v3 = vpack.c.bf16 %v2546_v42, %v2546_v42 }
 0x3a7   :  { %v2250_v7 = vpop.permute.xlu1 %2249 }
 0x3a8   :  { %v5292_v45 = vadd.f32 %v5291_v62, %v5123_v0  ;;  %2406 = vst.msk [vmem:[#allocation3 + $0x1b0] sm:$0xf] %vm2369_vm6, %v2250_v7  ;;  %v2767_v5 = vpop.permute.xlu0 %2766  ;;  %v6558_v46 = vld [vmem:[#allocation3 + $0x1bc] sm:$0xf0]  ;;  %v9729_v62 = vpack.c.bf16 %v2995_v18, %v2995_v18 }
 0x3a9   :  { %2920 = vst.msk [vmem:[#allocation3 + $0x1cc] sm:$0xf] %vm1471_vm3, %v2767_v5  ;;  %v6561_v37 = vor.u32 %v6960_v26, %v6558_v46  ;;  %v5296_v43 = vpop.f32.mrf.mxu0 }
 0x3aa   :  { %v5417_v48 = vmax.f32 %v5292_v45, 0.0  ;;  %3369 = vst.msk [vmem:[#allocation3 + $0x1cc] sm:$0xf] %vm1920_vm5, %v3216_v8 }
 0x3ab   :  { %5154 = vmatmul.bf16.gmra.mxu2 %v6561_v37 }
 0x3ac   :  { %v5469_v54 = vpack.c.bf16 %v5417_v48, %v5416_v11  ;;  %3231 = vrot.lane.b32.xlu2 %v3057_v53, %s7463_s29  ;;  %v2996_v11 = vld [vmem:[#allocation2 + $0x3f0] sm:$0xff] }
 0x3ad   :  { %3679 = vrot.lane.b32.xlu1 %v3505_v28, %s7467_s23  ;;  %v2547_v28 = vld [vmem:[#allocation2 + $0x3e2] sm:$0xff] }
 0x3ae   :  { %6845 = vmatmul.msk.bf16.gmra.mxu3 %vm666_vm0, %v5469_v54  ;;  %1820 = vrot.lane.b32.xlu0 %v9656_v50, %s7463_s29  ;;  %v5125_v25 = vpop.f32.mrf.mxu2  ;;  %v2256_v21 = vpop.permute.xlu2 %2255  ;;  %v7316_v54 = vld [vmem:[#allocation4 + $0x38] sm:$0xff]  }
 0x3af   :  { %v2769_v40 = vpop.permute.xlu1 %2768  ;;  %v6556_v22 = vld [vmem:[#allocation3 + $0x1b0] sm:$0xf]  ;;  %v4956_v23 = vpop.f32.mrf.mxu1 }
 0x3b0   :  { %2921 = vst.msk [vmem:[#allocation3 + $0x1d8] sm:$0xf] %vm1471_vm3, %v2769_v40  ;;  %v6557_v58 = vor.u32 %v6961_v15, %v6556_v22  ;;  %v3218_v32 = vpop.permute.xlu0 %3217  ;;  %v4957_v50 = vadd.f32 %v9676_v60, %v4956_v23  ;;  %v7052_v40 = vunpack.c.l.bf16 %v7316_v54  ;;  %v1584_v23 = vld [vmem:[#allocation2 + $0x3c2] sm:$0xff] }
 0x3b1   :  { %3370 = vst.msk [vmem:[#allocation3 + $0x1d8] sm:$0xf] %vm1920_vm5, %v3218_v32  ;;  %v5299_v35 = vpop.f32.mrf.mxu0 }
 0x3b2   :  { %4985 = vmatmul.bf16.gmra.mxu1 %v6557_v58  ;;  %3818 = vst.msk [vmem:[#allocation3 + $0x1d8] sm:$0xf] %vm2369_vm6, %v3666_v39  ;;  %v5126_v27 = vadd.f32 %v5125_v25, %v4957_v50  ;;  %v9741_v25 = vpack.c.bf16 %v2547_v28, %v2547_v28  ;;  %v7053_v58 = vunpack.c.h.bf16 %v7316_v54 }
 0x3b4   :  { %3681 = vrot.lane.b32.xlu2 %v3506_v61, %s7467_s23  ;;  %v5295_v4 = vadd.f32 %v5294_v2, %v5126_v27 }
 0x3b5   :  { %1822 = vrot.lane.b32.xlu1 %v2608_v10, %s7463_s29 }
 0x3b6   :  { %2271 = vrot.lane.b32.xlu0 %v3057_v53, %s7467_s23  ;;  %v3220_v17 = vpop.permute.xlu2 %3219  ;;  %v5127_v41 = vpop.f32.mrf.mxu2  ;;  %v5418_v45 = vmax.f32 %v5295_v4, 0.0  ;;  %v9739_v53 = vpack.c.bf16 %v2996_v11, %v2996_v11  ;;  %v2033_v4 = vld [vmem:[#allocation2 + $0x3d0] sm:$0xff] }
 0x3b7   :  { %v3664_v8 = vpop.permute.xlu1 %3663  ;;  %v4958_v49 = vpop.f32.mrf.mxu1 }
 0x3b8   :  { %3817 = vst.msk [vmem:[#allocation3 + $0x1cc] sm:$0xf] %vm2369_vm6, %v3664_v8  ;;  %v1807_v24 = vpop.permute.xlu0 %1806  ;;  %v4959_v30 = vadd.f32 %v9676_v60, %v4958_v49 }
 0x3b9   :  { %1960 = vst.msk [vmem:[#allocation3 + $0x1d4] sm:$0xf] %vm1920_vm5, %v1807_v24  ;;  %v6570_v7 = vld [vmem:[#allocation3 + $0x1d4] sm:$0xf0] }
 0x3ba   :  { %2409 = vst.msk [vmem:[#allocation3 + $0x1d4] sm:$0xf] %vm2369_vm6, %v2256_v21  ;;  %v5128_v10 = vadd.f32 %v5127_v41, %v4959_v30  ;;  %v1648_v30 = vpack.c.bf16 %v1584_v23, %v1584_v23  ;;  %v3443_v41 = vld [vmem:[#allocation2 + $0x3e1] sm:$0xff] }
 0x3bc   :  { %v5297_v0 = vadd.f32 %v5296_v43, %v5128_v10  ;;  %2269 = vrot.lane.b32.xlu2 %v9681_v1, %s7467_s23  ;;  %v3444_v1 = vld [vmem:[#allocation2 + $0x3f1] sm:$0xff]  ;;  %v3507_v43 = vpack.c.bf16 %v3443_v41, %v3443_v41 }
 0x3bd   :  { %2786 = vrot.lane.b32.xlu1 %v9725_v3, %s7466_s1  ;;  %v3508_v15 = vpack.c.bf16 %v3444_v1, %v3444_v1  ;;  %v2549_v1 = vld [vmem:[#allocation2 + $0x402] sm:$0xff] }
 0x3be   :  { %v5419_v39 = vmax.f32 %v5297_v0, 0.0  ;;  %3235 = vrot.lane.b32.xlu0 %v9729_v62, %s7463_s29  ;;  %v5778_v26 = vpop.f32.mrf.mxu3  ;;  %v3670_v46 = vpop.permute.xlu2 %3669 }
 0x3bf   :  { %v2254_v19 = vpop.permute.xlu1 %2253  ;;  %v6963_v5 = vld [vmem:[#allocation3 + $0x1cc] sm:$0xf]  ;;  %v5779_v22 = vadd.f32 %v9608_v9, %v5778_v26 }
 0x3c0   :  { %2408 = vst.msk [vmem:[#allocation3 + $0x1c8] sm:$0xf] %vm2369_vm6, %v2254_v19  ;;  %v6573_v51 = vor.u32 %v6963_v5, %v6570_v7  ;;  %v2771_v48 = vpop.permute.xlu0 %2770  ;;  %v5470_v37 = vpack.c.bf16 %v5419_v39, %v5418_v45  ;;  %v2097_v45 = vpack.c.bf16 %v2033_v4, %v2033_v4 }
 0x3c1   :  { %2922 = vst.msk [vmem:[#allocation3 + $0x1e4] sm:$0xf] %vm1471_vm3, %v2771_v48  ;;  %v6964_v50 = vld [vmem:[#allocation3 + $0x1d0] sm:$0xf0]  ;;  %v5917_v49 = vadd.f32 %v7052_v40, %v5779_v22  ;;  %v9764_v22 = vpack.c.bf16 %v2549_v1, %v2549_v1 }
 0x3c2   :  { %5159 = vmatmul.bf16.gmra.mxu2 %v6573_v51  ;;  %3371 = vst.msk [vmem:[#allocation3 + $0x1e4] sm:$0xf] %vm1920_vm5, %v3220_v17  ;;  %6846 = vmatmul.msk.bf16.gmra.mxu3 %vm666_vm0, %v5470_v37  ;;  %v5301_v51 = vpop.f32.mrf.mxu0 }
 0x3c3   :  { %v5981_v0 = vmax.f32 %v5917_v49, 0.0 }
 0x3c4   :  { %2788 = vrot.lane.b32.xlu2 %v9741_v25, %s7466_s1 }
 0x3c5   :  { %3237 = vrot.lane.b32.xlu1 %v9739_v53, %s7463_s29  ;;  %v5130_v21 = vpop.f32.mrf.mxu2 }
 0x3c6   :  { %3685 = vrot.lane.b32.xlu0 %v3508_v15, %s7467_s23  ;;  %v5780_v27 = vpop.f32.mrf.mxu3  ;;  %v2258_v8 = vpop.permute.xlu2 %2257 }
 0x3c7   :  { %v2773_v32 = vpop.permute.xlu1 %2772  ;;  %v4961_v2 = vpop.f32.mrf.mxu1  ;;  %v6568_v61 = vld [vmem:[#allocation3 + $0x1c8] sm:$0xf]  ;;  %v5781_v42 = vadd.f32 %v9608_v9, %v5780_v27 }
 0x3c8   :  { %2923 = vst.msk [vmem:[#allocation3 + $0x1f0] sm:$0xf] %vm1471_vm3, %v2773_v32  ;;  %v6569_v17 = vor.u32 %v6964_v50, %v6568_v61  ;;  %v3222_v24 = vpop.permute.xlu0 %3221  ;;  %v4962_v18 = vadd.f32 %v9676_v60, %v4961_v2  ;;  %v2997_v50 = vld [vmem:[#allocation2 + $0x400] sm:$0xff] }
 0x3c9   :  { %3372 = vst.msk [vmem:[#allocation3 + $0x1f0] sm:$0xf] %vm1920_vm5, %v3222_v24  ;;  %v5918_v10 = vadd.f32 %v7053_v58, %v5781_v42  ;;  %v9773_v49 = vpack.c.bf16 %v2997_v50, %v2997_v50 }
 0x3ca   :  { %4990 = vmatmul.bf16.gmra.mxu1 %v6569_v17  ;;  %3820 = vst.msk [vmem:[#allocation3 + $0x1f0] sm:$0xf] %vm2369_vm6, %v3670_v46  ;;  %v5131_v39 = vadd.f32 %v5130_v21, %v4962_v18  ;;  %v5304_v17 = vpop.f32.mrf.mxu0 }
 0x3cb   :  { %v5982_v7 = vmax.f32 %v5918_v10, 0.0  ;;  %v3446_v10 = vld [vmem:[#allocation2 + $0x411] sm:$0xff] }
 0x3cc   :  { %3683 = vrot.lane.b32.xlu2 %v3507_v43, %s7467_s23  ;;  %v5300_v28 = vadd.f32 %v5299_v35, %v5131_v39  ;;  %v2998_v43 = vld [vmem:[#allocation2 + $0x410] sm:$0xff] }
 0x3cd   :  { %1824 = vrot.lane.b32.xlu1 %v1648_v30, %s7463_s29  ;;  %v7188_v19 = vpack.c.bf16 %v5982_v7, %v5981_v0  ;;  %v5132_v48 = vpop.f32.mrf.mxu2 }
 0x3ce   :  { %2273 = vrot.lane.b32.xlu0 %v2097_v45, %s7467_s23  ;;  %v2777_v11 = vpop.permute.xlu2 %2776  ;;  %v5420_v15 = vmax.f32 %v5300_v28, 0.0 }
 0x3cf   :  { %v3668_v5 = vpop.permute.xlu1 %3667  ;;  %v4963_v26 = vpop.f32.mrf.mxu1  ;;  %7347 = vst [vmem:[#allocation7 + $0x38] sm:$0xff] %v7188_v19  }
 0x3d0   :  { %3819 = vst.msk [vmem:[#allocation3 + $0x1e4] sm:$0xf] %vm2369_vm6, %v3668_v5  ;;  %v4964_v46 = vadd.f32 %v9676_v60, %v4963_v26  ;;  %v1809_v37 = vpop.permute.xlu0 %1808  ;;  %v3510_v26 = vpack.c.bf16 %v3446_v10, %v3446_v10 }
 0x3d1   :  { %2925 = vst.msk [vmem:[#allocation3 + $0x208] sm:$0xf] %vm1471_vm3, %v2777_v11  ;;  %v6582_v58 = vld [vmem:[#allocation3 + $0x1ec] sm:$0xf0] }
 0x3d2   :  { %v5133_v54 = vadd.f32 %v5132_v48, %v4964_v46  ;;  %1961 = vst.msk [vmem:[#allocation3 + $0x1e0] sm:$0xf] %vm1920_vm5, %v1809_v37  ;;  %v9785_v46 = vpack.c.bf16 %v2998_v43, %v2998_v43 }
 0x3d3   :  { %2410 = vst.msk [vmem:[#allocation3 + $0x1e0] sm:$0xf] %vm2369_vm6, %v2258_v8  ;;  %v2548_v8 = vld [vmem:[#allocation2 + $0x3f2] sm:$0xff] }
 0x3d4   :  { %v5302_v40 = vadd.f32 %v5301_v51, %v5133_v54  ;;  %1826 = vrot.lane.b32.xlu2 %v9725_v3, %s7463_s29  ;;  %v3445_v3 = vld [vmem:[#allocation2 + $0x401] sm:$0xff]  ;;  %v2612_v42 = vpack.c.bf16 %v2548_v8, %v2548_v8  ;;  %v5306_v51 = vpop.f32.mrf.mxu0 }
 0x3d5   :  { %2275 = vrot.lane.b32.xlu1 %v9729_v62, %s7467_s23  ;;  %v3509_v24 = vpack.c.bf16 %v3445_v3, %v3445_v3 }
 0x3d6   :  { %v5421_v21 = vmax.f32 %v5302_v40, 0.0  ;;  %2792 = vrot.lane.b32.xlu0 %v9764_v22, %s7466_s1  ;;  %v3672_v32 = vpop.permute.xlu2 %3671 }
 0x3d7   :  { %v1811_v35 = vpop.permute.xlu1 %1810  ;;  %v6966_v23 = vld [vmem:[#allocation3 + $0x1e4] sm:$0xf] }
 0x3d8   :  { %1962 = vst.msk [vmem:[#allocation3 + $0x1ec] sm:$0xf] %vm1920_vm5, %v1811_v35  ;;  %v6585_v2 = vor.u32 %v6966_v23, %v6582_v58  ;;  %v5471_v61 = vpack.c.bf16 %v5421_v21, %v5420_v15  ;;  %v2260_v62 = vpop.permute.xlu0 %2259  ;;  %v4966_v27 = vpop.f32.mrf.mxu1  ;;  %v2550_v23 = vld [vmem:[#allocation2 + $0x412] sm:$0xff] }
 0x3d9   :  { %2411 = vst.msk [vmem:[#allocation3 + $0x1ec] sm:$0xf] %vm2369_vm6, %v2260_v62  ;;  %v4967_v18 = vadd.f32 %v9676_v60, %v4966_v27  ;;  %v7317_v62 = vld [vmem:[#allocation4 + $0x40] sm:$0xff]  }
 0x3da   :  { %5164 = vmatmul.bf16.gmra.mxu2 %v6585_v2  ;;  %6847 = vmatmul.msk.bf16.gmra.mxu3 %vm666_vm0, %v5471_v61  ;;  %v6580_v45 = vld [vmem:[#allocation3 + $0x1e0] sm:$0xf] }
 0x3dc   :  { %2790 = vrot.lane.b32.xlu2 %v2612_v42, %s7466_s1  ;;  %v5309_v2 = vpop.f32.mrf.mxu0 }
 0x3dd   :  { %3239 = vrot.lane.b32.xlu1 %v9773_v49, %s7463_s29  ;;  %v5135_v30 = vpop.f32.mrf.mxu2 }
 0x3de   :  { %3687 = vrot.lane.b32.xlu0 %v3509_v24, %s7467_s23  ;;  %v1815_v4 = vpop.permute.xlu2 %1814  ;;  %v5136_v19 = vadd.f32 %v5135_v30, %v4967_v18  ;;  %v3000_v30 = vld [vmem:[#allocation2 + $0x430] sm:$0xff] }
 0x3df   :  { %v2775_v41 = vpop.permute.xlu1 %2774  ;;  %1964 = vst.msk [vmem:[#allocation3 + $0x204] sm:$0xf] %vm1920_vm5, %v1815_v4  ;;  %v7056_v4 = vunpack.c.l.bf16 %v7317_v62  ;;  %v9811_v43 = vpack.c.bf16 %v3000_v30, %v3000_v30 }
 0x3e0   :  { %2924 = vst.msk [vmem:[#allocation3 + $0x1fc] sm:$0xf] %vm1471_vm3, %v2775_v41  ;;  %v3224_v0 = vpop.permute.xlu0 %3223  ;;  %v4968_v7 = vpop.f32.mrf.mxu1  ;;  %v6967_v39 = vld [vmem:[#allocation3 + $0x1e8] sm:$0xf0]  ;;  %v5305_v37 = vadd.f32 %v5304_v17, %v5136_v19  ;;  %v2551_v17 = vld [vmem:[#allocation2 + $0x422] sm:$0xff] }
 0x3e1   :  { %3373 = vst.msk [vmem:[#allocation3 + $0x1fc] sm:$0xf] %vm1920_vm5, %v3224_v0  ;;  %v6581_v5 = vor.u32 %v6967_v39, %v6580_v45  ;;  %v4969_v11 = vadd.f32 %v9676_v60, %v4968_v7  ;;  %v9806_v18 = vpack.c.bf16 %v2551_v17, %v2551_v17  ;;  %v7057_v0 = vunpack.c.h.bf16 %v7317_v62 }
 0x3e2   :  { %3821 = vst.msk [vmem:[#allocation3 + $0x1fc] sm:$0xf] %vm2369_vm6, %v3672_v32  ;;  %v5422_v21 = vmax.f32 %v5305_v37, 0.0  ;;  %v9796_v32 = vpack.c.bf16 %v2550_v23, %v2550_v23  ;;  %v2999_v37 = vld [vmem:[#allocation2 + $0x420] sm:$0xff] }
 0x3e3   :  { %4995 = vmatmul.bf16.gmra.mxu1 %v6581_v5 }
 0x3e4   :  { %3241 = vrot.lane.b32.xlu2 %v9785_v46, %s7463_s29 }
 0x3e5   :  { %3689 = vrot.lane.b32.xlu1 %v3510_v26, %s7467_s23  ;;  %v5137_v48 = vpop.f32.mrf.mxu2 }
 0x3e6   :  { %v5138_v28 = vadd.f32 %v5137_v48, %v4969_v11  ;;  %1830 = vrot.lane.b32.xlu0 %v2612_v42, %s7463_s29  ;;  %v2779_v40 = vpop.permute.xlu2 %2778 }
 0x3e7   :  { %v3226_v54 = vpop.permute.xlu1 %3225  ;;  %2926 = vst.msk [vmem:[#allocation3 + $0x214] sm:$0xf] %vm1471_vm3, %v2779_v40 }
 0x3e8   :  { %v5307_v1 = vadd.f32 %v5306_v51, %v5138_v28  ;;  %3374 = vst.msk [vmem:[#allocation3 + $0x208] sm:$0xf] %vm1920_vm5, %v3226_v54  ;;  %v3674_v15 = vpop.permute.xlu0 %3673  ;;  %v3447_v51 = vld [vmem:[#allocation2 + $0x421] sm:$0xff]  ;;  %v5311_v54 = vpop.f32.mrf.mxu0 }
 0x3e9   :  { %3822 = vst.msk [vmem:[#allocation3 + $0x208] sm:$0xf] %vm2369_vm6, %v3674_v15  ;;  %v6969_v42 = vld [vmem:[#allocation3 + $0x1fc] sm:$0xf]  ;;  %v3511_v15 = vpack.c.bf16 %v3447_v51, %v3447_v51 }
 0x3ea   :  { %v5423_v35 = vmax.f32 %v5307_v1, 0.0 }
 0x3ec   :  { %v5472_v58 = vpack.c.bf16 %v5423_v35, %v5422_v21  ;;  %1828 = vrot.lane.b32.xlu2 %v9741_v25, %s7463_s29 }
 0x3ed   :  { %2277 = vrot.lane.b32.xlu1 %v9739_v53, %s7467_s23 }
 0x3ee   :  { %6848 = vmatmul.msk.bf16.gmra.mxu3 %vm666_vm0, %v5472_v58  ;;  %2794 = vrot.lane.b32.xlu0 %v9796_v32, %s7466_s1  ;;  %v5783_v61 = vpop.f32.mrf.mxu3  ;;  %v5140_v50 = vpop.f32.mrf.mxu2  ;;  %v3063_v58 = vpack.c.bf16 %v2999_v37, %v2999_v37 }
 0x3ef   :  { %v1813_v27 = vpop.permute.xlu1 %1812  ;;  %v3230_v8 = vpop.permute.xlu2 %3229  ;;  %v5784_v10 = vadd.f32 %v9608_v9, %v5783_v61 }
 0x3f0   :  { %1963 = vst.msk [vmem:[#allocation3 + $0x1f8] sm:$0xf] %vm1920_vm5, %v1813_v27  ;;  %v2262_v53 = vpop.permute.xlu0 %2261  ;;  %v4971_v3 = vpop.f32.mrf.mxu1  ;;  %v6594_v24 = vld [vmem:[#allocation3 + $0x204] sm:$0xf0] }
 0x3f1   :  { %2412 = vst.msk [vmem:[#allocation3 + $0x1f8] sm:$0xf] %vm2369_vm6, %v2262_v53  ;;  %v6597_v25 = vor.u32 %v6969_v42, %v6594_v24  ;;  %v4972_v41 = vadd.f32 %v9676_v60, %v4971_v3  ;;  %v5919_v39 = vadd.f32 %v7056_v4, %v5784_v10  ;;  %v3448_v24 = vld [vmem:[#allocation2 + $0x431] sm:$0xff] }
 0x3f2   :  { %v3512_v30 = vpack.c.bf16 %v3448_v24, %v3448_v24 }
 0x3f3   :  { %5169 = vmatmul.bf16.gmra.mxu2 %v6597_v25  ;;  %v5141_v7 = vadd.f32 %v5140_v50, %v4972_v41  ;;  %v5983_v21 = vmax.f32 %v5919_v39, 0.0  ;;  %v5314_v41 = vpop.f32.mrf.mxu0  ;;  %v2552_v39 = vld [vmem:[#allocation2 + $0x432] sm:$0xff] }
 0x3f4   :  { %2279 = vrot.lane.b32.xlu2 %v9773_v49, %s7467_s23 }
 0x3f5   :  { %2796 = vrot.lane.b32.xlu1 %v9806_v18, %s7466_s1  ;;  %v5310_v1 = vadd.f32 %v5309_v2, %v5141_v7 }
 0x3f6   :  { %3245 = vrot.lane.b32.xlu0 %v9811_v43, %s7463_s29  ;;  %v5785_v45 = vpop.f32.mrf.mxu3  ;;  %v5142_v40 = vpop.f32.mrf.mxu2 }
 0x3f7   :  { %v5786_v19 = vadd.f32 %v9608_v9, %v5785_v45  ;;  %v2264_v5 = vpop.permute.xlu1 %2263  ;;  %v1817_v26 = vpop.permute.xlu2 %1816  ;;  %v5424_v62 = vmax.f32 %v5310_v1, 0.0 }
 0x3f8   :  { %2413 = vst.msk [vmem:[#allocation3 + $0x204] sm:$0xf] %vm2369_vm6, %v2264_v5  ;;  %v2781_v11 = vpop.permute.xlu0 %2780  ;;  %v4973_v48 = vpop.f32.mrf.mxu1  ;;  %v6592_v53 = vld [vmem:[#allocation3 + $0x1f8] sm:$0xf] }
 0x3f9   :  { %v5920_v28 = vadd.f32 %v7057_v0, %v5786_v19  ;;  %1965 = vst.msk [vmem:[#allocation3 + $0x210] sm:$0xf] %vm1920_vm5, %v1817_v26  ;;  %v4974_v49 = vadd.f32 %v9676_v60, %v4973_v48  ;;  %v7318_v0 = vld [vmem:[#allocation4 + $0x48] sm:$0xff]   ;;  %v3001_v26 = vld [vmem:[#allocation2 + $0x440] sm:$0xff] }
 0x3fa   :  { %2927 = vst.msk [vmem:[#allocation3 + $0x220] sm:$0xf] %vm1471_vm3, %v2781_v11  ;;  %v9839_v11 = vpack.c.bf16 %v2552_v39, %v2552_v39  ;;  %v9843_v48 = vpack.c.bf16 %v3001_v26, %v3001_v26  ;;  %v7061_v37 = vunpack.c.h.bf16 %v7318_v0 }
 0x3fb   :  { %v5984_v35 = vmax.f32 %v5920_v28, 0.0  ;;  %3376 = vst.msk [vmem:[#allocation3 + $0x220] sm:$0xf] %vm1920_vm5, %v3230_v8  ;;  %v5143_v23 = vadd.f32 %v5142_v40, %v4974_v49  ;;  %v5316_v1 = vpop.f32.mrf.mxu0 }
 0x3fc   :  { %3243 = vrot.lane.b32.xlu2 %v3063_v58, %s7463_s29 }
 0x3fd   :  { %3691 = vrot.lane.b32.xlu1 %v3511_v15, %s7467_s23  ;;  %v7193_v61 = vpack.c.bf16 %v5984_v35, %v5983_v21  ;;  %v5312_v50 = vadd.f32 %v5311_v54, %v5143_v23  ;;  %v3002_v54 = vld [vmem:[#allocation2 + $0x450] sm:$0xff] }
 0x3fe   :  { %1832 = vrot.lane.b32.xlu0 %v9764_v22, %s7463_s29 }
 0x3ff   :  { %7348 = vst [vmem:[#allocation7 + $0x40] sm:$0xff] %v7193_v61   ;;  %v5425_v2 = vmax.f32 %v5312_v50, 0.0  ;;  %v3228_v27 = vpop.permute.xlu1 %3227  ;;  %v2268_v17 = vpop.permute.xlu2 %2267  ;;  %v6970_v3 = vld [vmem:[#allocation3 + $0x200] sm:$0xf0] }
 0x400   :  { %3375 = vst.msk [vmem:[#allocation3 + $0x214] sm:$0xf] %vm1920_vm5, %v3228_v27  ;;  %v3676_v8 = vpop.permute.xlu0 %3675  ;;  %v6593_v42 = vor.u32 %v6970_v3, %v6592_v53  ;;  %v3066_v53 = vpack.c.bf16 %v3002_v54, %v3002_v54  ;;  %v2553_v3 = vld [vmem:[#allocation2 + $0x442] sm:$0xff] }
 0x401   :  { %3823 = vst.msk [vmem:[#allocation3 + $0x214] sm:$0xf] %vm2369_vm6, %v3676_v8  ;;  %v5473_v25 = vpack.c.bf16 %v5425_v2, %v5424_v62  ;;  %v3450_v62 = vld [vmem:[#allocation2 + $0x451] sm:$0xff] }
 0x402   :  { %5000 = vmatmul.bf16.gmra.mxu1 %v6593_v42 }
 0x403   :  { %6849 = vmatmul.msk.bf16.gmra.mxu3 %vm666_vm0, %v5473_v25  ;;  %v3514_v25 = vpack.c.bf16 %v3450_v62, %v3450_v62 }
 0x404   :  { %3693 = vrot.lane.b32.xlu2 %v3512_v30, %s7467_s23 }
 0x405   :  { %1834 = vrot.lane.b32.xlu1 %v9796_v32, %s7463_s29  ;;  %v5788_v22 = vpop.f32.mrf.mxu3  ;;  %v5145_v4 = vpop.f32.mrf.mxu2  ;;  %v7060_v32 = vunpack.c.l.bf16 %v7318_v0 }
 0x406   :  { %2283 = vrot.lane.b32.xlu0 %v3063_v58, %s7467_s23  ;;  %v5789_v51 = vadd.f32 %v9608_v9, %v5788_v22  ;;  %v2617_v22 = vpack.c.bf16 %v2553_v3, %v2553_v3 }
 0x407   :  { %v4976_v10 = vpop.f32.mrf.mxu1  ;;  %v3678_v7 = vpop.permute.xlu1 %3677 }
 0x408   :  { %v3232_v45 = vpop.permute.xlu2 %3231  ;;  %3824 = vst.msk [vmem:[#allocation3 + $0x220] sm:$0xf] %vm2369_vm6, %v3678_v7  ;;  %v1819_v19 = vpop.permute.xlu0 %1818  ;;  %v4977_v5 = vadd.f32 %v9676_v60, %v4976_v10  ;;  %v5921_v40 = vadd.f32 %v7060_v32, %v5789_v51  ;;  %v6972_v61 = vld [vmem:[#allocation3 + $0x214] sm:$0xf]  ;;  %v3449_v51 = vld [vmem:[#allocation2 + $0x441] sm:$0xff] }
 0x409   :  { %1966 = vst.msk [vmem:[#allocation3 + $0x21c] sm:$0xf] %vm1920_vm5, %v1819_v19 }
 0x40a   :  { %2415 = vst.msk [vmem:[#allocation3 + $0x21c] sm:$0xf] %vm2369_vm6, %v2268_v17  ;;  %v5146_v28 = vadd.f32 %v5145_v4, %v4977_v5  ;;  %v5985_v42 = vmax.f32 %v5921_v40, 0.0 }
 0x40c   :  { %2281 = vrot.lane.b32.xlu2 %v9785_v46, %s7467_s23  ;;  %v5315_v8 = vadd.f32 %v5314_v41, %v5146_v28  ;;  %v3513_v28 = vpack.c.bf16 %v3449_v51, %v3449_v51 }
 0x40d   :  { %2798 = vrot.lane.b32.xlu1 %v9839_v11, %s7466_s1  ;;  %v5790_v49 = vpop.f32.mrf.mxu3  ;;  %v5147_v2 = vpop.f32.mrf.mxu2 }
 0x40e   :  { %3247 = vrot.lane.b32.xlu0 %v9843_v48, %s7463_s29  ;;  %v5791_v15 = vadd.f32 %v9608_v9, %v5790_v49  ;;  %v5426_v10 = vmax.f32 %v5315_v8, 0.0 }
 0x40f   :  { %v4978_v21 = vpop.f32.mrf.mxu1  ;;  %v2266_v35 = vpop.permute.xlu1 %2265  ;;  %v6606_v50 = vld [vmem:[#allocation3 + $0x21c] sm:$0xf0] }
 0x410   :  { %v3682_v23 = vpop.permute.xlu2 %3681  ;;  %v4979_v58 = vadd.f32 %v9676_v60, %v4978_v21  ;;  %v5922_v27 = vadd.f32 %v7061_v37, %v5791_v15  ;;  %2414 = vst.msk [vmem:[#allocation3 + $0x210] sm:$0xf] %vm2369_vm6, %v2266_v35  ;;  %v2783_v46 = vpop.permute.xlu0 %2782  ;;  %v6609_v17 = vor.u32 %v6972_v61, %v6606_v50 }
 0x411   :  { %2928 = vst.msk [vmem:[#allocation3 + $0x22c] sm:$0xf] %vm1471_vm3, %v2783_v46  ;;  %v6973_v19 = vld [vmem:[#allocation3 + $0x218] sm:$0xf0]  ;;  %v5319_v37 = vpop.f32.mrf.mxu0 }
 0x412   :  { %v5148_v9 = vadd.f32 %v5147_v2, %v4979_v58  ;;  %v5986_v24 = vmax.f32 %v5922_v27, 0.0  ;;  %3377 = vst.msk [vmem:[#allocation3 + $0x22c] sm:$0xf] %vm1920_vm5, %v3232_v45  ;;  %5174 = vmatmul.bf16.gmra.mxu2 %v6609_v17 }
 0x414   :  { %v5317_v30 = vadd.f32 %v5316_v1, %v5148_v9  ;;  %v7198_v4 = vpack.c.bf16 %v5986_v24, %v5985_v42  ;;  %2800 = vrot.lane.b32.xlu2 %v2617_v22, %s7466_s1  ;;  %v7319_v1 = vld [vmem:[#allocation4 + $0x50] sm:$0xff]  }
 0x415   :  { %3249 = vrot.lane.b32.xlu1 %v3066_v53, %s7463_s29  ;;  %v7064_v61 = vunpack.c.l.bf16 %v7319_v1  ;;  %v7065_v27 = vunpack.c.h.bf16 %v7319_v1 }
 0x416   :  { %v5427_v0 = vmax.f32 %v5317_v30, 0.0  ;;  %7349 = vst [vmem:[#allocation7 + $0x48] sm:$0xff] %v7198_v4   ;;  %3697 = vrot.lane.b32.xlu0 %v3514_v25, %s7467_s23 }
 0x417   :  { %v2785_v41 = vpop.permute.xlu1 %2784  ;;  %v6604_v39 = vld [vmem:[#allocation3 + $0x210] sm:$0xf] }
 0x418   :  { %v2270_v7 = vpop.permute.xlu2 %2269  ;;  %v5474_v5 = vpack.c.bf16 %v5427_v0, %v5426_v10  ;;  %2929 = vst.msk [vmem:[#allocation3 + $0x238] sm:$0xf] %vm1471_vm3, %v2785_v41  ;;  %v3234_v45 = vpop.permute.xlu0 %3233  ;;  %v6605_v32 = vor.u32 %v6973_v19, %v6604_v39  ;;  %v3003_v10 = vld [vmem:[#allocation2 + $0x480] sm:$0xff] }
 0x419   :  { %v4981_v26 = vpop.f32.mrf.mxu1  ;;  %3378 = vst.msk [vmem:[#allocation3 + $0x238] sm:$0xf] %vm1920_vm5, %v3234_v45  ;;  %v5321_v62 = vpop.f32.mrf.mxu0  ;;  %v3451_v39 = vld [vmem:[#allocation2 + $0x481] sm:$0xff] }
 0x41a   :  { %6850 = vmatmul.msk.bf16.gmra.mxu3 %vm666_vm0, %v5474_v5  ;;  %3826 = vst.msk [vmem:[#allocation3 + $0x238] sm:$0xf] %vm2369_vm6, %v3682_v23  ;;  %5005 = vmatmul.bf16.gmra.mxu1 %v6605_v32  ;;  %v4982_v40 = vadd.f32 %v9676_v60, %v4981_v26  ;;  %v9889_v26 = vpack.c.bf16 %v3003_v10, %v3003_v10 }
 0x41c   :  { %3695 = vrot.lane.b32.xlu2 %v3513_v28, %s7467_s23  ;;  %v3515_v28 = vpack.c.bf16 %v3451_v39, %v3451_v39 }
 0x41d   :  { %1836 = vrot.lane.b32.xlu1 %v9806_v18, %s7463_s29  ;;  %v5150_v49 = vpop.f32.mrf.mxu2  ;;  %v5793_v54 = vpop.f32.mrf.mxu3  ;;  %v9871_v18 = vld [vmem:[%s10180_s6] ss:$0 sm:$0xff] }
 0x41e   :  { %2285 = vrot.lane.b32.xlu0 %v9811_v43, %s7467_s23  ;;  %v5151_v58 = vadd.f32 %v5150_v49, %v4982_v40  ;;  %v5794_v50 = vadd.f32 %v9871_v18, %v5793_v54  ;;  %v2555_v43 = vld [vmem:[#allocation2 + $0x482] sm:$0xff] }
 0x41f   :  { %v3680_v15 = vpop.permute.xlu1 %3679  ;;  %v9880_v46 = vpack.c.bf16 %v2555_v43, %v2555_v43 }
 0x420   :  { %v2789_v21 = vpop.permute.xlu2 %2788  ;;  %3825 = vst.msk [vmem:[#allocation3 + $0x22c] sm:$0xf] %vm2369_vm6, %v3680_v15  ;;  %v1821_v35 = vpop.permute.xlu0 %1820  ;;  %v5320_v3 = vadd.f32 %v5319_v37, %v5151_v58  ;;  %v5923_v8 = vadd.f32 %v7064_v61, %v5794_v50 }
 0x421   :  { %v4983_v23 = vpop.f32.mrf.mxu1  ;;  %2931 = vst.msk [vmem:[#allocation3 + $0x250] sm:$0xf] %vm1471_vm3, %v2789_v21  ;;  %v6618_v24 = vld [vmem:[#allocation3 + $0x234] sm:$0xf0]  ;;  %v5324_v49 = vpop.f32.mrf.mxu0 }
 0x422   :  { %1967 = vst.msk [vmem:[#allocation3 + $0x228] sm:$0xf] %vm1920_vm5, %v1821_v35  ;;  %v4984_v2 = vadd.f32 %v9676_v60, %v4983_v23  ;;  %v5987_v19 = vmax.f32 %v5923_v8, 0.0  ;;  %v3452_v21 = vld [vmem:[#allocation2 + $0x491] sm:$0xff] }
 0x423   :  { %2416 = vst.msk [vmem:[#allocation3 + $0x228] sm:$0xf] %vm2369_vm6, %v2270_v7  ;;  %v2554_v7 = vld [vmem:[#allocation2 + $0x472] sm:$0xff] }
 0x424   :  { %1838 = vrot.lane.b32.xlu2 %v9839_v11, %s7463_s29  ;;  %v5428_v11 = vmax.f32 %v5320_v3, 0.0  ;;  %v2618_v37 = vpack.c.bf16 %v2554_v7, %v2554_v7  ;;  %v3004_v35 = vld [vmem:[#allocation2 + $0x490] sm:$0xff] }
 0x425   :  { %2287 = vrot.lane.b32.xlu1 %v9843_v48, %s7467_s23  ;;  %v5152_v17 = vpop.f32.mrf.mxu2  ;;  %v5795_v53 = vpop.f32.mrf.mxu3 }
 0x426   :  { %v5153_v9 = vadd.f32 %v5152_v17, %v4984_v2  ;;  %v5796_v42 = vadd.f32 %v9871_v18, %v5795_v53  ;;  %2804 = vrot.lane.b32.xlu0 %v9880_v46, %s7466_s1  ;;  %v7320_v2 = vld [vmem:[#allocation4 + $0x58] sm:$0xff]   ;;  %v9901_v17 = vpack.c.bf16 %v3004_v35, %v3004_v35 }
 0x427   :  { %v1823_v22 = vpop.permute.xlu1 %1822  ;;  %v6975_v4 = vld [vmem:[#allocation3 + $0x22c] sm:$0xf]  ;;  %v7068_v3 = vunpack.c.l.bf16 %v7320_v2 }
 0x428   :  { %v5322_v25 = vadd.f32 %v5321_v62, %v5153_v9  ;;  %v5924_v30 = vadd.f32 %v7065_v27, %v5796_v42  ;;  %v3684_v48 = vpop.permute.xlu2 %3683  ;;  %1968 = vst.msk [vmem:[#allocation3 + $0x234] sm:$0xf] %vm1920_vm5, %v1823_v22  ;;  %v2272_v0 = vpop.permute.xlu0 %2271  ;;  %v6621_v41 = vor.u32 %v6975_v4, %v6618_v24  ;;  %v3516_v27 = vpack.c.bf16 %v3452_v21, %v3452_v21  ;;  %v2041_v4 = vld [vmem:[#allocation2 + $0x470] sm:$0xff] }
 0x429   :  { %2417 = vst.msk [vmem:[#allocation3 + $0x234] sm:$0xf] %vm2369_vm6, %v2272_v0 }
 0x42a   :  { %v5429_v5 = vmax.f32 %v5322_v25, 0.0  ;;  %v5988_v45 = vmax.f32 %v5924_v30, 0.0  ;;  %5179 = vmatmul.bf16.gmra.mxu2 %v6621_v41  ;;  %v6616_v61 = vld [vmem:[#allocation3 + $0x228] sm:$0xf]  ;;  %v9911_v30 = vld [vmem:[%s10178_s4] ss:$0 sm:$0xff] }
 0x42c   :  { %v5475_v32 = vpack.c.bf16 %v5429_v5, %v5428_v11  ;;  %v7203_v51 = vpack.c.bf16 %v5988_v45, %v5987_v19  ;;  %2802 = vrot.lane.b32.xlu2 %v2618_v37, %s7466_s1  ;;  %v2556_v5 = vld [vmem:[#allocation2 + $0x492] sm:$0xff]  ;;  %v5326_v45 = vpop.f32.mrf.mxu0 }
 0x42d   :  { %3251 = vrot.lane.b32.xlu1 %v9889_v26, %s7463_s29 }
 0x42e   :  { %7350 = vst [vmem:[#allocation7 + $0x50] sm:$0xff] %v7203_v51   ;;  %6851 = vmatmul.msk.bf16.gmra.mxu3 %vm666_vm0, %v5475_v32  ;;  %3699 = vrot.lane.b32.xlu0 %v3515_v28, %s7467_s23  ;;  %v5155_v54 = vpop.f32.mrf.mxu2  ;;  %v2105_v32 = vpack.c.bf16 %v2041_v4, %v2041_v4  ;;  %v9919_v28 = vpack.c.bf16 %v2556_v5, %v2556_v5  ;;  %v3005_v4 = vld [vmem:[#allocation2 + $0x4a0] sm:$0xff] }
 0x42f   :  { %v4986_v1 = vpop.f32.mrf.mxu1  ;;  %v2787_v40 = vpop.permute.xlu1 %2786 }
 0x430   :  { %v1827_v15 = vpop.permute.xlu2 %1826  ;;  %2930 = vst.msk [vmem:[#allocation3 + $0x244] sm:$0xf] %vm1471_vm3, %v2787_v40  ;;  %v3236_v23 = vpop.permute.xlu0 %3235  ;;  %v6976_v50 = vld [vmem:[#allocation3 + $0x230] sm:$0xf0]  ;;  %v4987_v43 = vadd.f32 %v9676_v60, %v4986_v1  ;;  %v1592_v60 = vld [vmem:[#allocation2 + $0x462] sm:$0xff] }
 0x431   :  { %v5798_v58 = vpop.f32.mrf.mxu3  ;;  %1970 = vst.msk [vmem:[#allocation3 + $0x24c] sm:$0xf] %vm1920_vm5, %v1827_v15  ;;  %v6617_v62 = vor.u32 %v6976_v50, %v6616_v61  ;;  %v1656_v41 = vpack.c.bf16 %v1592_v60, %v1592_v60 }
 0x432   :  { %3379 = vst.msk [vmem:[#allocation3 + $0x244] sm:$0xf] %vm1920_vm5, %v3236_v23  ;;  %v5156_v53 = vadd.f32 %v5155_v54, %v4987_v43  ;;  %v5799_v8 = vadd.f32 %v9871_v18, %v5798_v58  ;;  %v2557_v58 = vld [vmem:[#allocation2 + $0x4a2] sm:$0xff] }
 0x433   :  { %3827 = vst.msk [vmem:[#allocation3 + $0x244] sm:$0xf] %vm2369_vm6, %v3684_v48  ;;  %5010 = vmatmul.bf16.gmra.mxu1 %v6617_v62  ;;  %v7069_v48 = vunpack.c.h.bf16 %v7320_v2  ;;  %v3006_v62 = vld [vmem:[#allocation2 + $0x4b0] sm:$0xff] }
 0x434   :  { %3253 = vrot.lane.b32.xlu2 %v9901_v17, %s7463_s29  ;;  %v5325_v7 = vadd.f32 %v5324_v49, %v5156_v53  ;;  %v5925_v39 = vadd.f32 %v7068_v3, %v5799_v8  ;;  %v9931_v53 = vpack.c.bf16 %v3006_v62, %v3006_v62 }
 0x435   :  { %3701 = vrot.lane.b32.xlu1 %v3516_v27, %s7467_s23  ;;  %v9927_v27 = vpack.c.bf16 %v2557_v58, %v2557_v58 }
 0x436   :  { %1842 = vrot.lane.b32.xlu0 %v2618_v37, %s7463_s29  ;;  %v5157_v9 = vpop.f32.mrf.mxu2  ;;  %v5430_v54 = vmax.f32 %v5325_v7, 0.0  ;;  %v5989_v1 = vmax.f32 %v5925_v39, 0.0  ;;  %v3069_v7 = vpack.c.bf16 %v3005_v4, %v3005_v4 }
 0x437   :  { %v4988_v42 = vpop.f32.mrf.mxu1  ;;  %v3238_v24 = vpop.permute.xlu1 %3237 }
 0x438   :  { %v2791_v25 = vpop.permute.xlu2 %2790  ;;  %v4989_v22 = vadd.f32 %v9911_v30, %v4988_v42  ;;  %3380 = vst.msk [vmem:[#allocation3 + $0x250] sm:$0xf] %vm1920_vm5, %v3238_v24  ;;  %v3686_v10 = vpop.permute.xlu0 %3685 }
 0x439   :  { %v5800_v0 = vpop.f32.mrf.mxu3  ;;  %2932 = vst.msk [vmem:[#allocation3 + $0x25c] sm:$0xf] %vm1471_vm3, %v2791_v25  ;;  %v3453_v25 = vld [vmem:[#allocation2 + $0x4a1] sm:$0xff] }
 0x43a   :  { %v5158_v11 = vadd.f32 %v5157_v9, %v4989_v22  ;;  %v5801_v19 = vadd.f32 %v9871_v18, %v5800_v0  ;;  %3828 = vst.msk [vmem:[#allocation3 + $0x250] sm:$0xf] %vm2369_vm6, %v3686_v10  ;;  %v6978_v50 = vld [vmem:[#allocation3 + $0x244] sm:$0xf]  ;;  %v5329_v22 = vpop.f32.mrf.mxu0 }
 0x43b   :  { %v7321_v9 = vld [vmem:[#allocation4 + $0x60] sm:$0xff]  }
 0x43c   :  { %v5327_v51 = vadd.f32 %v5326_v45, %v5158_v11  ;;  %v5926_v37 = vadd.f32 %v7069_v48, %v5801_v19  ;;  %1840 = vrot.lane.b32.xlu2 %v1656_v41, %s7463_s29  ;;  %v3517_v41 = vpack.c.bf16 %v3453_v25, %v3453_v25  ;;  %v7073_v39 = vunpack.c.h.bf16 %v7321_v9  ;;  %v2558_v25 = vld [vmem:[#allocation2 + $0x4b2] sm:$0xff] }
 0x43d   :  { %2289 = vrot.lane.b32.xlu1 %v2105_v32, %s7467_s23 }
 0x43e   :  { %v5431_v49 = vmax.f32 %v5327_v51, 0.0  ;;  %v5990_v40 = vmax.f32 %v5926_v37, 0.0  ;;  %2806 = vrot.lane.b32.xlu0 %v9919_v28, %s7466_s1 }
 0x43f   :  { %v1825_v21 = vpop.permute.xlu1 %1824 }
 0x440   :  { %v7208_v15 = vpack.c.bf16 %v5990_v40, %v5989_v1  ;;  %v3242_v35 = vpop.permute.xlu2 %3241  ;;  %v5476_v23 = vpack.c.bf16 %v5431_v49, %v5430_v54  ;;  %1969 = vst.msk [vmem:[#allocation3 + $0x240] sm:$0xf] %vm1920_vm5, %v1825_v21  ;;  %v2274_v61 = vpop.permute.xlu0 %2273 }
 0x441   :  { %v6630_v43 = vld [vmem:[#allocation3 + $0x24c] sm:$0xf0]  ;;  %2418 = vst.msk [vmem:[#allocation3 + $0x240] sm:$0xf] %vm2369_vm6, %v2274_v61 }
 0x442   :  { %7351 = vst [vmem:[#allocation7 + $0x58] sm:$0xff] %v7208_v15   ;;  %6852 = vmatmul.msk.bf16.gmra.mxu3 %vm666_vm0, %v5476_v23  ;;  %v6633_v2 = vor.u32 %v6978_v50, %v6630_v43  ;;  %v3454_v23 = vld [vmem:[#allocation2 + $0x4b1] sm:$0xff]  ;;  %v5331_v61 = vpop.f32.mrf.mxu0 }
 0x444   :  { %5184 = vmatmul.bf16.gmra.mxu2 %v6633_v2  ;;  %2291 = vrot.lane.b32.xlu2 %v9889_v26, %s7467_s23  ;;  %v7072_v26 = vunpack.c.l.bf16 %v7321_v9  ;;  %v3518_v2 = vpack.c.bf16 %v3454_v23, %v3454_v23 }
 0x445   :  { %2808 = vrot.lane.b32.xlu1 %v9927_v27, %s7466_s1  ;;  %v5803_v3 = vpop.f32.mrf.mxu3  ;;  %v5160_v8 = vpop.f32.mrf.mxu2 }
 0x446   :  { %3257 = vrot.lane.b32.xlu0 %v9931_v53, %s7463_s29  ;;  %v5804_v0 = vadd.f32 %v9871_v18, %v5803_v3 }
 0x447   :  { %v4991_v60 = vpop.f32.mrf.mxu1  ;;  %v2276_v42 = vpop.permute.xlu1 %2275 }
 0x448   :  { %v1829_v24 = vpop.permute.xlu2 %1828  ;;  %2419 = vst.msk [vmem:[#allocation3 + $0x24c] sm:$0xf] %vm2369_vm6, %v2276_v42  ;;  %v2793_v48 = vpop.permute.xlu0 %2792  ;;  %v4992_v10 = vadd.f32 %v9911_v30, %v4991_v60  ;;  %v5927_v5 = vadd.f32 %v7072_v26, %v5804_v0  ;;  %v6628_v1 = vld [vmem:[#allocation3 + $0x240] sm:$0xf]  ;;  %v7322_v0 = vld [vmem:[#allocation4 + $0x68] sm:$0xff]  }
 0x449   :  { %1971 = vst.msk [vmem:[#allocation3 + $0x258] sm:$0xf] %vm1920_vm5, %v1829_v24 }
 0x44a   :  { %2933 = vst.msk [vmem:[#allocation3 + $0x268] sm:$0xf] %vm1471_vm3, %v2793_v48  ;;  %v5161_v11 = vadd.f32 %v5160_v8, %v4992_v10  ;;  %v5991_v50 = vmax.f32 %v5927_v5, 0.0  ;;  %v3007_v48 = vld [vmem:[#allocation2 + $0x4c0] sm:$0xff] }
 0x44b   :  { %3382 = vst.msk [vmem:[#allocation3 + $0x268] sm:$0xf] %vm1920_vm5, %v3242_v35  ;;  %v9963_v4 = vpack.c.bf16 %v3007_v48, %v3007_v48 }
 0x44c   :  { %3255 = vrot.lane.b32.xlu2 %v3069_v7, %s7463_s29  ;;  %v5330_v58 = vadd.f32 %v5329_v22, %v5161_v11 }
 0x44d   :  { %3703 = vrot.lane.b32.xlu1 %v3517_v41, %s7467_s23  ;;  %v5805_v19 = vpop.f32.mrf.mxu3  ;;  %v5162_v40 = vpop.f32.mrf.mxu2 }
 0x44e   :  { %1844 = vrot.lane.b32.xlu0 %v9880_v46, %s7463_s29  ;;  %v5806_v45 = vadd.f32 %v9871_v18, %v5805_v19  ;;  %v5432_v8 = vmax.f32 %v5330_v58, 0.0  ;;  %v3008_v19 = vld [vmem:[#allocation2 + $0x4d0] sm:$0xff] }
 0x44f   :  { %v4993_v32 = vpop.f32.mrf.mxu1  ;;  %v3240_v51 = vpop.permute.xlu1 %3239  ;;  %v6979_v49 = vld [vmem:[#allocation3 + $0x248] sm:$0xf0] }
 0x450   :  { %v2280_v37 = vpop.permute.xlu2 %2279  ;;  %v4994_v54 = vadd.f32 %v9911_v30, %v4993_v32  ;;  %v5928_v15 = vadd.f32 %v7073_v39, %v5806_v45  ;;  %3381 = vst.msk [vmem:[#allocation3 + $0x25c] sm:$0xf] %vm1920_vm5, %v3240_v51  ;;  %v3688_v21 = vpop.permute.xlu0 %3687  ;;  %v6629_v35 = vor.u32 %v6979_v49, %v6628_v1  ;;  %v2559_v51 = vld [vmem:[#allocation2 + $0x4c2] sm:$0xff]  ;;  %v9973_v49 = vpack.c.bf16 %v3008_v19, %v3008_v19 }
 0x451   :  { %3829 = vst.msk [vmem:[#allocation3 + $0x25c] sm:$0xf] %vm2369_vm6, %v3688_v21  ;;  %v5334_v1 = vpop.f32.mrf.mxu0  ;;  %v7077_v21 = vunpack.c.h.bf16 %v7322_v0 }
 0x452   :  { %v5163_v46 = vadd.f32 %v5162_v40, %v4994_v54  ;;  %v5992_v43 = vmax.f32 %v5928_v15, 0.0  ;;  %5015 = vmatmul.bf16.gmra.mxu1 %v6629_v35  ;;  %v9976_v15 = vpack.c.bf16 %v2559_v51, %v2559_v51 }
 0x454   :  { %v5332_v62 = vadd.f32 %v5331_v61, %v5163_v46  ;;  %v7213_v3 = vpack.c.bf16 %v5992_v43, %v5991_v50  ;;  %3705 = vrot.lane.b32.xlu2 %v3518_v2, %s7467_s23 }
 0x455   :  { %1846 = vrot.lane.b32.xlu1 %v9919_v28, %s7463_s29  ;;  %v9959_v28 = vpack.c.bf16 %v2558_v25, %v2558_v25 }
 0x456   :  { %v5433_v60 = vmax.f32 %v5332_v62, 0.0  ;;  %7352 = vst [vmem:[#allocation7 + $0x60] sm:$0xff] %v7213_v3   ;;  %2295 = vrot.lane.b32.xlu0 %v3069_v7, %s7467_s23 }
 0x457   :  { %v3690_v9 = vpop.permute.xlu1 %3689 }
 0x458   :  { %v3244_v42 = vpop.permute.xlu2 %3243  ;;  %v5477_v24 = vpack.c.bf16 %v5433_v60, %v5432_v8  ;;  %3830 = vst.msk [vmem:[#allocation3 + $0x268] sm:$0xf] %vm2369_vm6, %v3690_v9  ;;  %v1831_v22 = vpop.permute.xlu0 %1830  ;;  %v6981_v39 = vld [vmem:[#allocation3 + $0x25c] sm:$0xf] }
 0x459   :  { %1972 = vst.msk [vmem:[#allocation3 + $0x264] sm:$0xf] %vm1920_vm5, %v1831_v22 }
 0x45a   :  { %6853 = vmatmul.msk.bf16.gmra.mxu3 %vm666_vm0, %v5477_v24  ;;  %2421 = vst.msk [vmem:[#allocation3 + $0x264] sm:$0xf] %vm2369_vm6, %v2280_v37  ;;  %v7076_v37 = vunpack.c.l.bf16 %v7322_v0 }
 0x45c   :  { %2293 = vrot.lane.b32.xlu2 %v9901_v17, %s7467_s23  ;;  %v3456_v17 = vld [vmem:[#allocation2 + $0x4d1] sm:$0xff] }
 0x45d   :  { %2810 = vrot.lane.b32.xlu1 %v9959_v28, %s7466_s1  ;;  %v5808_v10 = vpop.f32.mrf.mxu3  ;;  %v5165_v26 = vpop.f32.mrf.mxu2  ;;  %v3520_v35 = vpack.c.bf16 %v3456_v17, %v3456_v17 }
 0x45e   :  { %3259 = vrot.lane.b32.xlu0 %v9963_v4, %s7463_s29  ;;  %v5809_v54 = vadd.f32 %v9871_v18, %v5808_v10 }
 0x45f   :  { %v2278_v41 = vpop.permute.xlu1 %2277  ;;  %v6642_v11 = vld [vmem:[#allocation3 + $0x264] sm:$0xf0] }
 0x460   :  { %v3694_v7 = vpop.permute.xlu2 %3693  ;;  %2420 = vst.msk [vmem:[#allocation3 + $0x258] sm:$0xf] %vm2369_vm6, %v2278_v41  ;;  %v2795_v5 = vpop.permute.xlu0 %2794  ;;  %v6645_v32 = vor.u32 %v6981_v39, %v6642_v11  ;;  %v5929_v58 = vadd.f32 %v7076_v37, %v5809_v54  ;;  %v2561_v54 = vld [vmem:[#allocation2 + $0x4e2] sm:$0xff] }
 0x461   :  { %v4996_v45 = vpop.f32.mrf.mxu1  ;;  %2934 = vst.msk [vmem:[#allocation3 + $0x274] sm:$0xf] %vm1471_vm3, %v2795_v5  ;;  %v6982_v3 = vld [vmem:[#allocation3 + $0x260] sm:$0xf0]  ;;  %v5336_v39 = vpop.f32.mrf.mxu0 }
 0x462   :  { %3383 = vst.msk [vmem:[#allocation3 + $0x274] sm:$0xf] %vm1920_vm5, %v3244_v42  ;;  %5189 = vmatmul.bf16.gmra.mxu2 %v6645_v32  ;;  %v4997_v40 = vadd.f32 %v9911_v30, %v4996_v45  ;;  %v3455_v42 = vld [vmem:[#allocation2 + $0x4c1] sm:$0xff]  ;;  %v5993_v24 = vmax.f32 %v5929_v58, 0.0 }
 0x463   :  { %v3519_v41 = vpack.c.bf16 %v3455_v42, %v3455_v42 }
 0x464   :  { %2812 = vrot.lane.b32.xlu2 %v9976_v15, %s7466_s1  ;;  %v5166_v61 = vadd.f32 %v5165_v26, %v4997_v40 }
 0x465   :  { %3261 = vrot.lane.b32.xlu1 %v9973_v49, %s7463_s29  ;;  %v5810_v23 = vpop.f32.mrf.mxu3  ;;  %v5167_v48 = vpop.f32.mrf.mxu2 }
 0x466   :  { %v5811_v46 = vadd.f32 %v9871_v18, %v5810_v23  ;;  %3709 = vrot.lane.b32.xlu0 %v3520_v35, %s7467_s23  ;;  %v5335_v10 = vadd.f32 %v5334_v1, %v5166_v61 }
 0x467   :  { %v2797_v43 = vpop.permute.xlu1 %2796  ;;  %v6640_v2 = vld [vmem:[#allocation3 + $0x258] sm:$0xf] }
 0x468   :  { %v5930_v50 = vadd.f32 %v7077_v21, %v5811_v46  ;;  %v2282_v62 = vpop.permute.xlu2 %2281  ;;  %2935 = vst.msk [vmem:[#allocation3 + $0x280] sm:$0xf] %vm1471_vm3, %v2797_v43  ;;  %v3246_v8 = vpop.permute.xlu0 %3245  ;;  %v6641_v9 = vor.u32 %v6982_v3, %v6640_v2  ;;  %v5434_v19 = vmax.f32 %v5335_v10, 0.0  ;;  %v3009_v46 = vld [vmem:[#allocation2 + $0x4e0] sm:$0xff]  ;;  %v2560_v43 = vld [vmem:[#allocation2 + $0x4d2] sm:$0xff] }
 0x469   :  { %v4998_v60 = vpop.f32.mrf.mxu1  ;;  %3384 = vst.msk [vmem:[#allocation3 + $0x280] sm:$0xf] %vm1920_vm5, %v3246_v8  ;;  %v10007_v3 = vpack.c.bf16 %v3009_v46, %v3009_v46 }
 0x46a   :  { %v5994_v25 = vmax.f32 %v5930_v50, 0.0  ;;  %v4999_v22 = vadd.f32 %v9911_v30, %v4998_v60  ;;  %3832 = vst.msk [vmem:[#allocation3 + $0x280] sm:$0xf] %vm2369_vm6, %v3694_v7  ;;  %5020 = vmatmul.bf16.gmra.mxu1 %v6641_v9  ;;  %v2624_v60 = vpack.c.bf16 %v2560_v43, %v2560_v43 }
 0x46c   :  { %v7218_v26 = vpack.c.bf16 %v5994_v25, %v5993_v24  ;;  %v5168_v0 = vadd.f32 %v5167_v48, %v4999_v22  ;;  %3707 = vrot.lane.b32.xlu2 %v3519_v41, %s7467_s23  ;;  %v3458_v25 = vld [vmem:[#allocation2 + $0x4f1] sm:$0xff] }
 0x46d   :  { %1848 = vrot.lane.b32.xlu1 %v9927_v27, %s7463_s29  ;;  %v7323_v27 = vld [vmem:[#allocation4 + $0x70] sm:$0xff]  }
 0x46e   :  { %7353 = vst [vmem:[#allocation7 + $0x68] sm:$0xff] %v7218_v26   ;;  %v5337_v11 = vadd.f32 %v5336_v39, %v5168_v0  ;;  %2297 = vrot.lane.b32.xlu0 %v9931_v53, %s7467_s23  ;;  %v2625_v53 = vpack.c.bf16 %v2561_v54, %v2561_v54  ;;  %v7080_v17 = vunpack.c.l.bf16 %v7323_v27  ;;  %v7081_v35 = vunpack.c.h.bf16 %v7323_v27  ;;  %v3010_v48 = vld [vmem:[#allocation2 + $0x4f0] sm:$0xff] }
 0x46f   :  { %v3692_v45 = vpop.permute.xlu1 %3691 }
 0x470   :  { %v5435_v5 = vmax.f32 %v5337_v11, 0.0  ;;  %v2801_v7 = vpop.permute.xlu2 %2800  ;;  %3831 = vst.msk [vmem:[#allocation3 + $0x274] sm:$0xf] %vm2369_vm6, %v3692_v45  ;;  %v1833_v32 = vpop.permute.xlu0 %1832 }
 0x471   :  { %v5813_v51 = vpop.f32.mrf.mxu3  ;;  %2937 = vst.msk [vmem:[#allocation3 + $0x298] sm:$0xf] %vm1471_vm3, %v2801_v7  ;;  %v6654_v58 = vld [vmem:[#allocation3 + $0x27c] sm:$0xf0]  ;;  %v3074_v7 = vpack.c.bf16 %v3010_v48, %v3010_v48 }
 0x472   :  { %v5478_v37 = vpack.c.bf16 %v5435_v5, %v5434_v19  ;;  %1973 = vst.msk [vmem:[#allocation3 + $0x270] sm:$0xf] %vm1920_vm5, %v1833_v32  ;;  %v5814_v1 = vadd.f32 %v9871_v18, %v5813_v51  ;;  %v3522_v5 = vpack.c.bf16 %v3458_v25, %v3458_v25  ;;  %v5339_v32 = vpop.f32.mrf.mxu0 }
 0x473   :  { %2422 = vst.msk [vmem:[#allocation3 + $0x270] sm:$0xf] %vm2369_vm6, %v2282_v62 }
 0x474   :  { %6854 = vmatmul.msk.bf16.gmra.mxu3 %vm666_vm0, %v5478_v37  ;;  %1850 = vrot.lane.b32.xlu2 %v9959_v28, %s7463_s29  ;;  %v5931_v62 = vadd.f32 %v7080_v17, %v5814_v1  ;;  %v3457_v28 = vld [vmem:[#allocation2 + $0x4e1] sm:$0xff]  ;;  %v7324_v17 = vld [vmem:[#allocation4 + $0x78] sm:$0xff]  }
 0x475   :  { %2299 = vrot.lane.b32.xlu1 %v9963_v4, %s7467_s23  ;;  %v3521_v9 = vpack.c.bf16 %v3457_v28, %v3457_v28  ;;  %v7085_v43 = vunpack.c.h.bf16 %v7324_v17 }
 0x476   :  { %2816 = vrot.lane.b32.xlu0 %v2625_v53, %s7466_s1  ;;  %v5995_v42 = vmax.f32 %v5931_v62, 0.0  ;;  %v5170_v22 = vpop.f32.mrf.mxu2 }
 0x477   :  { %v1835_v40 = vpop.permute.xlu1 %1834  ;;  %v6984_v23 = vld [vmem:[#allocation3 + $0x274] sm:$0xf] }
 0x478   :  { %v3696_v21 = vpop.permute.xlu2 %3695  ;;  %1974 = vst.msk [vmem:[#allocation3 + $0x27c] sm:$0xf] %vm1920_vm5, %v1835_v40  ;;  %v2284_v61 = vpop.permute.xlu0 %2283  ;;  %v6657_v4 = vor.u32 %v6984_v23, %v6654_v58  ;;  %v7084_v58 = vunpack.c.l.bf16 %v7324_v17 }
 0x479   :  { %v5815_v50 = vpop.f32.mrf.mxu3  ;;  %2423 = vst.msk [vmem:[#allocation3 + $0x27c] sm:$0xf] %vm2369_vm6, %v2284_v61 }
 0x47a   :  { %v5816_v2 = vadd.f32 %v9871_v18, %v5815_v50  ;;  %5194 = vmatmul.bf16.gmra.mxu2 %v6657_v4  ;;  %v6652_v11 = vld [vmem:[#allocation3 + $0x270] sm:$0xf]  ;;  %v5341_v50 = vpop.f32.mrf.mxu0 }
 0x47c   :  { %v5932_v8 = vadd.f32 %v7081_v35, %v5816_v2  ;;  %2814 = vrot.lane.b32.xlu2 %v2624_v60, %s7466_s1 }
 0x47d   :  { %3263 = vrot.lane.b32.xlu1 %v10007_v3, %s7463_s29 }
 0x47e   :  { %v5996_v24 = vmax.f32 %v5932_v8, 0.0  ;;  %3711 = vrot.lane.b32.xlu0 %v3521_v9, %s7467_s23 }
 0x47f   :  { %v2799_v26 = vpop.permute.xlu1 %2798  ;;  %v5001_v39 = vpop.f32.mrf.mxu1 }
 0x480   :  { %v7223_v10 = vpack.c.bf16 %v5996_v24, %v5995_v42  ;;  %v1839_v0 = vpop.permute.xlu2 %1838  ;;  %2936 = vst.msk [vmem:[#allocation3 + $0x28c] sm:$0xf] %vm1471_vm3, %v2799_v26  ;;  %v3248_v41 = vpop.permute.xlu0 %3247  ;;  %v6985_v19 = vld [vmem:[#allocation3 + $0x278] sm:$0xf0]  ;;  %v5002_v51 = vadd.f32 %v9911_v30, %v5001_v39 }
 0x481   :  { %v6653_v45 = vor.u32 %v6985_v19, %v6652_v11  ;;  %1976 = vst.msk [vmem:[#allocation3 + $0x294] sm:$0xf] %vm1920_vm5, %v1839_v0 }
 0x482   :  { %7354 = vst [vmem:[#allocation7 + $0x70] sm:$0xff] %v7223_v10   ;;  %v5171_v54 = vadd.f32 %v5170_v22, %v5002_v51 }
 0x483   :  { %3385 = vst.msk [vmem:[#allocation3 + $0x28c] sm:$0xf] %vm1920_vm5, %v3248_v41  ;;  %5025 = vmatmul.bf16.gmra.mxu1 %v6653_v45 }
 0x484   :  { %3833 = vst.msk [vmem:[#allocation3 + $0x28c] sm:$0xf] %vm2369_vm6, %v3696_v21  ;;  %3265 = vrot.lane.b32.xlu2 %v3074_v7, %s7463_s29  ;;  %v5172_v21 = vpop.f32.mrf.mxu2  ;;  %v5340_v23 = vadd.f32 %v5339_v32, %v5171_v54  ;;  %v7325_v32 = vld [vmem:[#allocation4 + $0x80] sm:$0xff]  }
 0x485   :  { %3713 = vrot.lane.b32.xlu1 %v3522_v5, %s7467_s23 }
 0x486   :  { %1854 = vrot.lane.b32.xlu0 %v2624_v60, %s7463_s29  ;;  %v5818_v37 = vpop.f32.mrf.mxu3  ;;  %v5436_v2 = vmax.f32 %v5340_v23, 0.0 }
 0x487   :  { %v3250_v27 = vpop.permute.xlu1 %3249  ;;  %v5003_v40 = vpop.f32.mrf.mxu1  ;;  %v5819_v46 = vadd.f32 %v9871_v18, %v5818_v37 }
 0x488   :  { %v2803_v53 = vpop.permute.xlu2 %2802  ;;  %3386 = vst.msk [vmem:[#allocation3 + $0x298] sm:$0xf] %vm1920_vm5, %v3250_v27  ;;  %v3698_v1 = vpop.permute.xlu0 %3697  ;;  %v5004_v35 = vadd.f32 %v9911_v30, %v5003_v40  ;;  %v7088_v40 = vunpack.c.l.bf16 %v7325_v32 }
 0x489   :  { %2938 = vst.msk [vmem:[#allocation3 + $0x2a4] sm:$0xf] %vm1471_vm3, %v2803_v53  ;;  %v5933_v28 = vadd.f32 %v7084_v58, %v5819_v46 }
 0x48a   :  { %3834 = vst.msk [vmem:[#allocation3 + $0x298] sm:$0xf] %vm2369_vm6, %v3698_v1  ;;  %v5173_v61 = vadd.f32 %v5172_v21, %v5004_v35 }
 0x48c   :  { %v5342_v4 = vadd.f32 %v5341_v50, %v5173_v61  ;;  %1852 = vrot.lane.b32.xlu2 %v9976_v15, %s7463_s29  ;;  %v5997_v15 = vmax.f32 %v5933_v28, 0.0  ;;  %v7089_v61 = vunpack.c.h.bf16 %v7325_v32 }
 0x48d   :  { %2301 = vrot.lane.b32.xlu1 %v9973_v49, %s7467_s23  ;;  %v6987_v49 = vld [vmem:[#allocation3 + $0x28c] sm:$0xf] }
 0x48e   :  { %v5820_v62 = vpop.f32.mrf.mxu3  ;;  %v5437_v8 = vmax.f32 %v5342_v4, 0.0 }
 0x48f   :  { %v5821_v60 = vadd.f32 %v9871_v18, %v5820_v62  ;;  %v1837_v9 = vpop.permute.xlu1 %1836 }
 0x490   :  { %v3254_v42 = vpop.permute.xlu2 %3253  ;;  %1975 = vst.msk [vmem:[#allocation3 + $0x288] sm:$0xf] %vm1920_vm5, %v1837_v9  ;;  %v2286_v24 = vpop.permute.xlu0 %2285  ;;  %v5479_v25 = vpack.c.bf16 %v5437_v8, %v5436_v2 }
 0x491   :  { %v5934_v22 = vadd.f32 %v7085_v43, %v5821_v60  ;;  %2424 = vst.msk [vmem:[#allocation3 + $0x288] sm:$0xf] %vm2369_vm6, %v2286_v24  ;;  %v6666_v48 = vld [vmem:[#allocation3 + $0x294] sm:$0xf0] }
 0x492   :  { %v6669_v10 = vor.u32 %v6987_v49, %v6666_v48  ;;  %6855 = vmatmul.msk.bf16.gmra.mxu3 %vm666_vm0, %v5479_v25 }
 0x493   :  { %v5998_v26 = vmax.f32 %v5934_v22, 0.0 }
 0x494   :  { %5199 = vmatmul.bf16.gmra.mxu2 %v6669_v10  ;;  %2303 = vrot.lane.b32.xlu2 %v10007_v3, %s7467_s23 }
 0x495   :  { %v7228_v0 = vpack.c.bf16 %v5998_v26, %v5997_v15  ;;  %v5175_v41 = vpop.f32.mrf.mxu2 }
 0x497   :  { %7355 = vst [vmem:[#allocation7 + $0x78] sm:$0xff] %v7228_v0   ;;  %v2288_v39 = vpop.permute.xlu1 %2287  ;;  %v5006_v5 = vpop.f32.mrf.mxu1 }
 0x498   :  { %v1841_v11 = vpop.permute.xlu2 %1840  ;;  %2425 = vst.msk [vmem:[#allocation3 + $0x294] sm:$0xf] %vm2369_vm6, %v2288_v39  ;;  %v2805_v19 = vpop.permute.xlu0 %2804  ;;  %v5007_v45 = vadd.f32 %v9911_v30, %v5006_v5  ;;  %v6664_v54 = vld [vmem:[#allocation3 + $0x288] sm:$0xf] }
 0x499   :  { %1977 = vst.msk [vmem:[#allocation3 + $0x2a0] sm:$0xf] %vm1920_vm5, %v1841_v11 }
 0x49a   :  { %2939 = vst.msk [vmem:[#allocation3 + $0x2b0] sm:$0xf] %vm1471_vm3, %v2805_v19  ;;  %v5176_v51 = vadd.f32 %v5175_v41, %v5007_v45  ;;  %v7326_v19 = vld [vmem:[#allocation4 + $0x88] sm:$0xff]  }
 0x49b   :  { %3388 = vst.msk [vmem:[#allocation3 + $0x2b0] sm:$0xf] %vm1920_vm5, %v3254_v42  ;;  %v7092_v5 = vunpack.c.l.bf16 %v7326_v19 }
 0x49c   :  { %v5345_v58 = vadd.f32 %v8892_v38, %v5176_v51 }
 0x49d   :  { %v5823_v7 = vpop.f32.mrf.mxu3  ;;  %v5177_v23 = vpop.f32.mrf.mxu2 }
 0x49e   :  { %v5824_v35 = vadd.f32 %v9871_v18, %v5823_v7  ;;  %v5438_v2 = vmax.f32 %v5345_v58, 0.0 }
 0x49f   :  { %v3252_v3 = vpop.permute.xlu1 %3251  ;;  %v6988_v27 = vld [vmem:[#allocation3 + $0x290] sm:$0xf0]  ;;  %v5008_v17 = vpop.f32.mrf.mxu1 }
 0x4a0   :  { %v2292_v37 = vpop.permute.xlu2 %2291  ;;  %3387 = vst.msk [vmem:[#allocation3 + $0x2a4] sm:$0xf] %vm1920_vm5, %v3252_v3  ;;  %v3700_v53 = vpop.permute.xlu0 %3699  ;;  %v6665_v1 = vor.u32 %v6988_v27, %v6664_v54  ;;  %v5009_v21 = vadd.f32 %v9911_v30, %v5008_v17  ;;  %v5935_v4 = vadd.f32 %v7088_v40, %v5824_v35 }
 0x4a1   :  { %3835 = vst.msk [vmem:[#allocation3 + $0x2a4] sm:$0xf] %vm2369_vm6, %v3700_v53  ;;  %v7093_v53 = vunpack.c.h.bf16 %v7326_v19 }
 0x4a2   :  { %5030 = vmatmul.bf16.gmra.mxu1 %v6665_v1  ;;  %v5178_v46 = vadd.f32 %v5177_v23, %v5009_v21  ;;  %v5999_v24 = vmax.f32 %v5935_v4, 0.0 }
 0x4a4   :  { %v5347_v43 = vadd.f32 %v8923_v44, %v5178_v46 }
 0x4a5   :  { %v5825_v50 = vpop.f32.mrf.mxu3 }
 0x4a6   :  { %v5826_v62 = vadd.f32 %v9871_v18, %v5825_v50  ;;  %v5439_v28 = vmax.f32 %v5347_v43, 0.0 }
 0x4a7   :  { %v3702_v60 = vpop.permute.xlu1 %3701 }
 0x4a8   :  { %v5936_v8 = vadd.f32 %v7089_v61, %v5826_v62  ;;  %v3256_v9 = vpop.permute.xlu2 %3255  ;;  %3836 = vst.msk [vmem:[#allocation3 + $0x2b0] sm:$0xf] %vm2369_vm6, %v3702_v60  ;;  %v1843_v42 = vpop.permute.xlu0 %1842  ;;  %v5480_v25 = vpack.c.bf16 %v5439_v28, %v5438_v2  ;;  %v6990_v10 = vld [vmem:[#allocation3 + $0x2a4] sm:$0xf] }
 0x4a9   :  { %1978 = vst.msk [vmem:[#allocation3 + $0x2ac] sm:$0xf] %vm1920_vm5, %v1843_v42 }
 0x4aa   :  { %v6000_v22 = vmax.f32 %v5936_v8, 0.0  ;;  %2427 = vst.msk [vmem:[#allocation3 + $0x2ac] sm:$0xf] %vm2369_vm6, %v2292_v37  ;;  %6856 = vmatmul.msk.bf16.gmra.mxu3 %vm666_vm0, %v5480_v25 }
 0x4ac   :  { %v7233_v38 = vpack.c.bf16 %v6000_v22, %v5999_v24 }
 0x4ad   :  { %v5180_v44 = vpop.f32.mrf.mxu2 }
 0x4ae   :  { %7356 = vst [vmem:[#allocation7 + $0x80] sm:$0xff] %v7233_v38  }
 0x4af   :  { %v2290_v49 = vpop.permute.xlu1 %2289  ;;  %v6678_v15 = vld [vmem:[#allocation3 + $0x2ac] sm:$0xf0] }
 0x4b0   :  { %v3706_v48 = vpop.permute.xlu2 %3705  ;;  %2426 = vst.msk [vmem:[#allocation3 + $0x2a0] sm:$0xf] %vm2369_vm6, %v2290_v49  ;;  %v2807_v26 = vpop.permute.xlu0 %2806  ;;  %v6681_v41 = vor.u32 %v6990_v10, %v6678_v15 }
 0x4b1   :  { %v5011_v0 = vpop.f32.mrf.mxu1  ;;  %2940 = vst.msk [vmem:[#allocation3 + $0x2bc] sm:$0xf] %vm1471_vm3, %v2807_v26  ;;  %v5828_v39 = vpop.f32.mrf.mxu3  ;;  %v6991_v37 = vld [vmem:[#allocation3 + $0x2a8] sm:$0xf0] }
 0x4b2   :  { %3389 = vst.msk [vmem:[#allocation3 + $0x2bc] sm:$0xf] %vm1920_vm5, %v3256_v9  ;;  %5204 = vmatmul.bf16.gmra.mxu2 %v6681_v41  ;;  %v5012_v11 = vadd.f32 %v9911_v30, %v5011_v0  ;;  %v5829_v45 = vadd.f32 %v9871_v18, %v5828_v39 }
 0x4b4   :  { %v5181_v7 = vadd.f32 %v5180_v44, %v5012_v11  ;;  %v5937_v35 = vadd.f32 %v7092_v5, %v5829_v45 }
 0x4b5   :  { %v5182_v21 = vpop.f32.mrf.mxu2 }
 0x4b6   :  { %v5350_v58 = vadd.f32 %v8957_v16, %v5181_v7  ;;  %v6001_v4 = vmax.f32 %v5937_v35, 0.0 }
 0x4b7   :  { %v2809_v32 = vpop.permute.xlu1 %2808  ;;  %v6676_v3 = vld [vmem:[#allocation3 + $0x2a0] sm:$0xf] }
 0x4b8   :  { %v2294_v51 = vpop.permute.xlu2 %2293  ;;  %2941 = vst.msk [vmem:[#allocation3 + $0x2c8] sm:$0xf] %vm1471_vm3, %v2809_v32  ;;  %v3258_v54 = vpop.permute.xlu0 %3257  ;;  %v6677_v17 = vor.u32 %v6991_v37, %v6676_v3  ;;  %v5440_v62 = vmax.f32 %v5350_v58, 0.0 }
 0x4b9   :  { %v5013_v27 = vpop.f32.mrf.mxu1  ;;  %3390 = vst.msk [vmem:[#allocation3 + $0x2c8] sm:$0xf] %vm1920_vm5, %v3258_v54  ;;  %v5830_v40 = vpop.f32.mrf.mxu3 }
 0x4ba   :  { %v5014_v1 = vadd.f32 %v9911_v30, %v5013_v27  ;;  %3838 = vst.msk [vmem:[#allocation3 + $0x2c8] sm:$0xf] %vm2369_vm6, %v3706_v48  ;;  %v5831_v23 = vadd.f32 %v9871_v18, %v5830_v40  ;;  %5035 = vmatmul.bf16.gmra.mxu1 %v6677_v17 }
 0x4bc   :  { %v5183_v46 = vadd.f32 %v5182_v21, %v5014_v1  ;;  %v5938_v61 = vadd.f32 %v7093_v53, %v5831_v23 }
 0x4be   :  { %v5352_v50 = vadd.f32 %v8986_v29, %v5183_v46  ;;  %v6002_v43 = vmax.f32 %v5938_v61, 0.0  ;;  %v7327_v29 = vld [vmem:[#allocation4 + $0x90] sm:$0xff]  }
 0x4bf   :  { %v3704_v28 = vpop.permute.xlu1 %3703  ;;  %v7096_v48 = vunpack.c.l.bf16 %v7327_v29  ;;  %v7097_v15 = vunpack.c.h.bf16 %v7327_v29 }
 0x4c0   :  { %v5441_v2 = vmax.f32 %v5352_v50, 0.0  ;;  %v2813_v8 = vpop.permute.xlu2 %2812  ;;  %v7238_v60 = vpack.c.bf16 %v6002_v43, %v6001_v4  ;;  %3837 = vst.msk [vmem:[#allocation3 + $0x2bc] sm:$0xf] %vm2369_vm6, %v3704_v28  ;;  %v1845_v9 = vpop.permute.xlu0 %1844  ;;  %v7328_v4 = vld [vmem:[#allocation4 + $0x98] sm:$0xff]  }
 0x4c1   :  { %2943 = vst.msk [vmem:[#allocation3 + $0x2e0] sm:$0xf] %vm1471_vm3, %v2813_v8  ;;  %v6690_v22 = vld [vmem:[#allocation3 + $0x2c4] sm:$0xf0] }
 0x4c2   :  { %v5481_v42 = vpack.c.bf16 %v5441_v2, %v5440_v62  ;;  %7357 = vst [vmem:[#allocation7 + $0x88] sm:$0xff] %v7238_v60   ;;  %v7100_v60 = vunpack.c.l.bf16 %v7328_v4 }
 0x4c3   :  { %1979 = vst.msk [vmem:[#allocation3 + $0x2b8] sm:$0xf] %vm1920_vm5, %v1845_v9  ;;  %v10088_v9 = vld [vmem:[%s10180_s6] ss:$0 sm:$0xff] }
 0x4c4   :  { %6857 = vmatmul.msk.bf16.gmra.mxu3 %vm666_vm0, %v5481_v42  ;;  %2428 = vst.msk [vmem:[#allocation3 + $0x2b8] sm:$0xf] %vm2369_vm6, %v2294_v51 }
 0x4c5   :  { %v5833_v16 = vpop.f32.mrf.mxu3 }
 0x4c6   :  { %v5834_v10 = vadd.f32 %v9871_v18, %v5833_v16 }
 0x4c7   :  { %v1847_v24 = vpop.permute.xlu1 %1846  ;;  %v6993_v25 = vld [vmem:[#allocation3 + $0x2bc] sm:$0xf]  ;;  %v5185_v51 = vpop.f32.mrf.mxu2 }
 0x4c8   :  { %1980 = vst.msk [vmem:[#allocation3 + $0x2c4] sm:$0xf] %vm1920_vm5, %v1847_v24  ;;  %v3708_v38 = vpop.permute.xlu2 %3707  ;;  %v2296_v44 = vpop.permute.xlu0 %2295  ;;  %v6693_v49 = vor.u32 %v6993_v25, %v6690_v22  ;;  %v5939_v0 = vadd.f32 %v7096_v48, %v5834_v10  ;;  %v7101_v24 = vunpack.c.h.bf16 %v7328_v4 }
 0x4c9   :  { %2429 = vst.msk [vmem:[#allocation3 + $0x2c4] sm:$0xf] %vm2369_vm6, %v2296_v44 }
 0x4ca   :  { %5209 = vmatmul.bf16.gmra.mxu2 %v6693_v49  ;;  %v6003_v32 = vmax.f32 %v5939_v0, 0.0 }
 0x4cb   :  { %v6688_v45 = vld [vmem:[#allocation3 + $0x2b8] sm:$0xf] }
 0x4cd   :  { %v5835_v26 = vpop.f32.mrf.mxu3 }
 0x4ce   :  { %v5836_v41 = vadd.f32 %v9871_v18, %v5835_v26 }
 0x4cf   :  { %v2811_v11 = vpop.permute.xlu1 %2810  ;;  %v5016_v37 = vpop.f32.mrf.mxu1 }
 0x4d0   :  { %v5940_v39 = vadd.f32 %v7097_v15, %v5836_v41  ;;  %2942 = vst.msk [vmem:[#allocation3 + $0x2d4] sm:$0xf] %vm1471_vm3, %v2811_v11  ;;  %v1851_v19 = vpop.permute.xlu2 %1850  ;;  %v3260_v5 = vpop.permute.xlu0 %3259  ;;  %v6994_v7 = vld [vmem:[#allocation3 + $0x2c0] sm:$0xf0]  ;;  %v5017_v18 = vadd.f32 %v9911_v30, %v5016_v37 }
 0x4d1   :  { %1982 = vst.msk [vmem:[#allocation3 + $0x2dc] sm:$0xf] %vm1920_vm5, %v1851_v19  ;;  %v6689_v54 = vor.u32 %v6994_v7, %v6688_v45  ;;  %v5187_v23 = vpop.f32.mrf.mxu2 }
 0x4d2   :  { %v6004_v3 = vmax.f32 %v5940_v39, 0.0  ;;  %3391 = vst.msk [vmem:[#allocation3 + $0x2d4] sm:$0xf] %vm1920_vm5, %v3260_v5  ;;  %v5186_v17 = vadd.f32 %v5185_v51, %v5017_v18 }
 0x4d3   :  { %3839 = vst.msk [vmem:[#allocation3 + $0x2d4] sm:$0xf] %vm2369_vm6, %v3708_v38  ;;  %5040 = vmatmul.bf16.gmra.mxu1 %v6689_v54 }
 0x4d4   :  { %v7243_v27 = vpack.c.bf16 %v6004_v3, %v6003_v32  ;;  %v5355_v58 = vadd.f32 %v9004_v55, %v5186_v17 }
 0x4d6   :  { %7358 = vst [vmem:[#allocation7 + $0x90] sm:$0xff] %v7243_v27   ;;  %v5442_v62 = vmax.f32 %v5355_v58, 0.0 }
 0x4d7   :  { %v3262_v53 = vpop.permute.xlu1 %3261  ;;  %v5018_v35 = vpop.f32.mrf.mxu1 }
 0x4d8   :  { %3392 = vst.msk [vmem:[#allocation3 + $0x2e0] sm:$0xf] %vm1920_vm5, %v3262_v53  ;;  %v2815_v1 = vpop.permute.xlu2 %2814  ;;  %v3710_v40 = vpop.permute.xlu0 %3709  ;;  %v5019_v21 = vadd.f32 %v9911_v30, %v5018_v35 }
 0x4d9   :  { %2944 = vst.msk [vmem:[#allocation3 + $0x2ec] sm:$0xf] %vm1471_vm3, %v2815_v1 }
 0x4da   :  { %3840 = vst.msk [vmem:[#allocation3 + $0x2e0] sm:$0xf] %vm2369_vm6, %v3710_v40  ;;  %v5188_v46 = vadd.f32 %v5187_v23, %v5019_v21  ;;  %v6996_v42 = vld [vmem:[#allocation3 + $0x2d4] sm:$0xf]  ;;  %v7329_v23 = vld [vmem:[#allocation4 + $0xa0] sm:$0xff]  }
 0x4dc   :  { %v5357_v50 = vadd.f32 %v9036_v63, %v5188_v46 }
 0x4dd   :  { %v5838_v61 = vpop.f32.mrf.mxu3 }
 0x4de   :  { %v5443_v2 = vmax.f32 %v5357_v50, 0.0  ;;  %v5839_v55 = vadd.f32 %v10088_v9, %v5838_v61 }
 0x4df   :  { %v1849_v43 = vpop.permute.xlu1 %1848 }
 0x4e0   :  { %1981 = vst.msk [vmem:[#allocation3 + $0x2d0] sm:$0xf] %vm1920_vm5, %v1849_v43  ;;  %v3266_v28 = vpop.permute.xlu2 %3265  ;;  %v2298_v8 = vpop.permute.xlu0 %2297  ;;  %v5482_v16 = vpack.c.bf16 %v5443_v2, %v5442_v62  ;;  %v5941_v22 = vadd.f32 %v7100_v60, %v5839_v55 }
 0x4e1   :  { %2430 = vst.msk [vmem:[#allocation3 + $0x2d0] sm:$0xf] %vm2369_vm6, %v2298_v8  ;;  %v6702_v63 = vld [vmem:[#allocation3 + $0x2dc] sm:$0xf0] }
 0x4e2   :  { %v6705_v29 = vor.u32 %v6996_v42, %v6702_v63  ;;  %6858 = vmatmul.msk.bf16.gmra.mxu3 %vm666_vm0, %v5482_v16  ;;  %v6005_v0 = vmax.f32 %v5941_v22, 0.0  ;;  %v10114_v16 = vld [vmem:[%s10178_s4] ss:$0 sm:$0xff]  ;;  %s7468_s4 = smov [#allocation7]  }
 0x4e3   :  { %s6163_s18 = sshll.u32 %s7468_s4, 4  ;;  %s6164_s18 = int_to_ptr.vmem [resolvable:$true] %s6163_s18 }
 0x4e4   :  { %5214 = vmatmul.bf16.gmra.mxu2 %v6705_v29 }
 0x4e5   :  { %v5840_v25 = vpop.f32.mrf.mxu3  ;;  %v5190_v44 = vpop.f32.mrf.mxu2 }
 0x4e6   :  { %v5841_v38 = vadd.f32 %v10088_v9, %v5840_v25 }
 0x4e7   :  { %v2300_v48 = vpop.permute.xlu1 %2299  ;;  %v5021_v10 = vpop.f32.mrf.mxu1 }
 0x4e8   :  { %v5942_v49 = vadd.f32 %v7101_v24, %v5841_v38  ;;  %2431 = vst.msk [vmem:[#allocation3 + $0x2dc] sm:$0xf] %vm2369_vm6, %v2300_v48  ;;  %v1853_v15 = vpop.permute.xlu2 %1852  ;;  %v2817_v26 = vpop.permute.xlu0 %2816  ;;  %v5022_v39 = vadd.f32 %v9911_v30, %v5021_v10  ;;  %v6700_v7 = vld [vmem:[#allocation3 + $0x2d0] sm:$0xf] }
 0x4e9   :  { %1983 = vst.msk [vmem:[#allocation3 + $0x2e8] sm:$0xf] %vm1920_vm5, %v1853_v15 }
 0x4ea   :  { %v6006_v41 = vmax.f32 %v5942_v49, 0.0  ;;  %2945 = vst.msk [vmem:[#allocation3 + $0x2f8] sm:$0xf] %vm1471_vm3, %v2817_v26  ;;  %v5191_v19 = vadd.f32 %v5190_v44, %v5022_v39 }
 0x4eb   :  { %3394 = vst.msk [vmem:[#allocation3 + $0x2f8] sm:$0xf] %vm1920_vm5, %v3266_v28 }
 0x4ec   :  { %v7248_v11 = vpack.c.bf16 %v6006_v41, %v6005_v0  ;;  %v5360_v27 = vadd.f32 %v9059_v31, %v5191_v19  ;;  %v7104_v31 = vunpack.c.l.bf16 %v7329_v23 }
 0x4ed   :  { %v5192_v54 = vpop.f32.mrf.mxu2 }
 0x4ee   :  { %7359 = vst [vmem:[#allocation7 + $0x98] sm:$0xff] %v7248_v11   ;;  %v5444_v17 = vmax.f32 %v5360_v27, 0.0 }
 0x4ef   :  { %v3264_v5 = vpop.permute.xlu1 %3263  ;;  %v5023_v45 = vpop.f32.mrf.mxu1  ;;  %v6997_v32 = vld [vmem:[#allocation3 + $0x2d8] sm:$0xf0] }
 0x4f0   :  { %3393 = vst.msk [vmem:[#allocation3 + $0x2ec] sm:$0xf] %vm1920_vm5, %v3264_v5  ;;  %v3712_v51 = vpop.permute.xlu0 %3711  ;;  %v5024_v3 = vadd.f32 %v9911_v30, %v5023_v45  ;;  %v6701_v37 = vor.u32 %v6997_v32, %v6700_v7  ;;  %v2304_v30 = vpop.permute.xlu2 %2303  ;;  %v7330_v5 = vld [vmem:[#allocation4 + $0xa8] sm:$0xff]  }
 0x4f1   :  { %3841 = vst.msk [vmem:[#allocation3 + $0x2ec] sm:$0xf] %vm2369_vm6, %v3712_v51  ;;  %v7108_v45 = vunpack.c.l.bf16 %v7330_v5  ;;  %v7109_v32 = vunpack.c.h.bf16 %v7330_v5 }
 0x4f2   :  { %v5193_v18 = vadd.f32 %v5192_v54, %v5024_v3  ;;  %5045 = vmatmul.bf16.gmra.mxu1 %v6701_v37 }
 0x4f4   :  { %v5362_v53 = vadd.f32 %v9071_v13, %v5193_v18  ;;  %v7105_v13 = vunpack.c.h.bf16 %v7329_v23 }
 0x4f6   :  { %v5445_v1 = vmax.f32 %v5362_v53, 0.0 }
 0x4f7   :  { %v5843_v40 = vpop.f32.mrf.mxu3  ;;  %v3714_v35 = vpop.permute.xlu1 %3713 }
 0x4f8   :  { %v5483_v21 = vpack.c.bf16 %v5445_v1, %v5444_v17  ;;  %3842 = vst.msk [vmem:[#allocation3 + $0x2f8] sm:$0xf] %vm2369_vm6, %v3714_v35  ;;  %v1855_v58 = vpop.permute.xlu0 %1854  ;;  %v5844_v46 = vadd.f32 %v10088_v9, %v5843_v40  ;;  %v6999_v62 = vld [vmem:[#allocation3 + $0x2ec] sm:$0xf] }
 0x4f9   :  { %1984 = vst.msk [vmem:[#allocation3 + $0x2f4] sm:$0xf] %vm1920_vm5, %v1855_v58 }
 0x4fa   :  { %2433 = vst.msk [vmem:[#allocation3 + $0x2f4] sm:$0xf] %vm2369_vm6, %v2304_v30  ;;  %6859 = vmatmul.msk.bf16.gmra.mxu3 %vm666_vm0, %v5483_v21  ;;  %v5943_v50 = vadd.f32 %v7104_v31, %v5844_v46 }
 0x4fc   :  { %v6007_v42 = vmax.f32 %v5943_v50, 0.0  ;;  %v7331_v50 = vld [vmem:[#allocation4 + $0xb0] sm:$0xff]  }
 0x4fd   :  { %v5195_v28 = vpop.f32.mrf.mxu2 }
 0x4ff   :  { %v5845_v61 = vpop.f32.mrf.mxu3  ;;  %v2302_v43 = vpop.permute.xlu1 %2301  ;;  %v6714_v2 = vld [vmem:[#allocation3 + $0x2f4] sm:$0xf0] }
 0x500   :  { %v5846_v4 = vadd.f32 %v10088_v9, %v5845_v61  ;;  %2432 = vst.msk [vmem:[#allocation3 + $0x2e8] sm:$0xf] %vm2369_vm6, %v2302_v43  ;;  %v5026_v8 = vpop.f32.mrf.mxu1  ;;  %v6717_v60 = vor.u32 %v6999_v62, %v6714_v2  ;;  %v7113_v62 = vunpack.c.h.bf16 %v7331_v50 }
 0x501   :  { %v5027_v29 = vadd.f32 %v10114_v16, %v5026_v8  ;;  %v7000_v38 = vld [vmem:[#allocation3 + $0x2f0] sm:$0xf0] }
 0x502   :  { %v5944_v55 = vadd.f32 %v7105_v13, %v5846_v4  ;;  %5219 = vmatmul.bf16.gmra.mxu2 %v6717_v60  ;;  %v7112_v4 = vunpack.c.l.bf16 %v7331_v50 }
 0x503   :  { %v5196_v25 = vadd.f32 %v5195_v28, %v5027_v29 }
 0x504   :  { %v6008_v63 = vmax.f32 %v5944_v55, 0.0 }
 0x505   :  { %v5197_v10 = vpop.f32.mrf.mxu2  ;;  %v5365_v15 = vadd.f32 %v9084_v34, %v5196_v25 }
 0x506   :  { %v7253_v24 = vpack.c.bf16 %v6008_v63, %v6007_v42 }
 0x507   :  { %v6712_v22 = vld [vmem:[#allocation3 + $0x2e8] sm:$0xf]  ;;  %v5446_v41 = vmax.f32 %v5365_v15, 0.0 }
 0x508   :  { %7360 = vst [vmem:[#allocation7 + $0xa0] sm:$0xff] %v7253_v24   ;;  %v5028_v44 = vpop.f32.mrf.mxu1  ;;  %v6713_v49 = vor.u32 %v7000_v38, %v6712_v22 }
 0x509   :  { %v5029_v48 = vadd.f32 %v10114_v16, %v5028_v44 }
 0x50a   :  { %5050 = vmatmul.bf16.gmra.mxu1 %v6713_v49 }
 0x50b   :  { %v5198_v26 = vadd.f32 %v5197_v10, %v5029_v48 }
 0x50d   :  { %v5367_v0 = vadd.f32 %v9099_v20, %v5198_v26 }
 0x50f   :  { %v5447_v39 = vmax.f32 %v5367_v0, 0.0 }
 0x511   :  { %v5484_v11 = vpack.c.bf16 %v5447_v39, %v5446_v41  ;;  %v7332_v41 = vld [vmem:[#allocation4 + $0xb8] sm:$0xff]  }
 0x512   :  { %v7116_v39 = vunpack.c.l.bf16 %v7332_v41 }
 0x513   :  { %6860 = vmatmul.msk.bf16.gmra.mxu3 %vm666_vm0, %v5484_v11 }
 0x515   :  { %v5848_v19 = vpop.f32.mrf.mxu3 }
 0x516   :  { %v5849_v7 = vadd.f32 %v10088_v9, %v5848_v19  ;;  %v7117_v19 = vunpack.c.h.bf16 %v7332_v41 }
 0x517   :  { %v5200_v37 = vpop.f32.mrf.mxu2 }
 0x518   :  { %v5945_v3 = vadd.f32 %v7108_v45, %v5849_v7 }
 0x51a   :  { %v6009_v18 = vmax.f32 %v5945_v3, 0.0 }
 0x51d   :  { %v5850_v51 = vpop.f32.mrf.mxu3 }
 0x51e   :  { %v5851_v54 = vadd.f32 %v10088_v9, %v5850_v51 }
 0x51f   :  { %v5031_v34 = vpop.f32.mrf.mxu1  ;;  %v5202_v21 = vpop.f32.mrf.mxu2 }
 0x520   :  { %v5946_v27 = vadd.f32 %v7109_v32, %v5851_v54  ;;  %v5032_v20 = vadd.f32 %v10114_v16, %v5031_v34 }
 0x522   :  { %v6010_v53 = vmax.f32 %v5946_v27, 0.0  ;;  %v5201_v1 = vadd.f32 %v5200_v37, %v5032_v20 }
 0x524   :  { %v7258_v17 = vpack.c.bf16 %v6010_v53, %v6009_v18  ;;  %v5370_v23 = vadd.f32 %v9120_v14, %v5201_v1 }
 0x526   :  { %7361 = vst [vmem:[#allocation7 + $0xa8] sm:$0xff] %v7258_v17   ;;  %v5448_v31 = vmax.f32 %v5370_v23, 0.0 }
 0x527   :  { %v5033_v40 = vpop.f32.mrf.mxu1 }
 0x528   :  { %v5034_v35 = vadd.f32 %v10114_v16, %v5033_v40 }
 0x52a   :  { %v5203_v58 = vadd.f32 %v5202_v21, %v5034_v35 }
 0x52c   :  { %v5372_v30 = vadd.f32 %v9137_v57, %v5203_v58  ;;  %v7333_v58 = vld [vmem:[#allocation4 + $0xc0] sm:$0xff]  }
 0x52d   :  { %v5853_v13 = vpop.f32.mrf.mxu3 }
 0x52e   :  { %v5449_v46 = vmax.f32 %v5372_v30, 0.0  ;;  %v5854_v43 = vadd.f32 %v10088_v9, %v5853_v13  ;;  %v7120_v30 = vunpack.c.l.bf16 %v7333_v58 }
 0x530   :  { %v5485_v61 = vpack.c.bf16 %v5449_v46, %v5448_v31  ;;  %v5947_v28 = vadd.f32 %v7112_v4, %v5854_v43  ;;  %v7121_v46 = vunpack.c.h.bf16 %v7333_v58 }
 0x532   :  { %6861 = vmatmul.msk.bf16.gmra.mxu3 %vm666_vm0, %v5485_v61  ;;  %v6011_v42 = vmax.f32 %v5947_v28, 0.0 }
 0x535   :  { %v5855_v2 = vpop.f32.mrf.mxu3  ;;  %v5205_v8 = vpop.f32.mrf.mxu2 }
 0x536   :  { %v5856_v60 = vadd.f32 %v10088_v9, %v5855_v2 }
 0x537   :  { %v5036_v14 = vpop.f32.mrf.mxu1 }
 0x538   :  { %v5948_v55 = vadd.f32 %v7113_v62, %v5856_v60  ;;  %v5037_v57 = vadd.f32 %v10114_v16, %v5036_v14 }
 0x53a   :  { %v6012_v63 = vmax.f32 %v5948_v55, 0.0  ;;  %v5206_v24 = vadd.f32 %v5205_v8, %v5037_v57 }
 0x53c   :  { %v7263_v29 = vpack.c.bf16 %v6012_v63, %v6011_v42  ;;  %v5375_v44 = vadd.f32 %v9155_v36, %v5206_v24 }
 0x53d   :  { %v5207_v38 = vpop.f32.mrf.mxu2 }
 0x53e   :  { %7362 = vst [vmem:[#allocation7 + $0xb0] sm:$0xff] %v7263_v29   ;;  %v5450_v10 = vmax.f32 %v5375_v44, 0.0 }
 0x53f   :  { %v5038_v25 = vpop.f32.mrf.mxu1 }
 0x540   :  { %v5039_v22 = vadd.f32 %v10114_v16, %v5038_v25 }
 0x542   :  { %v5208_v49 = vadd.f32 %v5207_v38, %v5039_v22  ;;  %v7334_v22 = vld [vmem:[#allocation4 + $0xc8] sm:$0xff]  }
 0x543   :  { %v7124_v44 = vunpack.c.l.bf16 %v7334_v22 }
 0x544   :  { %v5377_v48 = vadd.f32 %v9175_v12, %v5208_v49 }
 0x546   :  { %v5451_v15 = vmax.f32 %v5377_v48, 0.0  ;;  %v7125_v48 = vunpack.c.h.bf16 %v7334_v22 }
 0x547   :  { %v5858_v26 = vpop.f32.mrf.mxu3 }
 0x548   :  { %v5486_v0 = vpack.c.bf16 %v5451_v15, %v5450_v10  ;;  %v5859_v11 = vadd.f32 %v10088_v9, %v5858_v26 }
 0x54a   :  { %6862 = vmatmul.msk.bf16.gmra.mxu3 %vm666_vm0, %v5486_v0  ;;  %v5949_v45 = vadd.f32 %v7116_v39, %v5859_v11 }
 0x54c   :  { %v6013_v3 = vmax.f32 %v5949_v45, 0.0 }
 0x54d   :  { %v5210_v32 = vpop.f32.mrf.mxu2 }
 0x54f   :  { %v5860_v5 = vpop.f32.mrf.mxu3 }
 0x550   :  { %v5861_v7 = vadd.f32 %v10088_v9, %v5860_v5  ;;  %v5041_v36 = vpop.f32.mrf.mxu1 }
 0x551   :  { %v5042_v37 = vadd.f32 %v10114_v16, %v5041_v36 }
 0x552   :  { %v5950_v51 = vadd.f32 %v7117_v19, %v5861_v7 }
 0x553   :  { %v5211_v34 = vadd.f32 %v5210_v32, %v5042_v37 }
 0x554   :  { %v6014_v12 = vmax.f32 %v5950_v51, 0.0 }
 0x555   :  { %v5212_v18 = vpop.f32.mrf.mxu2  ;;  %v5380_v53 = vadd.f32 %v9198_v52, %v5211_v34 }
 0x556   :  { %v7268_v54 = vpack.c.bf16 %v6014_v12, %v6013_v3 }
 0x557   :  { %v5452_v40 = vmax.f32 %v5380_v53, 0.0 }
 0x558   :  { %7363 = vst [vmem:[#allocation7 + $0xb8] sm:$0xff] %v7268_v54   ;;  %v5043_v27 = vpop.f32.mrf.mxu1 }
 0x559   :  { %v5044_v20 = vadd.f32 %v10114_v16, %v5043_v27  ;;  %v7335_v27 = vld [vmem:[#allocation4 + $0xd0] sm:$0xff]  }
 0x55a   :  { %v7129_v53 = vunpack.c.h.bf16 %v7335_v27 }
 0x55b   :  { %v5213_v17 = vadd.f32 %v5212_v18, %v5044_v20  ;;  %v7128_v20 = vunpack.c.l.bf16 %v7335_v27 }
 0x55d   :  { %v5382_v1 = vadd.f32 %v9220_v56, %v5213_v17 }
 0x55f   :  { %v5453_v35 = vmax.f32 %v5382_v1, 0.0 }
 0x561   :  { %v5487_v21 = vpack.c.bf16 %v5453_v35, %v5452_v40 }
 0x563   :  { %6863 = vmatmul.msk.bf16.gmra.mxu3 %vm666_vm0, %v5487_v21 }
 0x565   :  { %v5863_v23 = vpop.f32.mrf.mxu3 }
 0x566   :  { %v5864_v31 = vadd.f32 %v10088_v9, %v5863_v23  ;;  %v7336_v23 = vld [vmem:[#allocation4 + $0xd8] sm:$0xff]  }
 0x567   :  { %v5215_v50 = vpop.f32.mrf.mxu2  ;;  %v7132_v58 = vunpack.c.l.bf16 %v7336_v23 }
 0x568   :  { %v5951_v61 = vadd.f32 %v7120_v30, %v5864_v31  ;;  %v7133_v31 = vunpack.c.h.bf16 %v7336_v23 }
 0x56a   :  { %v6015_v62 = vmax.f32 %v5951_v61, 0.0 }
 0x56d   :  { %v5865_v13 = vpop.f32.mrf.mxu3 }
 0x56e   :  { %v5866_v4 = vadd.f32 %v10088_v9, %v5865_v13 }
 0x56f   :  { %v5046_v52 = vpop.f32.mrf.mxu1  ;;  %v5217_v55 = vpop.f32.mrf.mxu2 }
 0x570   :  { %v5952_v43 = vadd.f32 %v7121_v46, %v5866_v4  ;;  %v5047_v56 = vadd.f32 %v10114_v16, %v5046_v52 }
 0x572   :  { %v6016_v2 = vmax.f32 %v5952_v43, 0.0  ;;  %v5216_v8 = vadd.f32 %v5215_v50, %v5047_v56 }
 0x574   :  { %v7273_v28 = vpack.c.bf16 %v6016_v2, %v6015_v62  ;;  %v5385_v57 = vadd.f32 %v9243_v59, %v5216_v8  ;;  %v7337_v62 = vld [vmem:[#allocation4 + $0xe0] sm:$0xff]  }
 0x575   :  { %v7136_v2 = vunpack.c.l.bf16 %v7337_v62  ;;  %v7137_v8 = vunpack.c.h.bf16 %v7337_v62 }
 0x576   :  { %7364 = vst [vmem:[#allocation7 + $0xc0] sm:$0xff] %v7273_v28   ;;  %v5454_v24 = vmax.f32 %v5385_v57, 0.0 }
 0x577   :  { %v5048_v60 = vpop.f32.mrf.mxu1 }
 0x578   :  { %v5049_v14 = vadd.f32 %v10114_v16, %v5048_v60 }
 0x57a   :  { %v5218_v42 = vadd.f32 %v5217_v55, %v5049_v14 }
 0x57c   :  { %v5387_v63 = vadd.f32 %v9261_v47, %v5218_v42 }
 0x57d   :  { %v5868_v29 = vpop.f32.mrf.mxu3 }
 0x57e   :  { %v5455_v25 = vmax.f32 %v5387_v63, 0.0  ;;  %v5869_v49 = vadd.f32 %v10088_v9, %v5868_v29 }
 0x580   :  { %v5488_v38 = vpack.c.bf16 %v5455_v25, %v5454_v24  ;;  %v5953_v15 = vadd.f32 %v7124_v44, %v5869_v49  ;;  %v7338_v25 = vld [vmem:[#allocation4 + $0xe8] sm:$0xff]  }
 0x581   :  { %v7140_v22 = vunpack.c.l.bf16 %v7338_v25  ;;  %v7141_v44 = vunpack.c.h.bf16 %v7338_v25 }
 0x582   :  { %6864 = vmatmul.msk.bf16.gmra.mxu3 %vm666_vm0, %v5488_v38  ;;  %v6017_v39 = vmax.f32 %v5953_v15, 0.0 }
 0x585   :  { %v5870_v10 = vpop.f32.mrf.mxu3  ;;  %v5220_v0 = vpop.f32.mrf.mxu2 }
 0x586   :  { %v5871_v26 = vadd.f32 %v10088_v9, %v5870_v10 }
 0x587   :  { %v5051_v59 = vpop.f32.mrf.mxu1 }
 0x588   :  { %v5954_v41 = vadd.f32 %v7125_v48, %v5871_v26  ;;  %v5052_v11 = vadd.f32 %v10114_v16, %v5051_v59 }
 0x58a   :  { %v6018_v47 = vmax.f32 %v5954_v41, 0.0  ;;  %v5221_v5 = vadd.f32 %v5220_v0, %v5052_v11 }
 0x58c   :  { %v7278_v19 = vpack.c.bf16 %v6018_v47, %v6017_v39  ;;  %v5390_v36 = vadd.f32 %v9285_v6, %v5221_v5  ;;  %v7339_v39 = vld [vmem:[#allocation4 + $0xf0] sm:$0xff]  }
 0x58d   :  { %v5222_v32 = vpop.f32.mrf.mxu2  ;;  %v7144_v47 = vunpack.c.l.bf16 %v7339_v39 }
 0x58e   :  { %7365 = vst [vmem:[#allocation7 + $0xc8] sm:$0xff] %v7278_v19   ;;  %v5456_v12 = vmax.f32 %v5390_v36, 0.0  ;;  %v7145_v19 = vunpack.c.h.bf16 %v7339_v39 }
 0x58f   :  { %v5053_v45 = vpop.f32.mrf.mxu1 }
 0x590   :  { %v5054_v7 = vadd.f32 %v10114_v16, %v5053_v45 }
 0x592   :  { %v5223_v51 = vadd.f32 %v5222_v32, %v5054_v7 }
 0x594   :  { %v5392_v3 = vadd.f32 %v9307_v33, %v5223_v51 }
 0x596   :  { %v5457_v37 = vmax.f32 %v5392_v3, 0.0  ;;  %v5873_v54 = vpop.f32.mrf.mxu3 }
 0x597   :  { %v5874_v18 = vadd.f32 %v10088_v9, %v5873_v54 }
 0x598   :  { %v5489_v34 = vpack.c.bf16 %v5457_v37, %v5456_v12  ;;  %v7340_v37 = vld [vmem:[#allocation4 + $0xf8] sm:$0xff]  }
 0x599   :  { %v5955_v1 = vadd.f32 %v7128_v20, %v5874_v18  ;;  %v7148_v54 = vunpack.c.l.bf16 %v7340_v37  ;;  %v7149_v27 = vunpack.c.h.bf16 %v7340_v37 }
 0x59a   :  { %6865 = vmatmul.msk.bf16.gmra.mxu3 %vm666_vm0, %v5489_v34 }
 0x59b   :  { %v6019_v6 = vmax.f32 %v5955_v1, 0.0 }
 0x59e   :  { %v5875_v17 = vpop.f32.mrf.mxu3 }
 0x59f   :  { %v5876_v16 = vadd.f32 %v10088_v9, %v5875_v17 }
 0x5a1   :  { %v5956_v40 = vadd.f32 %v7129_v53, %v5876_v16 }
 0x5a3   :  { %v6020_v35 = vmax.f32 %v5956_v40, 0.0 }
 0x5a5   :  { %v7283_v21 = vpack.c.bf16 %v6020_v35, %v6019_v6 }
 0x5a7   :  { %7366 = vst [vmem:[#allocation7 + $0xd0] sm:$0xff] %v7283_v21  }
 0x5b5   :  { %v5878_v33 = vpop.f32.mrf.mxu3 }
 0x5b6   :  { %v5879_v30 = vadd.f32 %v10088_v9, %v5878_v33 }
 0x5b8   :  { %v5957_v13 = vadd.f32 %v7132_v58, %v5879_v30 }
 0x5ba   :  { %v6021_v4 = vmax.f32 %v5957_v13, 0.0 }
 0x5bd   :  { %v5880_v46 = vpop.f32.mrf.mxu3 }
 0x5be   :  { %v5881_v61 = vadd.f32 %v10088_v9, %v5880_v46 }
 0x5c0   :  { %v5958_v50 = vadd.f32 %v7133_v31, %v5881_v61 }
 0x5c2   :  { %v6022_v52 = vmax.f32 %v5958_v50, 0.0 }
 0x5c4   :  { %v7288_v43 = vpack.c.bf16 %v6022_v52, %v6021_v4 }
 0x5c6   :  { %7367 = vst [vmem:[#allocation7 + $0xd8] sm:$0xff] %v7288_v43  }
 0x5cd   :  { %v5883_v56 = vpop.f32.mrf.mxu3 }
 0x5ce   :  { %v5884_v28 = vadd.f32 %v10088_v9, %v5883_v56 }
 0x5d0   :  { %v5959_v14 = vadd.f32 %v7136_v2, %v5884_v28 }
 0x5d2   :  { %v6023_v42 = vmax.f32 %v5959_v14, 0.0 }
 0x5d5   :  { %v5885_v60 = vpop.f32.mrf.mxu3 }
 0x5d6   :  { %v5886_v55 = vadd.f32 %v10088_v9, %v5885_v60 }
 0x5d8   :  { %v5960_v57 = vadd.f32 %v7137_v8, %v5886_v55 }
 0x5da   :  { %v6024_v63 = vmax.f32 %v5960_v57, 0.0 }
 0x5dc   :  { %v7293_v29 = vpack.c.bf16 %v6024_v63, %v6023_v42 }
 0x5de   :  { %7368 = vst [vmem:[#allocation7 + $0xe0] sm:$0xff] %v7293_v29  }
 0x5e6   :  { %v5888_v24 = vpop.f32.mrf.mxu3 }
 0x5e7   :  { %v5889_v38 = vadd.f32 %v10088_v9, %v5888_v24 }
 0x5e9   :  { %v5961_v48 = vadd.f32 %v7140_v22, %v5889_v38 }
 0x5eb   :  { %v6025_v26 = vmax.f32 %v5961_v48, 0.0 }
 0x5ee   :  { %v5890_v49 = vpop.f32.mrf.mxu3 }
 0x5ef   :  { %v5891_v10 = vadd.f32 %v10088_v9, %v5890_v49 }
 0x5f1   :  { %v5962_v15 = vadd.f32 %v7141_v44, %v5891_v10 }
 0x5f3   :  { %v6026_v0 = vmax.f32 %v5962_v15, 0.0 }
 0x5f5   :  { %v7298_v59 = vpack.c.bf16 %v6026_v0, %v6025_v26 }
 0x5f7   :  { %7369 = vst [vmem:[#allocation7 + $0xe8] sm:$0xff] %v7298_v59  }
 0x605   :  { %v5893_v41 = vpop.f32.mrf.mxu3 }
 0x606   :  { %v5894_v11 = vadd.f32 %v10088_v9, %v5893_v41 }
 0x608   :  { %v5963_v45 = vadd.f32 %v7144_v47, %v5894_v11 }
 0x60a   :  { %v6027_v36 = vmax.f32 %v5963_v45, 0.0 }
 0x60d   :  { %v5895_v5 = vpop.f32.mrf.mxu3 }
 0x60e   :  { %v5896_v7 = vadd.f32 %v10088_v9, %v5895_v5 }
 0x610   :  { %v5964_v32 = vadd.f32 %v7145_v19, %v5896_v7 }
 0x612   :  { %v6028_v51 = vmax.f32 %v5964_v32, 0.0 }
 0x614   :  { %v7303_v3 = vpack.c.bf16 %v6028_v51, %v6027_v36 }
 0x616   :  { %7370 = vst [vmem:[#allocation7 + $0xf0] sm:$0xff] %v7303_v3  }
 0x61d   :  { %v5898_v12 = vpop.f32.mrf.mxu3 }
 0x61e   :  { %v5899_v34 = vadd.f32 %v10088_v9, %v5898_v12 }
 0x620   :  { %v5965_v18 = vadd.f32 %v7148_v54, %v5899_v34 }
 0x622   :  { %v6029_v1 = vmax.f32 %v5965_v18, 0.0 }
 0x625   :  { %v5900_v20 = vpop.f32.mrf.mxu3 }
 0x626   :  { %v5901_v53 = vadd.f32 %v10088_v9, %v5900_v20 }
 0x628   :  { %v5966_v17 = vadd.f32 %v7149_v27, %v5901_v53 }
 0x62a   :  { %v6030_v16 = vmax.f32 %v5966_v17, 0.0 }
 0x62c   :  { %v7308_v40 = vpack.c.bf16 %v6030_v16, %v6029_v1 }
 0x62e   :  { %7371 = vst [vmem:[#allocation7 + $0xf8] sm:$0xff] %v7308_v40  }
 0x62f   :  { %6171 = dma.vmem_to_hbm [thread:$0]  %s6164_s18, 4096, %s6166_s3, [#allocation6], %s7463_s29, %s7463_s29, %s7464_s30  }
 0x630   :  { %7460 = dma.done.wait [#allocation6], 4096  }
 0x631   :  { %7461 = vsyncadd [#allocation6], 4294963200 }
 0x632   :  { %6176 = vsyncpa [#allocation5], 1 }
 0x633   :  { %6177 = vsyncpa [#allocation6], 1 }

</bundles_post_ra>
